<compile_context>
chip_gen: v7x
topology: tpu7x:2x2x1
jax: 0.10.0
libtpu: 0.0.40
codegen_flags: <defaults>
</compile_context>

<pallas_src>
import functools

import numpy as np

import jax
import jax.numpy as jnp
from jax import lax
from jax.experimental import pallas as pl
from jax.experimental.pallas import tpu as pltpu

C1 = 32              # conv1 output channels
C2 = 64              # conv2 output channels
W1_COLS = 16 * C1    # 512: conv1/pool1 lanes = (w_pad in [0,16)) x (c1 in [0,32))
W2_COLS = 7 * C2     # 448: conv2/pool2 lanes = (wq2 in [0,7))   x (c2 in [0,64))
NCLS_PAD = 128       # fc2 output padded to a full lane group


# ----------------------------------------------------------------------------
# Fused forward kernel (one batch tile per grid step, batch folded into M)
# ----------------------------------------------------------------------------
def _cnn_fused_kernel(xs_ref, w1b_ref, b1r_ref, w2b_ref, b2r_ref,
                      fc1w_ref, fc1b_ref, fc2w_ref, fc2b_ref,
                      o_ref, pA_ref, pB_ref, *, tb):
    f32 = jnp.float32
    bf16 = jnp.bfloat16
    m7 = 7 * tb

    # Input shift planes (built by the wrapper):
    #   xs[u][t*tb + b, :] = x_pad[b, 4*t + u, :]   (u in 0..5, t in 0..6)
    xlhs = [xs_ref[0, u] for u in range(6)]                 # each (7*tb, 30) bf16
    b1 = b1r_ref[...]                                       # (1, 512) f32
    b2 = b2r_ref[...]                                       # (1, 448) f32

    # ---- conv1 + bias + ReLU + 2x2 max-pool ---------------------------------
    # Two halves by pooled-row parity so results drop straight into the
    # parity-split pool1 scratches with contiguous, unmasked stores.
    #   even pooled rows hq=2t   use input rows 4t  +hp+kh -> planes[hp+kh]
    #   odd  pooled rows hq=2t+1 use input rows 4t+2+hp+kh -> planes[hp+kh+2]
    def conv1_half(plane_off):
        m = None
        for hp in (0, 1):
            for wp in (0, 1):
                acc = None
                for kh in range(3):
                    part = jnp.dot(xlhs[plane_off + hp + kh], w1b_ref[kh, wp],
                                   preferred_element_type=f32)     # (7tb, 512)
                    acc = part if acc is None else acc + part
                m = acc if m is None else jnp.maximum(m, acc)      # running max
        return jnp.maximum(m + b1, 0.0)                            # (7tb, 512) f32

    # pB[j*tb + b] = p1pad[b, 2j+1]  (pool1 even rows at j=0..6, zero at j=7)
    pB_ref[0:m7, :] = conv1_half(0).astype(bf16)
    pB_ref[m7:8 * tb, :] = jnp.zeros((tb, W1_COLS), bf16)
    # pA[j*tb + b] = p1pad[b, 2j]    (zero at j=0, pool1 odd rows at j=1..7)
    pA_ref[tb:8 * tb, :] = conv1_half(2).astype(bf16)
    pA_ref[0:tb, :] = jnp.zeros((tb, W1_COLS), bf16)

    # ---- conv2 + bias + ReLU + 2x2 max-pool ---------------------------------
    # Vertical phase s2 = hp+kh needs p1pad rows 2*hq2 + s2; with the parity
    # scratches these are four contiguous (7*tb, 512) slabs.
    lhs2 = [pA_ref[0:m7, :], pB_ref[0:m7, :],
            pA_ref[tb:8 * tb, :], pB_ref[tb:8 * tb, :]]
    m2 = None
    for hp in (0, 1):
        for wp in (0, 1):
            acc = None
            for kh in range(3):
                part = jnp.dot(lhs2[hp + kh], w2b_ref[kh, wp],
                               preferred_element_type=f32)         # (7tb, 448)
                acc = part if acc is None else acc + part
            m2 = acc if m2 is None else jnp.maximum(m2, acc)
    p2 = jnp.maximum(m2 + b2, 0.0).astype(bf16)                    # (7tb, 448)

    # ---- fc1 + ReLU: 7 batch-wide matmuls (one per pooled output row) -------
    h = None
    for t in range(7):
        part = jnp.dot(p2[t * tb:(t + 1) * tb, :], fc1w_ref[t],
                       preferred_element_type=f32)                 # (tb, 128)
        h = part if h is None else h + part
    h = jnp.maximum(h + fc1b_ref[...], 0.0)

    # ---- fc2: lane-dense 128-wide output (cols >= 10 are zero padding) ------
    o_ref[...] = (jnp.dot(h.astype(bf16), fc2w_ref[...],
                          preferred_element_type=f32) + fc2b_ref[...])


# ----------------------------------------------------------------------------
# Wrapper: one pallas_call, grid over batch tiles (parallel)
# ----------------------------------------------------------------------------
def _pick_tb(B):
    # Large batch tile (folds into matmul M) but keep >= 2 grid steps when the
    # batch allows it, so v7x can shard the "parallel" axis over its two TCs.
    half = -(-B // 2)
    tb = -(-half // 8) * 8
    return max(8, min(32, tb))


def cnn_forward(x_nchw, params):
    B = x_nchw.shape[0]
    assert x_nchw.shape[1:] == (1, 28, 28)
    tb = _pick_tb(B)
    nb = -(-B // tb)
    bp = nb * tb

    # 1-pixel halo + batch pad, then build the six stride-4 row planes the
    # kernel consumes, laid out row-position-major per tile: (6, 7*tb, 30) with
    # row index t*tb + b_in_tile.  Pure wrapper-side layout plumbing.
    x = x_nchw[:, 0, :, :].astype(jnp.float32)
    x = jnp.pad(x, ((0, bp - B), (1, 1), (1, 1)))                    # (bp, 30, 30)
    planes = jnp.stack([x[:, u:u + 25:4, :] for u in range(6)], 0)   # (6, bp, 7, 30)
    planes = planes.reshape(6, nb, tb, 7, 30).transpose(1, 0, 3, 2, 4)
    planes = planes.reshape(nb, 6, 7 * tb, 30).astype(jnp.bfloat16)

    kernel = functools.partial(_cnn_fused_kernel, tb=tb)
    out = pl.pallas_call(
        kernel,
        out_shape=jax.ShapeDtypeStruct((bp, NCLS_PAD), jnp.float32),
        grid=(nb,),
        in_specs=[
            pl.BlockSpec((1, 6, 7 * tb, 30), lambda i: (i, 0, 0, 0)),     # x planes
            pl.BlockSpec((3, 2, 30, W1_COLS), lambda i: (0, 0, 0, 0)),    # conv1 band
            pl.BlockSpec((1, W1_COLS), lambda i: (0, 0)),                 # conv1 bias
            pl.BlockSpec((3, 2, 16 * C1, W2_COLS), lambda i: (0, 0, 0, 0)),  # conv2 band
            pl.BlockSpec((1, W2_COLS), lambda i: (0, 0)),                 # conv2 bias
            pl.BlockSpec((7, W2_COLS, 128), lambda i: (0, 0, 0)),         # fc1 (HWC order)
            pl.BlockSpec((1, 128), lambda i: (0, 0)),                     # fc1 bias
            pl.BlockSpec((128, NCLS_PAD), lambda i: (0, 0)),              # fc2 (padded)
            pl.BlockSpec((1, NCLS_PAD), lambda i: (0, 0)),                # fc2 bias
        ],
        out_specs=pl.BlockSpec((tb, NCLS_PAD), lambda i: (i, 0)),
        scratch_shapes=[
            pltpu.VMEM((8 * tb, W1_COLS), jnp.bfloat16),   # pool1, even p1pad rows
            pltpu.VMEM((8 * tb, W1_COLS), jnp.bfloat16),   # pool1, odd  p1pad rows
        ],
        compiler_params=pltpu.CompilerParams(
            dimension_semantics=("parallel",),
            vmem_limit_bytes=32 * 1024 * 1024,
        ),
    )(planes, params["w1b"], params["b1r"], params["w2b"], params["b2r"],
      params["fc1w"], params["fc1b"], params["fc2w"], params["fc2b"])
    return out[:B, :10]


# ----------------------------------------------------------------------------
# Parameter preparation: torch-layout weights -> banded / permuted kernel weights
# (one-time host-side numpy; zero runtime cost)
# ----------------------------------------------------------------------------
def _conv1_band_weights(conv1_w):
    """(32,1,3,3) OIHW -> band[kh, wp] of shape (30, 16*32).
    band[kh, wp][wi, (wq+1)*32 + c] = w[c,0,kh,kw] iff wi == 2*wq+wp+kw.
    Columns for w_pad in {0,15} stay zero (conv2's W padding)."""
    w = np.asarray(conv1_w, np.float32)
    band = np.zeros((3, 2, 30, W1_COLS), np.float32)
    for kh in range(3):
        for wp in range(2):
            for wq in range(14):
                for kw in range(3):
                    wi = 2 * wq + wp + kw
                    band[kh, wp, wi, (wq + 1) * C1:(wq + 2) * C1] = w[:, 0, kh, kw]
    return band


def _conv2_band_weights(conv2_w):
    """(64,32,3,3) OIHW -> band[kh, wp] of shape (16*32, 7*64).
    band[kh, wp][w_pad*32+ci, wq*64+co] = w[co,ci,kh,kw] iff w_pad == 2*wq+wp+kw."""
    w = np.asarray(conv2_w, np.float32)
    band = np.zeros((3, 2, 16 * C1, W2_COLS), np.float32)
    for kh in range(3):
        for wp in range(2):
            for wq in range(7):
                for kw in range(3):
                    wpad = 2 * wq + wp + kw
                    band[kh, wp, wpad * C1:(wpad + 1) * C1,
                         wq * C2:(wq + 1) * C2] = np.transpose(w[:, :, kh, kw])
    return band


def prepare_params(raw):
    b1r = np.zeros((1, W1_COLS), np.float32)
    b1 = np.asarray(raw["conv1_b"], np.float32)
    for wq in range(14):
        b1r[0, (wq + 1) * C1:(wq + 2) * C1] = b1
    b2r = np.tile(np.asarray(raw["conv2_b"], np.float32), 7)[None, :]       # (1,448)

    # fc1: torch flatten order is (c, h, w); kernel lane order is (w*64 + c) per h.
    fc1 = np.asarray(raw["fc1_w"], np.float32).reshape(128, C2, 7, 7)       # (out,c,h,w)
    fc1 = np.transpose(fc1, (2, 3, 1, 0)).reshape(7, W2_COLS, 128)          # (h, w*64+c, out)

    fc2 = np.zeros((128, NCLS_PAD), np.float32)
    fc2[:, :10] = np.transpose(np.asarray(raw["fc2_w"], np.float32))        # (128,10)
    fc2b = np.zeros((1, NCLS_PAD), np.float32)
    fc2b[0, :10] = np.asarray(raw["fc2_b"], np.float32)

    return {
        "w1b": jnp.asarray(_conv1_band_weights(raw["conv1_w"]), jnp.bfloat16),
        "b1r": jnp.asarray(b1r, jnp.float32),
        "w2b": jnp.asarray(_conv2_band_weights(raw["conv2_w"]), jnp.bfloat16),
        "b2r": jnp.asarray(b2r, jnp.float32),
        "fc1w": jnp.asarray(fc1, jnp.bfloat16),
        "fc1b": jnp.asarray(raw["fc1_b"], jnp.float32)[None, :],
        "fc2w": jnp.asarray(fc2, jnp.bfloat16),
        "fc2b": jnp.asarray(fc2b, jnp.float32),
    }


def init_raw_params(key):
    ks = jax.random.split(key, 8)
    s = 0.05
    return {
        "conv1_w": jax.random.normal(ks[0], (32, 1, 3, 3), jnp.float32) * s,
        "conv1_b": jax.random.normal(ks[1], (32,), jnp.float32) * s,
        "conv2_w": jax.random.normal(ks[2], (64, 32, 3, 3), jnp.float32) * s,
        "conv2_b": jax.random.normal(ks[3], (64,), jnp.float32) * s,
        "fc1_w": jax.random.normal(ks[4], (128, 64 * 7 * 7), jnp.float32) * s,
        "fc1_b": jax.random.normal(ks[5], (128,), jnp.float32) * s,
        "fc2_w": jax.random.normal(ks[6], (10, 128), jnp.float32) * s,
        "fc2_b": jax.random.normal(ks[7], (10,), jnp.float32) * s,
    }


# ----------------------------------------------------------------------------
# Pure-JAX f32 reference (matches torch CNNModel.forward semantics)
# ----------------------------------------------------------------------------
def cnn_reference(x_nchw, raw):
    x = x_nchw.astype(jnp.float32)
    y = lax.conv_general_dilated(x, raw["conv1_w"], (1, 1), ((1, 1), (1, 1)),
                                 dimension_numbers=("NCHW", "OIHW", "NCHW"))
    y = jax.nn.relu(y + raw["conv1_b"][None, :, None, None])
    y = lax.reduce_window(y, -jnp.inf, lax.max, (1, 1, 2, 2), (1, 1, 2, 2), "VALID")
    y = lax.conv_general_dilated(y, raw["conv2_w"], (1, 1), ((1, 1), (1, 1)),
                                 dimension_numbers=("NCHW", "OIHW", "NCHW"))
    y = jax.nn.relu(y + raw["conv2_b"][None, :, None, None])
    y = lax.reduce_window(y, -jnp.inf, lax.max, (1, 1, 2, 2), (1, 1, 2, 2), "VALID")
    y = y.reshape(y.shape[0], -1)                       # torch view(-1, 64*7*7)
    y = jax.nn.relu(y @ raw["fc1_w"].T + raw["fc1_b"])
    return y @ raw["fc2_w"].T + raw["fc2_b"]


if __name__ == "__main__":
    key = jax.random.PRNGKey(0)
    k_param, k_x = jax.random.split(key)
    raw = init_raw_params(k_param)
    params = prepare_params(raw)

    # Input shape is fixed by fc1 = Linear(64*7*7, 128): 28x28, 1 channel.
    x = jax.random.normal(k_x, (2, 1, 28, 28), jnp.float32)

    logits = jax.jit(cnn_forward)(x, params)
    jax.block_until_ready(logits)
    assert logits.shape == (2, 10) and logits.dtype == jnp.float32

    ref = cnn_reference(x, raw)
    max_err = float(jnp.max(jnp.abs(logits - ref)))
    assert jnp.allclose(logits, ref, atol=8e-2, rtol=8e-2), max_err

    print("KERNEL_OK")
</pallas_src>

<mosaic_0001>
module attributes {stable_mosaic.version = 11 : i64} {
  func.func @_cnn_fused_kernel(%arg0: i32, %arg1: memref<1x6x56x30xbf16, #tpu.memory_space<vmem>>, %arg2: memref<3x2x30x512xbf16, #tpu.memory_space<vmem>>, %arg3: memref<1x512xf32, #tpu.memory_space<vmem>>, %arg4: memref<3x2x512x448xbf16, #tpu.memory_space<vmem>>, %arg5: memref<1x448xf32, #tpu.memory_space<vmem>>, %arg6: memref<7x448x128xbf16, #tpu.memory_space<vmem>>, %arg7: memref<1x128xf32, #tpu.memory_space<vmem>>, %arg8: memref<128x128xbf16, #tpu.memory_space<vmem>>, %arg9: memref<1x128xf32, #tpu.memory_space<vmem>>, %arg10: memref<8x128xf32, #tpu.memory_space<vmem>>, %arg11: memref<64x512xbf16, #tpu.memory_space<vmem>>, %arg12: memref<64x512xbf16, #tpu.memory_space<vmem>>) attributes {dimension_semantics = [#tpu.dimension_semantics<parallel>], iteration_bounds = array<i64: 1>, scalar_prefetch = 0 : i64, scratch_operands = 2 : i64, tpu.core_type = #tpu.core_type<tc>, window_params = [{transform_indices = @transform_0, window_bounds = array<i64: 1, 6, 56, 30>}, {pipeline_mode = #tpu.pipeline_mode<synchronous>, transform_indices = @transform_1, window_bounds = array<i64: 3, 2, 30, 512>}, {pipeline_mode = #tpu.pipeline_mode<synchronous>, transform_indices = @transform_2, window_bounds = array<i64: 1, 512>}, {pipeline_mode = #tpu.pipeline_mode<synchronous>, transform_indices = @transform_3, window_bounds = array<i64: 3, 2, 512, 448>}, {pipeline_mode = #tpu.pipeline_mode<synchronous>, transform_indices = @transform_4, window_bounds = array<i64: 1, 448>}, {pipeline_mode = #tpu.pipeline_mode<synchronous>, transform_indices = @transform_5, window_bounds = array<i64: 7, 448, 128>}, {pipeline_mode = #tpu.pipeline_mode<synchronous>, transform_indices = @transform_6, window_bounds = array<i64: 1, 128>}, {pipeline_mode = #tpu.pipeline_mode<synchronous>, transform_indices = @transform_7, window_bounds = array<i64: 128, 128>}, {pipeline_mode = #tpu.pipeline_mode<synchronous>, transform_indices = @transform_8, window_bounds = array<i64: 1, 128>}, {transform_indices = @transform_9, window_bounds = array<i64: 8, 128>}]} {
    %c0 = arith.constant 0 : index
    %c0_0 = arith.constant 0 : index
    %c0_1 = arith.constant 0 : index
    %c0_2 = arith.constant 0 : index
    %0 = vector.load %arg1[%c0, %c0_0, %c0_1, %c0_2] : memref<1x6x56x30xbf16, #tpu.memory_space<vmem>>, vector<1x1x56x30xbf16>
    %1 = vector.shape_cast %0 : vector<1x1x56x30xbf16> to vector<56x30xbf16>
    %c0_3 = arith.constant 0 : index
    %c1 = arith.constant 1 : index
    %c0_4 = arith.constant 0 : index
    %c0_5 = arith.constant 0 : index
    %2 = vector.load %arg1[%c0_3, %c1, %c0_4, %c0_5] : memref<1x6x56x30xbf16, #tpu.memory_space<vmem>>, vector<1x1x56x30xbf16>
    %3 = vector.shape_cast %2 : vector<1x1x56x30xbf16> to vector<56x30xbf16>
    %c0_6 = arith.constant 0 : index
    %c2 = arith.constant 2 : index
    %c0_7 = arith.constant 0 : index
    %c0_8 = arith.constant 0 : index
    %4 = vector.load %arg1[%c0_6, %c2, %c0_7, %c0_8] : memref<1x6x56x30xbf16, #tpu.memory_space<vmem>>, vector<1x1x56x30xbf16>
    %5 = vector.shape_cast %4 : vector<1x1x56x30xbf16> to vector<56x30xbf16>
    %c0_9 = arith.constant 0 : index
    %c3 = arith.constant 3 : index
    %c0_10 = arith.constant 0 : index
    %c0_11 = arith.constant 0 : index
    %6 = vector.load %arg1[%c0_9, %c3, %c0_10, %c0_11] : memref<1x6x56x30xbf16, #tpu.memory_space<vmem>>, vector<1x1x56x30xbf16>
    %7 = vector.shape_cast %6 : vector<1x1x56x30xbf16> to vector<56x30xbf16>
    %c0_12 = arith.constant 0 : index
    %c4 = arith.constant 4 : index
    %c0_13 = arith.constant 0 : index
    %c0_14 = arith.constant 0 : index
    %8 = vector.load %arg1[%c0_12, %c4, %c0_13, %c0_14] : memref<1x6x56x30xbf16, #tpu.memory_space<vmem>>, vector<1x1x56x30xbf16>
    %9 = vector.shape_cast %8 : vector<1x1x56x30xbf16> to vector<56x30xbf16>
    %c0_15 = arith.constant 0 : index
    %c5 = arith.constant 5 : index
    %c0_16 = arith.constant 0 : index
    %c0_17 = arith.constant 0 : index
    %10 = vector.load %arg1[%c0_15, %c5, %c0_16, %c0_17] : memref<1x6x56x30xbf16, #tpu.memory_space<vmem>>, vector<1x1x56x30xbf16>
    %11 = vector.shape_cast %10 : vector<1x1x56x30xbf16> to vector<56x30xbf16>
    %c0_18 = arith.constant 0 : index
    %c0_19 = arith.constant 0 : index
    %12 = vector.load %arg3[%c0_18, %c0_19] : memref<1x512xf32, #tpu.memory_space<vmem>>, vector<1x512xf32>
    %c0_20 = arith.constant 0 : index
    %c0_21 = arith.constant 0 : index
    %13 = vector.load %arg5[%c0_20, %c0_21] : memref<1x448xf32, #tpu.memory_space<vmem>>, vector<1x448xf32>
    %c0_22 = arith.constant 0 : index
    %c0_23 = arith.constant 0 : index
    %c0_24 = arith.constant 0 : index
    %c0_25 = arith.constant 0 : index
    %14 = vector.load %arg2[%c0_22, %c0_23, %c0_24, %c0_25] : memref<3x2x30x512xbf16, #tpu.memory_space<vmem>>, vector<1x1x30x512xbf16>
    %15 = vector.shape_cast %14 : vector<1x1x30x512xbf16> to vector<30x512xbf16>
    %cst = arith.constant dense<0.000000e+00> : vector<56x512xf32>
    %16 = tpu.matmul %1, %15, %cst {dimension_numbers = #tpu.dot_dimension_numbers<[1], [0], [0], [1], [0, 0, 1, 1], [], []>} : vector<56x30xbf16>, vector<30x512xbf16>, vector<56x512xf32> -> vector<56x512xf32>
    %c1_26 = arith.constant 1 : index
    %c0_27 = arith.constant 0 : index
    %c0_28 = arith.constant 0 : index
    %c0_29 = arith.constant 0 : index
    %17 = vector.load %arg2[%c1_26, %c0_27, %c0_28, %c0_29] : memref<3x2x30x512xbf16, #tpu.memory_space<vmem>>, vector<1x1x30x512xbf16>
    %18 = vector.shape_cast %17 : vector<1x1x30x512xbf16> to vector<30x512xbf16>
    %cst_30 = arith.constant dense<0.000000e+00> : vector<56x512xf32>
    %19 = tpu.matmul %3, %18, %cst_30 {dimension_numbers = #tpu.dot_dimension_numbers<[1], [0], [0], [1], [0, 0, 1, 1], [], []>} : vector<56x30xbf16>, vector<30x512xbf16>, vector<56x512xf32> -> vector<56x512xf32>
    %20 = arith.addf %16, %19 : vector<56x512xf32>
    %c2_31 = arith.constant 2 : index
    %c0_32 = arith.constant 0 : index
    %c0_33 = arith.constant 0 : index
    %c0_34 = arith.constant 0 : index
    %21 = vector.load %arg2[%c2_31, %c0_32, %c0_33, %c0_34] : memref<3x2x30x512xbf16, #tpu.memory_space<vmem>>, vector<1x1x30x512xbf16>
    %22 = vector.shape_cast %21 : vector<1x1x30x512xbf16> to vector<30x512xbf16>
    %cst_35 = arith.constant dense<0.000000e+00> : vector<56x512xf32>
    %23 = tpu.matmul %5, %22, %cst_35 {dimension_numbers = #tpu.dot_dimension_numbers<[1], [0], [0], [1], [0, 0, 1, 1], [], []>} : vector<56x30xbf16>, vector<30x512xbf16>, vector<56x512xf32> -> vector<56x512xf32>
    %24 = arith.addf %20, %23 : vector<56x512xf32>
    %c0_36 = arith.constant 0 : index
    %c1_37 = arith.constant 1 : index
    %c0_38 = arith.constant 0 : index
    %c0_39 = arith.constant 0 : index
    %25 = vector.load %arg2[%c0_36, %c1_37, %c0_38, %c0_39] : memref<3x2x30x512xbf16, #tpu.memory_space<vmem>>, vector<1x1x30x512xbf16>
    %26 = vector.shape_cast %25 : vector<1x1x30x512xbf16> to vector<30x512xbf16>
    %cst_40 = arith.constant dense<0.000000e+00> : vector<56x512xf32>
    %27 = tpu.matmul %1, %26, %cst_40 {dimension_numbers = #tpu.dot_dimension_numbers<[1], [0], [0], [1], [0, 0, 1, 1], [], []>} : vector<56x30xbf16>, vector<30x512xbf16>, vector<56x512xf32> -> vector<56x512xf32>
    %c1_41 = arith.constant 1 : index
    %c1_42 = arith.constant 1 : index
    %c0_43 = arith.constant 0 : index
    %c0_44 = arith.constant 0 : index
    %28 = vector.load %arg2[%c1_41, %c1_42, %c0_43, %c0_44] : memref<3x2x30x512xbf16, #tpu.memory_space<vmem>>, vector<1x1x30x512xbf16>
    %29 = vector.shape_cast %28 : vector<1x1x30x512xbf16> to vector<30x512xbf16>
    %cst_45 = arith.constant dense<0.000000e+00> : vector<56x512xf32>
    %30 = tpu.matmul %3, %29, %cst_45 {dimension_numbers = #tpu.dot_dimension_numbers<[1], [0], [0], [1], [0, 0, 1, 1], [], []>} : vector<56x30xbf16>, vector<30x512xbf16>, vector<56x512xf32> -> vector<56x512xf32>
    %31 = arith.addf %27, %30 : vector<56x512xf32>
    %c2_46 = arith.constant 2 : index
    %c1_47 = arith.constant 1 : index
    %c0_48 = arith.constant 0 : index
    %c0_49 = arith.constant 0 : index
    %32 = vector.load %arg2[%c2_46, %c1_47, %c0_48, %c0_49] : memref<3x2x30x512xbf16, #tpu.memory_space<vmem>>, vector<1x1x30x512xbf16>
    %33 = vector.shape_cast %32 : vector<1x1x30x512xbf16> to vector<30x512xbf16>
    %cst_50 = arith.constant dense<0.000000e+00> : vector<56x512xf32>
    %34 = tpu.matmul %5, %33, %cst_50 {dimension_numbers = #tpu.dot_dimension_numbers<[1], [0], [0], [1], [0, 0, 1, 1], [], []>} : vector<56x30xbf16>, vector<30x512xbf16>, vector<56x512xf32> -> vector<56x512xf32>
    %35 = arith.addf %31, %34 : vector<56x512xf32>
    %36 = arith.maximumf %24, %35 : vector<56x512xf32>
    %c0_51 = arith.constant 0 : index
    %c0_52 = arith.constant 0 : index
    %c0_53 = arith.constant 0 : index
    %c0_54 = arith.constant 0 : index
    %37 = vector.load %arg2[%c0_51, %c0_52, %c0_53, %c0_54] : memref<3x2x30x512xbf16, #tpu.memory_space<vmem>>, vector<1x1x30x512xbf16>
    %38 = vector.shape_cast %37 : vector<1x1x30x512xbf16> to vector<30x512xbf16>
    %cst_55 = arith.constant dense<0.000000e+00> : vector<56x512xf32>
    %39 = tpu.matmul %3, %38, %cst_55 {dimension_numbers = #tpu.dot_dimension_numbers<[1], [0], [0], [1], [0, 0, 1, 1], [], []>} : vector<56x30xbf16>, vector<30x512xbf16>, vector<56x512xf32> -> vector<56x512xf32>
    %c1_56 = arith.constant 1 : index
    %c0_57 = arith.constant 0 : index
    %c0_58 = arith.constant 0 : index
    %c0_59 = arith.constant 0 : index
    %40 = vector.load %arg2[%c1_56, %c0_57, %c0_58, %c0_59] : memref<3x2x30x512xbf16, #tpu.memory_space<vmem>>, vector<1x1x30x512xbf16>
    %41 = vector.shape_cast %40 : vector<1x1x30x512xbf16> to vector<30x512xbf16>
    %cst_60 = arith.constant dense<0.000000e+00> : vector<56x512xf32>
    %42 = tpu.matmul %5, %41, %cst_60 {dimension_numbers = #tpu.dot_dimension_numbers<[1], [0], [0], [1], [0, 0, 1, 1], [], []>} : vector<56x30xbf16>, vector<30x512xbf16>, vector<56x512xf32> -> vector<56x512xf32>
    %43 = arith.addf %39, %42 : vector<56x512xf32>
    %c2_61 = arith.constant 2 : index
    %c0_62 = arith.constant 0 : index
    %c0_63 = arith.constant 0 : index
    %c0_64 = arith.constant 0 : index
    %44 = vector.load %arg2[%c2_61, %c0_62, %c0_63, %c0_64] : memref<3x2x30x512xbf16, #tpu.memory_space<vmem>>, vector<1x1x30x512xbf16>
    %45 = vector.shape_cast %44 : vector<1x1x30x512xbf16> to vector<30x512xbf16>
    %cst_65 = arith.constant dense<0.000000e+00> : vector<56x512xf32>
    %46 = tpu.matmul %7, %45, %cst_65 {dimension_numbers = #tpu.dot_dimension_numbers<[1], [0], [0], [1], [0, 0, 1, 1], [], []>} : vector<56x30xbf16>, vector<30x512xbf16>, vector<56x512xf32> -> vector<56x512xf32>
    %47 = arith.addf %43, %46 : vector<56x512xf32>
    %48 = arith.maximumf %36, %47 : vector<56x512xf32>
    %c0_66 = arith.constant 0 : index
    %c1_67 = arith.constant 1 : index
    %c0_68 = arith.constant 0 : index
    %c0_69 = arith.constant 0 : index
    %49 = vector.load %arg2[%c0_66, %c1_67, %c0_68, %c0_69] : memref<3x2x30x512xbf16, #tpu.memory_space<vmem>>, vector<1x1x30x512xbf16>
    %50 = vector.shape_cast %49 : vector<1x1x30x512xbf16> to vector<30x512xbf16>
    %cst_70 = arith.constant dense<0.000000e+00> : vector<56x512xf32>
    %51 = tpu.matmul %3, %50, %cst_70 {dimension_numbers = #tpu.dot_dimension_numbers<[1], [0], [0], [1], [0, 0, 1, 1], [], []>} : vector<56x30xbf16>, vector<30x512xbf16>, vector<56x512xf32> -> vector<56x512xf32>
    %c1_71 = arith.constant 1 : index
    %c1_72 = arith.constant 1 : index
    %c0_73 = arith.constant 0 : index
    %c0_74 = arith.constant 0 : index
    %52 = vector.load %arg2[%c1_71, %c1_72, %c0_73, %c0_74] : memref<3x2x30x512xbf16, #tpu.memory_space<vmem>>, vector<1x1x30x512xbf16>
    %53 = vector.shape_cast %52 : vector<1x1x30x512xbf16> to vector<30x512xbf16>
    %cst_75 = arith.constant dense<0.000000e+00> : vector<56x512xf32>
    %54 = tpu.matmul %5, %53, %cst_75 {dimension_numbers = #tpu.dot_dimension_numbers<[1], [0], [0], [1], [0, 0, 1, 1], [], []>} : vector<56x30xbf16>, vector<30x512xbf16>, vector<56x512xf32> -> vector<56x512xf32>
    %55 = arith.addf %51, %54 : vector<56x512xf32>
    %c2_76 = arith.constant 2 : index
    %c1_77 = arith.constant 1 : index
    %c0_78 = arith.constant 0 : index
    %c0_79 = arith.constant 0 : index
    %56 = vector.load %arg2[%c2_76, %c1_77, %c0_78, %c0_79] : memref<3x2x30x512xbf16, #tpu.memory_space<vmem>>, vector<1x1x30x512xbf16>
    %57 = vector.shape_cast %56 : vector<1x1x30x512xbf16> to vector<30x512xbf16>
    %cst_80 = arith.constant dense<0.000000e+00> : vector<56x512xf32>
    %58 = tpu.matmul %7, %57, %cst_80 {dimension_numbers = #tpu.dot_dimension_numbers<[1], [0], [0], [1], [0, 0, 1, 1], [], []>} : vector<56x30xbf16>, vector<30x512xbf16>, vector<56x512xf32> -> vector<56x512xf32>
    %59 = arith.addf %55, %58 : vector<56x512xf32>
    %60 = arith.maximumf %48, %59 : vector<56x512xf32>
    %61 = vector.broadcast %12 : vector<1x512xf32> to vector<56x512xf32>
    %62 = arith.addf %60, %61 : vector<56x512xf32>
    %cst_81 = arith.constant 0.000000e+00 : f32
    %63 = vector.broadcast %cst_81 : f32 to vector<56x512xf32>
    %64 = arith.maximumf %62, %63 : vector<56x512xf32>
    %65 = arith.truncf %64 : vector<56x512xf32> to vector<56x512xbf16>
    %c0_82 = arith.constant 0 : index
    %c0_83 = arith.constant 0 : index
    %66 = vector.load %arg12[%c0_82, %c0_83] : memref<64x512xbf16, #tpu.memory_space<vmem>>, vector<56x512xbf16>
    tpu.vector_store %arg12[%c0_82, %c0_83], %65 {strides = array<i32>} : memref<64x512xbf16, #tpu.memory_space<vmem>>, vector<56x512xbf16>,
    %cst_84 = arith.constant 0.000000e+00 : bf16
    %67 = vector.broadcast %cst_84 : bf16 to vector<8x512xbf16>
    %c56 = arith.constant 56 : index
    %c0_85 = arith.constant 0 : index
    %68 = vector.load %arg12[%c56, %c0_85] : memref<64x512xbf16, #tpu.memory_space<vmem>>, vector<8x512xbf16>
    tpu.vector_store %arg12[%c56, %c0_85], %67 {strides = array<i32>} : memref<64x512xbf16, #tpu.memory_space<vmem>>, vector<8x512xbf16>,
    %c0_86 = arith.constant 0 : index
    %c0_87 = arith.constant 0 : index
    %c0_88 = arith.constant 0 : index
    %c0_89 = arith.constant 0 : index
    %69 = vector.load %arg2[%c0_86, %c0_87, %c0_88, %c0_89] : memref<3x2x30x512xbf16, #tpu.memory_space<vmem>>, vector<1x1x30x512xbf16>
    %70 = vector.shape_cast %69 : vector<1x1x30x512xbf16> to vector<30x512xbf16>
    %cst_90 = arith.constant dense<0.000000e+00> : vector<56x512xf32>
    %71 = tpu.matmul %5, %70, %cst_90 {dimension_numbers = #tpu.dot_dimension_numbers<[1], [0], [0], [1], [0, 0, 1, 1], [], []>} : vector<56x30xbf16>, vector<30x512xbf16>, vector<56x512xf32> -> vector<56x512xf32>
    %c1_91 = arith.constant 1 : index
    %c0_92 = arith.constant 0 : index
    %c0_93 = arith.constant 0 : index
    %c0_94 = arith.constant 0 : index
    %72 = vector.load %arg2[%c1_91, %c0_92, %c0_93, %c0_94] : memref<3x2x30x512xbf16, #tpu.memory_space<vmem>>, vector<1x1x30x512xbf16>
    %73 = vector.shape_cast %72 : vector<1x1x30x512xbf16> to vector<30x512xbf16>
    %cst_95 = arith.constant dense<0.000000e+00> : vector<56x512xf32>
    %74 = tpu.matmul %7, %73, %cst_95 {dimension_numbers = #tpu.dot_dimension_numbers<[1], [0], [0], [1], [0, 0, 1, 1], [], []>} : vector<56x30xbf16>, vector<30x512xbf16>, vector<56x512xf32> -> vector<56x512xf32>
    %75 = arith.addf %71, %74 : vector<56x512xf32>
    %c2_96 = arith.constant 2 : index
    %c0_97 = arith.constant 0 : index
    %c0_98 = arith.constant 0 : index
    %c0_99 = arith.constant 0 : index
    %76 = vector.load %arg2[%c2_96, %c0_97, %c0_98, %c0_99] : memref<3x2x30x512xbf16, #tpu.memory_space<vmem>>, vector<1x1x30x512xbf16>
    %77 = vector.shape_cast %76 : vector<1x1x30x512xbf16> to vector<30x512xbf16>
    %cst_100 = arith.constant dense<0.000000e+00> : vector<56x512xf32>
    %78 = tpu.matmul %9, %77, %cst_100 {dimension_numbers = #tpu.dot_dimension_numbers<[1], [0], [0], [1], [0, 0, 1, 1], [], []>} : vector<56x30xbf16>, vector<30x512xbf16>, vector<56x512xf32> -> vector<56x512xf32>
    %79 = arith.addf %75, %78 : vector<56x512xf32>
    %c0_101 = arith.constant 0 : index
    %c1_102 = arith.constant 1 : index
    %c0_103 = arith.constant 0 : index
    %c0_104 = arith.constant 0 : index
    %80 = vector.load %arg2[%c0_101, %c1_102, %c0_103, %c0_104] : memref<3x2x30x512xbf16, #tpu.memory_space<vmem>>, vector<1x1x30x512xbf16>
    %81 = vector.shape_cast %80 : vector<1x1x30x512xbf16> to vector<30x512xbf16>
    %cst_105 = arith.constant dense<0.000000e+00> : vector<56x512xf32>
    %82 = tpu.matmul %5, %81, %cst_105 {dimension_numbers = #tpu.dot_dimension_numbers<[1], [0], [0], [1], [0, 0, 1, 1], [], []>} : vector<56x30xbf16>, vector<30x512xbf16>, vector<56x512xf32> -> vector<56x512xf32>
    %c1_106 = arith.constant 1 : index
    %c1_107 = arith.constant 1 : index
    %c0_108 = arith.constant 0 : index
    %c0_109 = arith.constant 0 : index
    %83 = vector.load %arg2[%c1_106, %c1_107, %c0_108, %c0_109] : memref<3x2x30x512xbf16, #tpu.memory_space<vmem>>, vector<1x1x30x512xbf16>
    %84 = vector.shape_cast %83 : vector<1x1x30x512xbf16> to vector<30x512xbf16>
    %cst_110 = arith.constant dense<0.000000e+00> : vector<56x512xf32>
    %85 = tpu.matmul %7, %84, %cst_110 {dimension_numbers = #tpu.dot_dimension_numbers<[1], [0], [0], [1], [0, 0, 1, 1], [], []>} : vector<56x30xbf16>, vector<30x512xbf16>, vector<56x512xf32> -> vector<56x512xf32>
    %86 = arith.addf %82, %85 : vector<56x512xf32>
    %c2_111 = arith.constant 2 : index
    %c1_112 = arith.constant 1 : index
    %c0_113 = arith.constant 0 : index
    %c0_114 = arith.constant 0 : index
    %87 = vector.load %arg2[%c2_111, %c1_112, %c0_113, %c0_114] : memref<3x2x30x512xbf16, #tpu.memory_space<vmem>>, vector<1x1x30x512xbf16>
    %88 = vector.shape_cast %87 : vector<1x1x30x512xbf16> to vector<30x512xbf16>
    %cst_115 = arith.constant dense<0.000000e+00> : vector<56x512xf32>
    %89 = tpu.matmul %9, %88, %cst_115 {dimension_numbers = #tpu.dot_dimension_numbers<[1], [0], [0], [1], [0, 0, 1, 1], [], []>} : vector<56x30xbf16>, vector<30x512xbf16>, vector<56x512xf32> -> vector<56x512xf32>
    %90 = arith.addf %86, %89 : vector<56x512xf32>
    %91 = arith.maximumf %79, %90 : vector<56x512xf32>
    %c0_116 = arith.constant 0 : index
    %c0_117 = arith.constant 0 : index
    %c0_118 = arith.constant 0 : index
    %c0_119 = arith.constant 0 : index
    %92 = vector.load %arg2[%c0_116, %c0_117, %c0_118, %c0_119] : memref<3x2x30x512xbf16, #tpu.memory_space<vmem>>, vector<1x1x30x512xbf16>
    %93 = vector.shape_cast %92 : vector<1x1x30x512xbf16> to vector<30x512xbf16>
    %cst_120 = arith.constant dense<0.000000e+00> : vector<56x512xf32>
    %94 = tpu.matmul %7, %93, %cst_120 {dimension_numbers = #tpu.dot_dimension_numbers<[1], [0], [0], [1], [0, 0, 1, 1], [], []>} : vector<56x30xbf16>, vector<30x512xbf16>, vector<56x512xf32> -> vector<56x512xf32>
    %c1_121 = arith.constant 1 : index
    %c0_122 = arith.constant 0 : index
    %c0_123 = arith.constant 0 : index
    %c0_124 = arith.constant 0 : index
    %95 = vector.load %arg2[%c1_121, %c0_122, %c0_123, %c0_124] : memref<3x2x30x512xbf16, #tpu.memory_space<vmem>>, vector<1x1x30x512xbf16>
    %96 = vector.shape_cast %95 : vector<1x1x30x512xbf16> to vector<30x512xbf16>
    %cst_125 = arith.constant dense<0.000000e+00> : vector<56x512xf32>
    %97 = tpu.matmul %9, %96, %cst_125 {dimension_numbers = #tpu.dot_dimension_numbers<[1], [0], [0], [1], [0, 0, 1, 1], [], []>} : vector<56x30xbf16>, vector<30x512xbf16>, vector<56x512xf32> -> vector<56x512xf32>
    %98 = arith.addf %94, %97 : vector<56x512xf32>
    %c2_126 = arith.constant 2 : index
    %c0_127 = arith.constant 0 : index
    %c0_128 = arith.constant 0 : index
    %c0_129 = arith.constant 0 : index
    %99 = vector.load %arg2[%c2_126, %c0_127, %c0_128, %c0_129] : memref<3x2x30x512xbf16, #tpu.memory_space<vmem>>, vector<1x1x30x512xbf16>
    %100 = vector.shape_cast %99 : vector<1x1x30x512xbf16> to vector<30x512xbf16>
    %cst_130 = arith.constant dense<0.000000e+00> : vector<56x512xf32>
    %101 = tpu.matmul %11, %100, %cst_130 {dimension_numbers = #tpu.dot_dimension_numbers<[1], [0], [0], [1], [0, 0, 1, 1], [], []>} : vector<56x30xbf16>, vector<30x512xbf16>, vector<56x512xf32> -> vector<56x512xf32>
    %102 = arith.addf %98, %101 : vector<56x512xf32>
    %103 = arith.maximumf %91, %102 : vector<56x512xf32>
    %c0_131 = arith.constant 0 : index
    %c1_132 = arith.constant 1 : index
    %c0_133 = arith.constant 0 : index
    %c0_134 = arith.constant 0 : index
    %104 = vector.load %arg2[%c0_131, %c1_132, %c0_133, %c0_134] : memref<3x2x30x512xbf16, #tpu.memory_space<vmem>>, vector<1x1x30x512xbf16>
    %105 = vector.shape_cast %104 : vector<1x1x30x512xbf16> to vector<30x512xbf16>
    %cst_135 = arith.constant dense<0.000000e+00> : vector<56x512xf32>
    %106 = tpu.matmul %7, %105, %cst_135 {dimension_numbers = #tpu.dot_dimension_numbers<[1], [0], [0], [1], [0, 0, 1, 1], [], []>} : vector<56x30xbf16>, vector<30x512xbf16>, vector<56x512xf32> -> vector<56x512xf32>
    %c1_136 = arith.constant 1 : index
    %c1_137 = arith.constant 1 : index
    %c0_138 = arith.constant 0 : index
    %c0_139 = arith.constant 0 : index
    %107 = vector.load %arg2[%c1_136, %c1_137, %c0_138, %c0_139] : memref<3x2x30x512xbf16, #tpu.memory_space<vmem>>, vector<1x1x30x512xbf16>
    %108 = vector.shape_cast %107 : vector<1x1x30x512xbf16> to vector<30x512xbf16>
    %cst_140 = arith.constant dense<0.000000e+00> : vector<56x512xf32>
    %109 = tpu.matmul %9, %108, %cst_140 {dimension_numbers = #tpu.dot_dimension_numbers<[1], [0], [0], [1], [0, 0, 1, 1], [], []>} : vector<56x30xbf16>, vector<30x512xbf16>, vector<56x512xf32> -> vector<56x512xf32>
    %110 = arith.addf %106, %109 : vector<56x512xf32>
    %c2_141 = arith.constant 2 : index
    %c1_142 = arith.constant 1 : index
    %c0_143 = arith.constant 0 : index
    %c0_144 = arith.constant 0 : index
    %111 = vector.load %arg2[%c2_141, %c1_142, %c0_143, %c0_144] : memref<3x2x30x512xbf16, #tpu.memory_space<vmem>>, vector<1x1x30x512xbf16>
    %112 = vector.shape_cast %111 : vector<1x1x30x512xbf16> to vector<30x512xbf16>
    %cst_145 = arith.constant dense<0.000000e+00> : vector<56x512xf32>
    %113 = tpu.matmul %11, %112, %cst_145 {dimension_numbers = #tpu.dot_dimension_numbers<[1], [0], [0], [1], [0, 0, 1, 1], [], []>} : vector<56x30xbf16>, vector<30x512xbf16>, vector<56x512xf32> -> vector<56x512xf32>
    %114 = arith.addf %110, %113 : vector<56x512xf32>
    %115 = arith.maximumf %103, %114 : vector<56x512xf32>
    %116 = vector.broadcast %12 : vector<1x512xf32> to vector<56x512xf32>
    %117 = arith.addf %115, %116 : vector<56x512xf32>
    %cst_146 = arith.constant 0.000000e+00 : f32
    %118 = vector.broadcast %cst_146 : f32 to vector<56x512xf32>
    %119 = arith.maximumf %117, %118 : vector<56x512xf32>
    %120 = arith.truncf %119 : vector<56x512xf32> to vector<56x512xbf16>
    %c8 = arith.constant 8 : index
    %c0_147 = arith.constant 0 : index
    %121 = vector.load %arg11[%c8, %c0_147] : memref<64x512xbf16, #tpu.memory_space<vmem>>, vector<56x512xbf16>
    tpu.vector_store %arg11[%c8, %c0_147], %120 {strides = array<i32>} : memref<64x512xbf16, #tpu.memory_space<vmem>>, vector<56x512xbf16>,
    %cst_148 = arith.constant 0.000000e+00 : bf16
    %122 = vector.broadcast %cst_148 : bf16 to vector<8x512xbf16>
    %c0_149 = arith.constant 0 : index
    %c0_150 = arith.constant 0 : index
    %123 = vector.load %arg11[%c0_149, %c0_150] : memref<64x512xbf16, #tpu.memory_space<vmem>>, vector<8x512xbf16>
    tpu.vector_store %arg11[%c0_149, %c0_150], %122 {strides = array<i32>} : memref<64x512xbf16, #tpu.memory_space<vmem>>, vector<8x512xbf16>,
    %c0_151 = arith.constant 0 : index
    %c0_152 = arith.constant 0 : index
    %124 = vector.load %arg11[%c0_151, %c0_152] : memref<64x512xbf16, #tpu.memory_space<vmem>>, vector<56x512xbf16>
    %c0_153 = arith.constant 0 : index
    %c0_154 = arith.constant 0 : index
    %125 = vector.load %arg12[%c0_153, %c0_154] : memref<64x512xbf16, #tpu.memory_space<vmem>>, vector<56x512xbf16>
    %c8_155 = arith.constant 8 : index
    %c0_156 = arith.constant 0 : index
    %126 = vector.load %arg11[%c8_155, %c0_156] : memref<64x512xbf16, #tpu.memory_space<vmem>>, vector<56x512xbf16>
    %c8_157 = arith.constant 8 : index
    %c0_158 = arith.constant 0 : index
    %127 = vector.load %arg12[%c8_157, %c0_158] : memref<64x512xbf16, #tpu.memory_space<vmem>>, vector<56x512xbf16>
    %c0_159 = arith.constant 0 : index
    %c0_160 = arith.constant 0 : index
    %c0_161 = arith.constant 0 : index
    %c0_162 = arith.constant 0 : index
    %128 = vector.load %arg4[%c0_159, %c0_160, %c0_161, %c0_162] : memref<3x2x512x448xbf16, #tpu.memory_space<vmem>>, vector<1x1x512x448xbf16>
    %129 = vector.shape_cast %128 : vector<1x1x512x448xbf16> to vector<512x448xbf16>
    %cst_163 = arith.constant dense<0.000000e+00> : vector<56x448xf32>
    %130 = tpu.matmul %124, %129, %cst_163 {dimension_numbers = #tpu.dot_dimension_numbers<[1], [0], [0], [1], [0, 0, 1, 1], [], []>} : vector<56x512xbf16>, vector<512x448xbf16>, vector<56x448xf32> -> vector<56x448xf32>
    %c1_164 = arith.constant 1 : index
    %c0_165 = arith.constant 0 : index
    %c0_166 = arith.constant 0 : index
    %c0_167 = arith.constant 0 : index
    %131 = vector.load %arg4[%c1_164, %c0_165, %c0_166, %c0_167] : memref<3x2x512x448xbf16, #tpu.memory_space<vmem>>, vector<1x1x512x448xbf16>
    %132 = vector.shape_cast %131 : vector<1x1x512x448xbf16> to vector<512x448xbf16>
    %cst_168 = arith.constant dense<0.000000e+00> : vector<56x448xf32>
    %133 = tpu.matmul %125, %132, %cst_168 {dimension_numbers = #tpu.dot_dimension_numbers<[1], [0], [0], [1], [0, 0, 1, 1], [], []>} : vector<56x512xbf16>, vector<512x448xbf16>, vector<56x448xf32> -> vector<56x448xf32>
    %134 = arith.addf %130, %133 : vector<56x448xf32>
    %c2_169 = arith.constant 2 : index
    %c0_170 = arith.constant 0 : index
    %c0_171 = arith.constant 0 : index
    %c0_172 = arith.constant 0 : index
    %135 = vector.load %arg4[%c2_169, %c0_170, %c0_171, %c0_172] : memref<3x2x512x448xbf16, #tpu.memory_space<vmem>>, vector<1x1x512x448xbf16>
    %136 = vector.shape_cast %135 : vector<1x1x512x448xbf16> to vector<512x448xbf16>
    %cst_173 = arith.constant dense<0.000000e+00> : vector<56x448xf32>
    %137 = tpu.matmul %126, %136, %cst_173 {dimension_numbers = #tpu.dot_dimension_numbers<[1], [0], [0], [1], [0, 0, 1, 1], [], []>} : vector<56x512xbf16>, vector<512x448xbf16>, vector<56x448xf32> -> vector<56x448xf32>
    %138 = arith.addf %134, %137 : vector<56x448xf32>
    %c0_174 = arith.constant 0 : index
    %c1_175 = arith.constant 1 : index
    %c0_176 = arith.constant 0 : index
    %c0_177 = arith.constant 0 : index
    %139 = vector.load %arg4[%c0_174, %c1_175, %c0_176, %c0_177] : memref<3x2x512x448xbf16, #tpu.memory_space<vmem>>, vector<1x1x512x448xbf16>
    %140 = vector.shape_cast %139 : vector<1x1x512x448xbf16> to vector<512x448xbf16>
    %cst_178 = arith.constant dense<0.000000e+00> : vector<56x448xf32>
    %141 = tpu.matmul %124, %140, %cst_178 {dimension_numbers = #tpu.dot_dimension_numbers<[1], [0], [0], [1], [0, 0, 1, 1], [], []>} : vector<56x512xbf16>, vector<512x448xbf16>, vector<56x448xf32> -> vector<56x448xf32>
    %c1_179 = arith.constant 1 : index
    %c1_180 = arith.constant 1 : index
    %c0_181 = arith.constant 0 : index
    %c0_182 = arith.constant 0 : index
    %142 = vector.load %arg4[%c1_179, %c1_180, %c0_181, %c0_182] : memref<3x2x512x448xbf16, #tpu.memory_space<vmem>>, vector<1x1x512x448xbf16>
    %143 = vector.shape_cast %142 : vector<1x1x512x448xbf16> to vector<512x448xbf16>
    %cst_183 = arith.constant dense<0.000000e+00> : vector<56x448xf32>
    %144 = tpu.matmul %125, %143, %cst_183 {dimension_numbers = #tpu.dot_dimension_numbers<[1], [0], [0], [1], [0, 0, 1, 1], [], []>} : vector<56x512xbf16>, vector<512x448xbf16>, vector<56x448xf32> -> vector<56x448xf32>
    %145 = arith.addf %141, %144 : vector<56x448xf32>
    %c2_184 = arith.constant 2 : index
    %c1_185 = arith.constant 1 : index
    %c0_186 = arith.constant 0 : index
    %c0_187 = arith.constant 0 : index
    %146 = vector.load %arg4[%c2_184, %c1_185, %c0_186, %c0_187] : memref<3x2x512x448xbf16, #tpu.memory_space<vmem>>, vector<1x1x512x448xbf16>
    %147 = vector.shape_cast %146 : vector<1x1x512x448xbf16> to vector<512x448xbf16>
    %cst_188 = arith.constant dense<0.000000e+00> : vector<56x448xf32>
    %148 = tpu.matmul %126, %147, %cst_188 {dimension_numbers = #tpu.dot_dimension_numbers<[1], [0], [0], [1], [0, 0, 1, 1], [], []>} : vector<56x512xbf16>, vector<512x448xbf16>, vector<56x448xf32> -> vector<56x448xf32>
    %149 = arith.addf %145, %148 : vector<56x448xf32>
    %150 = arith.maximumf %138, %149 : vector<56x448xf32>
    %c0_189 = arith.constant 0 : index
    %c0_190 = arith.constant 0 : index
    %c0_191 = arith.constant 0 : index
    %c0_192 = arith.constant 0 : index
    %151 = vector.load %arg4[%c0_189, %c0_190, %c0_191, %c0_192] : memref<3x2x512x448xbf16, #tpu.memory_space<vmem>>, vector<1x1x512x448xbf16>
    %152 = vector.shape_cast %151 : vector<1x1x512x448xbf16> to vector<512x448xbf16>
    %cst_193 = arith.constant dense<0.000000e+00> : vector<56x448xf32>
    %153 = tpu.matmul %125, %152, %cst_193 {dimension_numbers = #tpu.dot_dimension_numbers<[1], [0], [0], [1], [0, 0, 1, 1], [], []>} : vector<56x512xbf16>, vector<512x448xbf16>, vector<56x448xf32> -> vector<56x448xf32>
    %c1_194 = arith.constant 1 : index
    %c0_195 = arith.constant 0 : index
    %c0_196 = arith.constant 0 : index
    %c0_197 = arith.constant 0 : index
    %154 = vector.load %arg4[%c1_194, %c0_195, %c0_196, %c0_197] : memref<3x2x512x448xbf16, #tpu.memory_space<vmem>>, vector<1x1x512x448xbf16>
    %155 = vector.shape_cast %154 : vector<1x1x512x448xbf16> to vector<512x448xbf16>
    %cst_198 = arith.constant dense<0.000000e+00> : vector<56x448xf32>
    %156 = tpu.matmul %126, %155, %cst_198 {dimension_numbers = #tpu.dot_dimension_numbers<[1], [0], [0], [1], [0, 0, 1, 1], [], []>} : vector<56x512xbf16>, vector<512x448xbf16>, vector<56x448xf32> -> vector<56x448xf32>
    %157 = arith.addf %153, %156 : vector<56x448xf32>
    %c2_199 = arith.constant 2 : index
    %c0_200 = arith.constant 0 : index
    %c0_201 = arith.constant 0 : index
    %c0_202 = arith.constant 0 : index
    %158 = vector.load %arg4[%c2_199, %c0_200, %c0_201, %c0_202] : memref<3x2x512x448xbf16, #tpu.memory_space<vmem>>, vector<1x1x512x448xbf16>
    %159 = vector.shape_cast %158 : vector<1x1x512x448xbf16> to vector<512x448xbf16>
    %cst_203 = arith.constant dense<0.000000e+00> : vector<56x448xf32>
    %160 = tpu.matmul %127, %159, %cst_203 {dimension_numbers = #tpu.dot_dimension_numbers<[1], [0], [0], [1], [0, 0, 1, 1], [], []>} : vector<56x512xbf16>, vector<512x448xbf16>, vector<56x448xf32> -> vector<56x448xf32>
    %161 = arith.addf %157, %160 : vector<56x448xf32>
    %162 = arith.maximumf %150, %161 : vector<56x448xf32>
    %c0_204 = arith.constant 0 : index
    %c1_205 = arith.constant 1 : index
    %c0_206 = arith.constant 0 : index
    %c0_207 = arith.constant 0 : index
    %163 = vector.load %arg4[%c0_204, %c1_205, %c0_206, %c0_207] : memref<3x2x512x448xbf16, #tpu.memory_space<vmem>>, vector<1x1x512x448xbf16>
    %164 = vector.shape_cast %163 : vector<1x1x512x448xbf16> to vector<512x448xbf16>
    %cst_208 = arith.constant dense<0.000000e+00> : vector<56x448xf32>
    %165 = tpu.matmul %125, %164, %cst_208 {dimension_numbers = #tpu.dot_dimension_numbers<[1], [0], [0], [1], [0, 0, 1, 1], [], []>} : vector<56x512xbf16>, vector<512x448xbf16>, vector<56x448xf32> -> vector<56x448xf32>
    %c1_209 = arith.constant 1 : index
    %c1_210 = arith.constant 1 : index
    %c0_211 = arith.constant 0 : index
    %c0_212 = arith.constant 0 : index
    %166 = vector.load %arg4[%c1_209, %c1_210, %c0_211, %c0_212] : memref<3x2x512x448xbf16, #tpu.memory_space<vmem>>, vector<1x1x512x448xbf16>
    %167 = vector.shape_cast %166 : vector<1x1x512x448xbf16> to vector<512x448xbf16>
    %cst_213 = arith.constant dense<0.000000e+00> : vector<56x448xf32>
    %168 = tpu.matmul %126, %167, %cst_213 {dimension_numbers = #tpu.dot_dimension_numbers<[1], [0], [0], [1], [0, 0, 1, 1], [], []>} : vector<56x512xbf16>, vector<512x448xbf16>, vector<56x448xf32> -> vector<56x448xf32>
    %169 = arith.addf %165, %168 : vector<56x448xf32>
    %c2_214 = arith.constant 2 : index
    %c1_215 = arith.constant 1 : index
    %c0_216 = arith.constant 0 : index
    %c0_217 = arith.constant 0 : index
    %170 = vector.load %arg4[%c2_214, %c1_215, %c0_216, %c0_217] : memref<3x2x512x448xbf16, #tpu.memory_space<vmem>>, vector<1x1x512x448xbf16>
    %171 = vector.shape_cast %170 : vector<1x1x512x448xbf16> to vector<512x448xbf16>
    %cst_218 = arith.constant dense<0.000000e+00> : vector<56x448xf32>
    %172 = tpu.matmul %127, %171, %cst_218 {dimension_numbers = #tpu.dot_dimension_numbers<[1], [0], [0], [1], [0, 0, 1, 1], [], []>} : vector<56x512xbf16>, vector<512x448xbf16>, vector<56x448xf32> -> vector<56x448xf32>
    %173 = arith.addf %169, %172 : vector<56x448xf32>
    %174 = arith.maximumf %162, %173 : vector<56x448xf32>
    %175 = vector.broadcast %13 : vector<1x448xf32> to vector<56x448xf32>
    %176 = arith.addf %174, %175 : vector<56x448xf32>
    %cst_219 = arith.constant 0.000000e+00 : f32
    %177 = vector.broadcast %cst_219 : f32 to vector<56x448xf32>
    %178 = arith.maximumf %176, %177 : vector<56x448xf32>
    %179 = arith.truncf %178 : vector<56x448xf32> to vector<56x448xbf16>
    %180 = vector.extract_strided_slice %179 {offsets = [0, 0], sizes = [8, 448], strides = [1, 1]} : vector<56x448xbf16> to vector<8x448xbf16>
    %c0_220 = arith.constant 0 : index
    %c0_221 = arith.constant 0 : index
    %c0_222 = arith.constant 0 : index
    %181 = vector.load %arg6[%c0_220, %c0_221, %c0_222] : memref<7x448x128xbf16, #tpu.memory_space<vmem>>, vector<1x448x128xbf16>
    %182 = vector.shape_cast %181 : vector<1x448x128xbf16> to vector<448x128xbf16>
    %cst_223 = arith.constant dense<0.000000e+00> : vector<8x128xf32>
    %183 = tpu.matmul %180, %182, %cst_223 {dimension_numbers = #tpu.dot_dimension_numbers<[1], [0], [0], [1], [0, 0, 1, 1], [], []>} : vector<8x448xbf16>, vector<448x128xbf16>, vector<8x128xf32> -> vector<8x128xf32>
    %184 = vector.extract_strided_slice %179 {offsets = [8, 0], sizes = [8, 448], strides = [1, 1]} : vector<56x448xbf16> to vector<8x448xbf16>
    %c1_224 = arith.constant 1 : index
    %c0_225 = arith.constant 0 : index
    %c0_226 = arith.constant 0 : index
    %185 = vector.load %arg6[%c1_224, %c0_225, %c0_226] : memref<7x448x128xbf16, #tpu.memory_space<vmem>>, vector<1x448x128xbf16>
    %186 = vector.shape_cast %185 : vector<1x448x128xbf16> to vector<448x128xbf16>
    %cst_227 = arith.constant dense<0.000000e+00> : vector<8x128xf32>
    %187 = tpu.matmul %184, %186, %cst_227 {dimension_numbers = #tpu.dot_dimension_numbers<[1], [0], [0], [1], [0, 0, 1, 1], [], []>} : vector<8x448xbf16>, vector<448x128xbf16>, vector<8x128xf32> -> vector<8x128xf32>
    %188 = arith.addf %183, %187 : vector<8x128xf32>
    %189 = vector.extract_strided_slice %179 {offsets = [16, 0], sizes = [8, 448], strides = [1, 1]} : vector<56x448xbf16> to vector<8x448xbf16>
    %c2_228 = arith.constant 2 : index
    %c0_229 = arith.constant 0 : index
    %c0_230 = arith.constant 0 : index
    %190 = vector.load %arg6[%c2_228, %c0_229, %c0_230] : memref<7x448x128xbf16, #tpu.memory_space<vmem>>, vector<1x448x128xbf16>
    %191 = vector.shape_cast %190 : vector<1x448x128xbf16> to vector<448x128xbf16>
    %cst_231 = arith.constant dense<0.000000e+00> : vector<8x128xf32>
    %192 = tpu.matmul %189, %191, %cst_231 {dimension_numbers = #tpu.dot_dimension_numbers<[1], [0], [0], [1], [0, 0, 1, 1], [], []>} : vector<8x448xbf16>, vector<448x128xbf16>, vector<8x128xf32> -> vector<8x128xf32>
    %193 = arith.addf %188, %192 : vector<8x128xf32>
    %194 = vector.extract_strided_slice %179 {offsets = [24, 0], sizes = [8, 448], strides = [1, 1]} : vector<56x448xbf16> to vector<8x448xbf16>
    %c3_232 = arith.constant 3 : index
    %c0_233 = arith.constant 0 : index
    %c0_234 = arith.constant 0 : index
    %195 = vector.load %arg6[%c3_232, %c0_233, %c0_234] : memref<7x448x128xbf16, #tpu.memory_space<vmem>>, vector<1x448x128xbf16>
    %196 = vector.shape_cast %195 : vector<1x448x128xbf16> to vector<448x128xbf16>
    %cst_235 = arith.constant dense<0.000000e+00> : vector<8x128xf32>
    %197 = tpu.matmul %194, %196, %cst_235 {dimension_numbers = #tpu.dot_dimension_numbers<[1], [0], [0], [1], [0, 0, 1, 1], [], []>} : vector<8x448xbf16>, vector<448x128xbf16>, vector<8x128xf32> -> vector<8x128xf32>
    %198 = arith.addf %193, %197 : vector<8x128xf32>
    %199 = vector.extract_strided_slice %179 {offsets = [32, 0], sizes = [8, 448], strides = [1, 1]} : vector<56x448xbf16> to vector<8x448xbf16>
    %c4_236 = arith.constant 4 : index
    %c0_237 = arith.constant 0 : index
    %c0_238 = arith.constant 0 : index
    %200 = vector.load %arg6[%c4_236, %c0_237, %c0_238] : memref<7x448x128xbf16, #tpu.memory_space<vmem>>, vector<1x448x128xbf16>
    %201 = vector.shape_cast %200 : vector<1x448x128xbf16> to vector<448x128xbf16>
    %cst_239 = arith.constant dense<0.000000e+00> : vector<8x128xf32>
    %202 = tpu.matmul %199, %201, %cst_239 {dimension_numbers = #tpu.dot_dimension_numbers<[1], [0], [0], [1], [0, 0, 1, 1], [], []>} : vector<8x448xbf16>, vector<448x128xbf16>, vector<8x128xf32> -> vector<8x128xf32>
    %203 = arith.addf %198, %202 : vector<8x128xf32>
    %204 = vector.extract_strided_slice %179 {offsets = [40, 0], sizes = [8, 448], strides = [1, 1]} : vector<56x448xbf16> to vector<8x448xbf16>
    %c5_240 = arith.constant 5 : index
    %c0_241 = arith.constant 0 : index
    %c0_242 = arith.constant 0 : index
    %205 = vector.load %arg6[%c5_240, %c0_241, %c0_242] : memref<7x448x128xbf16, #tpu.memory_space<vmem>>, vector<1x448x128xbf16>
    %206 = vector.shape_cast %205 : vector<1x448x128xbf16> to vector<448x128xbf16>
    %cst_243 = arith.constant dense<0.000000e+00> : vector<8x128xf32>
    %207 = tpu.matmul %204, %206, %cst_243 {dimension_numbers = #tpu.dot_dimension_numbers<[1], [0], [0], [1], [0, 0, 1, 1], [], []>} : vector<8x448xbf16>, vector<448x128xbf16>, vector<8x128xf32> -> vector<8x128xf32>
    %208 = arith.addf %203, %207 : vector<8x128xf32>
    %209 = vector.extract_strided_slice %179 {offsets = [48, 0], sizes = [8, 448], strides = [1, 1]} : vector<56x448xbf16> to vector<8x448xbf16>
    %c6 = arith.constant 6 : index
    %c0_244 = arith.constant 0 : index
    %c0_245 = arith.constant 0 : index
    %210 = vector.load %arg6[%c6, %c0_244, %c0_245] : memref<7x448x128xbf16, #tpu.memory_space<vmem>>, vector<1x448x128xbf16>
    %211 = vector.shape_cast %210 : vector<1x448x128xbf16> to vector<448x128xbf16>
    %cst_246 = arith.constant dense<0.000000e+00> : vector<8x128xf32>
    %212 = tpu.matmul %209, %211, %cst_246 {dimension_numbers = #tpu.dot_dimension_numbers<[1], [0], [0], [1], [0, 0, 1, 1], [], []>} : vector<8x448xbf16>, vector<448x128xbf16>, vector<8x128xf32> -> vector<8x128xf32>
    %213 = arith.addf %208, %212 : vector<8x128xf32>
    %c0_247 = arith.constant 0 : index
    %c0_248 = arith.constant 0 : index
    %214 = vector.load %arg7[%c0_247, %c0_248] : memref<1x128xf32, #tpu.memory_space<vmem>>, vector<1x128xf32>
    %215 = vector.broadcast %214 : vector<1x128xf32> to vector<8x128xf32>
    %216 = arith.addf %213, %215 : vector<8x128xf32>
    %cst_249 = arith.constant 0.000000e+00 : f32
    %217 = vector.broadcast %cst_249 : f32 to vector<8x128xf32>
    %218 = arith.maximumf %216, %217 : vector<8x128xf32>
    %219 = arith.truncf %218 : vector<8x128xf32> to vector<8x128xbf16>
    %c0_250 = arith.constant 0 : index
    %c0_251 = arith.constant 0 : index
    %220 = vector.load %arg8[%c0_250, %c0_251] : memref<128x128xbf16, #tpu.memory_space<vmem>>, vector<128x128xbf16>
    %cst_252 = arith.constant dense<0.000000e+00> : vector<8x128xf32>
    %221 = tpu.matmul %219, %220, %cst_252 {dimension_numbers = #tpu.dot_dimension_numbers<[1], [0], [0], [1], [0, 0, 1, 1], [], []>} : vector<8x128xbf16>, vector<128x128xbf16>, vector<8x128xf32> -> vector<8x128xf32>
    %c0_253 = arith.constant 0 : index
    %c0_254 = arith.constant 0 : index
    %222 = vector.load %arg9[%c0_253, %c0_254] : memref<1x128xf32, #tpu.memory_space<vmem>>, vector<1x128xf32>
    %223 = vector.broadcast %222 : vector<1x128xf32> to vector<8x128xf32>
    %224 = arith.addf %221, %223 : vector<8x128xf32>
    %c0_255 = arith.constant 0 : index
    %c0_256 = arith.constant 0 : index
    %225 = vector.load %arg10[%c0_255, %c0_256] : memref<8x128xf32, #tpu.memory_space<vmem>>, vector<8x128xf32>
    tpu.vector_store %arg10[%c0_255, %c0_256], %224 {strides = array<i32>} : memref<8x128xf32, #tpu.memory_space<vmem>>, vector<8x128xf32>,
    return
  }
  func.func @transform_0(%arg0: i32) -> (i32, i32, i32, i32) {
    %c0_i32 = arith.constant 0 : i32
    %c0_i32_0 = arith.constant 0 : i32
    %c0_i32_1 = arith.constant 0 : i32
    %c0_i32_2 = arith.constant 0 : i32
    return %arg0, %c0_i32, %c0_i32_0, %c0_i32_1 : i32, i32, i32, i32
  }
  func.func @transform_1(%arg0: i32) -> (i32, i32, i32, i32) {
    %c0_i32 = arith.constant 0 : i32
    %c0_i32_0 = arith.constant 0 : i32
    %c0_i32_1 = arith.constant 0 : i32
    %c0_i32_2 = arith.constant 0 : i32
    %c0_i32_3 = arith.constant 0 : i32
    return %c0_i32, %c0_i32_0, %c0_i32_1, %c0_i32_2 : i32, i32, i32, i32
  }
  func.func @transform_2(%arg0: i32) -> (i32, i32) {
    %c0_i32 = arith.constant 0 : i32
    %c0_i32_0 = arith.constant 0 : i32
    %c0_i32_1 = arith.constant 0 : i32
    return %c0_i32, %c0_i32_0 : i32, i32
  }
  func.func @transform_3(%arg0: i32) -> (i32, i32, i32, i32) {
    %c0_i32 = arith.constant 0 : i32
    %c0_i32_0 = arith.constant 0 : i32
    %c0_i32_1 = arith.constant 0 : i32
    %c0_i32_2 = arith.constant 0 : i32
    %c0_i32_3 = arith.constant 0 : i32
    return %c0_i32, %c0_i32_0, %c0_i32_1, %c0_i32_2 : i32, i32, i32, i32
  }
  func.func @transform_4(%arg0: i32) -> (i32, i32) {
    %c0_i32 = arith.constant 0 : i32
    %c0_i32_0 = arith.constant 0 : i32
    %c0_i32_1 = arith.constant 0 : i32
    return %c0_i32, %c0_i32_0 : i32, i32
  }
  func.func @transform_5(%arg0: i32) -> (i32, i32, i32) {
    %c0_i32 = arith.constant 0 : i32
    %c0_i32_0 = arith.constant 0 : i32
    %c0_i32_1 = arith.constant 0 : i32
    %c0_i32_2 = arith.constant 0 : i32
    return %c0_i32, %c0_i32_0, %c0_i32_1 : i32, i32, i32
  }
  func.func @transform_6(%arg0: i32) -> (i32, i32) {
    %c0_i32 = arith.constant 0 : i32
    %c0_i32_0 = arith.constant 0 : i32
    %c0_i32_1 = arith.constant 0 : i32
    return %c0_i32, %c0_i32_0 : i32, i32
  }
  func.func @transform_7(%arg0: i32) -> (i32, i32) {
    %c0_i32 = arith.constant 0 : i32
    %c0_i32_0 = arith.constant 0 : i32
    %c0_i32_1 = arith.constant 0 : i32
    return %c0_i32, %c0_i32_0 : i32, i32
  }
  func.func @transform_8(%arg0: i32) -> (i32, i32) {
    %c0_i32 = arith.constant 0 : i32
    %c0_i32_0 = arith.constant 0 : i32
    %c0_i32_1 = arith.constant 0 : i32
    return %c0_i32, %c0_i32_0 : i32, i32
  }
  func.func @transform_9(%arg0: i32) -> (i32, i32) {
    %c0_i32 = arith.constant 0 : i32
    %c0_i32_0 = arith.constant 0 : i32
    return %arg0, %c0_i32 : i32, i32
  }
}

</mosaic_0001>

<bundles_post_ra>
// kernel: cnn_forward.1
= control target key start
LH: loop header
LB: loop body
LE: loop exit
PB: predicated region body
PF: predicated region fallthrough
CT: control target
= control target key end

     0   :  { %v30473_v1 = vmov 0   ;;  %vm166_vm0 = vcmask 1046528   ;;  %vm153_vm1 = vcmask 244736   ;;  %vm4942_vm2 = vcmask 1043456   ;;  %s30463_s1 = inlined_call_operand.vmem [shape: bf16[3,2,30,512], index: 1, kind: input, shape index: {}]   ;;  %s30464_s0 = inlined_call_operand.vmem [shape: bf16[1,6,56,30], index: 0, kind: input, shape index: {}]   ;;  %s30465_s2 = inlined_call_operand.vmem [shape: f32[1,512], index: 2, kind: input, shape index: {}]   ;;  %s30466_s3 = inlined_call_operand.vmem [shape: bf16[3,2,512,448], index: 3, kind: input, shape index: {}]   ;;  %s30467_s5 = inlined_call_operand.vmem [shape: bf16[7,448,128], index: 5, kind: input, shape index: {}]   ;;  %s30468_s4 = inlined_call_operand.vmem [shape: f32[1,448], index: 4, kind: input, shape index: {}]   ;;  %s30469_s7 = inlined_call_operand.vmem [shape: bf16[128,128], index: 7, kind: input, shape index: {}]   ;;  %s30470_s6 = inlined_call_operand.vmem [shape: f32[1,128], index: 6, kind: input, shape index: {}]   ;;  %s30471_s8 = inlined_call_operand.vmem [shape: f32[1,128], index: 8, kind: input, shape index: {}]   ;;  %s30472_s9 = inlined_call_operand.vmem [shape: f32[8,128], index: 9, kind: output, shape index: {}]  }
   0x1   :  { %v22011_v0 = vld [vmem:[%s30463_s1 + $0x84] ss:$16 sps:$4 sm:$0xff]   ;;  %211 = vmatprep.mubr.bf16.mxu0 %v30473_v1  ;;  %2554 = vst [vmem:[#allocation3 + $0x60] sm:$0xf0] %v30473_v1  ;;  %2555 = vst [vmem:[#allocation3 + $0x68] sm:$0xf0] %v30473_v1  ;;  %241 = vmatprep.mubr.bf16.mxu1 %v30473_v1 }
   0x2   :  { %2556 = vst [vmem:[#allocation3 + $0x70] sm:$0xf0] %v30473_v1  ;;  %2557 = vst [vmem:[#allocation3 + $0x78] sm:$0xf0] %v30473_v1  ;;  %v22026_v2 = vld [vmem:[%s30463_s1 + $0x80] ss:$16 sps:$4 sm:$0xff]   ;;  %179 = vmatprep.subr.bf16.mxu0 %v22011_v0  ;;  %18420 = vmatprep.subr.bf16.mxu1 %v22011_v0 }
   0x3   :  { %5003 = vst [vmem:[#allocation2] sm:$0xf] %v30473_v1  ;;  %5004 = vst [vmem:[#allocation2 + $0x8] sm:$0xf] %v30473_v1  ;;  %v15844_v3 = vld [vmem:[%s30463_s1 + $0xa0] sm:$0xff]  ;;  %180 = vmatpush1.bf16.msra.mxu0 %v22026_v2  ;;  %18422 = vmatpush1.bf16.msra.mxu1 %v22026_v2  ;;  %v22157_v26 = vld [vmem:[%s30464_s0 + $0x2c] sm:$0xff]  }
   0x4   :  { %5005 = vst [vmem:[#allocation2 + $0x10] sm:$0xf] %v30473_v1  ;;  %5006 = vst [vmem:[#allocation2 + $0x18] sm:$0xf] %v30473_v1  ;;  %v15846_v4 = vld [vmem:[%s30463_s1 + $0xb0] sm:$0x77] }
   0x5   :  { %v22036_v5 = vcombine.high %v15844_v3, %v15846_v4  ;;  %v15856_v6 = vcombine.low %v15844_v3, %v15846_v4  ;;  %v22050_v8 = vld [vmem:[%s30464_s0 + $0x1c] sm:$0xff]   ;;  %v22055_v9 = vld [vmem:[%s30464_s0 + $0x34] ss:$0 sps:$4 sm:$0xff]   ;;  %v22065_v11 = vld [vmem:[%s30463_s1 + $0x88] ss:$16 sps:$4 sm:$0xff]   ;;  %vm13777_vm3 = vcmask 523264  }
   0x6   :  { %v22060_v10 = vld [vmem:[%s30463_s1 + $0x8c] ss:$16 sps:$4 sm:$0xff]   ;;  %v22070_v12 = vld [vmem:[%s30463_s1] ss:$16 sps:$4 sm:$0xff]   ;;  %v22075_v13 = vld [vmem:[%s30463_s1 + $0x4] ss:$16 sps:$4 sm:$0xff]  }
   0x7   :  { %15860 = vmatprep.subr.msk.bf16.mxu0 %vm166_vm0, %v22036_v5  ;;  %18421 = vmatprep.subr.msk.bf16.mxu1 %vm166_vm0, %v22036_v5  ;;  %v22045_v7 = vsel %vm166_vm0, %v15856_v6, 0  ;;  %v22082_v14 = vld [vmem:[%s30463_s1 + $0xac] ss:$16 sps:$4 sm:$0x7f]   ;;  %v22118_v20 = vld [vmem:[%s30463_s1 + $0x104] ss:$16 sps:$4 sm:$0xff]  }
   0x8   :  { %182 = vmatpush1.bf16.msra.mxu0 %v22045_v7  ;;  %18423 = vmatpush1.bf16.msra.mxu1 %v22045_v7  ;;  %v19592_v15 = vld [vmem:[%s30463_s1 + $0xa8] ss:$16 sps:$4 sm:$0x7f]   ;;  %v22096_v16 = vld [vmem:[%s30463_s1 + $0x24] ss:$16 sps:$4 sm:$0x7f]  }
   0x9   :  { %250 = vmatprep.subr.bf16.mxu1 %v22060_v10  ;;  %399 = vmatprep.subr.bf16.mxu0 %v22075_v13  ;;  %v19596_v17 = vld [vmem:[%s30463_s1 + $0x20] ss:$16 sps:$4 sm:$0x7f]   ;;  %v22106_v18 = vsel %vm166_vm0, %v19592_v15, 0  ;;  %v22123_v21 = vld [vmem:[%s30464_s0 + $0x24] sm:$0xff]   ;;  %v22276_v43 = vld [vmem:[%s30464_s0 + $0x38] sm:$0xff]  }
   0xa   :  { %v22110_v19 = vsel %vm166_vm0, %v19596_v17, 0  ;;  %v22130_v22 = vld [vmem:[%s30463_s1 + $0x8] ss:$16 sps:$4 sm:$0xff]   ;;  %v22136_v23 = vld [vmem:[%s30463_s1 + $0xc] ss:$16 sps:$4 sm:$0xff]   ;;  %v22180_v29 = vld [vmem:[%s30464_s0] sm:$0xff]  }
   0xb   :  { %15861 = vmatmul.mubr.msk.bf16.vlgmr.msra.gmra.mrb[0].mxu0 %vm153_vm1, %v22050_v8  ;;  %15864 = vmatmul.mubr.msk.bf16.vlgmr.msra.gmra.mrb[0].mxu1 %vm153_vm1, %v22055_v9  ;;  %v22141_v24 = vld [vmem:[%s30463_s1 + $0x2c] ss:$16 sps:$4 sm:$0x7f]   ;;  %v19608_v25 = vld [vmem:[%s30463_s1 + $0x28] ss:$16 sps:$4 sm:$0x7f]  }
   0xc   :  { %251 = vmatpush1.bf16.msra.mxu1 %v22065_v11  ;;  %400 = vmatpush1.bf16.msra.mxu0 %v22070_v12  ;;  %v22162_v27 = vsel %vm166_vm0, %v19608_v25, 0  ;;  %v22168_v28 = vld [vmem:[%s30463_s1 + $0x10c] ss:$16 sps:$4 sm:$0xff]   ;;  %v22185_v30 = vld [vmem:[%s30463_s1 + $0x100] ss:$16 sps:$4 sm:$0xff]   ;;  %vm21957_vm4 = vmmov 0  }
   0xd   :  { %15865 = vmatprep.subr.msk.bf16.mxu1 %vm166_vm0, %v22082_v14  ;;  %221 = vmatprep.mubr.bf16.mxu0 %v30473_v1  ;;  %v22190_v31 = vld [vmem:[%s30463_s1 + $0x124] ss:$16 sps:$4 sm:$0x7f]   ;;  %v19612_v32 = vld [vmem:[%s30463_s1 + $0x120] ss:$16 sps:$4 sm:$0x7f]  }
   0xe   :  { %282 = vmatprep.mubr.bf16.mxu1 %v30473_v1  ;;  %15882 = vmatprep.subr.msk.bf16.mxu0 %vm166_vm0, %v22096_v16  ;;  %v22205_v33 = vsel %vm166_vm0, %v19612_v32, 0  ;;  %v22210_v34 = vld [vmem:[%s30463_s1 + $0xc4] ss:$16 sps:$4 sm:$0xff]   ;;  %v22215_v35 = vld [vmem:[%s30464_s0 + $0x8] sm:$0xff]   ;;  %v22257_v41 = vld [vmem:[%s30464_s0 + $0x18] ss:$0 sps:$4 sm:$0xff]  }
   0xf   :  { %v22228_v36 = vld [vmem:[%s30464_s0 + $0x10] sm:$0xff]   ;;  %v22233_v37 = vld [vmem:[%s30463_s1 + $0x108] ss:$16 sps:$4 sm:$0xff]   ;;  %v22238_v38 = vld [vmem:[%s30463_s1 + $0x12c] ss:$16 sps:$4 sm:$0x7f]  }
  0x10   :  { %253 = vmatpush1.bf16.msra.mxu1 %v22106_v18  ;;  %402 = vmatpush1.bf16.msra.mxu0 %v22110_v19  ;;  %v19624_v39 = vld [vmem:[%s30463_s1 + $0x128] ss:$16 sps:$4 sm:$0x7f]   ;;  %v22252_v40 = vld [vmem:[%s30463_s1 + $0xcc] ss:$16 sps:$4 sm:$0xff]   ;;  %v22311_v49 = vld [vmem:[%s30464_s0 + $0x40] sm:$0xff]  }
  0x11   :  { %628 = vmatprep.subr.bf16.mxu0 %v22118_v20  ;;  %470 = vmatprep.subr.bf16.mxu1 %v22136_v23  ;;  %v22263_v42 = vsel %vm166_vm0, %v19624_v39, 0  ;;  %v22281_v44 = vld [vmem:[%s30463_s1 + $0xc0] ss:$16 sps:$4 sm:$0xff]   ;;  %v22286_v45 = vld [vmem:[%s30463_s1 + $0xe4] ss:$16 sps:$4 sm:$0x7f]  }
  0x12   :  { %v19628_v46 = vld [vmem:[%s30463_s1 + $0xe0] ss:$16 sps:$4 sm:$0x7f]   ;;  %v22306_v48 = vld [vmem:[%s30463_s1 + $0x44] ss:$16 sps:$4 sm:$0xff]   ;;  %v22324_v50 = vld [vmem:[%s30464_s0 + $0x48] sm:$0xff]  }
  0x13   :  { %15862 = vmatmul.mubr.msk.bf16.gmra.mrb[4].mxu0 %vm153_vm1, %v22123_v21  ;;  %15866 = vmatmul.mubr.msk.bf16.vlgmr.msra.gmra.mrb[4].mxu1 %vm153_vm1, %v22050_v8  ;;  %v22301_v47 = vsel %vm166_vm0, %v19628_v46, 0  ;;  %v22329_v51 = vld [vmem:[%s30463_s1 + $0xc8] ss:$16 sps:$4 sm:$0xff]   ;;  %v22334_v52 = vld [vmem:[%s30463_s1 + $0xec] ss:$16 sps:$4 sm:$0x7f]  }
  0x14   :  { %231 = vmatprep.mubr.bf16.mxu0 %v30473_v1  ;;  %292 = vmatprep.mubr.bf16.mxu1 %v30473_v1  ;;  %v19638_v53 = vld [vmem:[%s30463_s1 + $0xe8] ss:$16 sps:$4 sm:$0x7f]   ;;  %v22354_v55 = vld [vmem:[%s30463_s1 + $0x4c] ss:$16 sps:$4 sm:$0xff]  }
  0x15   :  { %471 = vmatpush1.bf16.msra.mxu1 %v22130_v22  ;;  %v22349_v54 = vsel %vm166_vm0, %v19638_v53, 0  ;;  %v22359_v56 = vld [vmem:[%s30464_s0 + $0x50] ss:$0 sps:$4 sm:$0xff]   ;;  %v22377_v58 = vld [vmem:[%s30463_s1 + $0x64] ss:$16 sps:$4 sm:$0x7f]  }
  0x16   :  { %15887 = vmatprep.subr.msk.bf16.mxu1 %vm166_vm0, %v22141_v24  ;;  %v22372_v57 = vld [vmem:[%s30463_s1 + $0x40] ss:$16 sps:$4 sm:$0xff]   ;;  %v22397_v61 = vld [vmem:[%s30463_s1 + $0x144] ss:$16 sps:$4 sm:$0xff]   ;;  %v22410_v62 = vld [vmem:[%s30463_s1 + $0x48] ss:$16 sps:$4 sm:$0xff]  }
  0x17   :  { %v19641_v59 = vld [vmem:[%s30463_s1 + $0x60] ss:$16 sps:$4 sm:$0x7f]   ;;  %v22415_v63 = vld [vmem:[%s30463_s1 + $0x6c] ss:$16 sps:$4 sm:$0x7f]  }
  0x18   :  { %v22392_v60 = vsel %vm166_vm0, %v19641_v59, 0  ;;  %v19650_v3 = vld [vmem:[%s30463_s1 + $0x68] ss:$16 sps:$4 sm:$0x7f]   ;;  %v22435_v6 = vld [vmem:[%s30463_s1 + $0x14c] ss:$16 sps:$4 sm:$0xff]  }
  0x19   :  { %473 = vmatpush1.bf16.msra.mxu1 %v22162_v27  ;;  %v22430_v4 = vsel %vm166_vm0, %v19650_v3, 0  ;;  %v22448_v15 = vld [vmem:[%s30463_s1 + $0x140] ss:$16 sps:$4 sm:$0xff]   ;;  %v22453_v17 = vld [vmem:[%s30463_s1 + $0x164] ss:$16 sps:$4 sm:$0x7f]  }
  0x1a   :  { %699 = vmatprep.subr.bf16.mxu1 %v22168_v28  ;;  %v19653_v25 = vld [vmem:[%s30463_s1 + $0x160] ss:$16 sps:$4 sm:$0x7f]   ;;  %v22481_v39 = vld [vmem:[%s30463_s1 + $0x148] ss:$16 sps:$4 sm:$0xff]  }
  0x1b   :  { %15863 = vmatmul.mubr.msk.bf16.gmra.mrb[8].mxu0 %vm153_vm1, %v22157_v26  ;;  %15867 = vmatmul.mubr.msk.bf16.gmra.mrb[8].mxu1 %vm153_vm1, %v22123_v21  ;;  %v22468_v32 = vsel %vm166_vm0, %v19653_v25, 0  ;;  %v22486_v46 = vld [vmem:[%s30463_s1 + $0x16c] ss:$16 sps:$4 sm:$0x7f]   ;;  %v22776_v3 = vld [vmem:[%s30463_s1 + $0x84] ss:$16 sps:$4 sm:$0xff]  }
  0x1c   :  { %302 = vmatprep.mubr.bf16.mxu1 %v30473_v1  ;;  %431 = vmatprep.mubr.bf16.mxu0 %v30473_v1  ;;  %30580 = vst [vmem:[#allocation9_spill] sm:$0xff] %v22776_v3 }
  0x23   :  { %15868 = vmatmul.mubr.msk.bf16.gmra.mrb[12].mxu1 %vm153_vm1, %v22157_v26  ;;  %15883 = vmatmul.mubr.msk.bf16.vlgmr.msra.gmra.mrb[0].mxu0 %vm153_vm1, %v22180_v29 }
  0x24   :  { %629 = vmatpush1.bf16.msra.mxu0 %v22185_v30  ;;  %312 = vmatprep.mubr.bf16.mxu1 %v30473_v1 }
  0x25   :  { %441 = vmatprep.mubr.bf16.mxu0 %v30473_v1  ;;  %15912 = vmatprep.subr.msk.bf16.mxu0 %vm166_vm0, %v22190_v31 }
  0x28   :  { %631 = vmatpush1.bf16.msra.mxu0 %v22205_v33 }
  0x29   :  { %864 = vmatprep.subr.bf16.mxu0 %v22210_v34 }
  0x2b   :  { %15869 = vmatmul.mubr.msk.bf16.gmra.mrb[16].mxu1 %vm153_vm1, %v22055_v9  ;;  %15884 = vmatmul.mubr.msk.bf16.gmra.mrb[4].mxu0 %vm153_vm1, %v22215_v35 }
  0x2c   :  { %451 = vmatprep.mubr.bf16.mxu0 %v30473_v1  ;;  %502 = vmatprep.mubr.bf16.mxu1 %v30473_v1 }
  0x33   :  { %15885 = vmatmul.mubr.msk.bf16.gmra.mrb[8].mxu0 %vm153_vm1, %v22228_v36  ;;  %15888 = vmatmul.mubr.msk.bf16.vlgmr.msra.gmra.mrb[4].mxu1 %vm153_vm1, %v22180_v29 }
  0x34   :  { %461 = vmatprep.mubr.bf16.mxu0 %v30473_v1  ;;  %512 = vmatprep.mubr.bf16.mxu1 %v30473_v1 }
  0x35   :  { %700 = vmatpush1.bf16.msra.mxu1 %v22233_v37 }
  0x36   :  { %15917 = vmatprep.subr.msk.bf16.mxu1 %vm166_vm0, %v22238_v38 }
  0x39   :  { %702 = vmatpush1.bf16.msra.mxu1 %v22263_v42 }
  0x3a   :  { %935 = vmatprep.subr.bf16.mxu1 %v22252_v40 }
  0x3b   :  { %15886 = vmatmul.mubr.msk.bf16.gmra.mrb[12].mxu0 %vm153_vm1, %v22257_v41  ;;  %15889 = vmatmul.mubr.msk.bf16.gmra.mrb[8].mxu1 %vm153_vm1, %v22215_v35 }
  0x3c   :  { %522 = vmatprep.mubr.bf16.mxu1 %v30473_v1  ;;  %660 = vmatprep.mubr.bf16.mxu0 %v30473_v1 }
  0x43   :  { %15890 = vmatmul.mubr.msk.bf16.gmra.mrb[12].mxu1 %vm153_vm1, %v22228_v36  ;;  %15913 = vmatmul.mubr.msk.bf16.vlgmr.msra.gmra.mrb[0].mxu0 %vm153_vm1, %v22276_v43 }
  0x44   :  { %865 = vmatpush1.bf16.msra.mxu0 %v22281_v44  ;;  %532 = vmatprep.mubr.bf16.mxu1 %v30473_v1 }
  0x45   :  { %670 = vmatprep.mubr.bf16.mxu0 %v30473_v1  ;;  %15946 = vmatprep.subr.msk.bf16.mxu0 %vm166_vm0, %v22286_v45 }
  0x48   :  { %867 = vmatpush1.bf16.msra.mxu0 %v22301_v47 }
  0x49   :  { %1054 = vmatprep.subr.bf16.mxu0 %v22306_v48 }
  0x4b   :  { %15891 = vmatmul.mubr.msk.bf16.gmra.mrb[16].mxu1 %vm153_vm1, %v22257_v41  ;;  %15914 = vmatmul.mubr.msk.bf16.gmra.mrb[4].mxu0 %vm153_vm1, %v22311_v49 }
  0x4c   :  { %680 = vmatprep.mubr.bf16.mxu0 %v30473_v1  ;;  %731 = vmatprep.mubr.bf16.mxu1 %v30473_v1 }
  0x53   :  { %15915 = vmatmul.mubr.msk.bf16.gmra.mrb[8].mxu0 %vm153_vm1, %v22324_v50  ;;  %15918 = vmatmul.mubr.msk.bf16.vlgmr.msra.gmra.mrb[4].mxu1 %vm153_vm1, %v22276_v43 }
  0x54   :  { %690 = vmatprep.mubr.bf16.mxu0 %v30473_v1  ;;  %741 = vmatprep.mubr.bf16.mxu1 %v30473_v1 }
  0x55   :  { %936 = vmatpush1.bf16.msra.mxu1 %v22329_v51 }
  0x56   :  { %15951 = vmatprep.subr.msk.bf16.mxu1 %vm166_vm0, %v22334_v52 }
  0x59   :  { %938 = vmatpush1.bf16.msra.mxu1 %v22349_v54 }
  0x5a   :  { %1125 = vmatprep.subr.bf16.mxu1 %v22354_v55 }
  0x5b   :  { %15916 = vmatmul.mubr.msk.bf16.gmra.mrb[12].mxu0 %vm153_vm1, %v22359_v56  ;;  %15919 = vmatmul.mubr.msk.bf16.gmra.mrb[8].mxu1 %vm153_vm1, %v22311_v49 }
  0x5c   :  { %751 = vmatprep.mubr.bf16.mxu1 %v30473_v1  ;;  %896 = vmatprep.mubr.bf16.mxu0 %v30473_v1 }
  0x63   :  { %15920 = vmatmul.mubr.msk.bf16.gmra.mrb[12].mxu1 %vm153_vm1, %v22324_v50  ;;  %15947 = vmatmul.mubr.msk.bf16.vlgmr.msra.gmra.mrb[16].mxu0 %vm153_vm1, %v22050_v8 }
  0x64   :  { %1055 = vmatpush1.bf16.msra.mxu0 %v22372_v57  ;;  %761 = vmatprep.mubr.bf16.mxu1 %v30473_v1 }
  0x65   :  { %906 = vmatprep.mubr.bf16.mxu0 %v30473_v1  ;;  %15964 = vmatprep.subr.msk.bf16.mxu0 %vm166_vm0, %v22377_v58 }
  0x68   :  { %1057 = vmatpush1.bf16.msra.mxu0 %v22392_v60 }
  0x69   :  { %1253 = vmatprep.subr.bf16.mxu0 %v22397_v61 }
  0x6b   :  { %15921 = vmatmul.mubr.msk.bf16.gmra.mrb[16].mxu1 %vm153_vm1, %v22359_v56  ;;  %15948 = vmatmul.mubr.msk.bf16.gmra.mrb[20].mxu0 %vm153_vm1, %v22123_v21 }
  0x6c   :  { %916 = vmatprep.mubr.bf16.mxu0 %v30473_v1  ;;  %967 = vmatprep.mubr.bf16.mxu1 %v30473_v1 }
  0x73   :  { %15949 = vmatmul.mubr.msk.bf16.gmra.mrb[24].mxu0 %vm153_vm1, %v22157_v26  ;;  %15952 = vmatmul.mubr.msk.bf16.vlgmr.msra.gmra.mrb[20].mxu1 %vm153_vm1, %v22050_v8 }
  0x74   :  { %926 = vmatprep.mubr.bf16.mxu0 %v30473_v1  ;;  %977 = vmatprep.mubr.bf16.mxu1 %v30473_v1 }
  0x75   :  { %1126 = vmatpush1.bf16.msra.mxu1 %v22410_v62 }
  0x76   :  { %15969 = vmatprep.subr.msk.bf16.mxu1 %vm166_vm0, %v22415_v63 }
  0x79   :  { %1128 = vmatpush1.bf16.msra.mxu1 %v22430_v4 }
  0x7a   :  { %1324 = vmatprep.subr.bf16.mxu1 %v22435_v6 }
  0x7b   :  { %15950 = vmatmul.mubr.msk.bf16.gmra.mrb[28].mxu0 %vm153_vm1, %v22055_v9  ;;  %15953 = vmatmul.mubr.msk.bf16.gmra.mrb[24].mxu1 %vm153_vm1, %v22123_v21 }
  0x7c   :  { %987 = vmatprep.mubr.bf16.mxu1 %v30473_v1  ;;  %1086 = vmatprep.mubr.bf16.mxu0 %v30473_v1 }
  0x83   :  { %15954 = vmatmul.mubr.msk.bf16.gmra.mrb[28].mxu1 %vm153_vm1, %v22157_v26  ;;  %15965 = vmatmul.mubr.msk.bf16.vlgmr.msra.gmra.mrb[16].mxu0 %vm153_vm1, %v22180_v29 }
  0x84   :  { %1254 = vmatpush1.bf16.msra.mxu0 %v22448_v15  ;;  %997 = vmatprep.mubr.bf16.mxu1 %v30473_v1 }
  0x85   :  { %1096 = vmatprep.mubr.bf16.mxu0 %v30473_v1  ;;  %15990 = vmatprep.subr.msk.bf16.mxu0 %vm166_vm0, %v22453_v17 }
  0x88   :  { %1256 = vmatpush1.bf16.msra.mxu0 %v22468_v32 }
  0x89   :  { %1451 = vmatprep.subr.bf16.mxu0 %v22011_v0  ;;  %v19659_v0 = vld [vmem:[%s30463_s1 + $0x168] ss:$16 sps:$4 sm:$0x7f]  }
  0x8a   :  { %v22501_v53 = vsel %vm166_vm0, %v19659_v0, 0 }
  0x8b   :  { %15955 = vmatmul.mubr.msk.bf16.gmra.mrb[32].mxu1 %vm153_vm1, %v22055_v9  ;;  %15966 = vmatmul.mubr.msk.bf16.gmra.mrb[20].mxu0 %vm153_vm1, %v22215_v35 }
  0x8c   :  { %1106 = vmatprep.mubr.bf16.mxu0 %v30473_v1  ;;  %1157 = vmatprep.mubr.bf16.mxu1 %v30473_v1 }
  0x93   :  { %15967 = vmatmul.mubr.msk.bf16.gmra.mrb[24].mxu0 %vm153_vm1, %v22228_v36  ;;  %15970 = vmatmul.mubr.msk.bf16.vlgmr.msra.gmra.mrb[20].mxu1 %vm153_vm1, %v22180_v29 }
  0x94   :  { %1116 = vmatprep.mubr.bf16.mxu0 %v30473_v1  ;;  %1167 = vmatprep.mubr.bf16.mxu1 %v30473_v1 }
  0x95   :  { %1325 = vmatpush1.bf16.msra.mxu1 %v22481_v39 }
  0x96   :  { %15995 = vmatprep.subr.msk.bf16.mxu1 %vm166_vm0, %v22486_v46 }
  0x99   :  { %1327 = vmatpush1.bf16.msra.mxu1 %v22501_v53 }
  0x9a   :  { %1522 = vmatprep.subr.bf16.mxu1 %v22060_v10 }
  0x9b   :  { %15968 = vmatmul.mubr.msk.bf16.gmra.mrb[28].mxu0 %vm153_vm1, %v22257_v41  ;;  %15971 = vmatmul.mubr.msk.bf16.gmra.mrb[24].mxu1 %vm153_vm1, %v22215_v35 }
  0x9c   :  { %1177 = vmatprep.mubr.bf16.mxu1 %v30473_v1  ;;  %1285 = vmatprep.mubr.bf16.mxu0 %v30473_v1 }
  0xa3   :  { %15972 = vmatmul.mubr.msk.bf16.gmra.mrb[28].mxu1 %vm153_vm1, %v22228_v36  ;;  %15991 = vmatmul.mubr.msk.bf16.vlgmr.msra.gmra.mrb[16].mxu0 %vm153_vm1, %v22276_v43 }
  0xa4   :  { %1452 = vmatpush1.bf16.msra.mxu0 %v22026_v2  ;;  %1187 = vmatprep.mubr.bf16.mxu1 %v30473_v1 }
  0xa5   :  { %1295 = vmatprep.mubr.bf16.mxu0 %v30473_v1  ;;  %16000 = vmatprep.subr.msk.bf16.mxu0 %vm166_vm0, %v22036_v5 }
  0xa8   :  { %1454 = vmatpush1.bf16.msra.mxu0 %v22045_v7 }
  0xa9   :  { %1593 = vmatprep.subr.bf16.mxu0 %v22075_v13 }
  0xab   :  { %15973 = vmatmul.mubr.msk.bf16.gmra.mrb[32].mxu1 %vm153_vm1, %v22257_v41  ;;  %15992 = vmatmul.mubr.msk.bf16.gmra.mrb[20].mxu0 %vm153_vm1, %v22311_v49 }
  0xac   :  { %1305 = vmatprep.mubr.bf16.mxu0 %v30473_v1  ;;  %1356 = vmatprep.mubr.bf16.mxu1 %v30473_v1 }
  0xb3   :  { %15993 = vmatmul.mubr.msk.bf16.gmra.mrb[24].mxu0 %vm153_vm1, %v22324_v50  ;;  %15996 = vmatmul.mubr.msk.bf16.vlgmr.msra.gmra.mrb[20].mxu1 %vm153_vm1, %v22276_v43 }
  0xb4   :  { %1315 = vmatprep.mubr.bf16.mxu0 %v30473_v1  ;;  %1366 = vmatprep.mubr.bf16.mxu1 %v30473_v1 }
  0xb5   :  { %1523 = vmatpush1.bf16.msra.mxu1 %v22065_v11 }
  0xb6   :  { %16005 = vmatprep.subr.msk.bf16.mxu1 %vm166_vm0, %v22082_v14  ;;  %v22634_v14 = vld [vmem:[%s30464_s0 + $0x5c] sm:$0xff]  }
  0xb9   :  { %1525 = vmatpush1.bf16.msra.mxu1 %v22106_v18 }
  0xba   :  { %1664 = vmatprep.subr.bf16.mxu1 %v22136_v23 }
  0xbb   :  { %15994 = vmatmul.mubr.msk.bf16.gmra.mrb[28].mxu0 %vm153_vm1, %v22359_v56  ;;  %15997 = vmatmul.mubr.msk.bf16.gmra.mrb[24].mxu1 %vm153_vm1, %v22311_v49 }
  0xbc   :  { %1376 = vmatprep.mubr.bf16.mxu1 %v30473_v1  ;;  %1483 = vmatprep.mubr.bf16.mxu0 %v30473_v1 }
  0xc3   :  { %15998 = vmatmul.mubr.msk.bf16.gmra.mrb[28].mxu1 %vm153_vm1, %v22324_v50  ;;  %16001 = vmatmul.mubr.msk.bf16.vlgmr.msra.gmra.mrb[32].mxu0 %vm153_vm1, %v22276_v43 }
  0xc4   :  { %1594 = vmatpush1.bf16.msra.mxu0 %v22070_v12  ;;  %1386 = vmatprep.mubr.bf16.mxu1 %v30473_v1  ;;  %v22620_v12 = vld [vmem:[%s30464_s0 + $0x54] sm:$0xff]  }
  0xc5   :  { %1493 = vmatprep.mubr.bf16.mxu0 %v30473_v1  ;;  %16010 = vmatprep.subr.msk.bf16.mxu0 %vm166_vm0, %v22096_v16  ;;  %v22647_v16 = vld [vmem:[%s30464_s0 + $0x64] sm:$0xff]  }
  0xc8   :  { %1596 = vmatpush1.bf16.msra.mxu0 %v22110_v19 }
  0xc9   :  { %1765 = vmatprep.subr.bf16.mxu0 %v22118_v20  ;;  %v22665_v20 = vld [vmem:[%s30464_s0 + $0x6c] ss:$0 sps:$4 sm:$0xff]  }
  0xcb   :  { %15999 = vmatmul.mubr.msk.bf16.gmra.mrb[32].mxu1 %vm153_vm1, %v22359_v56  ;;  %16002 = vmatmul.mubr.msk.bf16.gmra.mrb[36].mxu0 %vm153_vm1, %v22311_v49 }
  0xcc   :  { %1503 = vmatprep.mubr.bf16.mxu0 %v30473_v1  ;;  %1554 = vmatprep.mubr.bf16.mxu1 %v30473_v1 }
  0xd3   :  { %16003 = vmatmul.mubr.msk.bf16.gmra.mrb[40].mxu0 %vm153_vm1, %v22324_v50  ;;  %16006 = vmatmul.mubr.msk.bf16.vlgmr.msra.gmra.mrb[36].mxu1 %vm153_vm1, %v22276_v43 }
  0xd4   :  { %1513 = vmatprep.mubr.bf16.mxu0 %v30473_v1  ;;  %1564 = vmatprep.mubr.bf16.mxu1 %v30473_v1 }
  0xd5   :  { %1665 = vmatpush1.bf16.msra.mxu1 %v22130_v22 }
  0xd6   :  { %16015 = vmatprep.subr.msk.bf16.mxu1 %vm166_vm0, %v22141_v24 }
  0xd9   :  { %1667 = vmatpush1.bf16.msra.mxu1 %v22162_v27 }
  0xda   :  { %1836 = vmatprep.subr.bf16.mxu1 %v22168_v28 }
  0xdb   :  { %16004 = vmatmul.mubr.msk.bf16.gmra.mrb[44].mxu0 %vm153_vm1, %v22359_v56  ;;  %16007 = vmatmul.mubr.msk.bf16.gmra.mrb[40].mxu1 %vm153_vm1, %v22311_v49 }
  0xdc   :  { %1574 = vmatprep.mubr.bf16.mxu1 %v30473_v1  ;;  %1625 = vmatprep.mubr.bf16.mxu0 %v30473_v1 }
  0xde   :  { %v22579_v2 = vpop.f32.mrb[0].mxu1 }
  0xdf   :  { %v22581_v5 = vpop.f32.mrb[1].mxu1 }
  0xe0   :  { %v247_v7 = vpop.f32.mrb[2].mxu1 }
  0xe1   :  { %v248_v11 = vpop.f32.mrb[3].mxu1  ;;  %v30592_v7 = vmov 0  }
  0xe3   :  { %16008 = vmatmul.mubr.msk.bf16.gmra.mrb[44].mxu1 %vm153_vm1, %v22324_v50  ;;  %16011 = vmatmul.mubr.msk.bf16.vlgmr.msra.gmra.mrb[32].mxu0 %vm153_vm1, %v22050_v8 }
  0xe4   :  { %1766 = vmatpush1.bf16.msra.mxu0 %v22185_v30  ;;  %1584 = vmatprep.mubr.bf16.mxu1 %v30473_v1 }
  0xe5   :  { %1635 = vmatprep.mubr.bf16.mxu0 %v30473_v1  ;;  %16024 = vmatprep.subr.msk.bf16.mxu0 %vm166_vm0, %v22190_v31 }
  0xe8   :  { %1768 = vmatpush1.bf16.msra.mxu0 %v22205_v33 }
  0xe9   :  { %1963 = vmatprep.subr.bf16.mxu0 %v22210_v34 }
  0xeb   :  { %16009 = vmatmul.mubr.msk.bf16.gmra.mrb[48].mxu1 %vm153_vm1, %v22359_v56  ;;  %16012 = vmatmul.mubr.msk.bf16.gmra.mrb[36].mxu0 %vm153_vm1, %v22123_v21 }
  0xec   :  { %1645 = vmatprep.mubr.bf16.mxu0 %v30473_v1  ;;  %1696 = vmatprep.mubr.bf16.mxu1 %v30473_v1 }
  0xf3   :  { %16013 = vmatmul.mubr.msk.bf16.gmra.mrb[40].mxu0 %vm153_vm1, %v22157_v26  ;;  %16016 = vmatmul.mubr.msk.bf16.vlgmr.msra.gmra.mrb[36].mxu1 %vm153_vm1, %v22050_v8 }
  0xf4   :  { %1655 = vmatprep.mubr.bf16.mxu0 %v30473_v1  ;;  %1706 = vmatprep.mubr.bf16.mxu1 %v30473_v1 }
  0xf5   :  { %1837 = vmatpush1.bf16.msra.mxu1 %v22233_v37 }
  0xf6   :  { %16029 = vmatprep.subr.msk.bf16.mxu1 %vm166_vm0, %v22238_v38 }
  0xf9   :  { %1839 = vmatpush1.bf16.msra.mxu1 %v22263_v42 }
  0xfa   :  { %2034 = vmatprep.subr.bf16.mxu1 %v22252_v40 }
  0xfb   :  { %16014 = vmatmul.mubr.msk.bf16.gmra.mrb[44].mxu0 %vm153_vm1, %v22055_v9  ;;  %16017 = vmatmul.mubr.msk.bf16.gmra.mrb[40].mxu1 %vm153_vm1, %v22123_v21 }
  0xfc   :  { %1716 = vmatprep.mubr.bf16.mxu1 %v30473_v1  ;;  %1797 = vmatprep.mubr.bf16.mxu0 %v30473_v1 }
 0x103   :  { %16018 = vmatmul.mubr.msk.bf16.gmra.mrb[44].mxu1 %vm153_vm1, %v22157_v26  ;;  %16025 = vmatmul.mubr.msk.bf16.vlgmr.msra.gmra.mrb[32].mxu0 %vm153_vm1, %v22620_v12 }
 0x104   :  { %1964 = vmatpush1.bf16.msra.mxu0 %v22281_v44  ;;  %1726 = vmatprep.mubr.bf16.mxu1 %v30473_v1 }
 0x105   :  { %1807 = vmatprep.mubr.bf16.mxu0 %v30473_v1  ;;  %16034 = vmatprep.subr.msk.bf16.mxu0 %vm166_vm0, %v22286_v45 }
 0x108   :  { %1966 = vmatpush1.bf16.msra.mxu0 %v22301_v47 }
 0x109   :  { %2105 = vmatprep.subr.bf16.mxu0 %v22306_v48 }
 0x10b   :  { %16019 = vmatmul.mubr.msk.bf16.gmra.mrb[48].mxu1 %vm153_vm1, %v22055_v9  ;;  %16026 = vmatmul.mubr.msk.bf16.gmra.mrb[36].mxu0 %vm153_vm1, %v22634_v14 }
 0x10c   :  { %1817 = vmatprep.mubr.bf16.mxu0 %v30473_v1  ;;  %1868 = vmatprep.mubr.bf16.mxu1 %v30473_v1 }
 0x113   :  { %16027 = vmatmul.mubr.msk.bf16.gmra.mrb[40].mxu0 %vm153_vm1, %v22647_v16  ;;  %16030 = vmatmul.mubr.msk.bf16.vlgmr.msra.gmra.mrb[36].mxu1 %vm153_vm1, %v22620_v12 }
 0x114   :  { %1827 = vmatprep.mubr.bf16.mxu0 %v30473_v1  ;;  %1878 = vmatprep.mubr.bf16.mxu1 %v30473_v1 }
 0x115   :  { %2035 = vmatpush1.bf16.msra.mxu1 %v22329_v51 }
 0x116   :  { %v22656_v18 = vpop.f32.mrb[0].mxu0  ;;  %16039 = vmatprep.subr.msk.bf16.mxu1 %vm166_vm0, %v22334_v52 }
 0x117   :  { %v22660_v19 = vpop.f32.mrb[1].mxu0 }
 0x118   :  { %v22667_v22 = vpop.f32.mrb[2].mxu0 }
 0x119   :  { %v22669_v23 = vpop.f32.mrb[3].mxu0  ;;  %2037 = vmatpush1.bf16.msra.mxu1 %v22349_v54 }
 0x11a   :  { %2176 = vmatprep.subr.bf16.mxu1 %v22354_v55 }
 0x11b   :  { %16028 = vmatmul.mubr.msk.bf16.gmra.mrb[44].mxu0 %vm153_vm1, %v22665_v20  ;;  %16031 = vmatmul.mubr.msk.bf16.gmra.mrb[40].mxu1 %vm153_vm1, %v22634_v14 }
 0x11c   :  { %1888 = vmatprep.mubr.bf16.mxu1 %v30473_v1  ;;  %1995 = vmatprep.mubr.bf16.mxu0 %v30473_v1 }
 0x11e   :  { %v22679_v24 = vpop.f32.mrb[4].mxu0 }
 0x11f   :  { %v22681_v27 = vpop.f32.mrb[5].mxu0 }
 0x120   :  { %v22683_v28 = vpop.f32.mrb[6].mxu0 }
 0x121   :  { %v22685_v29 = vpop.f32.mrb[7].mxu0 }
 0x123   :  { %16032 = vmatmul.mubr.msk.bf16.gmra.mrb[44].mxu1 %vm153_vm1, %v22647_v16  ;;  %16035 = vmatmul.mubr.msk.bf16.vlgmr.msra.gmra.mrb[48].mxu0 %vm153_vm1, %v22276_v43 }
 0x124   :  { %2106 = vmatpush1.bf16.msra.mxu0 %v22372_v57  ;;  %1898 = vmatprep.mubr.bf16.mxu1 %v30473_v1 }
 0x125   :  { %2005 = vmatprep.mubr.bf16.mxu0 %v30473_v1  ;;  %16044 = vmatprep.subr.msk.bf16.mxu0 %vm166_vm0, %v22377_v58 }
 0x126   :  { %v22696_v30 = vpop.f32.mrb[8].mxu0  ;;  %v22698_v31 = vpop.f32.mrb[4].mxu1 }
 0x127   :  { %v22700_v33 = vpop.f32.mrb[9].mxu0  ;;  %v22702_v34 = vpop.f32.mrb[5].mxu1 }
 0x128   :  { %v22704_v35 = vpop.f32.mrb[10].mxu0  ;;  %v22706_v36 = vpop.f32.mrb[6].mxu1  ;;  %2108 = vmatpush1.bf16.msra.mxu0 %v22392_v60 }
 0x129   :  { %v22709_v37 = vpop.f32.mrb[11].mxu0  ;;  %v22711_v38 = vpop.f32.mrb[7].mxu1  ;;  %2247 = vmatprep.subr.bf16.mxu0 %v22397_v61 }
 0x12b   :  { %16033 = vmatmul.mubr.msk.bf16.gmra.mrb[48].mxu1 %vm153_vm1, %v22665_v20  ;;  %16036 = vmatmul.mubr.msk.bf16.gmra.mrb[52].mxu0 %vm153_vm1, %v22311_v49 }
 0x12c   :  { %2015 = vmatprep.mubr.bf16.mxu0 %v30473_v1  ;;  %2066 = vmatprep.mubr.bf16.mxu1 %v30473_v1 }
 0x12e   :  { %v692_v40 = vpop.f32.mrb[12].mxu0  ;;  %v22720_v41 = vpop.f32.mrb[8].mxu1 }
 0x12f   :  { %v22723_v42 = vadd.f32 %v692_v40, %v22579_v2  ;;  %v694_v44 = vpop.f32.mrb[13].mxu0  ;;  %v22725_v45 = vpop.f32.mrb[9].mxu1 }
 0x130   :  { %v22728_v47 = vadd.f32 %v694_v44, %v22581_v5  ;;  %v696_v48 = vpop.f32.mrb[14].mxu0  ;;  %v22730_v51 = vpop.f32.mrb[10].mxu1 }
 0x131   :  { %30575 = vst [vmem:[#allocation4_spill] sm:$0xff] %v22730_v51  ;;  %v697_v52 = vpop.f32.mrb[15].mxu0  ;;  %v22732_v54 = vpop.f32.mrb[11].mxu1  ;;  %v23107_v51 = vld [vmem:[%s30463_s1 + $0x12c] ss:$16 sps:$4 sm:$0x7f]  }
 0x132   :  { %30576 = vst [vmem:[#allocation5_spill] sm:$0xff] %v22732_v54  ;;  %30608 = vst [vmem:[#allocation36_spill] sm:$0xff] %v23107_v51 }
 0x133   :  { %16037 = vmatmul.mubr.msk.bf16.gmra.mrb[56].mxu0 %vm153_vm1, %v22324_v50  ;;  %16040 = vmatmul.mubr.msk.bf16.vlgmr.msra.gmra.mrb[52].mxu1 %vm153_vm1, %v22276_v43 }
 0x134   :  { %2025 = vmatprep.mubr.bf16.mxu0 %v30473_v1  ;;  %2076 = vmatprep.mubr.bf16.mxu1 %v30473_v1 }
 0x135   :  { %2177 = vmatpush1.bf16.msra.mxu1 %v22410_v62 }
 0x136   :  { %v22741_v55 = vpop.f32.mrb[12].mxu1  ;;  %16049 = vmatprep.subr.msk.bf16.mxu1 %vm166_vm0, %v22415_v63 }
 0x137   :  { %v22745_v57 = vpop.f32.mrb[13].mxu1 }
 0x138   :  { %v22747_v58 = vpop.f32.mrb[14].mxu1 }
 0x139   :  { %v22749_v59 = vpop.f32.mrb[15].mxu1  ;;  %2179 = vmatpush1.bf16.msra.mxu1 %v22430_v4  ;;  %v21091_v4 = vld [vmem:[%s30463_s1 + $0xa0] sm:$0xff] }
 0x13a   :  { %30577 = vst [vmem:[#allocation6_spill] sm:$0xff] %v22749_v59  ;;  %2318 = vmatprep.subr.bf16.mxu1 %v22435_v6 }
 0x13b   :  { %16038 = vmatmul.mubr.msk.bf16.gmra.mrb[60].mxu0 %vm153_vm1, %v22359_v56  ;;  %16041 = vmatmul.mubr.msk.bf16.gmra.mrb[56].mxu1 %vm153_vm1, %v22311_v49 }
 0x13c   :  { %2086 = vmatprep.mubr.bf16.mxu1 %v30473_v1  ;;  %2137 = vmatprep.mubr.bf16.mxu0 %v30473_v1 }
 0x13e   :  { %v22759_v60 = vpop.f32.mrb[16].mxu1 }
 0x13f   :  { %30578 = vst [vmem:[#allocation7_spill] sm:$0xff] %v22759_v60  ;;  %v22761_v61 = vpop.f32.mrb[17].mxu1 }
 0x140   :  { %30579 = vst [vmem:[#allocation8_spill] sm:$0xff] %v22761_v61  ;;  %v767_v62 = vpop.f32.mrb[18].mxu1 }
 0x141   :  { %v768_v63 = vpop.f32.mrb[19].mxu1  ;;  %v22902_v62 = vld [vmem:[%s30463_s1 + $0x24] ss:$16 sps:$4 sm:$0x7f]  }
 0x142   :  { %30588 = vst [vmem:[#allocation17_spill] sm:$0xff] %v22902_v62  ;;  %v22933_v63 = vld [vmem:[%s30463_s1 + $0x104] ss:$16 sps:$4 sm:$0xff]  }
 0x143   :  { %16042 = vmatmul.mubr.msk.bf16.gmra.mrb[60].mxu1 %vm153_vm1, %v22324_v50  ;;  %16045 = vmatmul.mubr.msk.bf16.vlgmr.msra.gmra.mrb[48].mxu0 %vm153_vm1, %v22050_v8  ;;  %30591 = vst [vmem:[#allocation20_spill] sm:$0xff] %v22933_v63 }
 0x144   :  { %2248 = vmatpush1.bf16.msra.mxu0 %v22448_v15  ;;  %2096 = vmatprep.mubr.bf16.mxu1 %v30473_v1 }
 0x145   :  { %2147 = vmatprep.mubr.bf16.mxu0 %v30473_v1  ;;  %16054 = vmatprep.subr.msk.bf16.mxu0 %vm166_vm0, %v22453_v17  ;;  %v19668_v17 = vld [vmem:[%s30463_s1 + $0xa8] ss:$16 sps:$4 sm:$0x7f]  }
 0x146   :  { %v22860_v25 = vsel %vm166_vm0, %v19668_v17, 0  ;;  %v22920_v17 = vld [vmem:[%s30463_s1] ss:$16 sps:$4 sm:$0xff]  }
 0x147   :  { %30586 = vst [vmem:[#allocation15_spill] sm:$0xff] %v22860_v25  ;;  %30589 = vst [vmem:[#allocation18_spill] sm:$0xff] %v22920_v17 }
 0x148   :  { %2250 = vmatpush1.bf16.msra.mxu0 %v22468_v32  ;;  %v22865_v32 = vld [vmem:[%s30463_s1 + $0xc] ss:$16 sps:$4 sm:$0xff]  }
 0x149   :  { %2622 = vmatprep.subr.bf16.mxu0 %v22776_v3  ;;  %30587 = vst [vmem:[#allocation16_spill] sm:$0xff] %v22865_v32  ;;  %v19680_v3 = vld [vmem:[%s30463_s1 + $0x28] ss:$16 sps:$4 sm:$0x7f]  }
 0x14b   :  { %16043 = vmatmul.mubr.msk.bf16.gmra.mrb[64].mxu1 %vm153_vm1, %v22359_v56  ;;  %16046 = vmatmul.mubr.msk.bf16.gmra.mrb[52].mxu0 %vm153_vm1, %v22123_v21 }
 0x14c   :  { %2157 = vmatprep.mubr.bf16.mxu0 %v30473_v1  ;;  %2208 = vmatprep.mubr.bf16.mxu1 %v30473_v1 }
 0x153   :  { %16047 = vmatmul.mubr.msk.bf16.gmra.mrb[56].mxu0 %vm153_vm1, %v22157_v26  ;;  %16050 = vmatmul.mubr.msk.bf16.vlgmr.msra.gmra.mrb[52].mxu1 %vm153_vm1, %v22050_v8  ;;  %v16070_v8 = vld [vmem:[%s30463_s1 + $0xb0] sm:$0x77] }
 0x154   :  { %2167 = vmatprep.mubr.bf16.mxu0 %v30473_v1  ;;  %2218 = vmatprep.mubr.bf16.mxu1 %v30473_v1  ;;  %v22808_v6 = vcombine.high %v21091_v4, %v16070_v8 }
 0x155   :  { %2319 = vmatpush1.bf16.msra.mxu1 %v22481_v39 }
 0x156   :  { %16059 = vmatprep.subr.msk.bf16.mxu1 %vm166_vm0, %v22486_v46  ;;  %30581 = vst [vmem:[#allocation10_spill] sm:$0xff] %v22808_v6 }
 0x159   :  { %2321 = vmatpush1.bf16.msra.mxu1 %v22501_v53 }
 0x15a   :  { %2693 = vmatprep.subr.bf16.mxu1 %v22060_v10  ;;  %v16076_v10 = vcombine.low %v21091_v4, %v16070_v8  ;;  %v19671_v4 = vld [vmem:[%s30463_s1 + $0x20] ss:$16 sps:$4 sm:$0x7f]  }
 0x15b   :  { %16048 = vmatmul.mubr.msk.bf16.gmra.mrb[60].mxu0 %vm153_vm1, %v22055_v9  ;;  %16051 = vmatmul.mubr.msk.bf16.gmra.mrb[56].mxu1 %vm153_vm1, %v22123_v21  ;;  %v22817_v21 = vld [vmem:[%s30463_s1 + $0x80] ss:$16 sps:$4 sm:$0xff]  }
 0x15c   :  { %2228 = vmatprep.mubr.bf16.mxu1 %v30473_v1  ;;  %2279 = vmatprep.mubr.bf16.mxu0 %v30473_v1  ;;  %30582 = vst [vmem:[#allocation11_spill] sm:$0xff] %v22817_v21  ;;  %v22825_v15 = vsel %vm166_vm0, %v16076_v10, 0  ;;  %v22928_v10 = vsel %vm166_vm0, %v19671_v4, 0  ;;  %v23000_v4 = vld [vmem:[%s30463_s1 + $0x8] ss:$16 sps:$4 sm:$0xff]  }
 0x15d   :  { %30583 = vst [vmem:[#allocation12_spill] sm:$0xff] %v22825_v15  ;;  %30590 = vst [vmem:[#allocation19_spill] sm:$0xff] %v22928_v10 }
 0x15e   :  { %30596 = vst [vmem:[#allocation24_spill] sm:$0xff] %v23000_v4 }
 0x163   :  { %16052 = vmatmul.mubr.msk.bf16.gmra.mrb[60].mxu1 %vm153_vm1, %v22157_v26  ;;  %16055 = vmatmul.mubr.msk.bf16.vlgmr.msra.gmra.mrb[48].mxu0 %vm153_vm1, %v22620_v12  ;;  %v22838_v26 = vld [vmem:[%s30463_s1 + $0xac] ss:$16 sps:$4 sm:$0x7f]  }
 0x164   :  { %2623 = vmatpush1.bf16.msra.mxu0 %v22817_v21  ;;  %2238 = vmatprep.mubr.bf16.mxu1 %v30473_v1  ;;  %30584 = vst [vmem:[#allocation13_spill] sm:$0xff] %v22838_v26 }
 0x165   :  { %2289 = vmatprep.mubr.bf16.mxu0 %v30473_v1  ;;  %16080 = vmatprep.subr.msk.bf16.mxu0 %vm166_vm0, %v22808_v6 }
 0x168   :  { %2625 = vmatpush1.bf16.msra.mxu0 %v22825_v15  ;;  %v23029_v15 = vld [vmem:[%s30463_s1 + $0x10c] ss:$16 sps:$4 sm:$0xff]  }
 0x169   :  { %2812 = vmatprep.subr.bf16.mxu0 %v22075_v13  ;;  %30599 = vst [vmem:[#allocation27_spill] sm:$0xff] %v23029_v15 }
 0x16b   :  { %16053 = vmatmul.mubr.msk.bf16.gmra.mrb[64].mxu1 %vm153_vm1, %v22055_v9  ;;  %16056 = vmatmul.mubr.msk.bf16.gmra.mrb[52].mxu0 %vm153_vm1, %v22634_v14  ;;  %v22852_v9 = vld [vmem:[%s30463_s1 + $0x88] ss:$16 sps:$4 sm:$0xff]  }
 0x16c   :  { %2299 = vmatprep.mubr.bf16.mxu0 %v30473_v1  ;;  %2350 = vmatprep.mubr.bf16.mxu1 %v30473_v1  ;;  %30585 = vst [vmem:[#allocation14_spill] sm:$0xff] %v22852_v9 }
 0x173   :  { %16057 = vmatmul.mubr.msk.bf16.gmra.mrb[56].mxu0 %vm153_vm1, %v22647_v16  ;;  %16060 = vmatmul.mubr.msk.bf16.vlgmr.msra.gmra.mrb[52].mxu1 %vm153_vm1, %v22620_v12 }
 0x174   :  { %2309 = vmatprep.mubr.bf16.mxu0 %v30473_v1  ;;  %2360 = vmatprep.mubr.bf16.mxu1 %v30473_v1 }
 0x175   :  { %2694 = vmatpush1.bf16.msra.mxu1 %v22852_v9  ;;  %v23024_v9 = vsel %vm166_vm0, %v19680_v3, 0 }
 0x176   :  { %v22855_v13 = vpop.f32.mrb[16].mxu0  ;;  %16085 = vmatprep.subr.msk.bf16.mxu1 %vm166_vm0, %v22838_v26  ;;  %30598 = vst [vmem:[#allocation26_spill] sm:$0xff] %v23024_v9 }
 0x177   :  { %v22869_v46 = vpop.f32.mrb[17].mxu0 }
 0x178   :  { %v22873_v53 = vpop.f32.mrb[18].mxu0 }
 0x179   :  { %v22877_v5 = vpop.f32.mrb[19].mxu0  ;;  %2696 = vmatpush1.bf16.msra.mxu1 %v22860_v25 }
 0x17a   :  { %2883 = vmatprep.subr.bf16.mxu1 %v22865_v32 }
 0x17b   :  { %16058 = vmatmul.mubr.msk.bf16.gmra.mrb[60].mxu0 %vm153_vm1, %v22665_v20  ;;  %16061 = vmatmul.mubr.msk.bf16.gmra.mrb[56].mxu1 %vm153_vm1, %v22634_v14 }
 0x17c   :  { %2370 = vmatprep.mubr.bf16.mxu1 %v30473_v1  ;;  %2654 = vmatprep.mubr.bf16.mxu0 %v30473_v1 }
 0x17e   :  { %v22889_v11 = vpop.f32.mrb[20].mxu0 }
 0x17f   :  { %v22893_v44 = vpop.f32.mrb[21].mxu0 }
 0x180   :  { %v22897_v52 = vpop.f32.mrb[22].mxu0 }
 0x181   :  { %v22906_v8 = vpop.f32.mrb[23].mxu0 }
 0x183   :  { %16062 = vmatmul.mubr.msk.bf16.gmra.mrb[60].mxu1 %vm153_vm1, %v22647_v16  ;;  %16081 = vmatmul.mubr.msk.bf16.vlgmr.msra.gmra.mrb[64].mxu0 %vm153_vm1, %v22620_v12 }
 0x184   :  { %2813 = vmatpush1.bf16.msra.mxu0 %v22920_v17  ;;  %2380 = vmatprep.mubr.bf16.mxu1 %v30473_v1 }
 0x185   :  { %2664 = vmatprep.mubr.bf16.mxu0 %v30473_v1  ;;  %16098 = vmatprep.subr.msk.bf16.mxu0 %vm166_vm0, %v22902_v62 }
 0x186   :  { %v22935_v48 = vpop.f32.mrb[24].mxu0  ;;  %v22937_v40 = vpop.f32.mrb[20].mxu1 }
 0x187   :  { %v22943_v0 = vpop.f32.mrb[25].mxu0  ;;  %v22945_v39 = vpop.f32.mrb[21].mxu1 }
 0x188   :  { %v22951_v62 = vpop.f32.mrb[26].mxu0  ;;  %v22953_v17 = vpop.f32.mrb[22].mxu1  ;;  %2815 = vmatpush1.bf16.msra.mxu0 %v22928_v10 }
 0x189   :  { %v22960_v32 = vpop.f32.mrb[27].mxu0  ;;  %v22962_v25 = vpop.f32.mrb[23].mxu1  ;;  %3040 = vmatprep.subr.bf16.mxu0 %v22933_v63 }
 0x18b   :  { %16063 = vmatmul.mubr.msk.bf16.gmra.mrb[64].mxu1 %vm153_vm1, %v22665_v20  ;;  %16082 = vmatmul.mubr.msk.bf16.gmra.mrb[68].mxu0 %vm153_vm1, %v22634_v14 }
 0x18c   :  { %2674 = vmatprep.mubr.bf16.mxu0 %v30592_v7  ;;  %2725 = vmatprep.mubr.bf16.mxu1 %v30592_v7 }
 0x18e   :  { %v22975_v2 = vpop.f32.mrb[28].mxu0  ;;  %v22977_v10 = vpop.f32.mrb[24].mxu1 }
 0x18f   :  { %30593 = vst [vmem:[#allocation21_spill] sm:$0xff] %v22975_v2  ;;  %v22983_v63 = vpop.f32.mrb[29].mxu0  ;;  %v22985_v26 = vpop.f32.mrb[25].mxu1 }
 0x190   :  { %v1321_v6 = vpop.f32.mrb[30].mxu0  ;;  %v22991_v21 = vpop.f32.mrb[26].mxu1 }
 0x191   :  { %30594 = vst [vmem:[#allocation22_spill] sm:$0xff] %v22991_v21  ;;  %v1322_v1 = vpop.f32.mrb[31].mxu0  ;;  %v22995_v2 = vpop.f32.mrb[27].mxu1  ;;  %v23007_v6 = vld [vmem:[%s30463_s1 + $0x2c] ss:$16 sps:$4 sm:$0x7f]  }
 0x192   :  { %30595 = vst [vmem:[#allocation23_spill] sm:$0xff] %v22995_v2  ;;  %30597 = vst [vmem:[#allocation25_spill] sm:$0xff] %v23007_v6 }
 0x193   :  { %16083 = vmatmul.mubr.msk.bf16.gmra.mrb[72].mxu0 %vm153_vm1, %v22647_v16  ;;  %16086 = vmatmul.mubr.msk.bf16.vlgmr.msra.gmra.mrb[68].mxu1 %vm153_vm1, %v22620_v12 }
 0x194   :  { %2684 = vmatprep.mubr.bf16.mxu0 %v30592_v7  ;;  %2735 = vmatprep.mubr.bf16.mxu1 %v30592_v7 }
 0x195   :  { %2884 = vmatpush1.bf16.msra.mxu1 %v23000_v4  ;;  %v19683_v4 = vld [vmem:[%s30463_s1 + $0x120] ss:$16 sps:$4 sm:$0x7f]  }
 0x196   :  { %v23019_v1 = vpop.f32.mrb[28].mxu1  ;;  %16103 = vmatprep.subr.msk.bf16.mxu1 %vm166_vm0, %v23007_v6 }
 0x197   :  { %v23033_v54 = vpop.f32.mrb[29].mxu1 }
 0x198   :  { %v23037_v21 = vpop.f32.mrb[30].mxu1 }
 0x199   :  { %v23041_v3 = vpop.f32.mrb[31].mxu1  ;;  %2886 = vmatpush1.bf16.msra.mxu1 %v23024_v9  ;;  %v23064_v9 = vld [vmem:[%s30463_s1 + $0x100] ss:$16 sps:$4 sm:$0xff]  }
 0x19a   :  { %30600 = vst [vmem:[#allocation28_spill] sm:$0xff] %v23041_v3  ;;  %3111 = vmatprep.subr.bf16.mxu1 %v23029_v15  ;;  %30603 = vst [vmem:[#allocation31_spill] sm:$0xff] %v23064_v9  ;;  %v23069_v3 = vld [vmem:[%s30463_s1 + $0x124] ss:$16 sps:$4 sm:$0x7f]  }
 0x19b   :  { %16084 = vmatmul.mubr.msk.bf16.gmra.mrb[76].mxu0 %vm153_vm1, %v22665_v20  ;;  %16087 = vmatmul.mubr.msk.bf16.gmra.mrb[72].mxu1 %vm153_vm1, %v22634_v14  ;;  %30604 = vst [vmem:[#allocation32_spill] sm:$0xff] %v23069_v3 }
 0x19c   :  { %2745 = vmatprep.mubr.bf16.mxu1 %v30592_v7  ;;  %2844 = vmatprep.mubr.bf16.mxu0 %v30592_v7 }
 0x19e   :  { %v23053_v6 = vpop.f32.mrb[32].mxu1 }
 0x19f   :  { %30601 = vst [vmem:[#allocation29_spill] sm:$0xff] %v23053_v6  ;;  %v23057_v2 = vpop.f32.mrb[33].mxu1  ;;  %v30618_v6 = vmax.f32 %v22667_v22, %v22873_v53  ;;  %v30620_v22 = vmax.f32 %v22679_v24, %v22889_v11  ;;  %v30622_v24 = vmax.f32 %v22683_v28, %v22897_v52 }
 0x1a0   :  { %30602 = vst [vmem:[#allocation30_spill] sm:$0xff] %v23057_v2  ;;  %v1392_v15 = vpop.f32.mrb[34].mxu1 }
 0x1a1   :  { %v1393_v59 = vpop.f32.mrb[35].mxu1  ;;  %v23089_v15 = vld [vmem:[%s30463_s1 + $0xc4] ss:$16 sps:$4 sm:$0xff]  }
 0x1a2   :  { %v23084_v59 = vsel %vm166_vm0, %v19683_v4, 0  ;;  %30606 = vst [vmem:[#allocation34_spill] sm:$0xff] %v23089_v15  ;;  %v23102_v4 = vld [vmem:[%s30463_s1 + $0x108] ss:$16 sps:$4 sm:$0xff]  }
 0x1a3   :  { %16088 = vmatmul.mubr.msk.bf16.gmra.mrb[76].mxu1 %vm153_vm1, %v22647_v16  ;;  %16099 = vmatmul.mubr.msk.bf16.vlgmr.msra.gmra.mrb[64].mxu0 %vm153_vm1, %v22276_v43  ;;  %30605 = vst [vmem:[#allocation33_spill] sm:$0xff] %v23084_v59  ;;  %30607 = vst [vmem:[#allocation35_spill] sm:$0xff] %v23102_v4 }
 0x1a4   :  { %3041 = vmatpush1.bf16.msra.mxu0 %v23064_v9  ;;  %2755 = vmatprep.mubr.bf16.mxu1 %v30592_v7  ;;  %v30616_v9 = vmax.f32 %v22656_v18, %v22855_v13 }
 0x1a5   :  { %2854 = vmatprep.mubr.bf16.mxu0 %v30592_v7  ;;  %16128 = vmatprep.subr.msk.bf16.mxu0 %vm166_vm0, %v23069_v3  ;;  %v23127_v3 = vld [vmem:[%s30463_s1 + $0xcc] ss:$16 sps:$4 sm:$0xff]  }
 0x1a6   :  { %30610 = vst [vmem:[#allocation38_spill] sm:$0xff] %v23127_v3 }
 0x1a8   :  { %3043 = vmatpush1.bf16.msra.mxu0 %v23084_v59 }
 0x1a9   :  { %3274 = vmatprep.subr.bf16.mxu0 %v23089_v15  ;;  %v19694_v15 = vld [vmem:[%s30463_s1 + $0x128] ss:$16 sps:$4 sm:$0x7f]  }
 0x1aa   :  { %v23122_v59 = vsel %vm166_vm0, %v19694_v15, 0  ;;  %v23145_v15 = vld [vmem:[%s30463_s1 + $0xc0] ss:$16 sps:$4 sm:$0xff]  }
 0x1ab   :  { %16089 = vmatmul.mubr.msk.bf16.gmra.mrb[80].mxu1 %vm153_vm1, %v22665_v20  ;;  %16100 = vmatmul.mubr.msk.bf16.gmra.mrb[68].mxu0 %vm153_vm1, %v22311_v49  ;;  %30609 = vst [vmem:[#allocation37_spill] sm:$0xff] %v23122_v59  ;;  %30612 = vst [vmem:[#allocation40_spill] sm:$0xff] %v23145_v15 }
 0x1ac   :  { %2864 = vmatprep.mubr.bf16.mxu0 %v30592_v7  ;;  %2915 = vmatprep.mubr.bf16.mxu1 %v30592_v7 }
 0x1b3   :  { %16101 = vmatmul.mubr.msk.bf16.gmra.mrb[72].mxu0 %vm153_vm1, %v22324_v50  ;;  %16104 = vmatmul.mubr.msk.bf16.vlgmr.msra.gmra.mrb[68].mxu1 %vm153_vm1, %v22276_v43  ;;  %v23140_v43 = vld [vmem:[%s30464_s0 + $0x70] sm:$0xff]  }
 0x1b4   :  { %2874 = vmatprep.mubr.bf16.mxu0 %v30592_v7  ;;  %2925 = vmatprep.mubr.bf16.mxu1 %v30592_v7  ;;  %30611 = vst [vmem:[#allocation39_spill] sm:$0xff] %v23140_v43 }
 0x1b5   :  { %3112 = vmatpush1.bf16.msra.mxu1 %v23102_v4  ;;  %v19717_v4 = vld [vmem:[%s30463_s1 + $0x4c] ss:$16 sps:$4 sm:$0xff]  }
 0x1b6   :  { %16133 = vmatprep.subr.msk.bf16.mxu1 %vm166_vm0, %v23107_v51  ;;  %v23170_v51 = vld [vmem:[%s30463_s1 + $0x44] ss:$16 sps:$4 sm:$0xff]  }
 0x1b7   :  { %30615 = vst [vmem:[#allocation43_spill] sm:$0xff] %v23170_v51 }
 0x1b9   :  { %3114 = vmatpush1.bf16.msra.mxu1 %v23122_v59 }
 0x1ba   :  { %3345 = vmatprep.subr.bf16.mxu1 %v23127_v3  ;;  %v23150_v3 = vld [vmem:[%s30463_s1 + $0xe4] ss:$16 sps:$4 sm:$0x7f]  }
 0x1bb   :  { %16102 = vmatmul.mubr.msk.bf16.gmra.mrb[76].mxu0 %vm153_vm1, %v22359_v56  ;;  %16105 = vmatmul.mubr.msk.bf16.gmra.mrb[72].mxu1 %vm153_vm1, %v22311_v49  ;;  %30613 = vst [vmem:[#allocation41_spill] sm:$0xff] %v23150_v3  ;;  %v19698_v49 = vld [vmem:[%s30463_s1 + $0xe0] ss:$16 sps:$4 sm:$0x7f]  }
 0x1bc   :  { %2935 = vmatprep.mubr.bf16.mxu1 %v30592_v7  ;;  %3072 = vmatprep.mubr.bf16.mxu0 %v30592_v7  ;;  %v23165_v59 = vsel %vm166_vm0, %v19698_v49, 0  ;;  %v23188_v49 = vld [vmem:[%s30464_s0 + $0x80] sm:$0xff]  }
 0x1bd   :  { %30614 = vst [vmem:[#allocation42_spill] sm:$0xff] %v23165_v59 }
 0x1c3   :  { %16106 = vmatmul.mubr.msk.bf16.gmra.mrb[76].mxu1 %vm153_vm1, %v22324_v50  ;;  %16129 = vmatmul.mubr.msk.bf16.vlgmr.msra.gmra.mrb[64].mxu0 %vm153_vm1, %v23140_v43  ;;  %v23175_v50 = vld [vmem:[%s30464_s0 + $0x78] sm:$0xff]  }
 0x1c4   :  { %3275 = vmatpush1.bf16.msra.mxu0 %v23145_v15  ;;  %2945 = vmatprep.mubr.bf16.mxu1 %v30592_v7 }
 0x1c5   :  { %3082 = vmatprep.mubr.bf16.mxu0 %v30592_v7  ;;  %16162 = vmatprep.subr.msk.bf16.mxu0 %vm166_vm0, %v23150_v3 }
 0x1c8   :  { %3277 = vmatpush1.bf16.msra.mxu0 %v23165_v59  ;;  %v19703_v59 = vld [vmem:[%s30463_s1 + $0xc8] ss:$16 sps:$4 sm:$0xff]  }
 0x1c9   :  { %3464 = vmatprep.subr.bf16.mxu0 %v23170_v51  ;;  %v19708_v51 = vld [vmem:[%s30463_s1 + $0xe8] ss:$16 sps:$4 sm:$0x7f]  }
 0x1ca   :  { %v23207_v15 = vsel %vm166_vm0, %v19708_v51, 0 }
 0x1cb   :  { %16107 = vmatmul.mubr.msk.bf16.gmra.mrb[80].mxu1 %vm153_vm1, %v22359_v56  ;;  %16130 = vmatmul.mubr.msk.bf16.gmra.mrb[68].mxu0 %vm153_vm1, %v23175_v50  ;;  %v19706_v56 = vld [vmem:[%s30463_s1 + $0xec] ss:$16 sps:$4 sm:$0x7f]  }
 0x1cc   :  { %3092 = vmatprep.mubr.bf16.mxu0 %v30592_v7  ;;  %3143 = vmatprep.mubr.bf16.mxu1 %v30592_v7 }
 0x1d3   :  { %16131 = vmatmul.mubr.msk.bf16.gmra.mrb[72].mxu0 %vm153_vm1, %v23188_v49  ;;  %16134 = vmatmul.mubr.msk.bf16.vlgmr.msra.gmra.mrb[68].mxu1 %vm153_vm1, %v23140_v43 }
 0x1d4   :  { %3102 = vmatprep.mubr.bf16.mxu0 %v30592_v7  ;;  %3153 = vmatprep.mubr.bf16.mxu1 %v30592_v7 }
 0x1d5   :  { %3346 = vmatpush1.bf16.msra.mxu1 %v19703_v59  ;;  %v23220_v59 = vld [vmem:[%s30464_s0 + $0x88] ss:$0 sps:$4 sm:$0xff]  }
 0x1d6   :  { %v1799_v3 = vpop.f32.mrb[32].mxu0  ;;  %16167 = vmatprep.subr.msk.bf16.mxu1 %vm166_vm0, %v19706_v56  ;;  %v30617_v56 = vmax.f32 %v22660_v19, %v22869_v46  ;;  %v30621_v46 = vmax.f32 %v22681_v27, %v22893_v44  ;;  %v19711_v27 = vld [vmem:[%s30463_s1 + $0x60] ss:$16 sps:$4 sm:$0x7f]   ;;  %v30623_v44 = vmax.f32 %v22685_v29, %v22906_v8  ;;  %v19714_v29 = vld [vmem:[%s30463_s1 + $0x144] ss:$16 sps:$4 sm:$0xff]  }
 0x1d7   :  { %v23215_v2 = vmax.f32 %v30616_v9, %v1799_v3  ;;  %v1801_v43 = vpop.f32.mrb[33].mxu0  ;;  %v30619_v9 = vmax.f32 %v22669_v23, %v22877_v5  ;;  %v19709_v3 = vld [vmem:[%s30463_s1 + $0x64] ss:$16 sps:$4 sm:$0x7f]   ;;  %v23281_v28 = vsel %vm166_vm0, %v19711_v27, 0  ;;  %v30631_v27 = vmax.f32 %v22711_v38, %v22962_v25 }
 0x1d8   :  { %v23225_v51 = vmax.f32 %v30617_v56, %v1801_v43  ;;  %v1803_v61 = vpop.f32.mrb[34].mxu0  ;;  %v30624_v56 = vmax.f32 %v22696_v30, %v22935_v48  ;;  %v30634_v38 = vmax.f32 %v22720_v41, %v22977_v10 }
 0x1d9   :  { %v23230_v60 = vmax.f32 %v30618_v6, %v1803_v61  ;;  %v1805_v18 = vpop.f32.mrb[35].mxu0  ;;  %3348 = vmatpush1.bf16.msra.mxu1 %v23207_v15  ;;  %v19700_v6 = vld [vmem:[%s30463_s1 + $0x40] ss:$16 sps:$4 sm:$0xff]  }
 0x1da   :  { %v23236_v13 = vmax.f32 %v30619_v9, %v1805_v18  ;;  %3535 = vmatprep.subr.bf16.mxu1 %v19717_v4  ;;  %v30625_v9 = vmax.f32 %v22698_v31, %v22937_v40  ;;  %v30628_v31 = vmax.f32 %v22704_v35, %v22951_v62 }
 0x1db   :  { %16132 = vmatmul.mubr.msk.bf16.gmra.mrb[76].mxu0 %vm153_vm1, %v23220_v59  ;;  %16135 = vmatmul.mubr.msk.bf16.gmra.mrb[72].mxu1 %vm153_vm1, %v23175_v50 }
 0x1dc   :  { %3163 = vmatprep.mubr.bf16.mxu1 %v30592_v7  ;;  %3306 = vmatprep.mubr.bf16.mxu0 %v30592_v7 }
 0x1de   :  { %v1809_v19 = vpop.f32.mrb[36].mxu0 }
 0x1df   :  { %v23247_v61 = vmax.f32 %v30620_v22, %v1809_v19  ;;  %v1811_v23 = vpop.f32.mrb[37].mxu0 }
 0x1e0   :  { %v23252_v53 = vmax.f32 %v30621_v46, %v1811_v23  ;;  %v1813_v5 = vpop.f32.mrb[38].mxu0  ;;  %v30626_v46 = vmax.f32 %v22700_v33, %v22943_v0 }
 0x1e1   :  { %v23263_v11 = vmax.f32 %v30622_v24, %v1813_v5  ;;  %v1815_v4 = vpop.f32.mrb[39].mxu0  ;;  %v30629_v24 = vmax.f32 %v22706_v36, %v22953_v17 }
 0x1e2   :  { %v23271_v43 = vmax.f32 %v30623_v44, %v1815_v4 }
 0x1e3   :  { %16136 = vmatmul.mubr.msk.bf16.gmra.mrb[76].mxu1 %vm153_vm1, %v23188_v49  ;;  %16163 = vmatmul.mubr.msk.bf16.vlgmr.msra.gmra.mrb[80].mxu0 %vm153_vm1, %v22620_v12 }
 0x1e4   :  { %3465 = vmatpush1.bf16.msra.mxu0 %v19700_v6  ;;  %3173 = vmatprep.mubr.bf16.mxu1 %v30592_v7  ;;  %v30627_v6 = vmax.f32 %v22702_v34, %v22945_v39  ;;  %v30630_v34 = vmax.f32 %v22709_v37, %v22960_v32  ;;  %v30632_v37 = vld [vmem:[#allocation21_spill] sm:$0xff] }
 0x1e5   :  { %3316 = vmatprep.mubr.bf16.mxu0 %v30592_v7  ;;  %16180 = vmatprep.subr.msk.bf16.mxu0 %vm166_vm0, %v19709_v3  ;;  %v30633_v32 = vmax.f32 %v22723_v42, %v30632_v37 }
 0x1e6   :  { %v1819_v52 = vpop.f32.mrb[40].mxu0  ;;  %v1870_v8 = vpop.f32.mrb[36].mxu1 }
 0x1e7   :  { %v23289_v18 = vmax.f32 %v30624_v56, %v1819_v52  ;;  %v23294_v19 = vmax.f32 %v30625_v9, %v1870_v8  ;;  %v1821_v22 = vpop.f32.mrb[41].mxu0  ;;  %v1872_v23 = vpop.f32.mrb[37].mxu1  ;;  %v30635_v52 = vmax.f32 %v22728_v47, %v22983_v63  ;;  %v30636_v56 = vmax.f32 %v22725_v45, %v22985_v26  ;;  %v19715_v47 = vld [vmem:[%s30463_s1 + $0x48] ss:$16 sps:$4 sm:$0xff]  }
 0x1e8   :  { %v23299_v5 = vmax.f32 %v30626_v46, %v1821_v22  ;;  %v23304_v3 = vmax.f32 %v30627_v6, %v1872_v23  ;;  %v1823_v30 = vpop.f32.mrb[42].mxu0  ;;  %v1874_v48 = vpop.f32.mrb[38].mxu1  ;;  %3467 = vmatpush1.bf16.msra.mxu0 %v23281_v28  ;;  %v30637_v23 = vld [vmem:[#allocation4_spill] sm:$0xff]  ;;  %v30638_v46 = vld [vmem:[#allocation22_spill] sm:$0xff]  ;;  %v30640_v63 = vld [vmem:[#allocation5_spill] sm:$0xff] }
 0x1e9   :  { %v23310_v40 = vmax.f32 %v30628_v31, %v1823_v30  ;;  %v23315_v33 = vmax.f32 %v30629_v24, %v1874_v48  ;;  %v1825_v0 = vpop.f32.mrb[43].mxu0  ;;  %v1876_v4 = vpop.f32.mrb[39].mxu1  ;;  %3662 = vmatprep.subr.bf16.mxu0 %v19714_v29  ;;  %v30639_v6 = vmax.f32 %v30637_v23, %v30638_v46  ;;  %v30641_v48 = vld [vmem:[#allocation23_spill] sm:$0xff]  ;;  %v30652_v23 = vld [vmem:[#allocation8_spill] sm:$0xff]  ;;  %v30653_v46 = vld [vmem:[#allocation30_spill] sm:$0xff] }
 0x1ea   :  { %v23320_v39 = vmax.f32 %v30630_v34, %v1825_v0  ;;  %v23325_v44 = vmax.f32 %v30631_v27, %v1876_v4  ;;  %v30642_v31 = vmax.f32 %v30640_v63, %v30641_v48  ;;  %v19718_v45 = vld [vmem:[%s30463_s1 + $0x6c] ss:$16 sps:$4 sm:$0x7f]   ;;  %v19720_v26 = vld [vmem:[%s30463_s1 + $0x68] ss:$16 sps:$4 sm:$0x7f]   ;;  %v30643_v27 = vmax.f32 %v22741_v55, %v23019_v1 }
 0x1eb   :  { %16137 = vmatmul.mubr.msk.bf16.gmra.mrb[80].mxu1 %vm153_vm1, %v23220_v59  ;;  %16164 = vmatmul.mubr.msk.bf16.gmra.mrb[84].mxu0 %vm153_vm1, %v22634_v14  ;;  %v23380_v4 = vsel %vm166_vm0, %v19720_v26, 0  ;;  %v19726_v34 = vld [vmem:[%s30463_s1 + $0x14c] ss:$16 sps:$4 sm:$0xff]   ;;  %v19723_v48 = vld [vmem:[%s30463_s1 + $0x160] ss:$16 sps:$4 sm:$0x7f]  }
 0x1ec   :  { %3326 = vmatprep.mubr.bf16.mxu0 %v30592_v7  ;;  %3377 = vmatprep.mubr.bf16.mxu1 %v30592_v7  ;;  %v30655_v26 = vld [vmem:[#allocation9_spill] sm:$0xff] }
 0x1ee   :  { %v1829_v35 = vpop.f32.mrb[44].mxu0  ;;  %v1880_v36 = vpop.f32.mrb[40].mxu1 }
 0x1ef   :  { %v23336_v62 = vmax.f32 %v30633_v32, %v1829_v35  ;;  %v23341_v25 = vmax.f32 %v30634_v38, %v1880_v36  ;;  %v1831_v17 = vpop.f32.mrb[45].mxu0  ;;  %v1882_v29 = vpop.f32.mrb[41].mxu1  ;;  %v30644_v36 = vmax.f32 %v22745_v57, %v23033_v54  ;;  %v30645_v38 = vmax.f32 %v22747_v58, %v23037_v21  ;;  %v30649_v57 = vld [vmem:[#allocation7_spill] sm:$0xff]  ;;  %v30650_v58 = vld [vmem:[#allocation29_spill] sm:$0xff] }
 0x1f0   :  { %v23346_v8 = vmax.f32 %v30635_v52, %v1831_v17  ;;  %v23351_v9 = vmax.f32 %v30636_v56, %v1882_v29  ;;  %v1833_v42 = vpop.f32.mrb[46].mxu0  ;;  %v1884_v22 = vpop.f32.mrb[42].mxu1  ;;  %v30646_v52 = vld [vmem:[#allocation6_spill] sm:$0xff]  ;;  %v30647_v56 = vld [vmem:[#allocation28_spill] sm:$0xff]  ;;  %v30651_v21 = vmax.f32 %v30649_v57, %v30650_v58 }
 0x1f1   :  { %v23356_v41 = vmax.f32 %v30639_v6, %v1884_v22  ;;  %v1834_v10 = vpop.f32.mrb[47].mxu0  ;;  %v1886_v30 = vpop.f32.mrb[43].mxu1  ;;  %v30648_v55 = vmax.f32 %v30646_v52, %v30647_v56  ;;  %v30654_v6 = vmax.f32 %v30652_v23, %v30653_v46  ;;  %v30658_v52 = vld [vmem:[#allocation10_spill] sm:$0xff]  ;;  %v30659_v56 = vld [vmem:[#allocation12_spill] sm:$0xff] }
 0x1f2   :  { %v23364_v24 = vmax.f32 %v30642_v31, %v1886_v30  ;;  %v21095_v31 = vld [vmem:[%s30464_s0 + $0x38] sm:$0xff]   ;;  %v30662_v46 = vld [vmem:[#allocation14_spill] sm:$0xff] }
 0x1f3   :  { %16165 = vmatmul.mubr.msk.bf16.gmra.mrb[88].mxu0 %vm153_vm1, %v22647_v16  ;;  %16168 = vmatmul.mubr.msk.bf16.vlgmr.msra.gmra.mrb[84].mxu1 %vm153_vm1, %v22620_v12 }
 0x1f4   :  { %3336 = vmatprep.mubr.bf16.mxu0 %v30592_v7  ;;  %3387 = vmatprep.mubr.bf16.mxu1 %v30592_v7 }
 0x1f5   :  { %3536 = vmatpush1.bf16.msra.mxu1 %v19715_v47  ;;  %v19721_v47 = vld [vmem:[%s30463_s1 + $0x164] ss:$16 sps:$4 sm:$0x7f]  }
 0x1f6   :  { %v1890_v0 = vpop.f32.mrb[44].mxu1  ;;  %16185 = vmatprep.subr.msk.bf16.mxu1 %vm166_vm0, %v19718_v45  ;;  %v23441_v45 = vsel %vm166_vm0, %v19723_v48, 0 }
 0x1f7   :  { %v23388_v35 = vmax.f32 %v30643_v27, %v1890_v0  ;;  %v1892_v12 = vpop.f32.mrb[45].mxu1  ;;  %v19724_v0 = vld [vmem:[%s30463_s1 + $0x148] ss:$16 sps:$4 sm:$0xff]  }
 0x1f8   :  { %v23393_v37 = vmax.f32 %v30644_v36, %v1892_v12  ;;  %v1894_v32 = vpop.f32.mrb[46].mxu1  ;;  %v21097_v27 = vld [vmem:[%s30464_s0 + $0x48] sm:$0xff]  }
 0x1f9   :  { %v23398_v17 = vmax.f32 %v30645_v38, %v1894_v32  ;;  %v1896_v29 = vpop.f32.mrb[47].mxu1  ;;  %3538 = vmatpush1.bf16.msra.mxu1 %v23380_v4  ;;  %v21098_v36 = vld [vmem:[%s30463_s1 + $0x8c] ss:$16 sps:$4 sm:$0xff]   ;;  %v21099_v32 = vld [vmem:[%s30464_s0 + $0x50] ss:$0 sps:$4 sm:$0xff]  }
 0x1fa   :  { %v23404_v1 = vmax.f32 %v30648_v55, %v1896_v29  ;;  %3733 = vmatprep.subr.bf16.mxu1 %v19726_v34  ;;  %v19727_v34 = vld [vmem:[%s30463_s1 + $0x16c] ss:$16 sps:$4 sm:$0x7f]   ;;  %v2446_v55 = vlaneseq }
 0x1fb   :  { %16166 = vmatmul.mubr.msk.bf16.gmra.mrb[92].mxu0 %vm153_vm1, %v22665_v20  ;;  %16169 = vmatmul.mubr.msk.bf16.gmra.mrb[88].mxu1 %vm153_vm1, %v22634_v14  ;;  %v19712_v14 = vld [vmem:[%s30463_s1 + $0x140] ss:$16 sps:$4 sm:$0xff]   ;;  %v30656_v38 = vld [vmem:[#allocation39_spill] sm:$0xff] }
 0x1fc   :  { %3397 = vmatprep.mubr.bf16.mxu1 %v30592_v7  ;;  %3496 = vmatprep.mubr.bf16.mxu0 %v30592_v7  ;;  %v30657_v29 = vld [vmem:[#allocation11_spill] sm:$0xff]  ;;  %v23501_v57 = vshrl.u32 %v2446_v55, 7 }
 0x1fe   :  { %v1900_v54 = vpop.f32.mrb[48].mxu1  ;;  %30660 = vst [vmem:[#allocation21_spill] sm:$0xff] %v23501_v57  ;;  %v30519_v58 = vsub.s32 0, %v23501_v57 }
 0x1ff   :  { %v23415_v42 = vmax.f32 %v30651_v21, %v1900_v54  ;;  %v1902_v22 = vpop.f32.mrb[49].mxu1  ;;  %v21100_v54 = vld [vmem:[%s30463_s1 + $0x4] ss:$16 sps:$4 sm:$0xff]   ;;  %v23507_v21 = vld [vmem:[%s30465_s2] sm:$0xf] }
 0x200   :  { %v23420_v10 = vmax.f32 %v30654_v6, %v1902_v22  ;;  %v1904_v30 = vpop.f32.mrb[50].mxu1  ;;  %v30517_v22 = vsub.s32 1, %v23501_v57  ;;  %v23519_v23 = vrot.slane %v23507_v21, %v30519_v58  ;;  %v19785_v58 = vld [vmem:[%s30466_s3 + $0x8c8] ss:$16 sps:$4 sm:$0xff]  }
 0x201   :  { %v1905_v63 = vpop.f32.mrb[51].mxu1 }
 0x202   :  { %30661 = vst [vmem:[#allocation4_spill] sm:$0xff] %v23519_v23  ;;  %v23525_v30 = vrot.slane %v23507_v21, %v30517_v22  ;;  %v19776_v22 = vld [vmem:[%s30466_s3 + $0x920] ss:$16 sps:$4 sm:$0xff]  }
 0x203   :  { %16170 = vmatmul.mubr.msk.bf16.gmra.mrb[92].mxu1 %vm153_vm1, %v22647_v16  ;;  %16181 = vmatmul.mubr.msk.bf16.vlgmr.msra.gmra.mrb[80].mxu0 %vm153_vm1, %v21095_v31  ;;  %v21096_v16 = vld [vmem:[%s30464_s0 + $0x40] sm:$0xff]  }
 0x204   :  { %3663 = vmatpush1.bf16.msra.mxu0 %v19712_v14  ;;  %3407 = vmatprep.mubr.bf16.mxu1 %v30592_v7  ;;  %30663 = vst [vmem:[#allocation22_spill] sm:$0xff] %v23525_v30  ;;  %v30664_v14 = vld [vmem:[#allocation13_spill] sm:$0xff] }
 0x205   :  { %3506 = vmatprep.mubr.bf16.mxu0 %v30592_v7  ;;  %16206 = vmatprep.subr.msk.bf16.mxu0 %vm166_vm0, %v19721_v47 }
 0x208   :  { %3665 = vmatpush1.bf16.msra.mxu0 %v23441_v45 }
 0x209   :  { %3860 = vmatprep.subr.bf16.mxu0 %v30655_v26 }
 0x20b   :  { %16171 = vmatmul.mubr.msk.bf16.gmra.mrb[96].mxu1 %vm153_vm1, %v22665_v20  ;;  %16182 = vmatmul.mubr.msk.bf16.gmra.mrb[84].mxu0 %vm153_vm1, %v21096_v16  ;;  %v19729_v20 = vld [vmem:[%s30463_s1 + $0x168] ss:$16 sps:$4 sm:$0x7f]  }
 0x20c   :  { %3516 = vmatprep.mubr.bf16.mxu0 %v30592_v7  ;;  %3567 = vmatprep.mubr.bf16.mxu1 %v30592_v7  ;;  %v23471_v12 = vsel %vm166_vm0, %v19729_v20, 0 }
 0x213   :  { %16183 = vmatmul.mubr.msk.bf16.gmra.mrb[88].mxu0 %vm153_vm1, %v21097_v27  ;;  %16186 = vmatmul.mubr.msk.bf16.vlgmr.msra.gmra.mrb[84].mxu1 %vm153_vm1, %v21095_v31 }
 0x214   :  { %3526 = vmatprep.mubr.bf16.mxu0 %v30592_v7  ;;  %3577 = vmatprep.mubr.bf16.mxu1 %v30592_v7 }
 0x215   :  { %3734 = vmatpush1.bf16.msra.mxu1 %v19724_v0 }
 0x216   :  { %16211 = vmatprep.subr.msk.bf16.mxu1 %vm166_vm0, %v19727_v34  ;;  %v30665_v34 = vld [vmem:[#allocation15_spill] sm:$0xff] }
 0x219   :  { %3736 = vmatpush1.bf16.msra.mxu1 %v23471_v12 }
 0x21a   :  { %3931 = vmatprep.subr.bf16.mxu1 %v21098_v36  ;;  %v30666_v36 = vld [vmem:[#allocation16_spill] sm:$0xff] }
 0x21b   :  { %16184 = vmatmul.mubr.msk.bf16.gmra.mrb[92].mxu0 %vm153_vm1, %v21099_v32  ;;  %16187 = vmatmul.mubr.msk.bf16.gmra.mrb[88].mxu1 %vm153_vm1, %v21096_v16 }
 0x21c   :  { %3587 = vmatprep.mubr.bf16.mxu1 %v30592_v7  ;;  %3694 = vmatprep.mubr.bf16.mxu0 %v30592_v7 }
 0x223   :  { %16188 = vmatmul.mubr.msk.bf16.gmra.mrb[92].mxu1 %vm153_vm1, %v21097_v27  ;;  %16207 = vmatmul.mubr.msk.bf16.vlgmr.msra.gmra.mrb[80].mxu0 %vm153_vm1, %v30656_v38 }
 0x224   :  { %3861 = vmatpush1.bf16.msra.mxu0 %v30657_v29  ;;  %3597 = vmatprep.mubr.bf16.mxu1 %v30592_v7 }
 0x225   :  { %3704 = vmatprep.mubr.bf16.mxu0 %v30592_v7  ;;  %16216 = vmatprep.subr.msk.bf16.mxu0 %vm166_vm0, %v30658_v52 }
 0x228   :  { %3863 = vmatpush1.bf16.msra.mxu0 %v30659_v56 }
 0x229   :  { %4002 = vmatprep.subr.bf16.mxu0 %v21100_v54 }
 0x22b   :  { %16189 = vmatmul.mubr.msk.bf16.gmra.mrb[96].mxu1 %vm153_vm1, %v21099_v32  ;;  %16208 = vmatmul.mubr.msk.bf16.gmra.mrb[84].mxu0 %vm153_vm1, %v23175_v50 }
 0x22c   :  { %3714 = vmatprep.mubr.bf16.mxu0 %v30592_v7  ;;  %3765 = vmatprep.mubr.bf16.mxu1 %v30592_v7 }
 0x233   :  { %16209 = vmatmul.mubr.msk.bf16.gmra.mrb[88].mxu0 %vm153_vm1, %v23188_v49  ;;  %16212 = vmatmul.mubr.msk.bf16.vlgmr.msra.gmra.mrb[84].mxu1 %vm153_vm1, %v30656_v38 }
 0x234   :  { %3724 = vmatprep.mubr.bf16.mxu0 %v30592_v7  ;;  %3775 = vmatprep.mubr.bf16.mxu1 %v30592_v7 }
 0x235   :  { %3932 = vmatpush1.bf16.msra.mxu1 %v30662_v46 }
 0x236   :  { %v2281_v6 = vpop.f32.mrb[48].mxu0  ;;  %16221 = vmatprep.subr.msk.bf16.mxu1 %vm166_vm0, %v30664_v14 }
 0x237   :  { %v2417_v47 = vmax.f32 %v23215_v2, %v2281_v6  ;;  %v2283_v63 = vpop.f32.mrb[49].mxu0 }
 0x238   :  { %v2418_v48 = vmax.f32 %v23225_v51, %v2283_v63  ;;  %v2285_v31 = vpop.f32.mrb[50].mxu0 }
 0x239   :  { %v2466_v26 = vadd.f32 %v23519_v23, %v2417_v47  ;;  %v2421_v16 = vmax.f32 %v23230_v60, %v2285_v31  ;;  %v2287_v0 = vpop.f32.mrb[51].mxu0  ;;  %3934 = vmatpush1.bf16.msra.mxu1 %v30665_v34  ;;  %v30518_v31 = vsub.s32 2, %v23501_v57 }
 0x23a   :  { %v2467_v20 = vadd.f32 %v23525_v30, %v2418_v48  ;;  %v2422_v27 = vmax.f32 %v23236_v13, %v2287_v0  ;;  %4073 = vmatprep.subr.bf16.mxu1 %v30666_v36 }
 0x23b   :  { %v2470_v32 = vadd.f32 %v23519_v23, %v2421_v16  ;;  %16210 = vmatmul.mubr.msk.bf16.gmra.mrb[92].mxu0 %vm153_vm1, %v23220_v59  ;;  %16213 = vmatmul.mubr.msk.bf16.gmra.mrb[88].mxu1 %vm153_vm1, %v23175_v50  ;;  %v2494_v60 = vmax.f32 %v2466_v26, 0.0 }
 0x23c   :  { %v2471_v2 = vadd.f32 %v23525_v30, %v2422_v27  ;;  %3785 = vmatprep.mubr.bf16.mxu1 %v30592_v7  ;;  %3892 = vmatprep.mubr.bf16.mxu0 %v30592_v7  ;;  %v2495_v29 = vmax.f32 %v2467_v20, 0.0  ;;  %v30669_v27 = vld [vmem:[#allocation17_spill] sm:$0xff] }
 0x23d   :  { %v2498_v51 = vmax.f32 %v2470_v32, 0.0 }
 0x23e   :  { %v2499_v13 = vmax.f32 %v2471_v2, 0.0  ;;  %v2291_v52 = vpop.f32.mrb[52].mxu0 }
 0x23f   :  { %v2522_v56 = vpack.c.bf16 %v2498_v51, %v2494_v60  ;;  %v2425_v55 = vmax.f32 %v23247_v61, %v2291_v52  ;;  %v2293_v54 = vpop.f32.mrb[53].mxu0  ;;  %v30516_v61 = vsub.s32 3, %v23501_v57 }
 0x240   :  { %v2523_v46 = vpack.c.bf16 %v2499_v13, %v2495_v29  ;;  %v2426_v6 = vmax.f32 %v23252_v53, %v2293_v54  ;;  %v2295_v14 = vpop.f32.mrb[54].mxu0 }
 0x241   :  { %2538 = vst [vmem:[#allocation3] sm:$0xff] %v2522_v56  ;;  %v2474_v47 = vadd.f32 %v23519_v23, %v2425_v55  ;;  %v2429_v63 = vmax.f32 %v23263_v11, %v2295_v14  ;;  %v2297_v48 = vpop.f32.mrb[55].mxu0  ;;  %v30667_v11 = vld [vmem:[#allocation18_spill] sm:$0xff]  ;;  %v23572_v51 = vrot.slane %v23507_v21, %v30516_v61 }
 0x242   :  { %2539 = vst [vmem:[#allocation3 + $0x8] sm:$0xff] %v2523_v46  ;;  %v2475_v26 = vadd.f32 %v23525_v30, %v2426_v6  ;;  %v2430_v16 = vmax.f32 %v23271_v43, %v2297_v48  ;;  %v23564_v43 = vrot.slane %v23507_v21, %v30518_v31  ;;  %v19790_v61 = vld [vmem:[%s30466_s3 + $0x964] ss:$16 sps:$4 sm:$0xff]  }
 0x243   :  { %v2478_v0 = vadd.f32 %v23519_v23, %v2429_v63  ;;  %16214 = vmatmul.mubr.msk.bf16.gmra.mrb[92].mxu1 %vm153_vm1, %v23188_v49  ;;  %16217 = vmatmul.mubr.msk.bf16.vlgmr.msra.gmra.mrb[96].mxu0 %vm153_vm1, %v30656_v38  ;;  %v2502_v34 = vmax.f32 %v2474_v47, 0.0  ;;  %30670 = vst [vmem:[#allocation23_spill] sm:$0xff] %v23572_v51  ;;  %v30671_v63 = vld [vmem:[#allocation19_spill] sm:$0xff] }
 0x244   :  { %v2479_v53 = vadd.f32 %v23525_v30, %v2430_v16  ;;  %4003 = vmatpush1.bf16.msra.mxu0 %v30667_v11  ;;  %3795 = vmatprep.mubr.bf16.mxu1 %v30592_v7  ;;  %30668 = vst [vmem:[#allocation5_spill] sm:$0xff] %v23564_v43  ;;  %v2503_v36 = vmax.f32 %v2475_v26, 0.0 }
 0x245   :  { %v2506_v20 = vmax.f32 %v2478_v0, 0.0  ;;  %3902 = vmatprep.mubr.bf16.mxu0 %v30592_v7  ;;  %16226 = vmatprep.subr.msk.bf16.mxu0 %vm166_vm0, %v30669_v27  ;;  %v30672_v0 = vld [vmem:[#allocation20_spill] sm:$0xff] }
 0x246   :  { %v2507_v32 = vmax.f32 %v2479_v53, 0.0  ;;  %v2301_v2 = vpop.f32.mrb[56].mxu0  ;;  %v2352_v60 = vpop.f32.mrb[52].mxu1 }
 0x247   :  { %v2526_v29 = vpack.c.bf16 %v2506_v20, %v2502_v34  ;;  %v2433_v13 = vmax.f32 %v23289_v18, %v2301_v2  ;;  %v2419_v52 = vmax.f32 %v23294_v19, %v2352_v60  ;;  %v2303_v56 = vpop.f32.mrb[57].mxu0  ;;  %v2354_v55 = vpop.f32.mrb[53].mxu1 }
 0x248   :  { %v2527_v54 = vpack.c.bf16 %v2507_v32, %v2503_v36  ;;  %v2434_v46 = vmax.f32 %v23299_v5, %v2303_v56  ;;  %v2420_v6 = vmax.f32 %v23304_v3, %v2354_v55  ;;  %v2305_v14 = vpop.f32.mrb[58].mxu0  ;;  %v2356_v47 = vpop.f32.mrb[54].mxu1  ;;  %4005 = vmatpush1.bf16.msra.mxu0 %v30671_v63 }
 0x249   :  { %2542 = vst [vmem:[#allocation3 + $0x20] sm:$0xff] %v2526_v29  ;;  %v2482_v21 = vadd.f32 %v23519_v23, %v2433_v13  ;;  %v2468_v48 = vadd.f32 %v23564_v43, %v2419_v52  ;;  %v2437_v18 = vmax.f32 %v23310_v40, %v2305_v14  ;;  %v2423_v19 = vmax.f32 %v23315_v33, %v2356_v47  ;;  %v2307_v26 = vpop.f32.mrb[59].mxu0  ;;  %v2358_v16 = vpop.f32.mrb[55].mxu1 }
 0x24a   :  { %4174 = vmatprep.subr.bf16.mxu0 %v30672_v0  ;;  %2543 = vst [vmem:[#allocation3 + $0x28] sm:$0xff] %v2527_v54  ;;  %v2483_v5 = vadd.f32 %v23525_v30, %v2434_v46  ;;  %v2469_v3 = vadd.f32 %v23572_v51, %v2420_v6  ;;  %v2438_v53 = vmax.f32 %v23320_v39, %v2307_v26 }
 0x24b   :  { %v2424_v11 = vmax.f32 %v23325_v44, %v2358_v16  ;;  %v2486_v34 = vadd.f32 %v23519_v23, %v2437_v18  ;;  %v2472_v20 = vadd.f32 %v23564_v43, %v2423_v19  ;;  %16215 = vmatmul.mubr.msk.bf16.gmra.mrb[96].mxu1 %vm153_vm1, %v23220_v59  ;;  %16218 = vmatmul.mubr.msk.bf16.gmra.mrb[100].mxu0 %vm153_vm1, %v23175_v50  ;;  %v2510_v39 = vmax.f32 %v2482_v21, 0.0 }
 0x24c   :  { %v2487_v40 = vadd.f32 %v23525_v30, %v2438_v53  ;;  %3912 = vmatprep.mubr.bf16.mxu0 %v30592_v7  ;;  %3963 = vmatprep.mubr.bf16.mxu1 %v30592_v7  ;;  %v2496_v44 = vmax.f32 %v2468_v48, 0.0  ;;  %v2511_v32 = vmax.f32 %v2483_v5, 0.0  ;;  %v2497_v2 = vmax.f32 %v2469_v3, 0.0 }
 0x24d   :  { %v2473_v33 = vadd.f32 %v23572_v51, %v2424_v11  ;;  %v2514_v27 = vmax.f32 %v2486_v34, 0.0  ;;  %v2500_v36 = vmax.f32 %v2472_v20, 0.0 }
 0x24e   :  { %v2515_v60 = vmax.f32 %v2487_v40, 0.0  ;;  %v2311_v13 = vpop.f32.mrb[60].mxu0  ;;  %v2362_v52 = vpop.f32.mrb[56].mxu1 }
 0x24f   :  { %v2501_v29 = vmax.f32 %v2473_v33, 0.0  ;;  %v2530_v56 = vpack.c.bf16 %v2514_v27, %v2510_v39  ;;  %v2524_v55 = vpack.c.bf16 %v2500_v36, %v2496_v44  ;;  %v2441_v54 = vmax.f32 %v23336_v62, %v2311_v13  ;;  %v2313_v6 = vpop.f32.mrb[61].mxu0  ;;  %v2364_v14 = vpop.f32.mrb[57].mxu1  ;;  %v30674_v36 = vld [vmem:[#allocation25_spill] sm:$0xff] }
 0x250   :  { %v2427_v46 = vmax.f32 %v23341_v25, %v2362_v52  ;;  %v2531_v47 = vpack.c.bf16 %v2515_v60, %v2511_v32  ;;  %v2442_v21 = vmax.f32 %v23346_v8, %v2313_v6  ;;  %v2428_v48 = vmax.f32 %v23351_v9, %v2364_v14  ;;  %v2315_v18 = vpop.f32.mrb[62].mxu0  ;;  %v2366_v19 = vpop.f32.mrb[58].mxu1 }
 0x251   :  { %v2525_v63 = vpack.c.bf16 %v2501_v29, %v2497_v2  ;;  %2546 = vst [vmem:[#allocation3 + $0x40] sm:$0xff] %v2530_v56  ;;  %2540 = vst [vmem:[#allocation3 + $0x10] sm:$0xff] %v2524_v55  ;;  %v2490_v26 = vadd.f32 %v23519_v23, %v2441_v54  ;;  %v2431_v62 = vmax.f32 %v23356_v41, %v2366_v19  ;;  %v2316_v0 = vpop.f32.mrb[63].mxu0  ;;  %v2368_v25 = vpop.f32.mrb[59].mxu1  ;;  %v30675_v54 = vld [vmem:[#allocation26_spill] sm:$0xff] }
 0x252   :  { %v2476_v16 = vadd.f32 %v23564_v43, %v2427_v46  ;;  %2547 = vst [vmem:[#allocation3 + $0x48] sm:$0xff] %v2531_v47  ;;  %v2491_v5 = vadd.f32 %v23525_v30, %v2442_v21  ;;  %v2477_v8 = vadd.f32 %v23572_v51, %v2428_v48  ;;  %v2432_v9 = vmax.f32 %v23364_v24, %v2368_v25  ;;  %v30673_v24 = vld [vmem:[#allocation24_spill] sm:$0xff]  ;;  %v19829_v30 = vld [vmem:[%s30466_s3 + $0x9ac] ss:$16 sps:$4 sm:$0xff]  }
 0x253   :  { %2541 = vst [vmem:[#allocation3 + $0x18] sm:$0xff] %v2525_v63  ;;  %v2518_v3 = vmax.f32 %v2490_v26, 0.0  ;;  %v2480_v53 = vadd.f32 %v23564_v43, %v2431_v62  ;;  %16219 = vmatmul.mubr.msk.bf16.gmra.mrb[104].mxu0 %vm153_vm1, %v23188_v49  ;;  %16222 = vmatmul.mubr.msk.bf16.vlgmr.msra.gmra.mrb[100].mxu1 %vm153_vm1, %v30656_v38 }
 0x254   :  { %v2519_v41 = vmax.f32 %v2491_v5, 0.0  ;;  %v2481_v11 = vadd.f32 %v23572_v51, %v2432_v9  ;;  %3922 = vmatprep.mubr.bf16.mxu0 %v30592_v7  ;;  %3973 = vmatprep.mubr.bf16.mxu1 %v30592_v7  ;;  %v2504_v20 = vmax.f32 %v2476_v16, 0.0  ;;  %v2505_v39 = vmax.f32 %v2477_v8, 0.0  ;;  %v30677_v8 = vld [vmem:[#allocation31_spill] sm:$0xff] }
 0x255   :  { %v2534_v34 = vpack.c.bf16 %v2518_v3, %v2518_v3  ;;  %v2508_v40 = vmax.f32 %v2480_v53, 0.0  ;;  %4074 = vmatpush1.bf16.msra.mxu1 %v30673_v24  ;;  %v30678_v3 = vld [vmem:[#allocation32_spill] sm:$0xff]  ;;  %v30679_v53 = vld [vmem:[#allocation33_spill] sm:$0xff]  ;;  %v30684_v24 = vld [vmem:[#allocation38_spill] sm:$0xff] }
 0x256   :  { %v2535_v33 = vpack.c.bf16 %v2519_v41, %v2519_v41  ;;  %v2509_v44 = vmax.f32 %v2481_v11, 0.0  ;;  %v2372_v27 = vpop.f32.mrb[60].mxu1  ;;  %16231 = vmatprep.subr.msk.bf16.mxu1 %vm166_vm0, %v30674_v36  ;;  %v30680_v41 = vld [vmem:[#allocation34_spill] sm:$0xff]  ;;  %v23660_v11 = vld [vmem:[%s30464_s0 + $0x5c] sm:$0xff]  }
 0x257   :  { %2550 = vst [vmem:[#allocation3 + $0x60] sm:$0xf] %v2534_v34  ;;  %v2528_v38 = vpack.c.bf16 %v2508_v40, %v2504_v20  ;;  %v2435_v32 = vmax.f32 %v23388_v35, %v2372_v27  ;;  %v2374_v2 = vpop.f32.mrb[61].mxu1  ;;  %v30676_v35 = vld [vmem:[#allocation27_spill] sm:$0xff]  ;;  %v23669_v34 = vld [vmem:[%s30464_s0 + $0x64] sm:$0xff]  }
 0x258   :  { %2551 = vst [vmem:[#allocation3 + $0x68] sm:$0xf] %v2535_v33  ;;  %v2529_v60 = vpack.c.bf16 %v2509_v44, %v2505_v39  ;;  %v2436_v29 = vmax.f32 %v23393_v37, %v2374_v2  ;;  %v2376_v13 = vpop.f32.mrb[62].mxu1  ;;  %v30682_v20 = vld [vmem:[#allocation36_spill] sm:$0xff]  ;;  %v30683_v40 = vld [vmem:[#allocation37_spill] sm:$0xff]  ;;  %v23710_v36 = vld [vmem:[%s30464_s0 + $0x94] sm:$0xff]  }
 0x259   :  { %2544 = vst [vmem:[#allocation3 + $0x30] sm:$0xff] %v2528_v38  ;;  %v2484_v52 = vadd.f32 %v23564_v43, %v2435_v32  ;;  %v2439_v56 = vmax.f32 %v23398_v17, %v2376_v13  ;;  %v2378_v55 = vpop.f32.mrb[63].mxu1  ;;  %4076 = vmatpush1.bf16.msra.mxu1 %v30675_v54  ;;  %v23685_v33 = vld [vmem:[%s30464_s0 + $0x6c] ss:$0 sps:$4 sm:$0xff]   ;;  %v30685_v44 = vld [vmem:[#allocation40_spill] sm:$0xff]  ;;  %v30687_v38 = vld [vmem:[#allocation42_spill] sm:$0xff] }
 0x25a   :  { %2545 = vst [vmem:[#allocation3 + $0x38] sm:$0xff] %v2529_v60  ;;  %v2485_v46 = vadd.f32 %v23572_v51, %v2436_v29  ;;  %v2440_v6 = vmax.f32 %v23404_v1, %v2378_v55  ;;  %4245 = vmatprep.subr.bf16.mxu1 %v30676_v35  ;;  %v23696_v39 = vld [vmem:[%s30464_s0 + $0x8c] sm:$0xff]   ;;  %v30688_v32 = vld [vmem:[#allocation43_spill] sm:$0xff] }
 0x25b   :  { %v2488_v14 = vadd.f32 %v23564_v43, %v2439_v56  ;;  %16220 = vmatmul.mubr.msk.bf16.gmra.mrb[108].mxu0 %vm153_vm1, %v23220_v59  ;;  %16223 = vmatmul.mubr.msk.bf16.gmra.mrb[104].mxu1 %vm153_vm1, %v23175_v50  ;;  %v2512_v17 = vmax.f32 %v2484_v52, 0.0  ;;  %v30686_v27 = vld [vmem:[#allocation41_spill] sm:$0xff]  ;;  %v23723_v2 = vld [vmem:[%s30464_s0 + $0x9c] sm:$0xff]   ;;  %v23745_v56 = vld [vmem:[%s30464_s0 + $0xa4] ss:$0 sps:$4 sm:$0xff]  }
 0x25c   :  { %v2489_v37 = vadd.f32 %v23572_v51, %v2440_v6  ;;  %3983 = vmatprep.mubr.bf16.mxu1 %v30592_v7  ;;  %4034 = vmatprep.mubr.bf16.mxu0 %v30592_v7  ;;  %v2513_v63 = vmax.f32 %v2485_v46, 0.0  ;;  %v21105_v60 = vld [vmem:[%s30463_s1 + $0xc8] ss:$16 sps:$4 sm:$0xff]   ;;  %v21106_v13 = vld [vmem:[%s30463_s1 + $0xec] ss:$16 sps:$4 sm:$0x7f]  }
 0x25d   :  { %v2516_v47 = vmax.f32 %v2488_v14, 0.0  ;;  %v21107_v46 = vld [vmem:[%s30463_s1 + $0x4c] ss:$16 sps:$4 sm:$0xff]  }
 0x25e   :  { %v2517_v1 = vmax.f32 %v2489_v37, 0.0  ;;  %v2382_v21 = vpop.f32.mrb[64].mxu1  ;;  %v21108_v37 = vld [vmem:[%s30464_s0 + $0x70] sm:$0xff]  }
 0x25f   :  { %v2532_v48 = vpack.c.bf16 %v2516_v47, %v2512_v17  ;;  %v2443_v18 = vmax.f32 %v23415_v42, %v2382_v21  ;;  %v2384_v19 = vpop.f32.mrb[65].mxu1  ;;  %v23644_v42 = vld [vmem:[%s30464_s0 + $0x54] sm:$0xff]   ;;  %v21109_v17 = vld [vmem:[%s30463_s1 + $0x40] ss:$16 sps:$4 sm:$0xff]  }
 0x260   :  { %v2533_v26 = vpack.c.bf16 %v2517_v1, %v2513_v63  ;;  %v2444_v16 = vmax.f32 %v23420_v10, %v2384_v19  ;;  %v2386_v62 = vpop.f32.mrb[66].mxu1  ;;  %v21110_v47 = vld [vmem:[%s30463_s1 + $0x64] ss:$16 sps:$4 sm:$0x7f]  }
 0x261   :  { %2548 = vst [vmem:[#allocation3 + $0x50] sm:$0xff] %v2532_v48  ;;  %v2492_v50 = vadd.f32 %v23564_v43, %v2443_v18  ;;  %v2387_v0 = vpop.f32.mrb[67].mxu1  ;;  %v21111_v62 = vld [vmem:[%s30463_s1 + $0x144] ss:$16 sps:$4 sm:$0xff]  }
 0x262   :  { %2549 = vst [vmem:[#allocation3 + $0x58] sm:$0xff] %v2533_v26  ;;  %v2493_v25 = vadd.f32 %v23572_v51, %v2444_v16  ;;  %v19809_v51 = vld [vmem:[%s30466_s3 + $0x948] ss:$16 sps:$4 sm:$0xff]  }
 0x263   :  { %v2520_v5 = vmax.f32 %v2492_v50, 0.0  ;;  %16224 = vmatmul.mubr.msk.bf16.gmra.mrb[108].mxu1 %vm153_vm1, %v23188_v49  ;;  %16227 = vmatmul.mubr.msk.bf16.vlgmr.msra.gmra.mrb[96].mxu0 %vm153_vm1, %v23644_v42  ;;  %v21112_v50 = vld [vmem:[%s30464_s0 + $0x78] sm:$0xff]  }
 0x264   :  { %v2521_v10 = vmax.f32 %v2493_v25, 0.0  ;;  %4175 = vmatpush1.bf16.msra.mxu0 %v30677_v8  ;;  %3993 = vmatprep.mubr.bf16.mxu1 %v30592_v7 }
 0x265   :  { %v2536_v9 = vpack.c.bf16 %v2520_v5, %v2520_v5  ;;  %4044 = vmatprep.mubr.bf16.mxu0 %v30592_v7  ;;  %16240 = vmatprep.subr.msk.bf16.mxu0 %vm166_vm0, %v30678_v3 }
 0x266   :  { %v2537_v49 = vpack.c.bf16 %v2521_v10, %v2521_v10 }
 0x267   :  { %2552 = vst [vmem:[#allocation3 + $0x70] sm:$0xf] %v2536_v9 }
 0x268   :  { %2553 = vst [vmem:[#allocation3 + $0x78] sm:$0xf] %v2537_v49  ;;  %4177 = vmatpush1.bf16.msra.mxu0 %v30679_v53  ;;  %v21113_v49 = vld [vmem:[%s30464_s0 + $0x80] sm:$0xff]   ;;  %v21114_v53 = vld [vmem:[%s30463_s1 + $0x48] ss:$16 sps:$4 sm:$0xff]  }
 0x269   :  { %4372 = vmatprep.subr.bf16.mxu0 %v30680_v41 }
 0x26b   :  { %16225 = vmatmul.mubr.msk.bf16.gmra.mrb[112].mxu1 %vm153_vm1, %v23220_v59  ;;  %16228 = vmatmul.mubr.msk.bf16.gmra.mrb[100].mxu0 %vm153_vm1, %v23660_v11  ;;  %v30681_v59 = vld [vmem:[#allocation35_spill] sm:$0xff] }
 0x26c   :  { %4054 = vmatprep.mubr.bf16.mxu0 %v30592_v7  ;;  %4105 = vmatprep.mubr.bf16.mxu1 %v30592_v7 }
 0x273   :  { %16229 = vmatmul.mubr.msk.bf16.gmra.mrb[104].mxu0 %vm153_vm1, %v23669_v34  ;;  %16232 = vmatmul.mubr.msk.bf16.vlgmr.msra.gmra.mrb[100].mxu1 %vm153_vm1, %v23644_v42 }
 0x274   :  { %4064 = vmatprep.mubr.bf16.mxu0 %v30592_v7  ;;  %4115 = vmatprep.mubr.bf16.mxu1 %v30592_v7 }
 0x275   :  { %4246 = vmatpush1.bf16.msra.mxu1 %v30681_v59  ;;  %v21115_v59 = vld [vmem:[%s30463_s1 + $0x6c] ss:$16 sps:$4 sm:$0x7f]  }
 0x276   :  { %16245 = vmatprep.subr.msk.bf16.mxu1 %vm166_vm0, %v30682_v20 }
 0x279   :  { %4248 = vmatpush1.bf16.msra.mxu1 %v30683_v40 }
 0x27a   :  { %4443 = vmatprep.subr.bf16.mxu1 %v30684_v24 }
 0x27b   :  { %16230 = vmatmul.mubr.msk.bf16.gmra.mrb[108].mxu0 %vm153_vm1, %v23685_v33  ;;  %16233 = vmatmul.mubr.msk.bf16.gmra.mrb[104].mxu1 %vm153_vm1, %v23660_v11 }
 0x27c   :  { %4125 = vmatprep.mubr.bf16.mxu1 %v30592_v7  ;;  %4206 = vmatprep.mubr.bf16.mxu0 %v30592_v7 }
 0x283   :  { %16234 = vmatmul.mubr.msk.bf16.gmra.mrb[108].mxu1 %vm153_vm1, %v23669_v34  ;;  %16241 = vmatmul.mubr.msk.bf16.vlgmr.msra.gmra.mrb[96].mxu0 %vm153_vm1, %v23696_v39 }
 0x284   :  { %4373 = vmatpush1.bf16.msra.mxu0 %v30685_v44  ;;  %4135 = vmatprep.mubr.bf16.mxu1 %v30592_v7  ;;  %v21116_v44 = vld [vmem:[%s30463_s1 + $0x14c] ss:$16 sps:$4 sm:$0xff]  }
 0x285   :  { %4216 = vmatprep.mubr.bf16.mxu0 %v30592_v7  ;;  %16250 = vmatprep.subr.msk.bf16.mxu0 %vm166_vm0, %v30686_v27  ;;  %v21117_v27 = vld [vmem:[%s30464_s0 + $0x88] ss:$0 sps:$4 sm:$0xff]  }
 0x288   :  { %4375 = vmatpush1.bf16.msra.mxu0 %v30687_v38 }
 0x289   :  { %4514 = vmatprep.subr.bf16.mxu0 %v30688_v32 }
 0x28b   :  { %16235 = vmatmul.mubr.msk.bf16.gmra.mrb[112].mxu1 %vm153_vm1, %v23685_v33  ;;  %16242 = vmatmul.mubr.msk.bf16.gmra.mrb[100].mxu0 %vm153_vm1, %v23710_v36 }
 0x28c   :  { %4226 = vmatprep.mubr.bf16.mxu0 %v30592_v7  ;;  %4277 = vmatprep.mubr.bf16.mxu1 %v30592_v7 }
 0x293   :  { %16243 = vmatmul.mubr.msk.bf16.gmra.mrb[104].mxu0 %vm153_vm1, %v23723_v2  ;;  %16246 = vmatmul.mubr.msk.bf16.vlgmr.msra.gmra.mrb[100].mxu1 %vm153_vm1, %v23696_v39 }
 0x294   :  { %4236 = vmatprep.mubr.bf16.mxu0 %v30592_v7  ;;  %4287 = vmatprep.mubr.bf16.mxu1 %v30592_v7 }
 0x295   :  { %4444 = vmatpush1.bf16.msra.mxu1 %v21105_v60 }
 0x296   :  { %v23734_v29 = vpop.f32.mrb[64].mxu0  ;;  %16255 = vmatprep.subr.msk.bf16.mxu1 %vm166_vm0, %v21106_v13  ;;  %v21118_v13 = vld [vmem:[%s30463_s1 + $0x140] ss:$16 sps:$4 sm:$0xff]  }
 0x297   :  { %v23740_v52 = vpop.f32.mrb[65].mxu0 }
 0x298   :  { %v23747_v55 = vpop.f32.mrb[66].mxu0 }
 0x299   :  { %v23749_v54 = vpop.f32.mrb[67].mxu0  ;;  %4446 = vmatpush1.bf16.msra.mxu1 %v23207_v15 }
 0x29a   :  { %4585 = vmatprep.subr.bf16.mxu1 %v21107_v46  ;;  %v19736_v46 = vld [vmem:[%s30466_s3 + $0x804] ss:$16 sps:$4 sm:$0xff]  }
 0x29b   :  { %16244 = vmatmul.mubr.msk.bf16.gmra.mrb[108].mxu0 %vm153_vm1, %v23745_v56  ;;  %16247 = vmatmul.mubr.msk.bf16.gmra.mrb[104].mxu1 %vm153_vm1, %v23710_v36 }
 0x29c   :  { %4297 = vmatprep.mubr.bf16.mxu1 %v30592_v7  ;;  %4404 = vmatprep.mubr.bf16.mxu0 %v30592_v7 }
 0x29e   :  { %v23761_v6 = vpop.f32.mrb[68].mxu0 }
 0x29f   :  { %v23763_v35 = vpop.f32.mrb[69].mxu0 }
 0x2a0   :  { %v23765_v15 = vpop.f32.mrb[70].mxu0 }
 0x2a1   :  { %v23767_v14 = vpop.f32.mrb[71].mxu0 }
 0x2a3   :  { %16248 = vmatmul.mubr.msk.bf16.gmra.mrb[108].mxu1 %vm153_vm1, %v23723_v2  ;;  %16251 = vmatmul.mubr.msk.bf16.vlgmr.msra.gmra.mrb[112].mxu0 %vm153_vm1, %v21108_v37 }
 0x2a4   :  { %4515 = vmatpush1.bf16.msra.mxu0 %v21109_v17  ;;  %4307 = vmatprep.mubr.bf16.mxu1 %v30592_v7  ;;  %v21120_v17 = vld [vmem:[%s30463_s1 + $0x148] ss:$16 sps:$4 sm:$0xff]  }
 0x2a5   :  { %4414 = vmatprep.mubr.bf16.mxu0 %v30592_v7  ;;  %16260 = vmatprep.subr.msk.bf16.mxu0 %vm166_vm0, %v21110_v47  ;;  %v21121_v47 = vld [vmem:[%s30463_s1 + $0x16c] ss:$16 sps:$4 sm:$0x7f]  }
 0x2a6   :  { %v23784_v63 = vpop.f32.mrb[72].mxu0  ;;  %v23786_v1 = vpop.f32.mrb[68].mxu1 }
 0x2a7   :  { %v23788_v21 = vpop.f32.mrb[73].mxu0  ;;  %v23790_v48 = vpop.f32.mrb[69].mxu1 }
 0x2a8   :  { %v23792_v18 = vpop.f32.mrb[74].mxu0  ;;  %v23794_v19 = vpop.f32.mrb[70].mxu1  ;;  %4517 = vmatpush1.bf16.msra.mxu0 %v23281_v28 }
 0x2a9   :  { %v23797_v26 = vpop.f32.mrb[75].mxu0  ;;  %v23799_v16 = vpop.f32.mrb[71].mxu1  ;;  %4656 = vmatprep.subr.bf16.mxu0 %v21111_v62  ;;  %v19739_v62 = vld [vmem:[%s30466_s3 + $0x824] ss:$16 sps:$4 sm:$0xff]  }
 0x2ab   :  { %16249 = vmatmul.mubr.msk.bf16.gmra.mrb[112].mxu1 %vm153_vm1, %v23745_v56  ;;  %16252 = vmatmul.mubr.msk.bf16.gmra.mrb[116].mxu0 %vm153_vm1, %v21112_v50 }
 0x2ac   :  { %4424 = vmatprep.mubr.bf16.mxu0 %v30592_v7  ;;  %4475 = vmatprep.mubr.bf16.mxu1 %v30592_v7 }
 0x2ae   :  { %v23812_v28 = vpop.f32.mrb[76].mxu0  ;;  %v23814_v0 = vpop.f32.mrb[72].mxu1 }
 0x2af   :  { %v23816_v25 = vpop.f32.mrb[77].mxu0  ;;  %v23818_v5 = vpop.f32.mrb[73].mxu1 }
 0x2b0   :  { %v3108_v10 = vpop.f32.mrb[78].mxu0  ;;  %v23820_v8 = vpop.f32.mrb[74].mxu1 }
 0x2b1   :  { %v3109_v9 = vpop.f32.mrb[79].mxu0  ;;  %v23822_v3 = vpop.f32.mrb[75].mxu1  ;;  %v19743_v10 = vld [vmem:[%s30466_s3 + $0x860] ss:$16 sps:$4 sm:$0xff]  }
 0x2b2   :  { %v19748_v9 = vld [vmem:[%s30466_s3 + $0x884] ss:$16 sps:$4 sm:$0xff]  }
 0x2b3   :  { %16253 = vmatmul.mubr.msk.bf16.gmra.mrb[120].mxu0 %vm153_vm1, %v21113_v49  ;;  %16256 = vmatmul.mubr.msk.bf16.vlgmr.msra.gmra.mrb[116].mxu1 %vm153_vm1, %v21108_v37  ;;  %v21119_v37 = vld [vmem:[%s30463_s1 + $0x164] ss:$16 sps:$4 sm:$0x7f]  }
 0x2b4   :  { %4434 = vmatprep.mubr.bf16.mxu0 %v30592_v7  ;;  %4485 = vmatprep.mubr.bf16.mxu1 %v30592_v7 }
 0x2b5   :  { %4586 = vmatpush1.bf16.msra.mxu1 %v21114_v53  ;;  %v19754_v53 = vld [vmem:[%s30466_s3 + $0x8a4] ss:$16 sps:$4 sm:$0xff]  }
 0x2b6   :  { %v23834_v41 = vpop.f32.mrb[76].mxu1  ;;  %16265 = vmatprep.subr.msk.bf16.mxu1 %vm166_vm0, %v21115_v59  ;;  %v19757_v59 = vld [vmem:[%s30466_s3 + $0x82c] ss:$16 sps:$4 sm:$0xff]  }
 0x2b7   :  { %v23840_v20 = vpop.f32.mrb[77].mxu1 }
 0x2b8   :  { %v23842_v40 = vpop.f32.mrb[78].mxu1 }
 0x2b9   :  { %30689 = vst [vmem:[#allocation6_spill] sm:$0xff] %v23842_v40  ;;  %v23844_v24 = vpop.f32.mrb[79].mxu1  ;;  %4588 = vmatpush1.bf16.msra.mxu1 %v23380_v4  ;;  %v19824_v40 = vld [vmem:[%s30466_s3 + $0xa20] ss:$16 sps:$4 sm:$0xff]  }
 0x2ba   :  { %30690 = vst [vmem:[#allocation28_spill] sm:$0xff] %v23844_v24  ;;  %4727 = vmatprep.subr.bf16.mxu1 %v21116_v44  ;;  %v19752_v44 = vld [vmem:[%s30466_s3 + $0x8a0] ss:$16 sps:$4 sm:$0xff]  }
 0x2bb   :  { %16254 = vmatmul.mubr.msk.bf16.gmra.mrb[124].mxu0 %vm153_vm1, %v21117_v27  ;;  %16257 = vmatmul.mubr.msk.bf16.gmra.mrb[120].mxu1 %vm153_vm1, %v21112_v50  ;;  %v19745_v50 = vld [vmem:[%s30466_s3 + $0x864] ss:$16 sps:$4 sm:$0xff]  }
 0x2bc   :  { %4495 = vmatprep.mubr.bf16.mxu1 %v30592_v7  ;;  %4546 = vmatprep.mubr.bf16.mxu0 %v30592_v7 }
 0x2be   :  { %v23857_v38 = vpop.f32.mrb[80].mxu1 }
 0x2bf   :  { %30691 = vst [vmem:[#allocation7_spill] sm:$0xff] %v23857_v38  ;;  %v23859_v4 = vpop.f32.mrb[81].mxu1  ;;  %v5028_v38 = vld [vmem:[#allocation3 + $0x28] sm:$0xff] }
 0x2c0   :  { %30692 = vst [vmem:[#allocation29_spill] sm:$0xff] %v23859_v4  ;;  %v3179_v32 = vpop.f32.mrb[82].mxu1  ;;  %v5036_v4 = vld [vmem:[#allocation3 + $0x68] sm:$0xf] }
 0x2c1   :  { %v3180_v60 = vpop.f32.mrb[83].mxu1  ;;  %v19760_v32 = vld [vmem:[%s30466_s3 + $0x8c4] ss:$16 sps:$4 sm:$0xff]  }
 0x2c2   :  { %v19763_v60 = vld [vmem:[%s30466_s3 + $0x84c] ss:$16 sps:$4 sm:$0xff]  }
 0x2c3   :  { %16258 = vmatmul.mubr.msk.bf16.gmra.mrb[124].mxu1 %vm153_vm1, %v21113_v49  ;;  %16261 = vmatmul.mubr.msk.bf16.vlgmr.msra.gmra.mrb[112].mxu0 %vm153_vm1, %v23644_v42  ;;  %v19749_v49 = vld [vmem:[%s30466_s3 + $0x808] ss:$16 sps:$4 sm:$0xff]  }
 0x2c4   :  { %4657 = vmatpush1.bf16.msra.mxu0 %v21118_v13  ;;  %4505 = vmatprep.mubr.bf16.mxu1 %v30592_v7 }
 0x2c5   :  { %4556 = vmatprep.mubr.bf16.mxu0 %v30592_v7  ;;  %16270 = vmatprep.subr.msk.bf16.mxu0 %vm166_vm0, %v21119_v37 }
 0x2c8   :  { %4659 = vmatpush1.bf16.msra.mxu0 %v23441_v45  ;;  %v19751_v45 = vld [vmem:[%s30466_s3 + $0x80c] ss:$16 sps:$4 sm:$0xff]  }
 0x2c9   :  { %5952 = vmatprep.subr.bf16.mxu0 %v19736_v46  ;;  %v19761_v46 = vld [vmem:[%s30466_s3 + $0x848] ss:$16 sps:$4 sm:$0xff]  }
 0x2cb   :  { %16259 = vmatmul.mubr.msk.bf16.gmra.mrb[128].mxu1 %vm153_vm1, %v21117_v27  ;;  %16262 = vmatmul.mubr.msk.bf16.gmra.mrb[116].mxu0 %vm153_vm1, %v23660_v11  ;;  %v19755_v27 = vld [vmem:[%s30466_s3 + $0x828] ss:$16 sps:$4 sm:$0xff]  }
 0x2cc   :  { %4566 = vmatprep.mubr.bf16.mxu0 %v30592_v7  ;;  %4617 = vmatprep.mubr.bf16.mxu1 %v30592_v7 }
 0x2d3   :  { %16263 = vmatmul.mubr.msk.bf16.gmra.mrb[120].mxu0 %vm153_vm1, %v23669_v34  ;;  %16266 = vmatmul.mubr.msk.bf16.vlgmr.msra.gmra.mrb[116].mxu1 %vm153_vm1, %v23644_v42  ;;  %v19734_v42 = vld [vmem:[%s30466_s3 + $0x800] ss:$16 sps:$4 sm:$0xff]  }
 0x2d4   :  { %4576 = vmatprep.mubr.bf16.mxu0 %v30592_v7  ;;  %4627 = vmatprep.mubr.bf16.mxu1 %v30592_v7 }
 0x2d5   :  { %4728 = vmatpush1.bf16.msra.mxu1 %v21120_v17  ;;  %v19766_v17 = vld [vmem:[%s30466_s3 + $0x8e4] ss:$16 sps:$4 sm:$0xff]  }
 0x2d6   :  { %16275 = vmatprep.subr.msk.bf16.mxu1 %vm166_vm0, %v21121_v47 }
 0x2d9   :  { %4730 = vmatpush1.bf16.msra.mxu1 %v23471_v12  ;;  %v19737_v12 = vld [vmem:[%s30466_s3 + $0x820] ss:$16 sps:$4 sm:$0xff]  }
 0x2da   :  { %6094 = vmatprep.subr.bf16.mxu1 %v19751_v45 }
 0x2db   :  { %16264 = vmatmul.mubr.msk.bf16.gmra.mrb[124].mxu0 %vm153_vm1, %v23685_v33  ;;  %16267 = vmatmul.mubr.msk.bf16.gmra.mrb[120].mxu1 %vm153_vm1, %v23660_v11  ;;  %v19742_v11 = vld [vmem:[%s30466_s3 + $0x844] ss:$16 sps:$4 sm:$0xff]  }
 0x2dc   :  { %4637 = vmatprep.mubr.bf16.mxu1 %v30592_v7  ;;  %4688 = vmatprep.mubr.bf16.mxu0 %v30592_v7 }
 0x2e3   :  { %16268 = vmatmul.mubr.msk.bf16.gmra.mrb[124].mxu1 %vm153_vm1, %v23669_v34  ;;  %16271 = vmatmul.mubr.msk.bf16.vlgmr.msra.gmra.mrb[112].mxu0 %vm153_vm1, %v23696_v39  ;;  %v19740_v34 = vld [vmem:[%s30466_s3 + $0x840] ss:$16 sps:$4 sm:$0xff]  }
 0x2e4   :  { %5953 = vmatpush1.bf16.msra.mxu0 %v19734_v42  ;;  %4647 = vmatprep.mubr.bf16.mxu1 %v30592_v7 }
 0x2e5   :  { %5954 = vmatprep.subr.bf16.mxu0 %v19739_v62  ;;  %4698 = vmatprep.mubr.bf16.mxu0 %v30592_v7  ;;  %v19769_v62 = vld [vmem:[%s30466_s3 + $0x86c] ss:$16 sps:$4 sm:$0xff]  }
 0x2e8   :  { %5955 = vmatpush1.bf16.msra.mxu0 %v19737_v12  ;;  %v19791_v12 = vld [vmem:[%s30466_s3 + $0x8e8] ss:$16 sps:$4 sm:$0xff]  }
 0x2e9   :  { %5956 = vmatprep.subr.bf16.mxu0 %v19742_v11 }
 0x2eb   :  { %16269 = vmatmul.mubr.msk.bf16.gmra.mrb[128].mxu1 %vm153_vm1, %v23685_v33  ;;  %16272 = vmatmul.mubr.msk.bf16.gmra.mrb[116].mxu0 %vm153_vm1, %v23710_v36  ;;  %v19746_v33 = vld [vmem:[%s30466_s3 + $0x880] ss:$16 sps:$4 sm:$0xff]  }
 0x2ec   :  { %5957 = vmatpush1.bf16.msra.mxu0 %v19740_v34  ;;  %4708 = vmatprep.mubr.bf16.mxu0 %v30592_v7  ;;  %v19823_v34 = vld [vmem:[%s30466_s3 + $0x98c] ss:$16 sps:$4 sm:$0xff]  }
 0x2ed   :  { %5958 = vmatprep.subr.bf16.mxu0 %v19745_v50  ;;  %4759 = vmatprep.mubr.bf16.mxu1 %v30592_v7  ;;  %v19764_v50 = vld [vmem:[%s30466_s3 + $0x8e0] ss:$16 sps:$4 sm:$0xff]  }
 0x2f0   :  { %5959 = vmatpush1.bf16.msra.mxu0 %v19743_v10  ;;  %v19767_v10 = vld [vmem:[%s30466_s3 + $0x868] ss:$16 sps:$4 sm:$0xff]  }
 0x2f1   :  { %5960 = vmatprep.subr.bf16.mxu0 %v19748_v9  ;;  %v19772_v9 = vld [vmem:[%s30466_s3 + $0x904] ss:$16 sps:$4 sm:$0xff]  }
 0x2f3   :  { %16273 = vmatmul.mubr.msk.bf16.gmra.mrb[120].mxu0 %vm153_vm1, %v23723_v2  ;;  %16276 = vmatmul.mubr.msk.bf16.vlgmr.msra.gmra.mrb[116].mxu1 %vm153_vm1, %v23696_v39  ;;  %v19758_v39 = vld [vmem:[%s30466_s3 + $0x8c0] ss:$16 sps:$4 sm:$0xff]  }
 0x2f4   :  { %5961 = vmatpush1.bf16.msra.mxu0 %v19746_v33  ;;  %6095 = vmatpush1.bf16.msra.mxu1 %v19749_v49  ;;  %v19775_v33 = vld [vmem:[%s30466_s3 + $0x88c] ss:$16 sps:$4 sm:$0xff]  }
 0x2f5   :  { %5962 = vmatprep.subr.bf16.mxu0 %v19754_v53  ;;  %6096 = vmatprep.subr.bf16.mxu1 %v19757_v59  ;;  %v21122_v49 = vld [vmem:[#allocation3 + $0x8] sm:$0xff] }
 0x2f6   :  { %v23969_v13 = vpop.f32.mrb[80].mxu0  ;;  %4718 = vmatprep.mubr.bf16.mxu0 %v30592_v7  ;;  %4769 = vmatprep.mubr.bf16.mxu1 %v30592_v7  ;;  %v19773_v59 = vld [vmem:[%s30466_s3 + $0x888] ss:$16 sps:$4 sm:$0xff]  }
 0x2f7   :  { %v23981_v45 = vpop.f32.mrb[81].mxu0 }
 0x2f8   :  { %5963 = vmatpush1.bf16.msra.mxu0 %v19752_v44  ;;  %6097 = vmatpush1.bf16.msra.mxu1 %v19755_v27  ;;  %v23988_v42 = vpop.f32.mrb[82].mxu0 }
 0x2f9   :  { %v23995_v11 = vpop.f32.mrb[83].mxu0  ;;  %5964 = vmatprep.subr.bf16.mxu0 %v19760_v32  ;;  %6098 = vmatprep.subr.bf16.mxu1 %v19763_v60  ;;  %v19778_v32 = vld [vmem:[%s30466_s3 + $0x924] ss:$16 sps:$4 sm:$0xff]   ;;  %v19781_v60 = vld [vmem:[%s30466_s3 + $0x8ac] ss:$16 sps:$4 sm:$0xff]  }
 0x2fb   :  { %16274 = vmatmul.mubr.msk.bf16.gmra.mrb[124].mxu0 %vm153_vm1, %v23745_v56  ;;  %16277 = vmatmul.mubr.msk.bf16.gmra.mrb[120].mxu1 %vm153_vm1, %v23710_v36  ;;  %v19770_v36 = vld [vmem:[%s30466_s3 + $0x900] ss:$16 sps:$4 sm:$0xff]  }
 0x2fc   :  { %5965 = vmatpush1.bf16.msra.mxu0 %v19758_v39  ;;  %6099 = vmatpush1.bf16.msra.mxu1 %v19761_v46  ;;  %v19788_v39 = vld [vmem:[%s30466_s3 + $0x960] ss:$16 sps:$4 sm:$0xff]  }
 0x2fd   :  { %5984 = vmatprep.mubr.bf16.mxu0 %v21122_v49  ;;  %5966 = vmatprep.subr.bf16.mxu0 %v19766_v17 }
 0x2fe   :  { %v24015_v53 = vpop.f32.mrb[84].mxu0  ;;  %6100 = vmatprep.subr.bf16.mxu1 %v19769_v62  ;;  %4779 = vmatprep.mubr.bf16.mxu1 %v30592_v7 }
 0x2ff   :  { %v24026_v27 = vpop.f32.mrb[85].mxu0 }
 0x300   :  { %5967 = vmatpush1.bf16.msra.mxu0 %v19764_v50  ;;  %6101 = vmatpush1.bf16.msra.mxu1 %v19767_v10  ;;  %v24036_v46 = vpop.f32.mrb[86].mxu0  ;;  %v19779_v50 = vld [vmem:[%s30466_s3 + $0x8a8] ss:$16 sps:$4 sm:$0xff]   ;;  %v19784_v10 = vld [vmem:[%s30466_s3 + $0x944] ss:$16 sps:$4 sm:$0xff]  }
 0x301   :  { %v24040_v62 = vpop.f32.mrb[87].mxu0  ;;  %5968 = vmatprep.subr.bf16.mxu0 %v19772_v9  ;;  %6102 = vmatprep.subr.bf16.mxu1 %v19775_v33  ;;  %v19787_v9 = vld [vmem:[%s30466_s3 + $0x8cc] ss:$16 sps:$4 sm:$0xff]  }
 0x303   :  { %16278 = vmatmul.mubr.msk.bf16.gmra.mrb[124].mxu1 %vm153_vm1, %v23723_v2  ;;  %v19782_v2 = vld [vmem:[%s30466_s3 + $0x940] ss:$16 sps:$4 sm:$0xff]  }
 0x304   :  { %5969 = vmatpush1.bf16.msra.mxu0 %v19770_v36  ;;  %6103 = vmatpush1.bf16.msra.mxu1 %v19773_v59  ;;  %v19793_v59 = vld [vmem:[%s30466_s3 + $0x8ec] ss:$16 sps:$4 sm:$0xff]  }
 0x305   :  { %5970 = vmatprep.subr.bf16.mxu0 %v19778_v32  ;;  %6104 = vmatprep.subr.bf16.mxu1 %v19781_v60 }
 0x306   :  { %v24058_v33 = vpop.f32.mrb[88].mxu0  ;;  %v24060_v31 = vpop.f32.mrb[84].mxu1  ;;  %4789 = vmatprep.mubr.bf16.mxu1 %v30592_v7 }
 0x307   :  { %v24073_v32 = vpop.f32.mrb[89].mxu0  ;;  %v24075_v60 = vpop.f32.mrb[85].mxu1 }
 0x308   :  { %5971 = vmatpush1.bf16.msra.mxu0 %v19776_v22  ;;  %6105 = vmatpush1.bf16.msra.mxu1 %v19779_v50  ;;  %v24084_v36 = vpop.f32.mrb[90].mxu0  ;;  %v24086_v44 = vpop.f32.mrb[86].mxu1 }
 0x309   :  { %v24095_v17 = vpop.f32.mrb[91].mxu0  ;;  %v24097_v47 = vpop.f32.mrb[87].mxu1  ;;  %5972 = vmatprep.subr.bf16.mxu0 %v19784_v10  ;;  %6106 = vmatprep.subr.bf16.mxu1 %v19787_v9  ;;  %v19796_v10 = vld [vmem:[%s30466_s3 + $0x984] ss:$16 sps:$4 sm:$0xff]   ;;  %v19799_v9 = vld [vmem:[%s30466_s3 + $0x90c] ss:$16 sps:$4 sm:$0xff]  }
 0x30b   :  { %16279 = vmatmul.mubr.msk.bf16.gmra.mrb[128].mxu1 %vm153_vm1, %v23745_v56  ;;  %v19794_v56 = vld [vmem:[%s30466_s3 + $0x980] ss:$16 sps:$4 sm:$0xff]  }
 0x30c   :  { %5973 = vmatpush1.bf16.msra.mxu0 %v19782_v2  ;;  %6107 = vmatpush1.bf16.msra.mxu1 %v19785_v58  ;;  %v19797_v58 = vld [vmem:[%s30466_s3 + $0x908] ss:$16 sps:$4 sm:$0xff]  }
 0x30d   :  { %6126 = vmatprep.mubr.bf16.mxu1 %v21122_v49  ;;  %5974 = vmatprep.subr.bf16.mxu0 %v19790_v61 }
 0x30e   :  { %v24117_v50 = vpop.f32.mrb[92].mxu0  ;;  %v24119_v22 = vpop.f32.mrb[88].mxu1  ;;  %6108 = vmatprep.subr.bf16.mxu1 %v19793_v59 }
 0x30f   :  { %v24125_v61 = vpop.f32.mrb[93].mxu0  ;;  %v24127_v49 = vpop.f32.mrb[89].mxu1 }
 0x310   :  { %5975 = vmatpush1.bf16.msra.mxu0 %v19788_v39  ;;  %6109 = vmatpush1.bf16.msra.mxu1 %v19791_v12  ;;  %v3730_v37 = vpop.f32.mrb[94].mxu0  ;;  %v24133_v59 = vpop.f32.mrb[90].mxu1  ;;  %v19805_v12 = vld [vmem:[%s30466_s3 + $0x92c] ss:$16 sps:$4 sm:$0xff]  }
 0x311   :  { %v3731_v2 = vpop.f32.mrb[95].mxu0  ;;  %v24143_v7 = vpop.f32.mrb[91].mxu1  ;;  %5976 = vmatprep.subr.bf16.mxu0 %v19796_v10  ;;  %6110 = vmatprep.subr.bf16.mxu1 %v19799_v9  ;;  %v19802_v37 = vld [vmem:[%s30466_s3 + $0x9a4] ss:$16 sps:$4 sm:$0xff]   ;;  %v19803_v10 = vld [vmem:[%s30466_s3 + $0x928] ss:$16 sps:$4 sm:$0xff]  }
 0x312   :  { %v19800_v2 = vld [vmem:[%s30466_s3 + $0x9a0] ss:$16 sps:$4 sm:$0xff]   ;;  %v19808_v9 = vld [vmem:[%s30466_s3 + $0x9c4] ss:$16 sps:$4 sm:$0xff]   ;;  %v19811_v39 = vld [vmem:[%s30466_s3 + $0x94c] ss:$16 sps:$4 sm:$0xff]  }
 0x314   :  { %5977 = vmatpush1.bf16.msra.mxu0 %v19794_v56  ;;  %6111 = vmatpush1.bf16.msra.mxu1 %v19797_v58  ;;  %v19812_v58 = vld [vmem:[%s30466_s3 + $0x9e0] ss:$16 sps:$4 sm:$0xff]  }
 0x315   :  { %5978 = vmatprep.subr.bf16.mxu0 %v19802_v37  ;;  %6112 = vmatprep.subr.bf16.mxu1 %v19805_v12  ;;  %v19806_v12 = vld [vmem:[%s30466_s3 + $0x9c0] ss:$16 sps:$4 sm:$0xff]  }
 0x316   :  { %v24165_v56 = vpop.f32.mrb[92].mxu1 }
 0x317   :  { %v24169_v57 = vpop.f32.mrb[93].mxu1 }
 0x318   :  { %5979 = vmatpush1.bf16.msra.mxu0 %v19800_v2  ;;  %6113 = vmatpush1.bf16.msra.mxu1 %v19803_v10  ;;  %v24173_v37 = vpop.f32.mrb[94].mxu1  ;;  %v19814_v2 = vld [vmem:[%s30466_s3 + $0x9e4] ss:$16 sps:$4 sm:$0xff]   ;;  %v19817_v10 = vld [vmem:[%s30466_s3 + $0x96c] ss:$16 sps:$4 sm:$0xff]  }
 0x319   :  { %30693 = vst [vmem:[#allocation8_spill] sm:$0xff] %v24173_v37  ;;  %v24183_v43 = vpop.f32.mrb[95].mxu1  ;;  %5980 = vmatprep.subr.bf16.mxu0 %v19808_v9  ;;  %6114 = vmatprep.subr.bf16.mxu1 %v19811_v39  ;;  %v19815_v39 = vld [vmem:[%s30466_s3 + $0x968] ss:$16 sps:$4 sm:$0xff]   ;;  %v19820_v9 = vld [vmem:[%s30466_s3 + $0xa04] ss:$16 sps:$4 sm:$0xff]  }
 0x31a   :  { %30694 = vst [vmem:[#allocation30_spill] sm:$0xff] %v24183_v43  ;;  %v5023_v37 = vld [vmem:[#allocation3] sm:$0xff]  ;;  %v19839_v43 = vld [vmem:[%s30466_s3 + $0x9e8] ss:$16 sps:$4 sm:$0xff]  }
 0x31c   :  { %5981 = vmatpush1.bf16.msra.mxu0 %v19806_v12  ;;  %6115 = vmatpush1.bf16.msra.mxu1 %v19809_v51  ;;  %v19818_v51 = vld [vmem:[%s30466_s3 + $0xa00] ss:$16 sps:$4 sm:$0xff]  }
 0x31d   :  { %5982 = vmatprep.subr.bf16.mxu0 %v19814_v2  ;;  %6116 = vmatprep.subr.bf16.mxu1 %v19817_v10  ;;  %v19821_v2 = vld [vmem:[%s30466_s3 + $0x988] ss:$16 sps:$4 sm:$0xff]   ;;  %v19826_v10 = vld [vmem:[%s30466_s3 + $0xa24] ss:$16 sps:$4 sm:$0xff]  }
 0x31e   :  { %v24205_v12 = vpop.f32.mrb[96].mxu1 }
 0x31f   :  { %30695 = vst [vmem:[#allocation9_spill] sm:$0xff] %v24205_v12  ;;  %v24212_v23 = vpop.f32.mrb[97].mxu1 }
 0x320   :  { %30696 = vst [vmem:[#allocation39_spill] sm:$0xff] %v24212_v23  ;;  %5983 = vmatpush1.bf16.msra.mxu0 %v19812_v58  ;;  %6117 = vmatpush1.bf16.msra.mxu1 %v19815_v39  ;;  %v3801_v24 = vpop.f32.mrb[98].mxu1  ;;  %v19827_v58 = vld [vmem:[%s30466_s3 + $0x9a8] ss:$16 sps:$4 sm:$0xff]   ;;  %v19830_v39 = vld [vmem:[%s30466_s3 + $0xa40] ss:$16 sps:$4 sm:$0xff]  }
 0x321   :  { %v3802_v12 = vpop.f32.mrb[99].mxu1  ;;  %6023 = vmatprep.subr.bf16.mxu0 %v19820_v9  ;;  %6118 = vmatprep.subr.bf16.mxu1 %v19823_v34  ;;  %v19832_v24 = vld [vmem:[%s30466_s3 + $0xa44] ss:$16 sps:$4 sm:$0xff]   ;;  %v19835_v34 = vld [vmem:[%s30466_s3 + $0x9cc] ss:$16 sps:$4 sm:$0xff]  }
 0x322   :  { %v19833_v9 = vld [vmem:[%s30466_s3 + $0x9c8] ss:$16 sps:$4 sm:$0xff]   ;;  %v19838_v12 = vld [vmem:[%s30466_s3 + $0xa64] ss:$16 sps:$4 sm:$0xff]  }
 0x323   :  { %5985 = vmatmul.mubr.bf16.vlgmr.msra.gmra.mrb[128].mxu0 %v5023_v37  ;;  %v19845_v23 = vld [vmem:[%s30466_s3 + $0xa08] ss:$16 sps:$4 sm:$0xff]  }
 0x324   :  { %5994 = vmatprep.mubr.bf16.mxu0 %v5028_v38  ;;  %6024 = vmatpush1.bf16.msra.mxu0 %v19818_v51  ;;  %v5027_v51 = vld [vmem:[#allocation3 + $0x20] sm:$0xff] }
 0x325   :  { %6119 = vmatpush1.bf16.msra.mxu1 %v19821_v2  ;;  %6025 = vmatprep.subr.bf16.mxu0 %v19826_v10  ;;  %v19841_v2 = vld [vmem:[%s30466_s3 + $0x9ec] ss:$16 sps:$4 sm:$0xff]   ;;  %v19836_v10 = vld [vmem:[%s30466_s3 + $0xa60] ss:$16 sps:$4 sm:$0xff]  }
 0x326   :  { %6120 = vmatprep.subr.bf16.mxu1 %v19829_v30  ;;  %v5032_v30 = vld [vmem:[#allocation3 + $0x48] sm:$0xff] }
 0x328   :  { %6026 = vmatpush1.bf16.msra.mxu0 %v19824_v40  ;;  %v19844_v40 = vld [vmem:[%s30466_s3 + $0xa84] ss:$16 sps:$4 sm:$0xff]  }
 0x329   :  { %6121 = vmatpush1.bf16.msra.mxu1 %v19827_v58  ;;  %6027 = vmatprep.subr.bf16.mxu0 %v19832_v24  ;;  %v19847_v58 = vld [vmem:[%s30466_s3 + $0xa0c] ss:$16 sps:$4 sm:$0xff]   ;;  %v19842_v24 = vld [vmem:[%s30466_s3 + $0xa80] ss:$16 sps:$4 sm:$0xff]  }
 0x32a   :  { %6122 = vmatprep.subr.bf16.mxu1 %v19835_v34  ;;  %v5031_v34 = vld [vmem:[#allocation3 + $0x40] sm:$0xff] }
 0x32b   :  { %5995 = vmatmul.mubr.bf16.gmra.mrb[132].mxu0 %v5027_v51 }
 0x32c   :  { %6004 = vmatprep.mubr.bf16.mxu0 %v5032_v30  ;;  %6028 = vmatpush1.bf16.msra.mxu0 %v19830_v39  ;;  %v19850_v39 = vld [vmem:[%s30466_s3 + $0xaa4] ss:$16 sps:$4 sm:$0xff]  }
 0x32d   :  { %6123 = vmatpush1.bf16.msra.mxu1 %v19833_v9  ;;  %6029 = vmatprep.subr.bf16.mxu0 %v19838_v12  ;;  %v19853_v9 = vld [vmem:[%s30466_s3 + $0xa2c] ss:$16 sps:$4 sm:$0xff]   ;;  %v19848_v12 = vld [vmem:[%s30466_s3 + $0xaa0] ss:$16 sps:$4 sm:$0xff]  }
 0x32e   :  { %6124 = vmatprep.subr.bf16.mxu1 %v19841_v2  ;;  %v19851_v2 = vld [vmem:[%s30466_s3 + $0xa28] ss:$16 sps:$4 sm:$0xff]  }
 0x330   :  { %6030 = vmatpush1.bf16.msra.mxu0 %v19836_v10  ;;  %v19859_v10 = vld [vmem:[%s30466_s3 + $0xa4c] ss:$16 sps:$4 sm:$0xff]  }
 0x331   :  { %6125 = vmatpush1.bf16.msra.mxu1 %v19839_v43  ;;  %6031 = vmatprep.subr.bf16.mxu0 %v19844_v40  ;;  %v19856_v43 = vld [vmem:[%s30466_s3 + $0xac4] ss:$16 sps:$4 sm:$0xff]   ;;  %v5035_v40 = vld [vmem:[#allocation3 + $0x60] sm:$0xf] }
 0x332   :  { %6165 = vmatprep.subr.bf16.mxu1 %v19847_v58  ;;  %v19857_v58 = vld [vmem:[%s30466_s3 + $0xa48] ss:$16 sps:$4 sm:$0xff]  }
 0x333   :  { %6005 = vmatmul.mubr.bf16.gmra.mrb[136].mxu0 %v5031_v34 }
 0x334   :  { %6127 = vmatmul.mubr.bf16.vlgmr.msra.gmra.mrb[132].mxu1 %v5023_v37  ;;  %6014 = vmatprep.mubr.bf16.mxu0 %v5036_v4  ;;  %v19854_v37 = vld [vmem:[%s30466_s3 + $0xac0] ss:$16 sps:$4 sm:$0xff]  }
 0x335   :  { %6032 = vmatpush1.bf16.msra.mxu0 %v19842_v24  ;;  %6136 = vmatprep.mubr.bf16.mxu1 %v5028_v38  ;;  %v19862_v38 = vld [vmem:[%s30466_s3 + $0xae4] ss:$16 sps:$4 sm:$0xff]   ;;  %v5026_v24 = vld [vmem:[#allocation3 + $0x18] sm:$0xff] }
 0x336   :  { %6166 = vmatpush1.bf16.msra.mxu1 %v19845_v23  ;;  %6033 = vmatprep.subr.bf16.mxu0 %v19850_v39  ;;  %v19865_v23 = vld [vmem:[%s30466_s3 + $0xa6c] ss:$16 sps:$4 sm:$0xff]   ;;  %v19860_v39 = vld [vmem:[%s30466_s3 + $0xae0] ss:$16 sps:$4 sm:$0xff]  }
 0x337   :  { %6167 = vmatprep.subr.bf16.mxu1 %v19853_v9  ;;  %v19863_v9 = vld [vmem:[%s30466_s3 + $0xa68] ss:$16 sps:$4 sm:$0xff]  }
 0x339   :  { %6034 = vmatpush1.bf16.msra.mxu0 %v19848_v12  ;;  %v19868_v12 = vld [vmem:[%s30466_s3 + $0xb04] ss:$16 sps:$4 sm:$0xff]  }
 0x33a   :  { %6168 = vmatpush1.bf16.msra.mxu1 %v19851_v2  ;;  %6035 = vmatprep.subr.bf16.mxu0 %v19856_v43  ;;  %v19871_v2 = vld [vmem:[%s30466_s3 + $0xa8c] ss:$16 sps:$4 sm:$0xff]   ;;  %v19869_v43 = vld [vmem:[%s30466_s3 + $0xa88] ss:$16 sps:$4 sm:$0xff]  }
 0x33b   :  { %6015 = vmatmul.mubr.bf16.gmra.mrb[140].mxu0 %v5035_v40  ;;  %6169 = vmatprep.subr.bf16.mxu1 %v19859_v10  ;;  %v19874_v10 = vld [vmem:[%s30466_s3 + $0xb24] ss:$16 sps:$4 sm:$0xff]  }
 0x33c   :  { %6137 = vmatmul.mubr.bf16.gmra.mrb[136].mxu1 %v5027_v51  ;;  %6055 = vmatprep.mubr.bf16.mxu0 %v5026_v24  ;;  %v19866_v51 = vld [vmem:[%s30466_s3 + $0xb00] ss:$16 sps:$4 sm:$0xff]  }
 0x33d   :  { %6036 = vmatpush1.bf16.msra.mxu0 %v19854_v37  ;;  %6146 = vmatprep.mubr.bf16.mxu1 %v5032_v30  ;;  %v19877_v30 = vld [vmem:[%s30466_s3 + $0xaac] ss:$16 sps:$4 sm:$0xff]   ;;  %v19872_v37 = vld [vmem:[%s30466_s3 + $0xb20] ss:$16 sps:$4 sm:$0xff]  }
 0x33e   :  { %6170 = vmatpush1.bf16.msra.mxu1 %v19857_v58  ;;  %6037 = vmatprep.subr.bf16.mxu0 %v19862_v38  ;;  %v19875_v58 = vld [vmem:[%s30466_s3 + $0xaa8] ss:$16 sps:$4 sm:$0xff]   ;;  %v19880_v38 = vld [vmem:[%s30466_s3 + $0xb44] ss:$16 sps:$4 sm:$0xff]  }
 0x33f   :  { %6171 = vmatprep.subr.bf16.mxu1 %v19865_v23  ;;  %v19883_v23 = vld [vmem:[%s30466_s3 + $0xacc] ss:$16 sps:$4 sm:$0xff]  }
 0x341   :  { %6038 = vmatpush1.bf16.msra.mxu0 %v19860_v39  ;;  %v19881_v39 = vld [vmem:[%s30466_s3 + $0xac8] ss:$16 sps:$4 sm:$0xff]  }
 0x342   :  { %6172 = vmatpush1.bf16.msra.mxu1 %v19863_v9  ;;  %6039 = vmatprep.subr.bf16.mxu0 %v19868_v12  ;;  %v19889_v9 = vld [vmem:[%s30466_s3 + $0xaec] ss:$16 sps:$4 sm:$0xff]   ;;  %v19884_v12 = vld [vmem:[%s30466_s3 + $0xb60] ss:$16 sps:$4 sm:$0xff]  }
 0x343   :  { %6173 = vmatprep.subr.bf16.mxu1 %v19871_v2  ;;  %v19887_v2 = vld [vmem:[%s30466_s3 + $0xae8] ss:$16 sps:$4 sm:$0xff]  }
 0x344   :  { %6147 = vmatmul.mubr.bf16.gmra.mrb[140].mxu1 %v5031_v34  ;;  %v19878_v34 = vld [vmem:[%s30466_s3 + $0xb40] ss:$16 sps:$4 sm:$0xff]  }
 0x345   :  { %6040 = vmatpush1.bf16.msra.mxu0 %v19866_v51  ;;  %6156 = vmatprep.mubr.bf16.mxu1 %v5036_v4  ;;  %v19886_v4 = vld [vmem:[%s30466_s3 + $0xb64] ss:$16 sps:$4 sm:$0xff]  }
 0x346   :  { %6174 = vmatpush1.bf16.msra.mxu1 %v19869_v43  ;;  %6041 = vmatprep.subr.bf16.mxu0 %v19874_v10  ;;  %v19892_v51 = vld [vmem:[%s30466_s3 + $0xb84] ss:$16 sps:$4 sm:$0xff]   ;;  %v19893_v43 = vld [vmem:[%s30466_s3 + $0xb08] ss:$16 sps:$4 sm:$0xff]  }
 0x347   :  { %6175 = vmatprep.subr.bf16.mxu1 %v19877_v30  ;;  %v19898_v10 = vld [vmem:[%s30466_s3 + $0xba4] ss:$16 sps:$4 sm:$0xff]   ;;  %v19901_v30 = vld [vmem:[%s30466_s3 + $0xb2c] ss:$16 sps:$4 sm:$0xff]  }
 0x349   :  { %6042 = vmatpush1.bf16.msra.mxu0 %v19872_v37  ;;  %v19896_v37 = vld [vmem:[%s30466_s3 + $0xba0] ss:$16 sps:$4 sm:$0xff]  }
 0x34a   :  { %6176 = vmatpush1.bf16.msra.mxu1 %v19875_v58  ;;  %6043 = vmatprep.subr.bf16.mxu0 %v19880_v38  ;;  %v19899_v58 = vld [vmem:[%s30466_s3 + $0xb28] ss:$16 sps:$4 sm:$0xff]   ;;  %v19904_v38 = vld [vmem:[%s30466_s3 + $0xbc4] ss:$16 sps:$4 sm:$0xff]  }
 0x34b   :  { %6177 = vmatprep.subr.bf16.mxu1 %v19883_v23  ;;  %v19907_v23 = vld [vmem:[%s30466_s3 + $0xb4c] ss:$16 sps:$4 sm:$0xff]  }
 0x34c   :  { %6157 = vmatmul.mubr.bf16.gmra.mrb[144].mxu1 %v5035_v40  ;;  %v19895_v40 = vld [vmem:[%s30466_s3 + $0xb0c] ss:$16 sps:$4 sm:$0xff]  }
 0x34d   :  { %6044 = vmatpush1.bf16.msra.mxu0 %v19878_v34  ;;  %6197 = vmatprep.mubr.bf16.mxu1 %v5026_v24  ;;  %v19890_v24 = vld [vmem:[%s30466_s3 + $0xb80] ss:$16 sps:$4 sm:$0xff]  }
 0x34e   :  { %6178 = vmatpush1.bf16.msra.mxu1 %v19881_v39  ;;  %6045 = vmatprep.subr.bf16.mxu0 %v19886_v4  ;;  %v30697_v39 = vmax.f32 %v23734_v29, %v23969_v13  ;;  %v30699_v29 = vmax.f32 %v23747_v55, %v23988_v42  ;;  %v19908_v55 = vld [vmem:[%s30466_s3 + $0xbe0] ss:$16 sps:$4 sm:$0xff]   ;;  %v19911_v42 = vld [vmem:[%s30466_s3 + $0xb68] ss:$16 sps:$4 sm:$0xff]  }
 0x34f   :  { %6179 = vmatprep.subr.bf16.mxu1 %v19889_v9 }
 0x351   :  { %6046 = vmatpush1.bf16.msra.mxu0 %v19884_v12  ;;  %v30698_v12 = vmax.f32 %v23740_v52, %v23981_v45  ;;  %v19910_v52 = vld [vmem:[%s30466_s3 + $0xbe4] ss:$16 sps:$4 sm:$0xff]   ;;  %v19913_v45 = vld [vmem:[%s30466_s3 + $0xb6c] ss:$16 sps:$4 sm:$0xff]  }
 0x352   :  { %6180 = vmatpush1.bf16.msra.mxu1 %v19887_v2  ;;  %6047 = vmatprep.subr.bf16.mxu0 %v19892_v51 }
 0x353   :  { %6181 = vmatprep.subr.bf16.mxu1 %v19895_v40  ;;  %v19902_v40 = vld [vmem:[%s30466_s3 + $0xbc0] ss:$16 sps:$4 sm:$0xff]  }
 0x355   :  { %6048 = vmatpush1.bf16.msra.mxu0 %v19890_v24  ;;  %v19905_v24 = vld [vmem:[%s30466_s3 + $0xb48] ss:$16 sps:$4 sm:$0xff]  }
 0x356   :  { %6182 = vmatpush1.bf16.msra.mxu1 %v19893_v43  ;;  %v4208_v34 = vpop.f32.mrb[96].mxu0  ;;  %6049 = vmatprep.subr.bf16.mxu0 %v19898_v10  ;;  %v30700_v10 = vmax.f32 %v23749_v54, %v23995_v11  ;;  %v30701_v54 = vmax.f32 %v23761_v6, %v24015_v53  ;;  %v24440_v53 = vld [vmem:[#allocation3 + $0x10] sm:$0xff] }
 0x357   :  { %v24384_v4 = vmax.f32 %v30697_v39, %v4208_v34  ;;  %6183 = vmatprep.subr.bf16.mxu1 %v19901_v30  ;;  %v4210_v9 = vpop.f32.mrb[97].mxu0  ;;  %v30702_v34 = vmax.f32 %v23763_v35, %v24026_v27  ;;  %v19926_v35 = vld [vmem:[%s30466_s3] ss:$16 sps:$4 sm:$0xff]   ;;  %v30704_v27 = vmax.f32 %v23767_v14, %v24040_v62  ;;  %v19917_v14 = vld [vmem:[%s30466_s3 + $0xba8] ss:$16 sps:$4 sm:$0xff]  }
 0x358   :  { %v24389_v2 = vmax.f32 %v30698_v12, %v4210_v9  ;;  %v4212_v51 = vpop.f32.mrb[98].mxu0  ;;  %v30703_v12 = vmax.f32 %v23765_v15, %v24036_v46  ;;  %v19919_v15 = vld [vmem:[%s30466_s3 + $0xbac] ss:$16 sps:$4 sm:$0xff]   ;;  %v19934_v46 = vld [vmem:[%s30466_s3 + $0x24] ss:$16 sps:$4 sm:$0xff]  }
 0x359   :  { %6050 = vmatpush1.bf16.msra.mxu0 %v19896_v37  ;;  %v24400_v13 = vmax.f32 %v30699_v29, %v4212_v51  ;;  %v4214_v43 = vpop.f32.mrb[99].mxu0  ;;  %v19928_v37 = vld [vmem:[%s30466_s3 + $0x4] ss:$16 sps:$4 sm:$0xff]   ;;  %v24460_v29 = vld [vmem:[#allocation3 + $0x38] sm:$0xff]  ;;  %v19932_v62 = vld [vmem:[%s30466_s3 + $0x20] ss:$16 sps:$4 sm:$0xff]  }
 0x35a   :  { %6184 = vmatpush1.bf16.msra.mxu1 %v19899_v58  ;;  %v24411_v30 = vmax.f32 %v30700_v10, %v4214_v43  ;;  %6051 = vmatprep.subr.bf16.mxu0 %v19904_v38  ;;  %v19940_v43 = vld [vmem:[%s30466_s3 + $0x44] ss:$16 sps:$4 sm:$0xff]   ;;  %v30705_v10 = vmax.f32 %v23784_v63, %v24058_v33  ;;  %v30708_v63 = vmax.f32 %v23790_v48, %v24075_v60 }
 0x35b   :  { %6185 = vmatprep.subr.bf16.mxu1 %v19907_v23  ;;  %v19916_v23 = vld [vmem:[%s30466_s3 + $0xb8c] ss:$16 sps:$4 sm:$0xff]   ;;  %v30710_v60 = vmax.f32 %v23794_v19, %v24086_v44 }
 0x35c   :  { %v19925_v19 = vld [vmem:[%s30466_s3 + $0xbec] ss:$16 sps:$4 sm:$0xff]  }
 0x35d   :  { %6052 = vmatpush1.bf16.msra.mxu0 %v19902_v40  ;;  %v19914_v40 = vld [vmem:[%s30466_s3 + $0xb88] ss:$16 sps:$4 sm:$0xff]  }
 0x35e   :  { %6186 = vmatpush1.bf16.msra.mxu1 %v19905_v24  ;;  %v4218_v58 = vpop.f32.mrb[100].mxu0  ;;  %6053 = vmatprep.subr.bf16.mxu0 %v19910_v52  ;;  %v24530_v44 = vld [vmem:[#allocation3 + $0x58] sm:$0xff] }
 0x35f   :  { %v24425_v11 = vmax.f32 %v30701_v54, %v4218_v58  ;;  %6187 = vmatprep.subr.bf16.mxu1 %v19913_v45  ;;  %v4220_v38 = vpop.f32.mrb[101].mxu0 }
 0x360   :  { %v24433_v39 = vmax.f32 %v30702_v34, %v4220_v38  ;;  %v4222_v9 = vpop.f32.mrb[102].mxu0  ;;  %v19922_v38 = vld [vmem:[%s30466_s3 + $0xbcc] ss:$16 sps:$4 sm:$0xff]  }
 0x361   :  { %6054 = vmatpush1.bf16.msra.mxu0 %v19908_v55  ;;  %v24438_v51 = vmax.f32 %v30703_v12, %v4222_v9  ;;  %v4224_v6 = vpop.f32.mrb[103].mxu0  ;;  %v19920_v9 = vld [vmem:[%s30466_s3 + $0xbc8] ss:$16 sps:$4 sm:$0xff]   ;;  %v19938_v12 = vld [vmem:[%s30466_s3 + $0x40] ss:$16 sps:$4 sm:$0xff]  }
 0x362   :  { %6188 = vmatpush1.bf16.msra.mxu1 %v19911_v42  ;;  %v24451_v24 = vmax.f32 %v30704_v27, %v4224_v6  ;;  %6876 = vmatprep.subr.bf16.mxu0 %v19928_v37  ;;  %v30706_v42 = vmax.f32 %v23786_v1, %v24060_v31  ;;  %v30711_v27 = vmax.f32 %v23797_v26, %v24095_v17  ;;  %v19944_v26 = vld [vmem:[%s30466_s3 + $0x60] ss:$16 sps:$4 sm:$0xff]   ;;  %v19923_v17 = vld [vmem:[%s30466_s3 + $0xbe8] ss:$16 sps:$4 sm:$0xff]  }
 0x363   :  { %6189 = vmatprep.subr.bf16.mxu1 %v19916_v23  ;;  %v30707_v23 = vmax.f32 %v23788_v21, %v24073_v32  ;;  %v19946_v21 = vld [vmem:[%s30466_s3 + $0x64] ss:$16 sps:$4 sm:$0xff]   ;;  %v30709_v32 = vmax.f32 %v23792_v18, %v24084_v36 }
 0x364   :  { %6056 = vmatmul.mubr.bf16.vlgmr.msra.gmra.mrb[128].mxu0 %v24440_v53  ;;  %v24524_v36 = vld [vmem:[#allocation3 + $0x30] sm:$0xff] }
 0x365   :  { %6065 = vmatprep.mubr.bf16.mxu0 %v24460_v29  ;;  %6877 = vmatpush1.bf16.msra.mxu0 %v19926_v35 }
 0x366   :  { %6190 = vmatpush1.bf16.msra.mxu1 %v19914_v40  ;;  %v4228_v52 = vpop.f32.mrb[104].mxu0  ;;  %v4279_v45 = vpop.f32.mrb[100].mxu1  ;;  %6878 = vmatprep.subr.bf16.mxu0 %v19934_v46  ;;  %v30712_v46 = vmax.f32 %v23799_v16, %v24097_v47 }
 0x367   :  { %v24475_v55 = vmax.f32 %v30705_v10, %v4228_v52  ;;  %v24480_v37 = vmax.f32 %v30706_v42, %v4279_v45  ;;  %6191 = vmatprep.subr.bf16.mxu1 %v19919_v15  ;;  %v4230_v58 = vpop.f32.mrb[105].mxu0  ;;  %v4281_v54 = vpop.f32.mrb[101].mxu1  ;;  %v30714_v52 = vmax.f32 %v23814_v0, %v24119_v22 }
 0x368   :  { %v24488_v34 = vmax.f32 %v30707_v23, %v4230_v58  ;;  %v24493_v33 = vmax.f32 %v30708_v63, %v4281_v54  ;;  %v4232_v31 = vpop.f32.mrb[106].mxu0  ;;  %v4283_v1 = vpop.f32.mrb[102].mxu1  ;;  %v19931_v58 = vld [vmem:[%s30466_s3 + $0xc] ss:$16 sps:$4 sm:$0xff]   ;;  %v30715_v54 = vmax.f32 %v23816_v25, %v24125_v61  ;;  %v30717_v23 = vmax.f32 %v23820_v8, %v24133_v59  ;;  %v19950_v59 = vld [vmem:[%s30466_s3 + $0x80] ss:$16 sps:$4 sm:$0xff]  }
 0x369   :  { %v24507_v48 = vmax.f32 %v30709_v32, %v4232_v31  ;;  %v24512_v6 = vmax.f32 %v30710_v60, %v4283_v1  ;;  %v4234_v40 = vpop.f32.mrb[107].mxu0  ;;  %v4285_v35 = vpop.f32.mrb[103].mxu1  ;;  %6879 = vmatpush1.bf16.msra.mxu0 %v19932_v62  ;;  %v30713_v62 = vmax.f32 %v23812_v28, %v24117_v50  ;;  %v30716_v28 = vmax.f32 %v23818_v5, %v24127_v49  ;;  %v19929_v5 = vld [vmem:[%s30466_s3 + $0x8] ss:$16 sps:$4 sm:$0xff]   ;;  %v19937_v8 = vld [vmem:[%s30466_s3 + $0x2c] ss:$16 sps:$4 sm:$0xff]  }
 0x36a   :  { %6192 = vmatpush1.bf16.msra.mxu1 %v19917_v14  ;;  %v24517_v15 = vmax.f32 %v30711_v27, %v4234_v40  ;;  %v24522_v18 = vmax.f32 %v30712_v46, %v4285_v35  ;;  %6880 = vmatprep.subr.bf16.mxu0 %v19940_v43  ;;  %v19952_v14 = vld [vmem:[%s30466_s3 + $0x84] ss:$16 sps:$4 sm:$0xff]   ;;  %v30718_v25 = vmax.f32 %v23822_v3, %v24143_v7  ;;  %v5038_v49 = vld [vmem:[#allocation3 + $0x78] sm:$0xf] }
 0x36b   :  { %6193 = vmatprep.subr.bf16.mxu1 %v19922_v38  ;;  %v19958_v7 = vld [vmem:[%s30466_s3 + $0xa4] ss:$16 sps:$4 sm:$0xff]   ;;  %v30719_v32 = vmax.f32 %v23834_v41, %v24165_v56  ;;  %v30720_v35 = vmax.f32 %v23840_v20, %v24169_v57  ;;  %v19941_v57 = vld [vmem:[%s30466_s3 + $0x48] ss:$16 sps:$4 sm:$0xff]   ;;  %v19949_v20 = vld [vmem:[%s30466_s3 + $0x6c] ss:$16 sps:$4 sm:$0xff]  }
 0x36c   :  { %6066 = vmatmul.mubr.bf16.gmra.mrb[132].mxu0 %v24524_v36  ;;  %v30721_v41 = vld [vmem:[#allocation6_spill] sm:$0xff]  ;;  %v30722_v56 = vld [vmem:[#allocation8_spill] sm:$0xff] }
 0x36d   :  { %6075 = vmatprep.mubr.bf16.mxu0 %v24530_v44  ;;  %6881 = vmatpush1.bf16.msra.mxu0 %v19938_v12  ;;  %v19935_v12 = vld [vmem:[%s30466_s3 + $0x28] ss:$16 sps:$4 sm:$0xff]  }
 0x36e   :  { %6194 = vmatpush1.bf16.msra.mxu1 %v19920_v9  ;;  %v4238_v16 = vpop.f32.mrb[108].mxu0  ;;  %v4289_v47 = vpop.f32.mrb[104].mxu1  ;;  %6882 = vmatprep.subr.bf16.mxu0 %v19946_v21  ;;  %v5033_v9 = vld [vmem:[#allocation3 + $0x50] sm:$0xff]  ;;  %v19943_v21 = vld [vmem:[%s30466_s3 + $0x4c] ss:$16 sps:$4 sm:$0xff]  }
 0x36f   :  { %v24545_v43 = vmax.f32 %v30713_v62, %v4238_v16  ;;  %v24550_v45 = vmax.f32 %v30714_v52, %v4289_v47  ;;  %6195 = vmatprep.subr.bf16.mxu1 %v19925_v19  ;;  %v4240_v10 = vpop.f32.mrb[109].mxu0  ;;  %v4291_v42 = vpop.f32.mrb[105].mxu1  ;;  %v30723_v19 = vmax.f32 %v30721_v41, %v30722_v56  ;;  %v5037_v47 = vld [vmem:[#allocation3 + $0x70] sm:$0xf]  ;;  %v19994_v56 = vld [vmem:[%s30466_s3 + $0x164] ss:$16 sps:$4 sm:$0xff]  }
 0x370   :  { %v24558_v38 = vmax.f32 %v30715_v54, %v4240_v10  ;;  %v24563_v50 = vmax.f32 %v30716_v28, %v4291_v42  ;;  %v4242_v0 = vpop.f32.mrb[110].mxu0  ;;  %v4293_v22 = vpop.f32.mrb[106].mxu1  ;;  %v19962_v10 = vld [vmem:[%s30466_s3 + $0xc0] ss:$16 sps:$4 sm:$0xff]   ;;  %v19970_v42 = vld [vmem:[%s30466_s3 + $0xe4] ss:$16 sps:$4 sm:$0xff]  }
 0x371   :  { %v24568_v63 = vmax.f32 %v30717_v23, %v4293_v22  ;;  %v4243_v31 = vpop.f32.mrb[111].mxu0  ;;  %v4295_v1 = vpop.f32.mrb[107].mxu1  ;;  %6883 = vmatpush1.bf16.msra.mxu0 %v19944_v26  ;;  %v19947_v54 = vld [vmem:[%s30466_s3 + $0x68] ss:$16 sps:$4 sm:$0xff]   ;;  %v19955_v28 = vld [vmem:[%s30466_s3 + $0x8c] ss:$16 sps:$4 sm:$0xff]  }
 0x372   :  { %6196 = vmatpush1.bf16.msra.mxu1 %v19923_v17  ;;  %v24573_v61 = vmax.f32 %v30718_v25, %v4295_v1  ;;  %6884 = vmatprep.subr.bf16.mxu0 %v19952_v14  ;;  %v30724_v17 = vld [vmem:[#allocation28_spill] sm:$0xff]  ;;  %v30725_v14 = vld [vmem:[#allocation30_spill] sm:$0xff]  ;;  %v30727_v0 = vld [vmem:[#allocation7_spill] sm:$0xff] }
 0x373   :  { %7018 = vmatprep.subr.bf16.mxu1 %v19931_v58  ;;  %v30726_v62 = vmax.f32 %v30724_v17, %v30725_v14  ;;  %v30728_v22 = vld [vmem:[#allocation9_spill] sm:$0xff]  ;;  %v19986_v41 = vld [vmem:[%s30466_s3 + $0x140] ss:$16 sps:$4 sm:$0xff]  }
 0x374   :  { %6076 = vmatmul.mubr.bf16.gmra.mrb[136].mxu0 %v5033_v9  ;;  %v30729_v23 = vmax.f32 %v30727_v0, %v30728_v22  ;;  %v30730_v25 = vld [vmem:[#allocation29_spill] sm:$0xff]  ;;  %v19992_v17 = vld [vmem:[%s30466_s3 + $0x160] ss:$16 sps:$4 sm:$0xff]  }
 0x375   :  { %6198 = vmatmul.mubr.bf16.vlgmr.msra.gmra.mrb[132].mxu1 %v24440_v53  ;;  %6085 = vmatprep.mubr.bf16.mxu0 %v5038_v49  ;;  %v19956_v53 = vld [vmem:[%s30466_s3 + $0xa0] ss:$16 sps:$4 sm:$0xff]   ;;  %v19977_v14 = vld [vmem:[%s30466_s3 + $0x108] ss:$16 sps:$4 sm:$0xff]   ;;  %v19997_v0 = vld [vmem:[%s30466_s3 + $0x16c] ss:$16 sps:$4 sm:$0xff]  }
 0x376   :  { %6207 = vmatprep.mubr.bf16.mxu1 %v24460_v29  ;;  %v4299_v3 = vpop.f32.mrb[108].mxu1  ;;  %7019 = vmatpush1.bf16.msra.mxu1 %v19929_v5  ;;  %v19964_v29 = vld [vmem:[%s30466_s3 + $0xc4] ss:$16 sps:$4 sm:$0xff]   ;;  %v30731_v5 = vld [vmem:[#allocation39_spill] sm:$0xff]  ;;  %v20010_v22 = vld [vmem:[%s30466_s3 + $0x1c0] ss:$16 sps:$4 sm:$0xff]  }
 0x377   :  { %v24598_v60 = vmax.f32 %v30719_v32, %v4299_v3  ;;  %v4301_v40 = vpop.f32.mrb[109].mxu1  ;;  %7020 = vmatprep.subr.bf16.mxu1 %v19937_v8  ;;  %6885 = vmatpush1.bf16.msra.mxu0 %v19950_v59  ;;  %v30732_v8 = vmax.f32 %v30730_v25, %v30731_v5  ;;  %v19974_v32 = vld [vmem:[%s30466_s3 + $0x100] ss:$16 sps:$4 sm:$0xff]   ;;  %v20001_v25 = vld [vmem:[%s30466_s3 + $0x188] ss:$16 sps:$4 sm:$0xff]  }
 0x378   :  { %v24609_v27 = vmax.f32 %v30720_v35, %v4301_v40  ;;  %v4303_v46 = vpop.f32.mrb[110].mxu1  ;;  %6886 = vmatprep.subr.bf16.mxu0 %v19958_v7  ;;  %v19982_v40 = vld [vmem:[%s30466_s3 + $0x124] ss:$16 sps:$4 sm:$0xff]   ;;  %v19980_v35 = vld [vmem:[%s30466_s3 + $0x120] ss:$16 sps:$4 sm:$0xff]  }
 0x379   :  { %v24614_v26 = vmax.f32 %v30723_v19, %v4303_v46  ;;  %v4305_v16 = vpop.f32.mrb[111].mxu1  ;;  %v19973_v46 = vld [vmem:[%s30466_s3 + $0xec] ss:$16 sps:$4 sm:$0xff]   ;;  %v19971_v19 = vld [vmem:[%s30466_s3 + $0xe8] ss:$16 sps:$4 sm:$0xff]  }
 0x37a   :  { %v24619_v52 = vmax.f32 %v30726_v62, %v4305_v16  ;;  %7021 = vmatpush1.bf16.msra.mxu1 %v19935_v12  ;;  %v19953_v12 = vld [vmem:[%s30466_s3 + $0x88] ss:$16 sps:$4 sm:$0xff]   ;;  %v19979_v16 = vld [vmem:[%s30466_s3 + $0x10c] ss:$16 sps:$4 sm:$0xff]   ;;  %v20024_v5 = vld [vmem:[%s30466_s3 + $0x204] ss:$16 sps:$4 sm:$0xff]  }
 0x37b   :  { %7022 = vmatprep.subr.bf16.mxu1 %v19943_v21  ;;  %6887 = vmatpush1.bf16.msra.mxu0 %v19956_v53  ;;  %v19961_v21 = vld [vmem:[%s30466_s3 + $0xac] ss:$16 sps:$4 sm:$0xff]   ;;  %v19959_v53 = vld [vmem:[%s30466_s3 + $0xa8] ss:$16 sps:$4 sm:$0xff]  }
 0x37c   :  { %6086 = vmatmul.mubr.bf16.gmra.mrb[140].mxu0 %v5037_v47  ;;  %6888 = vmatprep.subr.bf16.mxu0 %v19964_v29  ;;  %v19967_v29 = vld [vmem:[%s30466_s3 + $0xcc] ss:$16 sps:$4 sm:$0xff]  }
 0x37d   :  { %6208 = vmatmul.mubr.bf16.gmra.mrb[136].mxu1 %v24524_v36  ;;  %v19968_v36 = vld [vmem:[%s30466_s3 + $0xe0] ss:$16 sps:$4 sm:$0xff]   ;;  %v19985_v62 = vld [vmem:[%s30466_s3 + $0x12c] ss:$16 sps:$4 sm:$0xff]  }
 0x37e   :  { %6217 = vmatprep.mubr.bf16.mxu1 %v24530_v44  ;;  %v4309_v58 = vpop.f32.mrb[112].mxu1  ;;  %7023 = vmatpush1.bf16.msra.mxu1 %v19941_v57  ;;  %v19976_v44 = vld [vmem:[%s30466_s3 + $0x104] ss:$16 sps:$4 sm:$0xff]   ;;  %v19998_v57 = vld [vmem:[%s30466_s3 + $0x180] ss:$16 sps:$4 sm:$0xff]  }
 0x37f   :  { %v24644_v31 = vmax.f32 %v30729_v23, %v4309_v58  ;;  %v4311_v1 = vpop.f32.mrb[113].mxu1  ;;  %7024 = vmatprep.subr.bf16.mxu1 %v19949_v20  ;;  %6889 = vmatpush1.bf16.msra.mxu0 %v19962_v10  ;;  %v20006_v20 = vld [vmem:[%s30466_s3 + $0x1a4] ss:$16 sps:$4 sm:$0xff]   ;;  %v19983_v10 = vld [vmem:[%s30466_s3 + $0x128] ss:$16 sps:$4 sm:$0xff]  }
 0x380   :  { %v24655_v59 = vmax.f32 %v30732_v8, %v4311_v1  ;;  %v4313_v7 = vpop.f32.mrb[114].mxu1  ;;  %6890 = vmatprep.subr.bf16.mxu0 %v19970_v42  ;;  %v19991_v42 = vld [vmem:[%s30466_s3 + $0x14c] ss:$16 sps:$4 sm:$0xff]   ;;  %v20004_v58 = vld [vmem:[%s30466_s3 + $0x1a0] ss:$16 sps:$4 sm:$0xff]  }
 0x381   :  { %v4314_v3 = vpop.f32.mrb[115].mxu1  ;;  %v20018_v23 = vld [vmem:[%s30466_s3 + $0x1e4] ss:$16 sps:$4 sm:$0xff]   ;;  %v19995_v1 = vld [vmem:[%s30466_s3 + $0x168] ss:$16 sps:$4 sm:$0xff]  }
 0x382   :  { %7025 = vmatpush1.bf16.msra.mxu1 %v19947_v54  ;;  %v19989_v54 = vld [vmem:[%s30466_s3 + $0x148] ss:$16 sps:$4 sm:$0xff]   ;;  %v20009_v8 = vld [vmem:[%s30466_s3 + $0x1ac] ss:$16 sps:$4 sm:$0xff]  }
 0x383   :  { %7026 = vmatprep.subr.bf16.mxu1 %v19955_v28  ;;  %6891 = vmatpush1.bf16.msra.mxu0 %v19968_v36  ;;  %v20012_v28 = vld [vmem:[%s30466_s3 + $0x1c4] ss:$16 sps:$4 sm:$0xff]   ;;  %v20003_v36 = vld [vmem:[%s30466_s3 + $0x18c] ss:$16 sps:$4 sm:$0xff]   ;;  %v20007_v7 = vld [vmem:[%s30466_s3 + $0x1a8] ss:$16 sps:$4 sm:$0xff]  }
 0x384   :  { %6892 = vmatprep.subr.bf16.mxu0 %v19976_v44  ;;  %v20016_v44 = vld [vmem:[%s30466_s3 + $0x1e0] ss:$16 sps:$4 sm:$0xff]   ;;  %v20015_v3 = vld [vmem:[%s30466_s3 + $0x1cc] ss:$16 sps:$4 sm:$0xff]  }
 0x385   :  { %6218 = vmatmul.mubr.bf16.gmra.mrb[140].mxu1 %v5033_v9  ;;  %v19988_v9 = vld [vmem:[%s30466_s3 + $0x144] ss:$16 sps:$4 sm:$0xff]  }
 0x386   :  { %6227 = vmatprep.mubr.bf16.mxu1 %v5038_v49  ;;  %7027 = vmatpush1.bf16.msra.mxu1 %v19953_v12  ;;  %v19965_v49 = vld [vmem:[%s30466_s3 + $0xc8] ss:$16 sps:$4 sm:$0xff]  }
 0x387   :  { %7028 = vmatprep.subr.bf16.mxu1 %v19961_v21  ;;  %6893 = vmatpush1.bf16.msra.mxu0 %v19974_v32  ;;  %v20013_v12 = vld [vmem:[%s30466_s3 + $0x1c8] ss:$16 sps:$4 sm:$0xff]   ;;  %v20021_v21 = vld [vmem:[%s30466_s3 + $0x1ec] ss:$16 sps:$4 sm:$0xff]  }
 0x388   :  { %6894 = vmatprep.subr.bf16.mxu0 %v19982_v40  ;;  %v20019_v32 = vld [vmem:[%s30466_s3 + $0x1e8] ss:$16 sps:$4 sm:$0xff]   ;;  %v20027_v40 = vld [vmem:[%s30466_s3 + $0x20c] ss:$16 sps:$4 sm:$0xff]  }
 0x38a   :  { %7029 = vmatpush1.bf16.msra.mxu1 %v19959_v53 }
 0x38b   :  { %7030 = vmatprep.subr.bf16.mxu1 %v19967_v29  ;;  %6895 = vmatpush1.bf16.msra.mxu0 %v19980_v35 }
 0x38c   :  { %6896 = vmatprep.subr.bf16.mxu0 %v19988_v9 }
 0x38d   :  { %6228 = vmatmul.mubr.bf16.gmra.mrb[144].mxu1 %v5037_v47  ;;  %v20000_v47 = vld [vmem:[%s30466_s3 + $0x184] ss:$16 sps:$4 sm:$0xff]  }
 0x38e   :  { %7031 = vmatpush1.bf16.msra.mxu1 %v19965_v49 }
 0x38f   :  { %7032 = vmatprep.subr.bf16.mxu1 %v19973_v46  ;;  %6897 = vmatpush1.bf16.msra.mxu0 %v19986_v41  ;;  %v30733_v46 = vld [vmem:[#allocation4_spill] sm:$0xff] }
 0x390   :  { %6898 = vmatprep.subr.bf16.mxu0 %v19994_v56 }
 0x392   :  { %7033 = vmatpush1.bf16.msra.mxu1 %v19971_v19 }
 0x393   :  { %7034 = vmatprep.subr.bf16.mxu1 %v19979_v16  ;;  %6899 = vmatpush1.bf16.msra.mxu0 %v19992_v17  ;;  %v30734_v16 = vld [vmem:[#allocation22_spill] sm:$0xff] }
 0x394   :  { %6900 = vmatprep.subr.bf16.mxu0 %v20000_v47 }
 0x396   :  { %7035 = vmatpush1.bf16.msra.mxu1 %v19977_v14 }
 0x397   :  { %7036 = vmatprep.subr.bf16.mxu1 %v19985_v62  ;;  %6901 = vmatpush1.bf16.msra.mxu0 %v19998_v57 }
 0x398   :  { %6902 = vmatprep.subr.bf16.mxu0 %v20006_v20 }
 0x39a   :  { %7037 = vmatpush1.bf16.msra.mxu1 %v19983_v10 }
 0x39b   :  { %7038 = vmatprep.subr.bf16.mxu1 %v19991_v42  ;;  %6903 = vmatpush1.bf16.msra.mxu0 %v20004_v58 }
 0x39c   :  { %6904 = vmatprep.subr.bf16.mxu0 %v20012_v28 }
 0x39e   :  { %7039 = vmatpush1.bf16.msra.mxu1 %v19989_v54 }
 0x39f   :  { %7040 = vmatprep.subr.bf16.mxu1 %v19997_v0  ;;  %6905 = vmatpush1.bf16.msra.mxu0 %v20010_v22 }
 0x3a0   :  { %6906 = vmatprep.subr.bf16.mxu0 %v20018_v23 }
 0x3a2   :  { %7041 = vmatpush1.bf16.msra.mxu1 %v19995_v1 }
 0x3a3   :  { %7042 = vmatprep.subr.bf16.mxu1 %v20003_v36  ;;  %6907 = vmatpush1.bf16.msra.mxu0 %v20016_v44 }
 0x3a4   :  { %6947 = vmatprep.subr.bf16.mxu0 %v20024_v5 }
 0x3a6   :  { %7043 = vmatpush1.bf16.msra.mxu1 %v20001_v25 }
 0x3a7   :  { %7044 = vmatprep.subr.bf16.mxu1 %v20009_v8 }
 0x3aa   :  { %7045 = vmatpush1.bf16.msra.mxu1 %v20007_v7 }
 0x3ab   :  { %7046 = vmatprep.subr.bf16.mxu1 %v20015_v3 }
 0x3ae   :  { %7047 = vmatpush1.bf16.msra.mxu1 %v20013_v12 }
 0x3af   :  { %7048 = vmatprep.subr.bf16.mxu1 %v20021_v21 }
 0x3b2   :  { %7049 = vmatpush1.bf16.msra.mxu1 %v20019_v32 }
 0x3b3   :  { %7089 = vmatprep.subr.bf16.mxu1 %v20027_v40 }
 0x3b6   :  { %v4690_v53 = vpop.f32.mrb[112].mxu0 }
 0x3b7   :  { %v4826_v29 = vmax.f32 %v24384_v4, %v4690_v53  ;;  %v4692_v35 = vpop.f32.mrb[113].mxu0 }
 0x3b8   :  { %v4827_v9 = vmax.f32 %v24389_v2, %v4692_v35  ;;  %v4694_v49 = vpop.f32.mrb[114].mxu0 }
 0x3b9   :  { %v4854_v41 = vadd.f32 %v4826_v29, %v30733_v46  ;;  %v4830_v56 = vmax.f32 %v24400_v13, %v4694_v49  ;;  %v4696_v19 = vpop.f32.mrb[115].mxu0 }
 0x3ba   :  { %v4855_v17 = vadd.f32 %v4827_v9, %v30734_v16  ;;  %v4831_v14 = vmax.f32 %v24411_v30, %v4696_v19 }
 0x3bb   :  { %v4858_v47 = vadd.f32 %v4830_v56, %v30733_v46  ;;  %v4882_v57 = vmax.f32 %v4854_v41, 0.0  ;;  %v20022_v56 = vld [vmem:[%s30466_s3 + $0x200] ss:$16 sps:$4 sm:$0xff]  }
 0x3bc   :  { %v4859_v62 = vadd.f32 %v4831_v14, %v30734_v16  ;;  %v4883_v4 = vmax.f32 %v4855_v17, 0.0  ;;  %v30735_v17 = vld [vmem:[#allocation5_spill] sm:$0xff] }
 0x3bd   :  { %v4886_v20 = vmax.f32 %v4858_v47, 0.0 }
 0x3be   :  { %v4887_v10 = vmax.f32 %v4859_v62, 0.0  ;;  %v4700_v42 = vpop.f32.mrb[116].mxu0 }
 0x3bf   :  { %v4910_v2 = vpack.c.bf16 %v4886_v20, %v4882_v57  ;;  %v4834_v58 = vmax.f32 %v24425_v11, %v4700_v42  ;;  %v4702_v54 = vpop.f32.mrb[117].mxu0  ;;  %v30736_v20 = vld [vmem:[#allocation23_spill] sm:$0xff]  ;;  %v20030_v42 = vld [vmem:[%s30466_s3 + $0x224] ss:$16 sps:$4 sm:$0xff]  }
 0x3c0   :  { %v4911_v28 = vpack.c.bf16 %v4887_v10, %v4883_v4  ;;  %v4835_v13 = vmax.f32 %v24433_v39, %v4702_v54  ;;  %v4704_v0 = vpop.f32.mrb[118].mxu0 }
 0x3c1   :  { %v4943_v22 = vrot.slane %v4910_v2, 4  ;;  %v4862_v30 = vadd.f32 %v4834_v58, %v30733_v46  ;;  %v4838_v23 = vmax.f32 %v24438_v51, %v4704_v0  ;;  %v4706_v1 = vpop.f32.mrb[119].mxu0  ;;  %v20028_v0 = vld [vmem:[%s30466_s3 + $0x220] ss:$16 sps:$4 sm:$0xff]  }
 0x3c2   :  { %v4944_v36 = vrot.slane %v4911_v28, 4  ;;  %v4863_v44 = vadd.f32 %v4835_v13, %v30734_v16  ;;  %v4839_v25 = vmax.f32 %v24451_v24, %v4706_v1 }
 0x3c3   :  { %4987 = vst [vmem:[#allocation2] sm:$0xf0] %v4943_v22  ;;  %v4866_v5 = vadd.f32 %v4838_v23, %v30733_v46  ;;  %v4890_v8 = vmax.f32 %v4862_v30, 0.0 }
 0x3c4   :  { %4988 = vst [vmem:[#allocation2 + $0x8] sm:$0xf0] %v4944_v36  ;;  %v4867_v11 = vadd.f32 %v4839_v25, %v30734_v16  ;;  %v4891_v39 = vmax.f32 %v4863_v44, 0.0 }
 0x3c5   :  { %v4894_v7 = vmax.f32 %v4866_v5, 0.0 }
 0x3c6   :  { %v4895_v3 = vmax.f32 %v4867_v11, 0.0  ;;  %v4710_v12 = vpop.f32.mrb[120].mxu0  ;;  %v4761_v21 = vpop.f32.mrb[116].mxu1 }
 0x3c7   :  { %v24793_v32 = vpack.c.bf16 %v4894_v7, %v4890_v8  ;;  %v4842_v51 = vmax.f32 %v24475_v55, %v4710_v12  ;;  %v4828_v40 = vmax.f32 %v24480_v37, %v4761_v21  ;;  %v4712_v24 = vpop.f32.mrb[121].mxu0  ;;  %v4763_v53 = vpop.f32.mrb[117].mxu1  ;;  %v20025_v55 = vld [vmem:[%s30466_s3 + $0x208] ss:$16 sps:$4 sm:$0xff]  }
 0x3c8   :  { %v24797_v29 = vpack.c.bf16 %v4895_v3, %v4891_v39  ;;  %v4843_v35 = vmax.f32 %v24488_v34, %v4712_v24  ;;  %v4829_v9 = vmax.f32 %v24493_v33, %v4763_v53  ;;  %v4714_v49 = vpop.f32.mrb[122].mxu0  ;;  %v4765_v41 = vpop.f32.mrb[118].mxu1 }
 0x3c9   :  { %v4947_v37 = vrot.slane %v24793_v32, 4  ;;  %v4870_v19 = vadd.f32 %v4842_v51, %v30733_v46  ;;  %v4856_v14 = vadd.f32 %v4828_v40, %v30735_v17  ;;  %v4846_v34 = vmax.f32 %v24507_v48, %v4714_v49  ;;  %v4716_v47 = vpop.f32.mrb[123].mxu0  ;;  %v4767_v33 = vpop.f32.mrb[119].mxu1  ;;  %v20033_v48 = vld [vmem:[%s30466_s3 + $0x22c] ss:$16 sps:$4 sm:$0xff]  }
 0x3ca   :  { %v4949_v62 = vrot.slane %v24797_v29, 4  ;;  %v24813_v57 = vadd.f32 %v4843_v35, %v30734_v16  ;;  %v24816_v4 = vadd.f32 %v4829_v9, %v30736_v20  ;;  %v4832_v10 = vmax.f32 %v24512_v6, %v4765_v41  ;;  %v5007_v28 = vld [vmem:[#allocation2] sm:$0xff]  ;;  %v20039_v40 = vld [vmem:[%s30466_s3 + $0x24c] ss:$16 sps:$4 sm:$0xff]  }
 0x3cb   :  { %v24828_v2 = vsel %vm4942_vm2, %v4943_v22, %v4947_v37  ;;  %v4874_v58 = vadd.f32 %v4846_v34, %v30733_v46  ;;  %v5008_v54 = vld [vmem:[#allocation2 + $0x8] sm:$0xff]  ;;  %v4898_v30 = vmax.f32 %v4870_v19, 0.0  ;;  %v4847_v1 = vmax.f32 %v24517_v15, %v4716_v47  ;;  %v20036_v51 = vld [vmem:[%s30466_s3 + $0x244] ss:$16 sps:$4 sm:$0xff]   ;;  %v20034_v47 = vld [vmem:[%s30466_s3 + $0x240] ss:$16 sps:$4 sm:$0xff]  }
 0x3cc   :  { %4991 = vst [vmem:[#allocation2 + $0x20] sm:$0xff] %v24828_v2  ;;  %v24835_v6 = vsel %vm4942_vm2, %v4944_v36, %v4949_v62  ;;  %v4860_v13 = vadd.f32 %v4832_v10, %v30735_v17  ;;  %6908 = vmatprep.mubr.bf16.mxu0 %v5008_v54  ;;  %7050 = vmatprep.mubr.bf16.mxu1 %v5008_v54  ;;  %v20031_v22 = vld [vmem:[%s30466_s3 + $0x228] ss:$16 sps:$4 sm:$0xff]   ;;  %v4884_v44 = vmax.f32 %v4856_v14, 0.0  ;;  %v4899_v25 = vmax.f32 %v24813_v57, 0.0 }
 0x3cd   :  { %4992 = vst [vmem:[#allocation2 + $0x28] sm:$0xff] %v24835_v6  ;;  %v4902_v23 = vmax.f32 %v4874_v58, 0.0  ;;  %v4833_v36 = vmax.f32 %v24522_v18, %v4767_v33  ;;  %6909 = vmatmul.mubr.bf16.vlgmr.msra.gmra.mrb[128].mxu0 %v5007_v28  ;;  %7051 = vmatmul.mubr.bf16.vlgmr.msra.gmra.mrb[132].mxu1 %v5007_v28  ;;  %v4885_v5 = vmax.f32 %v24816_v4, 0.0  ;;  %v4875_v3 = vadd.f32 %v4847_v1, %v30734_v16  ;;  %v20043_v1 = vld [vmem:[%s30466_s3 + $0x268] ss:$16 sps:$4 sm:$0xff]  }
 0x3ce   :  { %v4888_v11 = vmax.f32 %v4860_v13, 0.0  ;;  %6948 = vmatpush1.bf16.msra.mxu0 %v20022_v56  ;;  %7090 = vmatpush1.bf16.msra.mxu1 %v20025_v55  ;;  %v4720_v8 = vpop.f32.mrb[124].mxu0  ;;  %v4771_v39 = vpop.f32.mrb[120].mxu1  ;;  %v20051_v29 = vld [vmem:[%s30466_s3 + $0x28c] ss:$16 sps:$4 sm:$0xff]  }
 0x3cf   :  { %v24849_v7 = vpack.c.bf16 %v4902_v23, %v4898_v30  ;;  %v4861_v15 = vadd.f32 %v4833_v36, %v30736_v20  ;;  %v4850_v18 = vmax.f32 %v24545_v43, %v4720_v8  ;;  %v4722_v12 = vpop.f32.mrb[125].mxu0  ;;  %v4773_v21 = vpop.f32.mrb[121].mxu1  ;;  %6949 = vmatprep.subr.bf16.mxu0 %v20030_v42  ;;  %v4836_v53 = vmax.f32 %v24550_v45, %v4771_v39  ;;  %v20045_v42 = vld [vmem:[%s30466_s3 + $0x26c] ss:$16 sps:$4 sm:$0xff]  }
 0x3d0   :  { %v24860_v24 = vpack.c.bf16 %v4888_v11, %v4884_v44  ;;  %v4851_v35 = vmax.f32 %v24558_v38, %v4722_v12  ;;  %v4837_v9 = vmax.f32 %v24563_v50, %v4773_v21  ;;  %v4724_v43 = vpop.f32.mrb[126].mxu0  ;;  %v4775_v49 = vpop.f32.mrb[122].mxu1  ;;  %7091 = vmatprep.subr.bf16.mxu1 %v20033_v48  ;;  %v4903_v56 = vmax.f32 %v4875_v3, 0.0  ;;  %6918 = vmatprep.mubr.bf16.mxu0 %v24835_v6  ;;  %v20048_v11 = vld [vmem:[%s30466_s3 + $0x284] ss:$16 sps:$4 sm:$0xff]  }
 0x3d1   :  { %v4955_v41 = vrot.slane %v24849_v7, 4  ;;  %v4889_v55 = vmax.f32 %v4861_v15, 0.0  ;;  %v4878_v19 = vadd.f32 %v4850_v18, %v30733_v46  ;;  %v4725_v14 = vpop.f32.mrb[127].mxu0  ;;  %v4777_v34 = vpop.f32.mrb[123].mxu1  ;;  %7060 = vmatprep.mubr.bf16.mxu1 %v24835_v6  ;;  %v4864_v38 = vadd.f32 %v4836_v53, %v30735_v17  ;;  %v20037_v46 = vld [vmem:[%s30466_s3 + $0x248] ss:$16 sps:$4 sm:$0xff]  }
 0x3d2   :  { %v4945_v45 = vrot.slane %v24860_v24, 4  ;;  %v4879_v50 = vadd.f32 %v4851_v35, %v30734_v16  ;;  %6950 = vmatpush1.bf16.msra.mxu0 %v20028_v0  ;;  %7092 = vmatpush1.bf16.msra.mxu1 %v20031_v22  ;;  %v4919_v57 = vpack.c.bf16 %v4903_v56, %v4899_v25  ;;  %v20042_v16 = vld [vmem:[%s30466_s3 + $0x264] ss:$16 sps:$4 sm:$0xff]   ;;  %v4840_v48 = vmax.f32 %v24568_v63, %v4775_v49  ;;  %v20040_v63 = vld [vmem:[%s30466_s3 + $0x260] ss:$16 sps:$4 sm:$0xff]  }
 0x3d3   :  { %v24881_v33 = vsel %vm4942_vm2, %v4947_v37, %v4955_v41  ;;  %v24883_v4 = vpack.c.bf16 %v4889_v55, %v4885_v5  ;;  %v4906_v10 = vmax.f32 %v4878_v19, 0.0  ;;  %6951 = vmatprep.subr.bf16.mxu0 %v20036_v51  ;;  %7093 = vmatprep.subr.bf16.mxu1 %v20039_v40  ;;  %v4865_v37 = vadd.f32 %v4837_v9, %v30736_v20  ;;  %v20046_v40 = vld [vmem:[%s30466_s3 + $0x280] ss:$16 sps:$4 sm:$0xff]   ;;  %v20049_v53 = vld [vmem:[%s30466_s3 + $0x288] ss:$16 sps:$4 sm:$0xff]  }
 0x3d4   :  { %4995 = vst [vmem:[#allocation2 + $0x40] sm:$0xff] %v24881_v33  ;;  %4989 = vst [vmem:[#allocation2 + $0x10] sm:$0xf0] %v4945_v45  ;;  %v4907_v32 = vmax.f32 %v4879_v50, 0.0  ;;  %v4957_v58 = vrot.slane %v4919_v57, 4  ;;  %v4841_v13 = vmax.f32 %v24573_v61, %v4777_v34  ;;  %v4892_v0 = vmax.f32 %v4864_v38, 0.0 }
 0x3d5   :  { %v4946_v54 = vrot.slane %v24883_v4, 4  ;;  %v4922_v28 = vpack.c.bf16 %v4906_v10, %v4906_v10  ;;  %6919 = vmatmul.mubr.bf16.gmra.mrb[132].mxu0 %v24828_v2  ;;  %7061 = vmatmul.mubr.bf16.gmra.mrb[136].mxu1 %v24828_v2  ;;  %v4868_v30 = vadd.f32 %v4840_v48, %v30735_v17  ;;  %v4893_v8 = vmax.f32 %v4865_v37, 0.0  ;;  %v20054_v9 = vld [vmem:[%s30466_s3 + $0x2a4] ss:$16 sps:$4 sm:$0xff]   ;;  %v20057_v43 = vld [vmem:[%s30466_s3 + $0x2ac] ss:$16 sps:$4 sm:$0xff]  }
 0x3d6   :  { %v4923_v22 = vpack.c.bf16 %v4907_v32, %v4907_v32  ;;  %6952 = vmatpush1.bf16.msra.mxu0 %v20034_v47  ;;  %7094 = vmatpush1.bf16.msra.mxu1 %v20037_v46  ;;  %v4781_v23 = vpop.f32.mrb[124].mxu1  ;;  %v24910_v61 = vsel %vm4942_vm2, %v4949_v62, %v4957_v58  ;;  %v4869_v44 = vadd.f32 %v4841_v13, %v30736_v20  ;;  %v20055_v47 = vld [vmem:[%s30466_s3 + $0x2a8] ss:$16 sps:$4 sm:$0xff]   ;;  %v20060_v10 = vld [vmem:[%s30466_s3 + $0x2c4] ss:$16 sps:$4 sm:$0xff]  }
 0x3d7   :  { %4990 = vst [vmem:[#allocation2 + $0x18] sm:$0xf0] %v4946_v54  ;;  %v4963_v36 = vrot.slane %v4922_v28, 4  ;;  %v4844_v25 = vmax.f32 %v24598_v60, %v4781_v23  ;;  %v4783_v5 = vpop.f32.mrb[125].mxu1  ;;  %6953 = vmatprep.subr.bf16.mxu0 %v20042_v16  ;;  %7095 = vmatprep.subr.bf16.mxu1 %v20045_v42  ;;  %4996 = vst [vmem:[#allocation2 + $0x48] sm:$0xff] %v24910_v61  ;;  %v4896_v39 = vmax.f32 %v4868_v30, 0.0 }
 0x3d8   :  { %v4965_v62 = vrot.slane %v4923_v22, 4  ;;  %v4845_v7 = vmax.f32 %v24609_v27, %v4783_v5  ;;  %v4785_v3 = vpop.f32.mrb[126].mxu1  ;;  %6928 = vmatprep.mubr.bf16.mxu0 %v24910_v61  ;;  %7070 = vmatprep.mubr.bf16.mxu1 %v24910_v61  ;;  %v4897_v15 = vmax.f32 %v4869_v44, 0.0  ;;  %v20063_v37 = vld [vmem:[%s30466_s3 + $0x2cc] ss:$16 sps:$4 sm:$0xff]  }
 0x3d9   :  { %v24927_v60 = vsel %vm4942_vm2, %v4955_v41, %v4963_v36  ;;  %v4872_v18 = vadd.f32 %v4844_v25, %v30735_v17  ;;  %v4848_v12 = vmax.f32 %v24614_v26, %v4785_v3  ;;  %v4787_v21 = vpop.f32.mrb[127].mxu1  ;;  %v4916_v27 = vpack.c.bf16 %v4896_v39, %v4892_v0  ;;  %v20058_v0 = vld [vmem:[%s30466_s3 + $0x2c0] ss:$16 sps:$4 sm:$0xff]   ;;  %v20075_v39 = vld [vmem:[%s30466_s3 + $0x30c] ss:$16 sps:$4 sm:$0xff]  }
 0x3da   :  { %4999 = vst [vmem:[#allocation2 + $0x60] sm:$0xff] %v24927_v60  ;;  %v24933_v51 = vsel %vm4942_vm2, %v4957_v58, %v4965_v62  ;;  %6954 = vmatpush1.bf16.msra.mxu0 %v20040_v63  ;;  %7096 = vmatpush1.bf16.msra.mxu1 %v20043_v1  ;;  %v4917_v26 = vpack.c.bf16 %v4897_v15, %v4893_v8  ;;  %v20069_v1 = vld [vmem:[%s30466_s3 + $0x2ec] ss:$16 sps:$4 sm:$0xff]   ;;  %v20072_v8 = vld [vmem:[%s30466_s3 + $0x304] ss:$16 sps:$4 sm:$0xff]  }
 0x3db   :  { %5000 = vst [vmem:[#allocation2 + $0x68] sm:$0xff] %v24933_v51  ;;  %v4876_v35 = vadd.f32 %v4848_v12, %v30735_v17  ;;  %6955 = vmatprep.subr.bf16.mxu0 %v20048_v11  ;;  %7097 = vmatprep.subr.bf16.mxu1 %v20051_v29  ;;  %v4951_v49 = vrot.slane %v4916_v27, 4  ;;  %v4873_v41 = vadd.f32 %v4845_v7, %v30736_v20  ;;  %v4900_v19 = vmax.f32 %v4872_v18, 0.0  ;;  %v20064_v11 = vld [vmem:[%s30466_s3 + $0x2e0] ss:$16 sps:$4 sm:$0xff]  }
 0x3dc   :  { %v4849_v56 = vmax.f32 %v24619_v52, %v4787_v21  ;;  %v4953_v55 = vrot.slane %v4917_v26, 4  ;;  %v20052_v52 = vld [vmem:[%s30466_s3 + $0x2a0] ss:$16 sps:$4 sm:$0xff]   ;;  %v20067_v29 = vld [vmem:[%s30466_s3 + $0x2e8] ss:$16 sps:$4 sm:$0xff]  }
 0x3dd   :  { %v4904_v14 = vmax.f32 %v4876_v35, 0.0  ;;  %6929 = vmatmul.mubr.bf16.gmra.mrb[136].mxu0 %v24881_v33  ;;  %7071 = vmatmul.mubr.bf16.gmra.mrb[140].mxu1 %v24881_v33  ;;  %v24956_v34 = vsel %vm4942_vm2, %v4945_v45, %v4951_v49  ;;  %v4901_v16 = vmax.f32 %v4873_v41, 0.0  ;;  %v20070_v18 = vld [vmem:[%s30466_s3 + $0x300] ss:$16 sps:$4 sm:$0xff]   ;;  %v20073_v12 = vld [vmem:[%s30466_s3 + $0x308] ss:$16 sps:$4 sm:$0xff]  }
 0x3de   :  { %v4877_v38 = vadd.f32 %v4849_v56, %v30736_v20  ;;  %6956 = vmatpush1.bf16.msra.mxu0 %v20046_v40  ;;  %7098 = vmatpush1.bf16.msra.mxu1 %v20049_v53  ;;  %v4791_v50 = vpop.f32.mrb[128].mxu1  ;;  %4993 = vst [vmem:[#allocation2 + $0x30] sm:$0xff] %v24956_v34  ;;  %v24969_v24 = vsel %vm4942_vm2, %v4946_v54, %v4953_v55  ;;  %v5010_v5 = vld [vmem:[#allocation2 + $0x18] sm:$0xff]  ;;  %v20078_v21 = vld [vmem:[%s30466_s3 + $0x324] ss:$16 sps:$4 sm:$0xff]  }
 0x3df   :  { %v4920_v45 = vpack.c.bf16 %v4904_v14, %v4900_v19  ;;  %v4852_v46 = vmax.f32 %v24644_v31, %v4791_v50  ;;  %v4793_v57 = vpop.f32.mrb[129].mxu1  ;;  %6957 = vmatprep.subr.bf16.mxu0 %v20054_v9  ;;  %7099 = vmatprep.subr.bf16.mxu1 %v20057_v43  ;;  %4994 = vst [vmem:[#allocation2 + $0x38] sm:$0xff] %v24969_v24  ;;  %v20081_v27 = vld [vmem:[%s30466_s3 + $0x32c] ss:$16 sps:$4 sm:$0xff]   ;;  %v20076_v40 = vld [vmem:[%s30466_s3 + $0x320] ss:$16 sps:$4 sm:$0xff]  }
 0x3e0   :  { %v4905_v42 = vmax.f32 %v4877_v38, 0.0  ;;  %v4853_v32 = vmax.f32 %v24655_v59, %v4793_v57  ;;  %v4795_v4 = vpop.f32.mrb[130].mxu1  ;;  %v20061_v59 = vld [vmem:[%s30466_s3 + $0x2c8] ss:$16 sps:$4 sm:$0xff]   ;;  %v20084_v26 = vld [vmem:[%s30466_s3 + $0x344] ss:$16 sps:$4 sm:$0xff]  }
 0x3e1   :  { %v4959_v48 = vrot.slane %v4920_v45, 4  ;;  %v4880_v31 = vadd.f32 %v4852_v46, %v30735_v17  ;;  %v4796_v58 = vpop.f32.mrb[131].mxu1  ;;  %v20066_v17 = vld [vmem:[%s30466_s3 + $0x2e4] ss:$16 sps:$4 sm:$0xff]   ;;  %v5019_v63 = vld [vmem:[#allocation2 + $0x60] sm:$0xf] }
 0x3e2   :  { %v4921_v54 = vpack.c.bf16 %v4905_v42, %v4901_v16  ;;  %v4881_v28 = vadd.f32 %v4853_v32, %v30736_v20  ;;  %6958 = vmatpush1.bf16.msra.mxu0 %v20052_v52  ;;  %7100 = vmatpush1.bf16.msra.mxu1 %v20055_v47  ;;  %v5020_v13 = vld [vmem:[#allocation2 + $0x68] sm:$0xf]  ;;  %v20087_v35 = vld [vmem:[%s30466_s3 + $0x34c] ss:$16 sps:$4 sm:$0xff]   ;;  %v20082_v9 = vld [vmem:[%s30466_s3 + $0x340] ss:$16 sps:$4 sm:$0xff]  }
 0x3e3   :  { %v24989_v22 = vsel %vm4942_vm2, %v4951_v49, %v4959_v48  ;;  %v4908_v30 = vmax.f32 %v4880_v31, 0.0  ;;  %6938 = vmatprep.mubr.bf16.mxu0 %v5020_v13  ;;  %7080 = vmatprep.mubr.bf16.mxu1 %v5020_v13  ;;  %v20079_v53 = vld [vmem:[%s30466_s3 + $0x328] ss:$16 sps:$4 sm:$0xff]   ;;  %v20090_v49 = vld [vmem:[%s30466_s3 + $0x364] ss:$16 sps:$4 sm:$0xff]  }
 0x3e4   :  { %4997 = vst [vmem:[#allocation2 + $0x50] sm:$0xff] %v24989_v22  ;;  %v4961_v20 = vrot.slane %v4921_v54, 4  ;;  %v4909_v23 = vmax.f32 %v4881_v28, 0.0  ;;  %6959 = vmatprep.subr.bf16.mxu0 %v20060_v10  ;;  %7101 = vmatprep.subr.bf16.mxu1 %v20063_v37  ;;  %v20085_v43 = vld [vmem:[%s30466_s3 + $0x348] ss:$16 sps:$4 sm:$0xff]   ;;  %v5009_v13 = vld [vmem:[#allocation2 + $0x10] sm:$0xff] }
 0x3e5   :  { %v4924_v36 = vpack.c.bf16 %v4908_v30, %v4908_v30  ;;  %6939 = vmatmul.mubr.bf16.gmra.mrb[140].mxu0 %v5019_v63  ;;  %7081 = vmatmul.mubr.bf16.gmra.mrb[144].mxu1 %v5019_v63  ;;  %v20093_v41 = vld [vmem:[%s30466_s3 + $0x36c] ss:$16 sps:$4 sm:$0xff]   ;;  %v20088_v56 = vld [vmem:[%s30466_s3 + $0x360] ss:$16 sps:$4 sm:$0xff]   ;;  %v20096_v19 = vld [vmem:[%s30466_s3 + $0x384] ss:$16 sps:$4 sm:$0xff]  }
 0x3e6   :  { %v24999_v44 = vsel %vm4942_vm2, %v4953_v55, %v4961_v20  ;;  %v4925_v25 = vpack.c.bf16 %v4909_v23, %v4909_v23  ;;  %6960 = vmatpush1.bf16.msra.mxu0 %v20058_v0  ;;  %7102 = vmatpush1.bf16.msra.mxu1 %v20061_v59  ;;  %v20091_v55 = vld [vmem:[%s30466_s3 + $0x368] ss:$16 sps:$4 sm:$0xff]   ;;  %v20099_v14 = vld [vmem:[%s30466_s3 + $0x38c] ss:$16 sps:$4 sm:$0xff]   ;;  %v20094_v38 = vld [vmem:[%s30466_s3 + $0x380] ss:$16 sps:$4 sm:$0xff]  }
 0x3e7   :  { %4998 = vst [vmem:[#allocation2 + $0x58] sm:$0xff] %v24999_v44  ;;  %v4967_v62 = vrot.slane %v4924_v36, 4  ;;  %6979 = vmatprep.mubr.bf16.mxu0 %v5010_v5  ;;  %7121 = vmatprep.mubr.bf16.mxu1 %v5010_v5  ;;  %v20097_v50 = vld [vmem:[%s30466_s3 + $0x388] ss:$16 sps:$4 sm:$0xff]   ;;  %v20102_v52 = vld [vmem:[%s30466_s3 + $0x3a4] ss:$16 sps:$4 sm:$0xff]  }
 0x3e8   :  { %v4969_v7 = vrot.slane %v4925_v25, 4  ;;  %6961 = vmatprep.subr.bf16.mxu0 %v20066_v17  ;;  %7103 = vmatprep.subr.bf16.mxu1 %v20069_v1  ;;  %v20105_v47 = vld [vmem:[%s30466_s3 + $0x3ac] ss:$16 sps:$4 sm:$0xff]   ;;  %v20100_v45 = vld [vmem:[%s30466_s3 + $0x3a0] ss:$16 sps:$4 sm:$0xff]  }
 0x3e9   :  { %v25015_v3 = vsel %vm4942_vm2, %v4959_v48, %v4967_v62  ;;  %v20103_v46 = vld [vmem:[%s30466_s3 + $0x3a8] ss:$16 sps:$4 sm:$0xff]   ;;  %v20108_v57 = vld [vmem:[%s30466_s3 + $0x3c4] ss:$16 sps:$4 sm:$0xff]   ;;  %v20111_v10 = vld [vmem:[%s30466_s3 + $0x3cc] ss:$16 sps:$4 sm:$0xff]  }
 0x3ea   :  { %5001 = vst [vmem:[#allocation2 + $0x70] sm:$0xff] %v25015_v3  ;;  %v25019_v15 = vsel %vm4942_vm2, %v4961_v20, %v4969_v7  ;;  %6962 = vmatpush1.bf16.msra.mxu0 %v20064_v11  ;;  %7104 = vmatpush1.bf16.msra.mxu1 %v20067_v29  ;;  %v20106_v16 = vld [vmem:[%s30466_s3 + $0x3c0] ss:$16 sps:$4 sm:$0xff]   ;;  %v20109_v42 = vld [vmem:[%s30466_s3 + $0x3c8] ss:$16 sps:$4 sm:$0xff]  }
 0x3eb   :  { %5002 = vst [vmem:[#allocation2 + $0x78] sm:$0xff] %v25019_v15  ;;  %6963 = vmatprep.subr.bf16.mxu0 %v20072_v8  ;;  %7105 = vmatprep.subr.bf16.mxu1 %v20075_v39  ;;  %v20114_v32 = vld [vmem:[%s30466_s3 + $0x3e4] ss:$16 sps:$4 sm:$0xff]   ;;  %v20117_v4 = vld [vmem:[%s30466_s3 + $0x3ec] ss:$16 sps:$4 sm:$0xff]  }
 0x3ec   :  { %v20112_v37 = vld [vmem:[%s30466_s3 + $0x3e0] ss:$16 sps:$4 sm:$0xff]   ;;  %v20115_v48 = vld [vmem:[%s30466_s3 + $0x3e8] ss:$16 sps:$4 sm:$0xff]   ;;  %v20120_v31 = vld [vmem:[%s30466_s3 + $0x1004] ss:$16 sps:$4 sm:$0xff]  }
 0x3ed   :  { %v20123_v58 = vld [vmem:[%s30466_s3 + $0x100c] ss:$16 sps:$4 sm:$0xff]   ;;  %v20118_v54 = vld [vmem:[%s30466_s3 + $0x1000] ss:$16 sps:$4 sm:$0xff]   ;;  %v20121_v28 = vld [vmem:[%s30466_s3 + $0x1008] ss:$16 sps:$4 sm:$0xff]  }
 0x3ee   :  { %6964 = vmatpush1.bf16.msra.mxu0 %v20070_v18  ;;  %7106 = vmatpush1.bf16.msra.mxu1 %v20073_v12  ;;  %v20126_v0 = vld [vmem:[%s30466_s3 + $0x1024] ss:$16 sps:$4 sm:$0xff]   ;;  %v20129_v59 = vld [vmem:[%s30466_s3 + $0x102c] ss:$16 sps:$4 sm:$0xff]   ;;  %v20124_v30 = vld [vmem:[%s30466_s3 + $0x1020] ss:$16 sps:$4 sm:$0xff]  }
 0x3ef   :  { %6965 = vmatprep.subr.bf16.mxu0 %v20078_v21  ;;  %7107 = vmatprep.subr.bf16.mxu1 %v20081_v27  ;;  %v20127_v17 = vld [vmem:[%s30466_s3 + $0x1028] ss:$16 sps:$4 sm:$0xff]   ;;  %v20132_v20 = vld [vmem:[%s30466_s3 + $0x1044] ss:$16 sps:$4 sm:$0xff]   ;;  %v20135_v23 = vld [vmem:[%s30466_s3 + $0x104c] ss:$16 sps:$4 sm:$0xff]  }
 0x3f0   :  { %v20130_v63 = vld [vmem:[%s30466_s3 + $0x1040] ss:$16 sps:$4 sm:$0xff]   ;;  %v20133_v1 = vld [vmem:[%s30466_s3 + $0x1048] ss:$16 sps:$4 sm:$0xff]   ;;  %v20138_v36 = vld [vmem:[%s30466_s3 + $0x1064] ss:$16 sps:$4 sm:$0xff]  }
 0x3f1   :  { %v20141_v25 = vld [vmem:[%s30466_s3 + $0x106c] ss:$16 sps:$4 sm:$0xff]   ;;  %v20136_v5 = vld [vmem:[%s30466_s3 + $0x1060] ss:$16 sps:$4 sm:$0xff]   ;;  %v20139_v11 = vld [vmem:[%s30466_s3 + $0x1068] ss:$16 sps:$4 sm:$0xff]  }
 0x3f2   :  { %6966 = vmatpush1.bf16.msra.mxu0 %v20076_v40  ;;  %7108 = vmatpush1.bf16.msra.mxu1 %v20079_v53  ;;  %v20144_v29 = vld [vmem:[%s30466_s3 + $0x1084] ss:$16 sps:$4 sm:$0xff]   ;;  %v20147_v62 = vld [vmem:[%s30466_s3 + $0x108c] ss:$16 sps:$4 sm:$0xff]   ;;  %v20142_v8 = vld [vmem:[%s30466_s3 + $0x1080] ss:$16 sps:$4 sm:$0xff]  }
 0x3f3   :  { %6967 = vmatprep.subr.bf16.mxu0 %v20084_v26  ;;  %7109 = vmatprep.subr.bf16.mxu1 %v20087_v35  ;;  %v20145_v39 = vld [vmem:[%s30466_s3 + $0x1088] ss:$16 sps:$4 sm:$0xff]   ;;  %v20150_v7 = vld [vmem:[%s30466_s3 + $0x10a4] ss:$16 sps:$4 sm:$0xff]   ;;  %v20153_v18 = vld [vmem:[%s30466_s3 + $0x10ac] ss:$16 sps:$4 sm:$0xff]  }
 0x3f4   :  { %v5022_v12 = vld [vmem:[#allocation2 + $0x78] sm:$0xf]  ;;  %v5040_v21 = vld [vmem:[#allocation2 + $0x8] sm:$0xf0]  ;;  %v20148_v27 = vld [vmem:[%s30466_s3 + $0x10a0] ss:$16 sps:$4 sm:$0xff]  }
 0x3f5   :  { %v20151_v40 = vld [vmem:[%s30466_s3 + $0x10a8] ss:$16 sps:$4 sm:$0xff]   ;;  %v20156_v53 = vld [vmem:[%s30466_s3 + $0x10c4] ss:$16 sps:$4 sm:$0xff]   ;;  %v20159_v26 = vld [vmem:[%s30466_s3 + $0x10cc] ss:$16 sps:$4 sm:$0xff]  }
 0x3f6   :  { %6968 = vmatpush1.bf16.msra.mxu0 %v20082_v9  ;;  %7110 = vmatpush1.bf16.msra.mxu1 %v20085_v43  ;;  %v7309_v35 = vrot.slane %v24835_v6, 4  ;;  %v7308_v9 = vrot.slane %v5040_v21, 4  ;;  %v20154_v43 = vld [vmem:[%s30466_s3 + $0x10c0] ss:$16 sps:$4 sm:$0xff]   ;;  %v7319_v21 = vrot.slane %v24910_v61, 4 }
 0x3f7   :  { %6969 = vmatprep.subr.bf16.mxu0 %v20090_v49  ;;  %7111 = vmatprep.subr.bf16.mxu1 %v20093_v41  ;;  %v20157_v49 = vld [vmem:[%s30466_s3 + $0x10c8] ss:$16 sps:$4 sm:$0xff]   ;;  %v5021_v41 = vld [vmem:[#allocation2 + $0x70] sm:$0xf]  ;;  %v20225_v61 = vld [vmem:[%s30466_s3 + $0x122c] ss:$16 sps:$4 sm:$0xff]  }
 0x3f8   :  { %v20228_v6 = vld [vmem:[%s30466_s3 + $0x1244] ss:$16 sps:$4 sm:$0xff]  }
 0x3fa   :  { %6970 = vmatpush1.bf16.msra.mxu0 %v20088_v56  ;;  %7112 = vmatpush1.bf16.msra.mxu1 %v20091_v55  ;;  %v20162_v56 = vld [vmem:[%s30466_s3 + $0x10e4] ss:$16 sps:$4 sm:$0xff]   ;;  %v20165_v55 = vld [vmem:[%s30466_s3 + $0x10ec] ss:$16 sps:$4 sm:$0xff]  }
 0x3fb   :  { %6971 = vmatprep.subr.bf16.mxu0 %v20096_v19  ;;  %7113 = vmatprep.subr.bf16.mxu1 %v20099_v14  ;;  %v25214_v19 = vsel %vm4942_vm2, %v7308_v9, %v7309_v35  ;;  %v20160_v14 = vld [vmem:[%s30466_s3 + $0x10e0] ss:$16 sps:$4 sm:$0xff]  }
 0x3fc   :  { %v20220_v9 = vld [vmem:[%s30466_s3 + $0x1220] ss:$16 sps:$4 sm:$0xff]  }
 0x3fe   :  { %6972 = vmatpush1.bf16.msra.mxu0 %v20094_v38  ;;  %7114 = vmatpush1.bf16.msra.mxu1 %v20097_v50  ;;  %v20163_v38 = vld [vmem:[%s30466_s3 + $0x10e8] ss:$16 sps:$4 sm:$0xff]   ;;  %v20168_v50 = vld [vmem:[%s30466_s3 + $0x1104] ss:$16 sps:$4 sm:$0xff]  }
 0x3ff   :  { %6973 = vmatprep.subr.bf16.mxu0 %v20102_v52  ;;  %7115 = vmatprep.subr.bf16.mxu1 %v20105_v47  ;;  %v20171_v52 = vld [vmem:[%s30466_s3 + $0x110c] ss:$16 sps:$4 sm:$0xff]   ;;  %v20166_v47 = vld [vmem:[%s30466_s3 + $0x1100] ss:$16 sps:$4 sm:$0xff]  }
 0x402   :  { %6974 = vmatpush1.bf16.msra.mxu0 %v20100_v45  ;;  %7116 = vmatpush1.bf16.msra.mxu1 %v20103_v46  ;;  %v20169_v45 = vld [vmem:[%s30466_s3 + $0x1108] ss:$16 sps:$4 sm:$0xff]   ;;  %v20174_v46 = vld [vmem:[%s30466_s3 + $0x1124] ss:$16 sps:$4 sm:$0xff]  }
 0x403   :  { %6975 = vmatprep.subr.bf16.mxu0 %v20108_v57  ;;  %7117 = vmatprep.subr.bf16.mxu1 %v20111_v10  ;;  %v20177_v57 = vld [vmem:[%s30466_s3 + $0x112c] ss:$16 sps:$4 sm:$0xff]   ;;  %v20172_v10 = vld [vmem:[%s30466_s3 + $0x1120] ss:$16 sps:$4 sm:$0xff]  }
 0x406   :  { %6976 = vmatpush1.bf16.msra.mxu0 %v20106_v16  ;;  %7118 = vmatpush1.bf16.msra.mxu1 %v20109_v42  ;;  %v20175_v16 = vld [vmem:[%s30466_s3 + $0x1128] ss:$16 sps:$4 sm:$0xff]   ;;  %v20180_v42 = vld [vmem:[%s30466_s3 + $0x1144] ss:$16 sps:$4 sm:$0xff]  }
 0x407   :  { %6977 = vmatprep.subr.bf16.mxu0 %v20114_v32  ;;  %7119 = vmatprep.subr.bf16.mxu1 %v20117_v4  ;;  %v20183_v32 = vld [vmem:[%s30466_s3 + $0x114c] ss:$16 sps:$4 sm:$0xff]   ;;  %v20178_v4 = vld [vmem:[%s30466_s3 + $0x1140] ss:$16 sps:$4 sm:$0xff]  }
 0x40a   :  { %6978 = vmatpush1.bf16.msra.mxu0 %v20112_v37  ;;  %7120 = vmatpush1.bf16.msra.mxu1 %v20115_v48  ;;  %v20181_v37 = vld [vmem:[%s30466_s3 + $0x1148] ss:$16 sps:$4 sm:$0xff]   ;;  %v20186_v48 = vld [vmem:[%s30466_s3 + $0x1164] ss:$16 sps:$4 sm:$0xff]  }
 0x40b   :  { %7989 = vmatprep.subr.bf16.mxu0 %v20120_v31  ;;  %8131 = vmatprep.subr.bf16.mxu1 %v20123_v58  ;;  %v20189_v31 = vld [vmem:[%s30466_s3 + $0x116c] ss:$16 sps:$4 sm:$0xff]   ;;  %v20184_v58 = vld [vmem:[%s30466_s3 + $0x1160] ss:$16 sps:$4 sm:$0xff]  }
 0x40d   :  { %6980 = vmatmul.mubr.bf16.vlgmr.msra.gmra.mrb[128].mxu0 %v5009_v13  ;;  %7122 = vmatmul.mubr.bf16.vlgmr.msra.gmra.mrb[132].mxu1 %v5009_v13  ;;  %v20195_v13 = vld [vmem:[%s30466_s3 + $0x118c] ss:$16 sps:$4 sm:$0xff]  }
 0x40e   :  { %6989 = vmatprep.mubr.bf16.mxu0 %v24969_v24  ;;  %7131 = vmatprep.mubr.bf16.mxu1 %v24969_v24 }
 0x40f   :  { %7990 = vmatpush1.bf16.msra.mxu0 %v20118_v54  ;;  %8132 = vmatpush1.bf16.msra.mxu1 %v20121_v28  ;;  %v20187_v54 = vld [vmem:[%s30466_s3 + $0x1168] ss:$16 sps:$4 sm:$0xff]   ;;  %v20192_v28 = vld [vmem:[%s30466_s3 + $0x1184] ss:$16 sps:$4 sm:$0xff]  }
 0x410   :  { %7991 = vmatprep.subr.bf16.mxu0 %v20126_v0  ;;  %8133 = vmatprep.subr.bf16.mxu1 %v20129_v59  ;;  %v20190_v0 = vld [vmem:[%s30466_s3 + $0x1180] ss:$16 sps:$4 sm:$0xff]   ;;  %v20193_v59 = vld [vmem:[%s30466_s3 + $0x1188] ss:$16 sps:$4 sm:$0xff]  }
 0x413   :  { %7992 = vmatpush1.bf16.msra.mxu0 %v20124_v30  ;;  %8134 = vmatpush1.bf16.msra.mxu1 %v20127_v17  ;;  %v20198_v30 = vld [vmem:[%s30466_s3 + $0x11a4] ss:$16 sps:$4 sm:$0xff]   ;;  %v20201_v17 = vld [vmem:[%s30466_s3 + $0x11ac] ss:$16 sps:$4 sm:$0xff]  }
 0x414   :  { %7993 = vmatprep.subr.bf16.mxu0 %v20132_v20  ;;  %8135 = vmatprep.subr.bf16.mxu1 %v20135_v23  ;;  %v20196_v20 = vld [vmem:[%s30466_s3 + $0x11a0] ss:$16 sps:$4 sm:$0xff]   ;;  %v20199_v23 = vld [vmem:[%s30466_s3 + $0x11a8] ss:$16 sps:$4 sm:$0xff]  }
 0x415   :  { %6990 = vmatmul.mubr.bf16.gmra.mrb[132].mxu0 %v24956_v34  ;;  %7132 = vmatmul.mubr.bf16.gmra.mrb[136].mxu1 %v24956_v34 }
 0x416   :  { %6999 = vmatprep.mubr.bf16.mxu0 %v24999_v44  ;;  %7141 = vmatprep.mubr.bf16.mxu1 %v24999_v44 }
 0x417   :  { %7994 = vmatpush1.bf16.msra.mxu0 %v20130_v63  ;;  %8136 = vmatpush1.bf16.msra.mxu1 %v20133_v1  ;;  %v20204_v63 = vld [vmem:[%s30466_s3 + $0x11c4] ss:$16 sps:$4 sm:$0xff]   ;;  %v20207_v1 = vld [vmem:[%s30466_s3 + $0x11cc] ss:$16 sps:$4 sm:$0xff]  }
 0x418   :  { %7995 = vmatprep.subr.bf16.mxu0 %v20138_v36  ;;  %8137 = vmatprep.subr.bf16.mxu1 %v20141_v25  ;;  %v20202_v36 = vld [vmem:[%s30466_s3 + $0x11c0] ss:$16 sps:$4 sm:$0xff]   ;;  %v20205_v25 = vld [vmem:[%s30466_s3 + $0x11c8] ss:$16 sps:$4 sm:$0xff]  }
 0x41b   :  { %7996 = vmatpush1.bf16.msra.mxu0 %v20136_v5  ;;  %8138 = vmatpush1.bf16.msra.mxu1 %v20139_v11  ;;  %v20210_v5 = vld [vmem:[%s30466_s3 + $0x11e4] ss:$16 sps:$4 sm:$0xff]   ;;  %v20213_v11 = vld [vmem:[%s30466_s3 + $0x11ec] ss:$16 sps:$4 sm:$0xff]  }
 0x41c   :  { %7997 = vmatprep.subr.bf16.mxu0 %v20144_v29  ;;  %8139 = vmatprep.subr.bf16.mxu1 %v20147_v62  ;;  %v5039_v29 = vld [vmem:[#allocation2] sm:$0xf0]  ;;  %v20208_v62 = vld [vmem:[%s30466_s3 + $0x11e0] ss:$16 sps:$4 sm:$0xff]  }
 0x41d   :  { %7000 = vmatmul.mubr.bf16.gmra.mrb[136].mxu0 %v24989_v22  ;;  %7142 = vmatmul.mubr.bf16.gmra.mrb[140].mxu1 %v24989_v22 }
 0x41e   :  { %7009 = vmatprep.mubr.bf16.mxu0 %v5022_v12  ;;  %7151 = vmatprep.mubr.bf16.mxu1 %v5022_v12  ;;  %v7305_v12 = vrot.slane %v5039_v29, 4  ;;  %v20271_v29 = vld [vmem:[%s30466_s3 + $0x1328] ss:$16 sps:$4 sm:$0xff]  }
 0x41f   :  { %7998 = vmatpush1.bf16.msra.mxu0 %v20142_v8  ;;  %8140 = vmatpush1.bf16.msra.mxu1 %v20145_v39  ;;  %v20211_v8 = vld [vmem:[%s30466_s3 + $0x11e8] ss:$16 sps:$4 sm:$0xff]   ;;  %v20216_v39 = vld [vmem:[%s30466_s3 + $0x1204] ss:$16 sps:$4 sm:$0xff]  }
 0x420   :  { %7999 = vmatprep.subr.bf16.mxu0 %v20150_v7  ;;  %8141 = vmatprep.subr.bf16.mxu1 %v20153_v18  ;;  %v20219_v7 = vld [vmem:[%s30466_s3 + $0x120c] ss:$16 sps:$4 sm:$0xff]   ;;  %v7306_v18 = vrot.slane %v24828_v2, 4  ;;  %v20222_v2 = vld [vmem:[%s30466_s3 + $0x1224] ss:$16 sps:$4 sm:$0xff]  }
 0x423   :  { %8000 = vmatpush1.bf16.msra.mxu0 %v20148_v27  ;;  %8142 = vmatpush1.bf16.msra.mxu1 %v20151_v40  ;;  %v20214_v27 = vld [vmem:[%s30466_s3 + $0x1200] ss:$16 sps:$4 sm:$0xff]   ;;  %v20217_v40 = vld [vmem:[%s30466_s3 + $0x1208] ss:$16 sps:$4 sm:$0xff]  }
 0x424   :  { %8001 = vmatprep.subr.bf16.mxu0 %v20156_v53  ;;  %8143 = vmatprep.subr.bf16.mxu1 %v20159_v26  ;;  %v25335_v53 = vsel %vm4942_vm2, %v7305_v12, %v7306_v18  ;;  %v25348_v26 = vsel %vm4942_vm2, %v7309_v35, %v7319_v21  ;;  %v7317_v35 = vrot.slane %v24881_v33, 4  ;;  %v20229_v33 = vld [vmem:[%s30466_s3 + $0x1248] ss:$16 sps:$4 sm:$0xff]   ;;  %v20285_v12 = vld [vmem:[%s30466_s3 + $0x136c] ss:$16 sps:$4 sm:$0xff]  }
 0x425   :  { %7010 = vmatmul.mubr.bf16.gmra.mrb[140].mxu0 %v5021_v41  ;;  %7152 = vmatmul.mubr.bf16.gmra.mrb[144].mxu1 %v5021_v41  ;;  %v25366_v41 = vrot.slane %v24933_v51, 4  ;;  %v20234_v51 = vld [vmem:[%s30466_s3 + $0x1264] ss:$16 sps:$4 sm:$0xff]  }
 0x426   :  { %8021 = vmatprep.mubr.bf16.mxu0 %v25214_v19  ;;  %8163 = vmatprep.mubr.bf16.mxu1 %v25214_v19 }
 0x427   :  { %8002 = vmatpush1.bf16.msra.mxu0 %v20154_v43  ;;  %8144 = vmatpush1.bf16.msra.mxu1 %v20157_v49  ;;  %v20223_v43 = vld [vmem:[%s30466_s3 + $0x1228] ss:$16 sps:$4 sm:$0xff]   ;;  %v20231_v49 = vld [vmem:[%s30466_s3 + $0x124c] ss:$16 sps:$4 sm:$0xff]  }
 0x428   :  { %8003 = vmatprep.subr.bf16.mxu0 %v20162_v56  ;;  %8145 = vmatprep.subr.bf16.mxu1 %v20165_v55  ;;  %v20226_v56 = vld [vmem:[%s30466_s3 + $0x1240] ss:$16 sps:$4 sm:$0xff]   ;;  %v25375_v55 = vsel %vm4942_vm2, %v7306_v18, %v7317_v35  ;;  %v20282_v18 = vld [vmem:[%s30466_s3 + $0x1364] ss:$16 sps:$4 sm:$0xff]  }
 0x42b   :  { %8004 = vmatpush1.bf16.msra.mxu0 %v20160_v14  ;;  %8146 = vmatpush1.bf16.msra.mxu1 %v20163_v38  ;;  %v20237_v14 = vld [vmem:[%s30466_s3 + $0x126c] ss:$16 sps:$4 sm:$0xff]   ;;  %v25387_v38 = vsel %vm4942_vm2, %v7319_v21, %v25366_v41  ;;  %v20280_v21 = vld [vmem:[%s30466_s3 + $0x1360] ss:$16 sps:$4 sm:$0xff]  }
 0x42c   :  { %8005 = vmatprep.subr.bf16.mxu0 %v20168_v50  ;;  %8147 = vmatprep.subr.bf16.mxu1 %v20171_v52  ;;  %v20232_v50 = vld [vmem:[%s30466_s3 + $0x1260] ss:$16 sps:$4 sm:$0xff]   ;;  %v20235_v52 = vld [vmem:[%s30466_s3 + $0x1268] ss:$16 sps:$4 sm:$0xff]  }
 0x42f   :  { %8006 = vmatpush1.bf16.msra.mxu0 %v20166_v47  ;;  %8148 = vmatpush1.bf16.msra.mxu1 %v20169_v45  ;;  %v20240_v47 = vld [vmem:[%s30466_s3 + $0x1284] ss:$16 sps:$4 sm:$0xff]   ;;  %v25401_v45 = vrot.slane %v24927_v60, 4 }
 0x430   :  { %8007 = vmatprep.subr.bf16.mxu0 %v20174_v46  ;;  %8149 = vmatprep.subr.bf16.mxu1 %v20177_v57  ;;  %v20243_v46 = vld [vmem:[%s30466_s3 + $0x128c] ss:$16 sps:$4 sm:$0xff]   ;;  %v20238_v57 = vld [vmem:[%s30466_s3 + $0x1280] ss:$16 sps:$4 sm:$0xff]  }
 0x431   :  { %v25414_v60 = vsel %vm4942_vm2, %v7317_v35, %v25401_v45  ;;  %v20292_v35 = vld [vmem:[%s30466_s3 + $0x13a0] ss:$16 sps:$4 sm:$0xff]  }
 0x433   :  { %8008 = vmatpush1.bf16.msra.mxu0 %v20172_v10  ;;  %8150 = vmatpush1.bf16.msra.mxu1 %v20175_v16  ;;  %v20241_v10 = vld [vmem:[%s30466_s3 + $0x1288] ss:$16 sps:$4 sm:$0xff]   ;;  %v20246_v16 = vld [vmem:[%s30466_s3 + $0x12a4] ss:$16 sps:$4 sm:$0xff]  }
 0x434   :  { %8009 = vmatprep.subr.bf16.mxu0 %v20180_v42  ;;  %8151 = vmatprep.subr.bf16.mxu1 %v20183_v32  ;;  %v20249_v42 = vld [vmem:[%s30466_s3 + $0x12ac] ss:$16 sps:$4 sm:$0xff]   ;;  %v20244_v32 = vld [vmem:[%s30466_s3 + $0x12a0] ss:$16 sps:$4 sm:$0xff]  }
 0x437   :  { %8010 = vmatpush1.bf16.msra.mxu0 %v20178_v4  ;;  %8152 = vmatpush1.bf16.msra.mxu1 %v20181_v37  ;;  %v5042_v4 = vld [vmem:[#allocation2 + $0x18] sm:$0xf0]  ;;  %v20247_v37 = vld [vmem:[%s30466_s3 + $0x12a8] ss:$16 sps:$4 sm:$0xff]  }
 0x438   :  { %8011 = vmatprep.subr.bf16.mxu0 %v20186_v48  ;;  %8153 = vmatprep.subr.bf16.mxu1 %v20189_v31  ;;  %v20252_v48 = vld [vmem:[%s30466_s3 + $0x12c4] ss:$16 sps:$4 sm:$0xff]   ;;  %v20255_v31 = vld [vmem:[%s30466_s3 + $0x12cc] ss:$16 sps:$4 sm:$0xff]  }
 0x43b   :  { %8012 = vmatpush1.bf16.msra.mxu0 %v20184_v58  ;;  %8154 = vmatpush1.bf16.msra.mxu1 %v20187_v54  ;;  %v7315_v58 = vrot.slane %v24969_v24, 4  ;;  %v7314_v54 = vrot.slane %v5042_v4, 4  ;;  %v7323_v4 = vrot.slane %v24999_v44, 4  ;;  %v7321_v24 = vrot.slane %v24989_v22, 4  ;;  %v20322_v22 = vld [vmem:[%s30466_s3 + $0xc40] ss:$16 sps:$4 sm:$0xff]  }
 0x43c   :  { %8013 = vmatprep.subr.bf16.mxu0 %v20192_v28  ;;  %8155 = vmatprep.subr.bf16.mxu1 %v20195_v13  ;;  %v20250_v28 = vld [vmem:[%s30466_s3 + $0x12c0] ss:$16 sps:$4 sm:$0xff]   ;;  %v20253_v13 = vld [vmem:[%s30466_s3 + $0x12c8] ss:$16 sps:$4 sm:$0xff]  }
 0x43d   :  { %v25586_v44 = vsel %vm4942_vm2, %v7315_v58, %v7323_v4 }
 0x43f   :  { %8014 = vmatpush1.bf16.msra.mxu0 %v20190_v0  ;;  %8156 = vmatpush1.bf16.msra.mxu1 %v20193_v59  ;;  %v20258_v0 = vld [vmem:[%s30466_s3 + $0x12e4] ss:$16 sps:$4 sm:$0xff]   ;;  %v20261_v59 = vld [vmem:[%s30466_s3 + $0x12ec] ss:$16 sps:$4 sm:$0xff]  }
 0x440   :  { %8015 = vmatprep.subr.bf16.mxu0 %v20198_v30  ;;  %8157 = vmatprep.subr.bf16.mxu1 %v20201_v17  ;;  %v25456_v30 = vsel %vm4942_vm2, %v7314_v54, %v7315_v58  ;;  %v20256_v17 = vld [vmem:[%s30466_s3 + $0x12e0] ss:$16 sps:$4 sm:$0xff]   ;;  %v20321_v54 = vld [vmem:[%s30466_s3 + $0xc2c] ss:$16 sps:$4 sm:$0xff]   ;;  %v20319_v58 = vld [vmem:[%s30466_s3 + $0xc28] ss:$16 sps:$4 sm:$0xff]  }
 0x443   :  { %8016 = vmatpush1.bf16.msra.mxu0 %v20196_v20  ;;  %8158 = vmatpush1.bf16.msra.mxu1 %v20199_v23  ;;  %v20259_v20 = vld [vmem:[%s30466_s3 + $0x12e8] ss:$16 sps:$4 sm:$0xff]   ;;  %v20264_v23 = vld [vmem:[%s30466_s3 + $0x1304] ss:$16 sps:$4 sm:$0xff]  }
 0x444   :  { %8017 = vmatprep.subr.bf16.mxu0 %v20204_v63  ;;  %8159 = vmatprep.subr.bf16.mxu1 %v20207_v1  ;;  %v20267_v63 = vld [vmem:[%s30466_s3 + $0x130c] ss:$16 sps:$4 sm:$0xff]   ;;  %v20262_v1 = vld [vmem:[%s30466_s3 + $0x1300] ss:$16 sps:$4 sm:$0xff]  }
 0x447   :  { %8018 = vmatpush1.bf16.msra.mxu0 %v20202_v36  ;;  %8160 = vmatpush1.bf16.msra.mxu1 %v20205_v25  ;;  %v20265_v36 = vld [vmem:[%s30466_s3 + $0x1308] ss:$16 sps:$4 sm:$0xff]   ;;  %v20270_v25 = vld [vmem:[%s30466_s3 + $0x1324] ss:$16 sps:$4 sm:$0xff]  }
 0x448   :  { %8019 = vmatprep.subr.bf16.mxu0 %v20210_v5  ;;  %8161 = vmatprep.subr.bf16.mxu1 %v20213_v11  ;;  %v20273_v5 = vld [vmem:[%s30466_s3 + $0x132c] ss:$16 sps:$4 sm:$0xff]   ;;  %v20268_v11 = vld [vmem:[%s30466_s3 + $0x1320] ss:$16 sps:$4 sm:$0xff]  }
 0x44b   :  { %8020 = vmatpush1.bf16.msra.mxu0 %v20208_v62  ;;  %8162 = vmatpush1.bf16.msra.mxu1 %v20211_v8  ;;  %v20276_v62 = vld [vmem:[%s30466_s3 + $0x1344] ss:$16 sps:$4 sm:$0xff]   ;;  %v20279_v8 = vld [vmem:[%s30466_s3 + $0x134c] ss:$16 sps:$4 sm:$0xff]  }
 0x44c   :  { %8060 = vmatprep.subr.bf16.mxu0 %v20216_v39  ;;  %8202 = vmatprep.subr.bf16.mxu1 %v20219_v7  ;;  %v20274_v39 = vld [vmem:[%s30466_s3 + $0x1340] ss:$16 sps:$4 sm:$0xff]   ;;  %v20277_v7 = vld [vmem:[%s30466_s3 + $0x1348] ss:$16 sps:$4 sm:$0xff]  }
 0x44e   :  { %8022 = vmatmul.mubr.bf16.vlgmr.msra.gmra.mrb[128].mxu0 %v25335_v53  ;;  %8164 = vmatmul.mubr.bf16.vlgmr.msra.gmra.mrb[132].mxu1 %v25335_v53 }
 0x44f   :  { %8031 = vmatprep.mubr.bf16.mxu0 %v25348_v26  ;;  %8061 = vmatpush1.bf16.msra.mxu0 %v20214_v27  ;;  %v20283_v27 = vld [vmem:[%s30466_s3 + $0x1368] ss:$16 sps:$4 sm:$0xff]  }
 0x450   :  { %8173 = vmatprep.mubr.bf16.mxu1 %v25348_v26  ;;  %8203 = vmatpush1.bf16.msra.mxu1 %v20217_v40  ;;  %v20288_v40 = vld [vmem:[%s30466_s3 + $0x1384] ss:$16 sps:$4 sm:$0xff]  }
 0x451   :  { %8062 = vmatprep.subr.bf16.mxu0 %v20222_v2  ;;  %8204 = vmatprep.subr.bf16.mxu1 %v20225_v61  ;;  %v20291_v2 = vld [vmem:[%s30466_s3 + $0x138c] ss:$16 sps:$4 sm:$0xff]   ;;  %v20286_v61 = vld [vmem:[%s30466_s3 + $0x1380] ss:$16 sps:$4 sm:$0xff]  }
 0x453   :  { %8063 = vmatpush1.bf16.msra.mxu0 %v20220_v9  ;;  %v20289_v9 = vld [vmem:[%s30466_s3 + $0x1388] ss:$16 sps:$4 sm:$0xff]  }
 0x454   :  { %8205 = vmatpush1.bf16.msra.mxu1 %v20223_v43  ;;  %8064 = vmatprep.subr.bf16.mxu0 %v20228_v6  ;;  %v20294_v43 = vld [vmem:[%s30466_s3 + $0x13a4] ss:$16 sps:$4 sm:$0xff]   ;;  %v20297_v6 = vld [vmem:[%s30466_s3 + $0x13ac] ss:$16 sps:$4 sm:$0xff]  }
 0x455   :  { %8206 = vmatprep.subr.bf16.mxu1 %v20231_v49  ;;  %v20295_v49 = vld [vmem:[%s30466_s3 + $0x13a8] ss:$16 sps:$4 sm:$0xff]  }
 0x456   :  { %8032 = vmatmul.mubr.bf16.gmra.mrb[132].mxu0 %v25375_v55  ;;  %8174 = vmatmul.mubr.bf16.gmra.mrb[136].mxu1 %v25375_v55 }
 0x457   :  { %8041 = vmatprep.mubr.bf16.mxu0 %v25387_v38  ;;  %8065 = vmatpush1.bf16.msra.mxu0 %v20226_v56  ;;  %v20300_v56 = vld [vmem:[%s30466_s3 + $0x13c4] ss:$16 sps:$4 sm:$0xff]  }
 0x458   :  { %8183 = vmatprep.mubr.bf16.mxu1 %v25387_v38  ;;  %8207 = vmatpush1.bf16.msra.mxu1 %v20229_v33  ;;  %v20303_v33 = vld [vmem:[%s30466_s3 + $0x13cc] ss:$16 sps:$4 sm:$0xff]  }
 0x459   :  { %8066 = vmatprep.subr.bf16.mxu0 %v20234_v51  ;;  %8208 = vmatprep.subr.bf16.mxu1 %v20237_v14  ;;  %v20298_v51 = vld [vmem:[%s30466_s3 + $0x13c0] ss:$16 sps:$4 sm:$0xff]   ;;  %v20301_v14 = vld [vmem:[%s30466_s3 + $0x13c8] ss:$16 sps:$4 sm:$0xff]  }
 0x45b   :  { %8067 = vmatpush1.bf16.msra.mxu0 %v20232_v50  ;;  %v20306_v50 = vld [vmem:[%s30466_s3 + $0x13e4] ss:$16 sps:$4 sm:$0xff]  }
 0x45c   :  { %8209 = vmatpush1.bf16.msra.mxu1 %v20235_v52  ;;  %8068 = vmatprep.subr.bf16.mxu0 %v20240_v47  ;;  %v20309_v52 = vld [vmem:[%s30466_s3 + $0x13ec] ss:$16 sps:$4 sm:$0xff]   ;;  %v5041_v47 = vld [vmem:[#allocation2 + $0x10] sm:$0xf0] }
 0x45d   :  { %8210 = vmatprep.subr.bf16.mxu1 %v20243_v46  ;;  %v20304_v46 = vld [vmem:[%s30466_s3 + $0x13e0] ss:$16 sps:$4 sm:$0xff]  }
 0x45e   :  { %8042 = vmatmul.mubr.bf16.gmra.mrb[136].mxu0 %v25414_v60  ;;  %8184 = vmatmul.mubr.bf16.gmra.mrb[140].mxu1 %v25414_v60 }
 0x45f   :  { %8051 = vmatprep.mubr.bf16.mxu0 %v25366_v41  ;;  %8069 = vmatpush1.bf16.msra.mxu0 %v20238_v57  ;;  %v20307_v57 = vld [vmem:[%s30466_s3 + $0x13e8] ss:$16 sps:$4 sm:$0xff]  }
 0x460   :  { %8193 = vmatprep.mubr.bf16.mxu1 %v25366_v41  ;;  %8211 = vmatpush1.bf16.msra.mxu1 %v20241_v10  ;;  %v20312_v10 = vld [vmem:[%s30466_s3 + $0xc04] ss:$16 sps:$4 sm:$0xff]  }
 0x461   :  { %8070 = vmatprep.subr.bf16.mxu0 %v20246_v16  ;;  %8212 = vmatprep.subr.bf16.mxu1 %v20249_v42  ;;  %v7312_v16 = vrot.slane %v24956_v34, 4  ;;  %v7311_v42 = vrot.slane %v5041_v47, 4  ;;  %v20313_v34 = vld [vmem:[%s30466_s3 + $0xc08] ss:$16 sps:$4 sm:$0xff]   ;;  %v20372_v47 = vld [vmem:[%s30466_s3 + $0xd44] ss:$16 sps:$4 sm:$0xff]  }
 0x463   :  { %8071 = vmatpush1.bf16.msra.mxu0 %v20244_v32  ;;  %v20315_v32 = vld [vmem:[%s30466_s3 + $0xc0c] ss:$16 sps:$4 sm:$0xff]  }
 0x464   :  { %8213 = vmatpush1.bf16.msra.mxu1 %v20247_v37  ;;  %8072 = vmatprep.subr.bf16.mxu0 %v20252_v48  ;;  %v20310_v37 = vld [vmem:[%s30466_s3 + $0xc00] ss:$16 sps:$4 sm:$0xff]   ;;  %v25574_v48 = vsel %vm4942_vm2, %v7311_v42, %v7312_v16  ;;  %v20381_v42 = vld [vmem:[%s30466_s3 + $0xd6c] ss:$16 sps:$4 sm:$0xff]  }
 0x465   :  { %8214 = vmatprep.subr.bf16.mxu1 %v20255_v31  ;;  %v20318_v31 = vld [vmem:[%s30466_s3 + $0xc24] ss:$16 sps:$4 sm:$0xff]  }
 0x466   :  { %8052 = vmatmul.mubr.bf16.gmra.mrb[140].mxu0 %v25401_v45  ;;  %8194 = vmatmul.mubr.bf16.gmra.mrb[144].mxu1 %v25401_v45 }
 0x467   :  { %8073 = vmatpush1.bf16.msra.mxu0 %v20250_v28  ;;  %8092 = vmatprep.mubr.bf16.mxu0 %v25456_v30  ;;  %v20316_v28 = vld [vmem:[%s30466_s3 + $0xc20] ss:$16 sps:$4 sm:$0xff]  }
 0x468   :  { %8215 = vmatpush1.bf16.msra.mxu1 %v20253_v13  ;;  %8234 = vmatprep.mubr.bf16.mxu1 %v25456_v30  ;;  %v20324_v13 = vld [vmem:[%s30466_s3 + $0xc44] ss:$16 sps:$4 sm:$0xff]  }
 0x469   :  { %8074 = vmatprep.subr.bf16.mxu0 %v20258_v0  ;;  %8216 = vmatprep.subr.bf16.mxu1 %v20261_v59  ;;  %v25605_v0 = vrot.slane %v25019_v15, 4  ;;  %v20327_v59 = vld [vmem:[%s30466_s3 + $0xc4c] ss:$16 sps:$4 sm:$0xff]   ;;  %v20325_v15 = vld [vmem:[%s30466_s3 + $0xc48] ss:$16 sps:$4 sm:$0xff]  }
 0x46b   :  { %8075 = vmatpush1.bf16.msra.mxu0 %v20256_v17  ;;  %v25614_v17 = vsel %vm4942_vm2, %v7312_v16, %v7321_v24  ;;  %v20378_v16 = vld [vmem:[%s30466_s3 + $0xd64] ss:$16 sps:$4 sm:$0xff]  }
 0x46c   :  { %8217 = vmatpush1.bf16.msra.mxu1 %v20259_v20  ;;  %8076 = vmatprep.subr.bf16.mxu0 %v20264_v23  ;;  %v20330_v20 = vld [vmem:[%s30466_s3 + $0xc64] ss:$16 sps:$4 sm:$0xff]   ;;  %v25625_v23 = vsel %vm4942_vm2, %v7323_v4, %v25605_v0  ;;  %v20379_v4 = vld [vmem:[%s30466_s3 + $0xd68] ss:$16 sps:$4 sm:$0xff]  }
 0x46d   :  { %8218 = vmatprep.subr.bf16.mxu1 %v20267_v63  ;;  %v20333_v63 = vld [vmem:[%s30466_s3 + $0xc6c] ss:$16 sps:$4 sm:$0xff]  }
 0x46f   :  { %8077 = vmatpush1.bf16.msra.mxu0 %v20262_v1  ;;  %v20328_v1 = vld [vmem:[%s30466_s3 + $0xc60] ss:$16 sps:$4 sm:$0xff]  }
 0x470   :  { %8219 = vmatpush1.bf16.msra.mxu1 %v20265_v36  ;;  %8078 = vmatprep.subr.bf16.mxu0 %v20270_v25  ;;  %v25637_v36 = vrot.slane %v25015_v3, 4  ;;  %v20331_v25 = vld [vmem:[%s30466_s3 + $0xc68] ss:$16 sps:$4 sm:$0xff]   ;;  %v20334_v3 = vld [vmem:[%s30466_s3 + $0xc80] ss:$16 sps:$4 sm:$0xff]  }
 0x471   :  { %8220 = vmatprep.subr.bf16.mxu1 %v20273_v5  ;;  %v20336_v5 = vld [vmem:[%s30466_s3 + $0xc84] ss:$16 sps:$4 sm:$0xff]  }
 0x473   :  { %8079 = vmatpush1.bf16.msra.mxu0 %v20268_v11  ;;  %v20339_v11 = vld [vmem:[%s30466_s3 + $0xc8c] ss:$16 sps:$4 sm:$0xff]  }
 0x474   :  { %8221 = vmatpush1.bf16.msra.mxu1 %v20271_v29  ;;  %8080 = vmatprep.subr.bf16.mxu0 %v20276_v62  ;;  %v25653_v29 = vsel %vm4942_vm2, %v7321_v24, %v25637_v36  ;;  %v20337_v62 = vld [vmem:[%s30466_s3 + $0xc88] ss:$16 sps:$4 sm:$0xff]   ;;  %v20393_v24 = vld [vmem:[%s30466_s3 + $0xdac] ss:$16 sps:$4 sm:$0xff]  }
 0x475   :  { %8222 = vmatprep.subr.bf16.mxu1 %v20279_v8  ;;  %v20342_v8 = vld [vmem:[%s30466_s3 + $0xca4] ss:$16 sps:$4 sm:$0xff]  }
 0x477   :  { %8081 = vmatpush1.bf16.msra.mxu0 %v20274_v39  ;;  %v20345_v39 = vld [vmem:[%s30466_s3 + $0xcac] ss:$16 sps:$4 sm:$0xff]  }
 0x478   :  { %8223 = vmatpush1.bf16.msra.mxu1 %v20277_v7  ;;  %8082 = vmatprep.subr.bf16.mxu0 %v20282_v18  ;;  %v20340_v7 = vld [vmem:[%s30466_s3 + $0xca0] ss:$16 sps:$4 sm:$0xff]   ;;  %v20343_v18 = vld [vmem:[%s30466_s3 + $0xca8] ss:$16 sps:$4 sm:$0xff]  }
 0x479   :  { %8224 = vmatprep.subr.bf16.mxu1 %v20285_v12  ;;  %v20348_v12 = vld [vmem:[%s30466_s3 + $0xcc4] ss:$16 sps:$4 sm:$0xff]  }
 0x47b   :  { %8083 = vmatpush1.bf16.msra.mxu0 %v20280_v21  ;;  %v20351_v21 = vld [vmem:[%s30466_s3 + $0xccc] ss:$16 sps:$4 sm:$0xff]  }
 0x47c   :  { %8225 = vmatpush1.bf16.msra.mxu1 %v20283_v27  ;;  %8084 = vmatprep.subr.bf16.mxu0 %v20288_v40  ;;  %v20346_v27 = vld [vmem:[%s30466_s3 + $0xcc0] ss:$16 sps:$4 sm:$0xff]   ;;  %v20349_v40 = vld [vmem:[%s30466_s3 + $0xcc8] ss:$16 sps:$4 sm:$0xff]  }
 0x47d   :  { %8226 = vmatprep.subr.bf16.mxu1 %v20291_v2  ;;  %v20354_v2 = vld [vmem:[%s30466_s3 + $0xce4] ss:$16 sps:$4 sm:$0xff]  }
 0x47f   :  { %8085 = vmatpush1.bf16.msra.mxu0 %v20286_v61  ;;  %v20357_v61 = vld [vmem:[%s30466_s3 + $0xcec] ss:$16 sps:$4 sm:$0xff]  }
 0x480   :  { %8227 = vmatpush1.bf16.msra.mxu1 %v20289_v9  ;;  %8086 = vmatprep.subr.bf16.mxu0 %v20294_v43  ;;  %v21123_v9 = vld [vmem:[#allocation3 + $0x8] sm:$0xff]  ;;  %v20352_v43 = vld [vmem:[%s30466_s3 + $0xce0] ss:$16 sps:$4 sm:$0xff]  }
 0x481   :  { %8228 = vmatprep.subr.bf16.mxu1 %v20297_v6  ;;  %v20355_v6 = vld [vmem:[%s30466_s3 + $0xce8] ss:$16 sps:$4 sm:$0xff]  }
 0x483   :  { %8087 = vmatpush1.bf16.msra.mxu0 %v20292_v35  ;;  %v20360_v35 = vld [vmem:[%s30466_s3 + $0xd04] ss:$16 sps:$4 sm:$0xff]  }
 0x484   :  { %8229 = vmatpush1.bf16.msra.mxu1 %v20295_v49  ;;  %8088 = vmatprep.subr.bf16.mxu0 %v20300_v56  ;;  %v20363_v49 = vld [vmem:[%s30466_s3 + $0xd0c] ss:$16 sps:$4 sm:$0xff]   ;;  %v20358_v56 = vld [vmem:[%s30466_s3 + $0xd00] ss:$16 sps:$4 sm:$0xff]  }
 0x485   :  { %8230 = vmatprep.subr.bf16.mxu1 %v20303_v33  ;;  %v20361_v33 = vld [vmem:[%s30466_s3 + $0xd08] ss:$16 sps:$4 sm:$0xff]  }
 0x487   :  { %8089 = vmatpush1.bf16.msra.mxu0 %v20298_v51  ;;  %v20366_v51 = vld [vmem:[%s30466_s3 + $0xd24] ss:$16 sps:$4 sm:$0xff]  }
 0x488   :  { %8231 = vmatpush1.bf16.msra.mxu1 %v20301_v14  ;;  %8090 = vmatprep.subr.bf16.mxu0 %v20306_v50  ;;  %v20369_v14 = vld [vmem:[%s30466_s3 + $0xd2c] ss:$16 sps:$4 sm:$0xff]   ;;  %v20364_v50 = vld [vmem:[%s30466_s3 + $0xd20] ss:$16 sps:$4 sm:$0xff]  }
 0x489   :  { %8232 = vmatprep.subr.bf16.mxu1 %v20309_v52  ;;  %v20367_v52 = vld [vmem:[%s30466_s3 + $0xd28] ss:$16 sps:$4 sm:$0xff]  }
 0x48b   :  { %8091 = vmatpush1.bf16.msra.mxu0 %v20304_v46  ;;  %v20375_v46 = vld [vmem:[%s30466_s3 + $0xd4c] ss:$16 sps:$4 sm:$0xff]  }
 0x48c   :  { %8233 = vmatpush1.bf16.msra.mxu1 %v20307_v57  ;;  %9199 = vmatprep.subr.bf16.mxu0 %v20312_v10  ;;  %v20370_v57 = vld [vmem:[%s30466_s3 + $0xd40] ss:$16 sps:$4 sm:$0xff]   ;;  %v20373_v10 = vld [vmem:[%s30466_s3 + $0xd48] ss:$16 sps:$4 sm:$0xff]  }
 0x48d   :  { %9341 = vmatprep.subr.bf16.mxu1 %v20315_v32  ;;  %v20376_v32 = vld [vmem:[%s30466_s3 + $0xd60] ss:$16 sps:$4 sm:$0xff]  }
 0x48e   :  { %8093 = vmatmul.mubr.bf16.vlgmr.msra.gmra.mrb[128].mxu0 %v25574_v48 }
 0x48f   :  { %8235 = vmatmul.mubr.bf16.vlgmr.msra.gmra.mrb[132].mxu1 %v25574_v48  ;;  %8102 = vmatprep.mubr.bf16.mxu0 %v25586_v44 }
 0x490   :  { %8244 = vmatprep.mubr.bf16.mxu1 %v25586_v44  ;;  %9200 = vmatpush1.bf16.msra.mxu0 %v20310_v37  ;;  %v20384_v37 = vld [vmem:[%s30466_s3 + $0xd84] ss:$16 sps:$4 sm:$0xff]  }
 0x491   :  { %9342 = vmatpush1.bf16.msra.mxu1 %v20313_v34  ;;  %9201 = vmatprep.subr.bf16.mxu0 %v20318_v31  ;;  %v20387_v34 = vld [vmem:[%s30466_s3 + $0xd8c] ss:$16 sps:$4 sm:$0xff]   ;;  %v20382_v31 = vld [vmem:[%s30466_s3 + $0xd80] ss:$16 sps:$4 sm:$0xff]  }
 0x492   :  { %9343 = vmatprep.subr.bf16.mxu1 %v20321_v54  ;;  %v20385_v54 = vld [vmem:[%s30466_s3 + $0xd88] ss:$16 sps:$4 sm:$0xff]  }
 0x494   :  { %9202 = vmatpush1.bf16.msra.mxu0 %v20316_v28  ;;  %v20390_v28 = vld [vmem:[%s30466_s3 + $0xda4] ss:$16 sps:$4 sm:$0xff]  }
 0x495   :  { %9344 = vmatpush1.bf16.msra.mxu1 %v20319_v58  ;;  %9203 = vmatprep.subr.bf16.mxu0 %v20324_v13  ;;  %v20388_v58 = vld [vmem:[%s30466_s3 + $0xda0] ss:$16 sps:$4 sm:$0xff]   ;;  %v20391_v13 = vld [vmem:[%s30466_s3 + $0xda8] ss:$16 sps:$4 sm:$0xff]  }
 0x496   :  { %8103 = vmatmul.mubr.bf16.gmra.mrb[132].mxu0 %v25614_v17  ;;  %9345 = vmatprep.subr.bf16.mxu1 %v20327_v59  ;;  %v20396_v59 = vld [vmem:[%s30466_s3 + $0xdc4] ss:$16 sps:$4 sm:$0xff]  }
 0x497   :  { %8245 = vmatmul.mubr.bf16.gmra.mrb[136].mxu1 %v25614_v17  ;;  %8112 = vmatprep.mubr.bf16.mxu0 %v25625_v23 }
 0x498   :  { %8254 = vmatprep.mubr.bf16.mxu1 %v25625_v23  ;;  %9204 = vmatpush1.bf16.msra.mxu0 %v20322_v22  ;;  %v20399_v22 = vld [vmem:[%s30466_s3 + $0xdcc] ss:$16 sps:$4 sm:$0xff]  }
 0x499   :  { %9346 = vmatpush1.bf16.msra.mxu1 %v20325_v15  ;;  %9205 = vmatprep.subr.bf16.mxu0 %v20330_v20  ;;  %v20394_v15 = vld [vmem:[%s30466_s3 + $0xdc0] ss:$16 sps:$4 sm:$0xff]   ;;  %v20397_v20 = vld [vmem:[%s30466_s3 + $0xdc8] ss:$16 sps:$4 sm:$0xff]  }
 0x49a   :  { %9347 = vmatprep.subr.bf16.mxu1 %v20333_v63  ;;  %v20402_v63 = vld [vmem:[%s30466_s3 + $0xde4] ss:$16 sps:$4 sm:$0xff]  }
 0x49c   :  { %9206 = vmatpush1.bf16.msra.mxu0 %v20328_v1  ;;  %v20405_v1 = vld [vmem:[%s30466_s3 + $0xdec] ss:$16 sps:$4 sm:$0xff]  }
 0x49d   :  { %9348 = vmatpush1.bf16.msra.mxu1 %v20331_v25  ;;  %9207 = vmatprep.subr.bf16.mxu0 %v20336_v5  ;;  %v20400_v25 = vld [vmem:[%s30466_s3 + $0xde0] ss:$16 sps:$4 sm:$0xff]   ;;  %v20403_v5 = vld [vmem:[%s30466_s3 + $0xde8] ss:$16 sps:$4 sm:$0xff]  }
 0x49e   :  { %8113 = vmatmul.mubr.bf16.gmra.mrb[136].mxu0 %v25653_v29  ;;  %9349 = vmatprep.subr.bf16.mxu1 %v20339_v11  ;;  %v20408_v11 = vld [vmem:[%s30466_s3 + $0xe04] ss:$16 sps:$4 sm:$0xff]  }
 0x49f   :  { %8255 = vmatmul.mubr.bf16.gmra.mrb[140].mxu1 %v25653_v29  ;;  %8122 = vmatprep.mubr.bf16.mxu0 %v25605_v0 }
 0x4a0   :  { %8264 = vmatprep.mubr.bf16.mxu1 %v25605_v0  ;;  %9208 = vmatpush1.bf16.msra.mxu0 %v20334_v3  ;;  %v20411_v3 = vld [vmem:[%s30466_s3 + $0xe0c] ss:$16 sps:$4 sm:$0xff]  }
 0x4a1   :  { %9350 = vmatpush1.bf16.msra.mxu1 %v20337_v62  ;;  %9209 = vmatprep.subr.bf16.mxu0 %v20342_v8  ;;  %v20406_v62 = vld [vmem:[%s30466_s3 + $0xe00] ss:$16 sps:$4 sm:$0xff]   ;;  %v20409_v8 = vld [vmem:[%s30466_s3 + $0xe08] ss:$16 sps:$4 sm:$0xff]  }
 0x4a2   :  { %9351 = vmatprep.subr.bf16.mxu1 %v20345_v39  ;;  %v20414_v39 = vld [vmem:[%s30466_s3 + $0xe24] ss:$16 sps:$4 sm:$0xff]  }
 0x4a4   :  { %9210 = vmatpush1.bf16.msra.mxu0 %v20340_v7  ;;  %v21124_v7 = vld [vmem:[#allocation3] sm:$0xff] }
 0x4a5   :  { %9352 = vmatpush1.bf16.msra.mxu1 %v20343_v18  ;;  %9211 = vmatprep.subr.bf16.mxu0 %v20348_v12  ;;  %v20417_v18 = vld [vmem:[%s30466_s3 + $0xe2c] ss:$16 sps:$4 sm:$0xff]  }
 0x4a6   :  { %8123 = vmatmul.mubr.bf16.gmra.mrb[140].mxu0 %v25637_v36  ;;  %9353 = vmatprep.subr.bf16.mxu1 %v20351_v21  ;;  %v21125_v12 = vld [vmem:[#allocation3 + $0x28] sm:$0xff]  ;;  %v20412_v21 = vld [vmem:[%s30466_s3 + $0xe20] ss:$16 sps:$4 sm:$0xff]  }
 0x4a7   :  { %8265 = vmatmul.mubr.bf16.gmra.mrb[144].mxu1 %v25637_v36  ;;  %9231 = vmatprep.mubr.bf16.mxu0 %v21123_v9 }
 0x4a8   :  { %9212 = vmatpush1.bf16.msra.mxu0 %v20346_v27  ;;  %9373 = vmatprep.mubr.bf16.mxu1 %v21123_v9  ;;  %v20415_v27 = vld [vmem:[%s30466_s3 + $0xe28] ss:$16 sps:$4 sm:$0xff]  }
 0x4a9   :  { %9354 = vmatpush1.bf16.msra.mxu1 %v20349_v40  ;;  %9213 = vmatprep.subr.bf16.mxu0 %v20354_v2  ;;  %v20420_v40 = vld [vmem:[%s30466_s3 + $0xe44] ss:$16 sps:$4 sm:$0xff]   ;;  %v20423_v2 = vld [vmem:[%s30466_s3 + $0xe4c] ss:$16 sps:$4 sm:$0xff]   ;;  %v20421_v9 = vld [vmem:[%s30466_s3 + $0xe48] ss:$16 sps:$4 sm:$0xff]  }
 0x4aa   :  { %9355 = vmatprep.subr.bf16.mxu1 %v20357_v61  ;;  %v20418_v61 = vld [vmem:[%s30466_s3 + $0xe40] ss:$16 sps:$4 sm:$0xff]  }
 0x4ac   :  { %9214 = vmatpush1.bf16.msra.mxu0 %v20352_v43  ;;  %v20426_v43 = vld [vmem:[%s30466_s3 + $0xe64] ss:$16 sps:$4 sm:$0xff]  }
 0x4ad   :  { %9356 = vmatpush1.bf16.msra.mxu1 %v20355_v6  ;;  %9215 = vmatprep.subr.bf16.mxu0 %v20360_v35  ;;  %v21126_v6 = vld [vmem:[#allocation3 + $0x20] sm:$0xff]  ;;  %v20429_v35 = vld [vmem:[%s30466_s3 + $0xe6c] ss:$16 sps:$4 sm:$0xff]  }
 0x4ae   :  { %9357 = vmatprep.subr.bf16.mxu1 %v20363_v49  ;;  %v21127_v49 = vld [vmem:[#allocation3 + $0x48] sm:$0xff] }
 0x4b0   :  { %9216 = vmatpush1.bf16.msra.mxu0 %v20358_v56  ;;  %v20424_v56 = vld [vmem:[%s30466_s3 + $0xe60] ss:$16 sps:$4 sm:$0xff]  }
 0x4b1   :  { %9358 = vmatpush1.bf16.msra.mxu1 %v20361_v33  ;;  %9217 = vmatprep.subr.bf16.mxu0 %v20366_v51  ;;  %v20427_v33 = vld [vmem:[%s30466_s3 + $0xe68] ss:$16 sps:$4 sm:$0xff]   ;;  %v20432_v51 = vld [vmem:[%s30466_s3 + $0xe84] ss:$16 sps:$4 sm:$0xff]  }
 0x4b2   :  { %9359 = vmatprep.subr.bf16.mxu1 %v20369_v14  ;;  %v20435_v14 = vld [vmem:[%s30466_s3 + $0xe8c] ss:$16 sps:$4 sm:$0xff]  }
 0x4b4   :  { %9218 = vmatpush1.bf16.msra.mxu0 %v20364_v50  ;;  %v20430_v50 = vld [vmem:[%s30466_s3 + $0xe80] ss:$16 sps:$4 sm:$0xff]  }
 0x4b5   :  { %9360 = vmatpush1.bf16.msra.mxu1 %v20367_v52  ;;  %9219 = vmatprep.subr.bf16.mxu0 %v20372_v47  ;;  %v20433_v52 = vld [vmem:[%s30466_s3 + $0xe88] ss:$16 sps:$4 sm:$0xff]   ;;  %v20438_v47 = vld [vmem:[%s30466_s3 + $0xea4] ss:$16 sps:$4 sm:$0xff]  }
 0x4b6   :  { %9361 = vmatprep.subr.bf16.mxu1 %v20375_v46  ;;  %v21128_v46 = vld [vmem:[#allocation3 + $0x40] sm:$0xff] }
 0x4b8   :  { %9220 = vmatpush1.bf16.msra.mxu0 %v20370_v57  ;;  %v20441_v57 = vld [vmem:[%s30466_s3 + $0xeac] ss:$16 sps:$4 sm:$0xff]  }
 0x4b9   :  { %9362 = vmatpush1.bf16.msra.mxu1 %v20373_v10  ;;  %9221 = vmatprep.subr.bf16.mxu0 %v20378_v16  ;;  %v21129_v10 = vld [vmem:[#allocation3 + $0x68] sm:$0xf]  ;;  %v20436_v16 = vld [vmem:[%s30466_s3 + $0xea0] ss:$16 sps:$4 sm:$0xff]  }
 0x4ba   :  { %9363 = vmatprep.subr.bf16.mxu1 %v20381_v42  ;;  %v20439_v42 = vld [vmem:[%s30466_s3 + $0xea8] ss:$16 sps:$4 sm:$0xff]  }
 0x4bc   :  { %9222 = vmatpush1.bf16.msra.mxu0 %v20376_v32  ;;  %v20444_v32 = vld [vmem:[%s30466_s3 + $0xec4] ss:$16 sps:$4 sm:$0xff]  }
 0x4bd   :  { %9364 = vmatpush1.bf16.msra.mxu1 %v20379_v4  ;;  %9223 = vmatprep.subr.bf16.mxu0 %v20384_v37  ;;  %v20447_v4 = vld [vmem:[%s30466_s3 + $0xecc] ss:$16 sps:$4 sm:$0xff]   ;;  %v20442_v37 = vld [vmem:[%s30466_s3 + $0xec0] ss:$16 sps:$4 sm:$0xff]  }
 0x4be   :  { %9365 = vmatprep.subr.bf16.mxu1 %v20387_v34  ;;  %v20445_v34 = vld [vmem:[%s30466_s3 + $0xec8] ss:$16 sps:$4 sm:$0xff]  }
 0x4c0   :  { %9224 = vmatpush1.bf16.msra.mxu0 %v20382_v31  ;;  %v20450_v31 = vld [vmem:[%s30466_s3 + $0xee4] ss:$16 sps:$4 sm:$0xff]  }
 0x4c1   :  { %9366 = vmatpush1.bf16.msra.mxu1 %v20385_v54  ;;  %9225 = vmatprep.subr.bf16.mxu0 %v20390_v28  ;;  %v21130_v54 = vld [vmem:[#allocation3 + $0x60] sm:$0xf]  ;;  %v20453_v28 = vld [vmem:[%s30466_s3 + $0xeec] ss:$16 sps:$4 sm:$0xff]  }
 0x4c2   :  { %9367 = vmatprep.subr.bf16.mxu1 %v20393_v24  ;;  %v21131_v24 = vld [vmem:[#allocation3 + $0x18] sm:$0xff] }
 0x4c4   :  { %9226 = vmatpush1.bf16.msra.mxu0 %v20388_v58  ;;  %v20448_v58 = vld [vmem:[%s30466_s3 + $0xee0] ss:$16 sps:$4 sm:$0xff]  }
 0x4c5   :  { %9368 = vmatpush1.bf16.msra.mxu1 %v20391_v13  ;;  %9227 = vmatprep.subr.bf16.mxu0 %v20396_v59  ;;  %v20451_v13 = vld [vmem:[%s30466_s3 + $0xee8] ss:$16 sps:$4 sm:$0xff]   ;;  %v20456_v59 = vld [vmem:[%s30466_s3 + $0xf04] ss:$16 sps:$4 sm:$0xff]  }
 0x4c6   :  { %9369 = vmatprep.subr.bf16.mxu1 %v20399_v22  ;;  %v20459_v22 = vld [vmem:[%s30466_s3 + $0xf0c] ss:$16 sps:$4 sm:$0xff]  }
 0x4c8   :  { %9228 = vmatpush1.bf16.msra.mxu0 %v20394_v15  ;;  %v20454_v15 = vld [vmem:[%s30466_s3 + $0xf00] ss:$16 sps:$4 sm:$0xff]  }
 0x4c9   :  { %9370 = vmatpush1.bf16.msra.mxu1 %v20397_v20  ;;  %9229 = vmatprep.subr.bf16.mxu0 %v20402_v63  ;;  %v20457_v20 = vld [vmem:[%s30466_s3 + $0xf08] ss:$16 sps:$4 sm:$0xff]   ;;  %v20462_v63 = vld [vmem:[%s30466_s3 + $0xf24] ss:$16 sps:$4 sm:$0xff]  }
 0x4ca   :  { %9371 = vmatprep.subr.bf16.mxu1 %v20405_v1  ;;  %v20465_v1 = vld [vmem:[%s30466_s3 + $0xf2c] ss:$16 sps:$4 sm:$0xff]  }
 0x4cc   :  { %9230 = vmatpush1.bf16.msra.mxu0 %v20400_v25  ;;  %v20460_v25 = vld [vmem:[%s30466_s3 + $0xf20] ss:$16 sps:$4 sm:$0xff]  }
 0x4cd   :  { %9372 = vmatpush1.bf16.msra.mxu1 %v20403_v5  ;;  %9270 = vmatprep.subr.bf16.mxu0 %v20408_v11  ;;  %v20463_v5 = vld [vmem:[%s30466_s3 + $0xf28] ss:$16 sps:$4 sm:$0xff]   ;;  %v20468_v11 = vld [vmem:[%s30466_s3 + $0xf44] ss:$16 sps:$4 sm:$0xff]  }
 0x4ce   :  { %9412 = vmatprep.subr.bf16.mxu1 %v20411_v3  ;;  %v20471_v3 = vld [vmem:[%s30466_s3 + $0xf4c] ss:$16 sps:$4 sm:$0xff]  }
 0x4cf   :  { %9232 = vmatmul.mubr.bf16.vlgmr.msra.gmra.mrb[144].mxu0 %v21124_v7 }
 0x4d0   :  { %9374 = vmatmul.mubr.bf16.vlgmr.msra.gmra.mrb[148].mxu1 %v21124_v7  ;;  %9241 = vmatprep.mubr.bf16.mxu0 %v21125_v12  ;;  %v20477_v7 = vld [vmem:[%s30466_s3 + $0xf6c] ss:$16 sps:$4 sm:$0xff]  }
 0x4d1   :  { %9271 = vmatpush1.bf16.msra.mxu0 %v20406_v62  ;;  %9383 = vmatprep.mubr.bf16.mxu1 %v21125_v12  ;;  %v20466_v62 = vld [vmem:[%s30466_s3 + $0xf40] ss:$16 sps:$4 sm:$0xff]   ;;  %v20475_v12 = vld [vmem:[%s30466_s3 + $0xf68] ss:$16 sps:$4 sm:$0xff]  }
 0x4d2   :  { %9413 = vmatpush1.bf16.msra.mxu1 %v20409_v8  ;;  %9272 = vmatprep.subr.bf16.mxu0 %v20414_v39  ;;  %v20469_v8 = vld [vmem:[%s30466_s3 + $0xf48] ss:$16 sps:$4 sm:$0xff]   ;;  %v20474_v39 = vld [vmem:[%s30466_s3 + $0xf64] ss:$16 sps:$4 sm:$0xff]  }
 0x4d3   :  { %9414 = vmatprep.subr.bf16.mxu1 %v20417_v18  ;;  %v20472_v18 = vld [vmem:[%s30466_s3 + $0xf60] ss:$16 sps:$4 sm:$0xff]  }
 0x4d5   :  { %9273 = vmatpush1.bf16.msra.mxu0 %v20412_v21  ;;  %v20480_v21 = vld [vmem:[%s30466_s3 + $0xf84] ss:$16 sps:$4 sm:$0xff]  }
 0x4d6   :  { %9415 = vmatpush1.bf16.msra.mxu1 %v20415_v27  ;;  %9274 = vmatprep.subr.bf16.mxu0 %v20420_v40  ;;  %v20483_v27 = vld [vmem:[%s30466_s3 + $0xf8c] ss:$16 sps:$4 sm:$0xff]   ;;  %v20478_v40 = vld [vmem:[%s30466_s3 + $0xf80] ss:$16 sps:$4 sm:$0xff]  }
 0x4d7   :  { %9242 = vmatmul.mubr.bf16.gmra.mrb[148].mxu0 %v21126_v6  ;;  %9416 = vmatprep.subr.bf16.mxu1 %v20423_v2  ;;  %v20481_v2 = vld [vmem:[%s30466_s3 + $0xf88] ss:$16 sps:$4 sm:$0xff]  }
 0x4d8   :  { %9384 = vmatmul.mubr.bf16.gmra.mrb[152].mxu1 %v21126_v6  ;;  %9251 = vmatprep.mubr.bf16.mxu0 %v21127_v49  ;;  %v20487_v6 = vld [vmem:[%s30466_s3 + $0xfa8] ss:$16 sps:$4 sm:$0xff]  }
 0x4d9   :  { %9275 = vmatpush1.bf16.msra.mxu0 %v20418_v61  ;;  %9393 = vmatprep.mubr.bf16.mxu1 %v21127_v49  ;;  %v20486_v61 = vld [vmem:[%s30466_s3 + $0xfa4] ss:$16 sps:$4 sm:$0xff]   ;;  %v20495_v49 = vld [vmem:[%s30466_s3 + $0xfcc] ss:$16 sps:$4 sm:$0xff]  }
 0x4da   :  { %9417 = vmatpush1.bf16.msra.mxu1 %v20421_v9  ;;  %9276 = vmatprep.subr.bf16.mxu0 %v20426_v43  ;;  %v20489_v9 = vld [vmem:[%s30466_s3 + $0xfac] ss:$16 sps:$4 sm:$0xff]   ;;  %v20484_v43 = vld [vmem:[%s30466_s3 + $0xfa0] ss:$16 sps:$4 sm:$0xff]  }
 0x4db   :  { %9418 = vmatprep.subr.bf16.mxu1 %v20429_v35  ;;  %v20492_v35 = vld [vmem:[%s30466_s3 + $0xfc4] ss:$16 sps:$4 sm:$0xff]  }
 0x4dd   :  { %9277 = vmatpush1.bf16.msra.mxu0 %v20424_v56  ;;  %v20490_v56 = vld [vmem:[%s30466_s3 + $0xfc0] ss:$16 sps:$4 sm:$0xff]  }
 0x4de   :  { %9419 = vmatpush1.bf16.msra.mxu1 %v20427_v33  ;;  %9278 = vmatprep.subr.bf16.mxu0 %v20432_v51  ;;  %v20493_v33 = vld [vmem:[%s30466_s3 + $0xfc8] ss:$16 sps:$4 sm:$0xff]   ;;  %v20498_v51 = vld [vmem:[%s30466_s3 + $0xfe4] ss:$16 sps:$4 sm:$0xff]  }
 0x4df   :  { %9252 = vmatmul.mubr.bf16.gmra.mrb[152].mxu0 %v21128_v46  ;;  %9420 = vmatprep.subr.bf16.mxu1 %v20435_v14  ;;  %v20501_v14 = vld [vmem:[%s30466_s3 + $0xfec] ss:$16 sps:$4 sm:$0xff]  }
 0x4e0   :  { %9394 = vmatmul.mubr.bf16.gmra.mrb[156].mxu1 %v21128_v46  ;;  %9261 = vmatprep.mubr.bf16.mxu0 %v21129_v10  ;;  %v20507_v46 = vld [vmem:[%s30466_s3 + $0x40c] ss:$16 sps:$4 sm:$0xff]  }
 0x4e1   :  { %9279 = vmatpush1.bf16.msra.mxu0 %v20430_v50  ;;  %9403 = vmatprep.mubr.bf16.mxu1 %v21129_v10  ;;  %v20496_v50 = vld [vmem:[%s30466_s3 + $0xfe0] ss:$16 sps:$4 sm:$0xff]   ;;  %v20505_v10 = vld [vmem:[%s30466_s3 + $0x408] ss:$16 sps:$4 sm:$0xff]  }
 0x4e2   :  { %9421 = vmatpush1.bf16.msra.mxu1 %v20433_v52  ;;  %9280 = vmatprep.subr.bf16.mxu0 %v20438_v47  ;;  %v20499_v52 = vld [vmem:[%s30466_s3 + $0xfe8] ss:$16 sps:$4 sm:$0xff]   ;;  %v20504_v47 = vld [vmem:[%s30466_s3 + $0x404] ss:$16 sps:$4 sm:$0xff]  }
 0x4e3   :  { %9422 = vmatprep.subr.bf16.mxu1 %v20441_v57  ;;  %v20502_v57 = vld [vmem:[%s30466_s3 + $0x400] ss:$16 sps:$4 sm:$0xff]  }
 0x4e5   :  { %9281 = vmatpush1.bf16.msra.mxu0 %v20436_v16  ;;  %v20510_v16 = vld [vmem:[%s30466_s3 + $0x424] ss:$16 sps:$4 sm:$0xff]  }
 0x4e6   :  { %9423 = vmatpush1.bf16.msra.mxu1 %v20439_v42  ;;  %9282 = vmatprep.subr.bf16.mxu0 %v20444_v32  ;;  %v21132_v42 = vld [vmem:[#allocation3 + $0x10] sm:$0xff]  ;;  %v20513_v32 = vld [vmem:[%s30466_s3 + $0x42c] ss:$16 sps:$4 sm:$0xff]  }
 0x4e7   :  { %9262 = vmatmul.mubr.bf16.gmra.mrb[156].mxu0 %v21130_v54  ;;  %9424 = vmatprep.subr.bf16.mxu1 %v20447_v4  ;;  %v21133_v4 = vld [vmem:[#allocation3 + $0x38] sm:$0xff] }
 0x4e8   :  { %9404 = vmatmul.mubr.bf16.gmra.mrb[160].mxu1 %v21130_v54  ;;  %9302 = vmatprep.mubr.bf16.mxu0 %v21131_v24  ;;  %v20519_v54 = vld [vmem:[%s30466_s3 + $0x44c] ss:$16 sps:$4 sm:$0xff]  }
 0x4e9   :  { %9283 = vmatpush1.bf16.msra.mxu0 %v20442_v37  ;;  %9444 = vmatprep.mubr.bf16.mxu1 %v21131_v24  ;;  %v20508_v37 = vld [vmem:[%s30466_s3 + $0x420] ss:$16 sps:$4 sm:$0xff]   ;;  %v20517_v24 = vld [vmem:[%s30466_s3 + $0x448] ss:$16 sps:$4 sm:$0xff]  }
 0x4ea   :  { %9425 = vmatpush1.bf16.msra.mxu1 %v20445_v34  ;;  %9284 = vmatprep.subr.bf16.mxu0 %v20450_v31  ;;  %v20511_v34 = vld [vmem:[%s30466_s3 + $0x428] ss:$16 sps:$4 sm:$0xff]   ;;  %v20516_v31 = vld [vmem:[%s30466_s3 + $0x444] ss:$16 sps:$4 sm:$0xff]  }
 0x4eb   :  { %9426 = vmatprep.subr.bf16.mxu1 %v20453_v28  ;;  %v20514_v28 = vld [vmem:[%s30466_s3 + $0x440] ss:$16 sps:$4 sm:$0xff]  }
 0x4ed   :  { %9285 = vmatpush1.bf16.msra.mxu0 %v20448_v58  ;;  %v20522_v58 = vld [vmem:[%s30466_s3 + $0x464] ss:$16 sps:$4 sm:$0xff]  }
 0x4ee   :  { %9427 = vmatpush1.bf16.msra.mxu1 %v20451_v13  ;;  %9286 = vmatprep.subr.bf16.mxu0 %v20456_v59  ;;  %v21134_v13 = vld [vmem:[#allocation3 + $0x30] sm:$0xff]  ;;  %v20525_v59 = vld [vmem:[%s30466_s3 + $0x46c] ss:$16 sps:$4 sm:$0xff]  }
 0x4ef   :  { %9428 = vmatprep.subr.bf16.mxu1 %v20459_v22  ;;  %v21135_v22 = vld [vmem:[#allocation3 + $0x58] sm:$0xff] }
 0x4f1   :  { %9287 = vmatpush1.bf16.msra.mxu0 %v20454_v15  ;;  %v20520_v15 = vld [vmem:[%s30466_s3 + $0x460] ss:$16 sps:$4 sm:$0xff]  }
 0x4f2   :  { %9429 = vmatpush1.bf16.msra.mxu1 %v20457_v20  ;;  %9288 = vmatprep.subr.bf16.mxu0 %v20462_v63  ;;  %v20523_v20 = vld [vmem:[%s30466_s3 + $0x468] ss:$16 sps:$4 sm:$0xff]   ;;  %v20528_v63 = vld [vmem:[%s30466_s3 + $0x484] ss:$16 sps:$4 sm:$0xff]  }
 0x4f3   :  { %9430 = vmatprep.subr.bf16.mxu1 %v20465_v1  ;;  %v20531_v1 = vld [vmem:[%s30466_s3 + $0x48c] ss:$16 sps:$4 sm:$0xff]  }
 0x4f5   :  { %9289 = vmatpush1.bf16.msra.mxu0 %v20460_v25  ;;  %v20526_v25 = vld [vmem:[%s30466_s3 + $0x480] ss:$16 sps:$4 sm:$0xff]  }
 0x4f6   :  { %9431 = vmatpush1.bf16.msra.mxu1 %v20463_v5  ;;  %9290 = vmatprep.subr.bf16.mxu0 %v20468_v11  ;;  %v20529_v5 = vld [vmem:[%s30466_s3 + $0x488] ss:$16 sps:$4 sm:$0xff]   ;;  %v20534_v11 = vld [vmem:[%s30466_s3 + $0x4a4] ss:$16 sps:$4 sm:$0xff]  }
 0x4f7   :  { %9432 = vmatprep.subr.bf16.mxu1 %v20471_v3  ;;  %v21136_v3 = vld [vmem:[#allocation3 + $0x50] sm:$0xff] }
 0x4f9   :  { %9291 = vmatpush1.bf16.msra.mxu0 %v20466_v62  ;;  %v20537_v62 = vld [vmem:[%s30466_s3 + $0x4ac] ss:$16 sps:$4 sm:$0xff]  }
 0x4fa   :  { %9433 = vmatpush1.bf16.msra.mxu1 %v20469_v8  ;;  %9292 = vmatprep.subr.bf16.mxu0 %v20474_v39  ;;  %v21137_v8 = vld [vmem:[#allocation3 + $0x78] sm:$0xf]  ;;  %v20532_v39 = vld [vmem:[%s30466_s3 + $0x4a0] ss:$16 sps:$4 sm:$0xff]  }
 0x4fb   :  { %9434 = vmatprep.subr.bf16.mxu1 %v20477_v7  ;;  %v20535_v7 = vld [vmem:[%s30466_s3 + $0x4a8] ss:$16 sps:$4 sm:$0xff]  }
 0x4fd   :  { %9293 = vmatpush1.bf16.msra.mxu0 %v20472_v18  ;;  %v20540_v18 = vld [vmem:[%s30466_s3 + $0x4c4] ss:$16 sps:$4 sm:$0xff]  }
 0x4fe   :  { %9435 = vmatpush1.bf16.msra.mxu1 %v20475_v12  ;;  %9294 = vmatprep.subr.bf16.mxu0 %v20480_v21  ;;  %v20543_v12 = vld [vmem:[%s30466_s3 + $0x4cc] ss:$16 sps:$4 sm:$0xff]   ;;  %v20538_v21 = vld [vmem:[%s30466_s3 + $0x4c0] ss:$16 sps:$4 sm:$0xff]  }
 0x4ff   :  { %9436 = vmatprep.subr.bf16.mxu1 %v20483_v27  ;;  %v20541_v27 = vld [vmem:[%s30466_s3 + $0x4c8] ss:$16 sps:$4 sm:$0xff]  }
 0x501   :  { %9295 = vmatpush1.bf16.msra.mxu0 %v20478_v40  ;;  %v20546_v40 = vld [vmem:[%s30466_s3 + $0x4e4] ss:$16 sps:$4 sm:$0xff]  }
 0x502   :  { %9437 = vmatpush1.bf16.msra.mxu1 %v20481_v2  ;;  %9296 = vmatprep.subr.bf16.mxu0 %v20486_v61  ;;  %v21138_v2 = vld [vmem:[#allocation3 + $0x70] sm:$0xf]  ;;  %v20549_v61 = vld [vmem:[%s30466_s3 + $0x4ec] ss:$16 sps:$4 sm:$0xff]  }
 0x503   :  { %9438 = vmatprep.subr.bf16.mxu1 %v20489_v9  ;;  %v21139_v9 = vld [vmem:[#allocation2 + $0x8] sm:$0xff] }
 0x505   :  { %9297 = vmatpush1.bf16.msra.mxu0 %v20484_v43  ;;  %v20544_v43 = vld [vmem:[%s30466_s3 + $0x4e0] ss:$16 sps:$4 sm:$0xff]  }
 0x506   :  { %9439 = vmatpush1.bf16.msra.mxu1 %v20487_v6  ;;  %9298 = vmatprep.subr.bf16.mxu0 %v20492_v35  ;;  %v20547_v6 = vld [vmem:[%s30466_s3 + $0x4e8] ss:$16 sps:$4 sm:$0xff]   ;;  %v20552_v35 = vld [vmem:[%s30466_s3 + $0x504] ss:$16 sps:$4 sm:$0xff]  }
 0x507   :  { %9440 = vmatprep.subr.bf16.mxu1 %v20495_v49  ;;  %v20555_v49 = vld [vmem:[%s30466_s3 + $0x50c] ss:$16 sps:$4 sm:$0xff]  }
 0x509   :  { %9299 = vmatpush1.bf16.msra.mxu0 %v20490_v56  ;;  %v20550_v56 = vld [vmem:[%s30466_s3 + $0x500] ss:$16 sps:$4 sm:$0xff]  }
 0x50a   :  { %9441 = vmatpush1.bf16.msra.mxu1 %v20493_v33  ;;  %9300 = vmatprep.subr.bf16.mxu0 %v20498_v51  ;;  %v20553_v33 = vld [vmem:[%s30466_s3 + $0x508] ss:$16 sps:$4 sm:$0xff]   ;;  %v20558_v51 = vld [vmem:[%s30466_s3 + $0x524] ss:$16 sps:$4 sm:$0xff]  }
 0x50b   :  { %9442 = vmatprep.subr.bf16.mxu1 %v20501_v14  ;;  %v20561_v14 = vld [vmem:[%s30466_s3 + $0x52c] ss:$16 sps:$4 sm:$0xff]  }
 0x50d   :  { %9301 = vmatpush1.bf16.msra.mxu0 %v20496_v50  ;;  %v20556_v50 = vld [vmem:[%s30466_s3 + $0x520] ss:$16 sps:$4 sm:$0xff]  }
 0x50e   :  { %9443 = vmatpush1.bf16.msra.mxu1 %v20499_v52  ;;  %10123 = vmatprep.subr.bf16.mxu0 %v20504_v47  ;;  %v20559_v52 = vld [vmem:[%s30466_s3 + $0x528] ss:$16 sps:$4 sm:$0xff]   ;;  %v20564_v47 = vld [vmem:[%s30466_s3 + $0x544] ss:$16 sps:$4 sm:$0xff]  }
 0x50f   :  { %10265 = vmatprep.subr.bf16.mxu1 %v20507_v46  ;;  %v20567_v46 = vld [vmem:[%s30466_s3 + $0x54c] ss:$16 sps:$4 sm:$0xff]  }
 0x510   :  { %9303 = vmatmul.mubr.bf16.vlgmr.msra.gmra.mrb[144].mxu0 %v21132_v42 }
 0x511   :  { %9445 = vmatmul.mubr.bf16.vlgmr.msra.gmra.mrb[148].mxu1 %v21132_v42  ;;  %9312 = vmatprep.mubr.bf16.mxu0 %v21133_v4  ;;  %v20573_v42 = vld [vmem:[%s30466_s3 + $0x56c] ss:$16 sps:$4 sm:$0xff]  }
 0x512   :  { %9454 = vmatprep.mubr.bf16.mxu1 %v21133_v4  ;;  %10124 = vmatpush1.bf16.msra.mxu0 %v20502_v57  ;;  %v20562_v57 = vld [vmem:[%s30466_s3 + $0x540] ss:$16 sps:$4 sm:$0xff]   ;;  %v20571_v4 = vld [vmem:[%s30466_s3 + $0x568] ss:$16 sps:$4 sm:$0xff]  }
 0x513   :  { %10266 = vmatpush1.bf16.msra.mxu1 %v20505_v10  ;;  %10125 = vmatprep.subr.bf16.mxu0 %v20510_v16  ;;  %v20565_v10 = vld [vmem:[%s30466_s3 + $0x548] ss:$16 sps:$4 sm:$0xff]   ;;  %v20570_v16 = vld [vmem:[%s30466_s3 + $0x564] ss:$16 sps:$4 sm:$0xff]  }
 0x514   :  { %10267 = vmatprep.subr.bf16.mxu1 %v20513_v32  ;;  %v20568_v32 = vld [vmem:[%s30466_s3 + $0x560] ss:$16 sps:$4 sm:$0xff]  }
 0x516   :  { %10126 = vmatpush1.bf16.msra.mxu0 %v20508_v37  ;;  %v20576_v37 = vld [vmem:[%s30466_s3 + $0x584] ss:$16 sps:$4 sm:$0xff]  }
 0x517   :  { %10268 = vmatpush1.bf16.msra.mxu1 %v20511_v34  ;;  %10127 = vmatprep.subr.bf16.mxu0 %v20516_v31  ;;  %v20579_v34 = vld [vmem:[%s30466_s3 + $0x58c] ss:$16 sps:$4 sm:$0xff]   ;;  %v20574_v31 = vld [vmem:[%s30466_s3 + $0x580] ss:$16 sps:$4 sm:$0xff]  }
 0x518   :  { %9313 = vmatmul.mubr.bf16.gmra.mrb[148].mxu0 %v21134_v13  ;;  %10269 = vmatprep.subr.bf16.mxu1 %v20519_v54  ;;  %v20577_v54 = vld [vmem:[%s30466_s3 + $0x588] ss:$16 sps:$4 sm:$0xff]  }
 0x519   :  { %9455 = vmatmul.mubr.bf16.gmra.mrb[152].mxu1 %v21134_v13  ;;  %9322 = vmatprep.mubr.bf16.mxu0 %v21135_v22  ;;  %v20583_v13 = vld [vmem:[%s30466_s3 + $0x5a8] ss:$16 sps:$4 sm:$0xff]  }
 0x51a   :  { %9464 = vmatprep.mubr.bf16.mxu1 %v21135_v22  ;;  %10128 = vmatpush1.bf16.msra.mxu0 %v20514_v28  ;;  %v20582_v28 = vld [vmem:[%s30466_s3 + $0x5a4] ss:$16 sps:$4 sm:$0xff]   ;;  %v20591_v22 = vld [vmem:[%s30466_s3 + $0x5cc] ss:$16 sps:$4 sm:$0xff]  }
 0x51b   :  { %10270 = vmatpush1.bf16.msra.mxu1 %v20517_v24  ;;  %10129 = vmatprep.subr.bf16.mxu0 %v20522_v58  ;;  %v20585_v24 = vld [vmem:[%s30466_s3 + $0x5ac] ss:$16 sps:$4 sm:$0xff]   ;;  %v20580_v58 = vld [vmem:[%s30466_s3 + $0x5a0] ss:$16 sps:$4 sm:$0xff]  }
 0x51c   :  { %10271 = vmatprep.subr.bf16.mxu1 %v20525_v59  ;;  %v20588_v59 = vld [vmem:[%s30466_s3 + $0x5c4] ss:$16 sps:$4 sm:$0xff]  }
 0x51e   :  { %10130 = vmatpush1.bf16.msra.mxu0 %v20520_v15  ;;  %v20586_v15 = vld [vmem:[%s30466_s3 + $0x5c0] ss:$16 sps:$4 sm:$0xff]  }
 0x51f   :  { %10272 = vmatpush1.bf16.msra.mxu1 %v20523_v20  ;;  %10131 = vmatprep.subr.bf16.mxu0 %v20528_v63  ;;  %v20589_v20 = vld [vmem:[%s30466_s3 + $0x5c8] ss:$16 sps:$4 sm:$0xff]   ;;  %v20594_v63 = vld [vmem:[%s30466_s3 + $0x5e4] ss:$16 sps:$4 sm:$0xff]  }
 0x520   :  { %9323 = vmatmul.mubr.bf16.gmra.mrb[152].mxu0 %v21136_v3  ;;  %10273 = vmatprep.subr.bf16.mxu1 %v20531_v1  ;;  %v20597_v1 = vld [vmem:[%s30466_s3 + $0x5ec] ss:$16 sps:$4 sm:$0xff]  }
 0x521   :  { %9465 = vmatmul.mubr.bf16.gmra.mrb[156].mxu1 %v21136_v3  ;;  %9332 = vmatprep.mubr.bf16.mxu0 %v21137_v8  ;;  %v20603_v3 = vld [vmem:[%s30466_s3 + $0x60c] ss:$16 sps:$4 sm:$0xff]  }
 0x522   :  { %9474 = vmatprep.mubr.bf16.mxu1 %v21137_v8  ;;  %10132 = vmatpush1.bf16.msra.mxu0 %v20526_v25  ;;  %v20592_v25 = vld [vmem:[%s30466_s3 + $0x5e0] ss:$16 sps:$4 sm:$0xff]   ;;  %v20601_v8 = vld [vmem:[%s30466_s3 + $0x608] ss:$16 sps:$4 sm:$0xff]  }
 0x523   :  { %10274 = vmatpush1.bf16.msra.mxu1 %v20529_v5  ;;  %10133 = vmatprep.subr.bf16.mxu0 %v20534_v11  ;;  %v20595_v5 = vld [vmem:[%s30466_s3 + $0x5e8] ss:$16 sps:$4 sm:$0xff]   ;;  %v20600_v11 = vld [vmem:[%s30466_s3 + $0x604] ss:$16 sps:$4 sm:$0xff]  }
 0x524   :  { %10275 = vmatprep.subr.bf16.mxu1 %v20537_v62  ;;  %v20598_v62 = vld [vmem:[%s30466_s3 + $0x600] ss:$16 sps:$4 sm:$0xff]  }
 0x526   :  { %10134 = vmatpush1.bf16.msra.mxu0 %v20532_v39  ;;  %v20606_v39 = vld [vmem:[%s30466_s3 + $0x624] ss:$16 sps:$4 sm:$0xff]  }
 0x527   :  { %10276 = vmatpush1.bf16.msra.mxu1 %v20535_v7  ;;  %10135 = vmatprep.subr.bf16.mxu0 %v20540_v18  ;;  %v21140_v7 = vld [vmem:[#allocation2] sm:$0xff]  ;;  %v20609_v18 = vld [vmem:[%s30466_s3 + $0x62c] ss:$16 sps:$4 sm:$0xff]  }
 0x528   :  { %9333 = vmatmul.mubr.bf16.gmra.mrb[156].mxu0 %v21138_v2  ;;  %10277 = vmatprep.subr.bf16.mxu1 %v20543_v12  ;;  %v21141_v12 = vld [vmem:[#allocation2 + $0x28] sm:$0xff] }
 0x529   :  { %9475 = vmatmul.mubr.bf16.gmra.mrb[160].mxu1 %v21138_v2  ;;  %10155 = vmatprep.mubr.bf16.mxu0 %v21139_v9  ;;  %v20615_v2 = vld [vmem:[%s30466_s3 + $0x64c] ss:$16 sps:$4 sm:$0xff]  }
 0x52a   :  { %10136 = vmatpush1.bf16.msra.mxu0 %v20538_v21  ;;  %10297 = vmatprep.mubr.bf16.mxu1 %v21139_v9  ;;  %v20604_v21 = vld [vmem:[%s30466_s3 + $0x620] ss:$16 sps:$4 sm:$0xff]   ;;  %v20613_v9 = vld [vmem:[%s30466_s3 + $0x648] ss:$16 sps:$4 sm:$0xff]  }
 0x52b   :  { %10278 = vmatpush1.bf16.msra.mxu1 %v20541_v27  ;;  %10137 = vmatprep.subr.bf16.mxu0 %v20546_v40  ;;  %v20607_v27 = vld [vmem:[%s30466_s3 + $0x628] ss:$16 sps:$4 sm:$0xff]   ;;  %v20612_v40 = vld [vmem:[%s30466_s3 + $0x644] ss:$16 sps:$4 sm:$0xff]  }
 0x52c   :  { %10279 = vmatprep.subr.bf16.mxu1 %v20549_v61  ;;  %v20610_v61 = vld [vmem:[%s30466_s3 + $0x640] ss:$16 sps:$4 sm:$0xff]  }
 0x52e   :  { %10138 = vmatpush1.bf16.msra.mxu0 %v20544_v43  ;;  %v20618_v43 = vld [vmem:[%s30466_s3 + $0x664] ss:$16 sps:$4 sm:$0xff]  }
 0x52f   :  { %10280 = vmatpush1.bf16.msra.mxu1 %v20547_v6  ;;  %10139 = vmatprep.subr.bf16.mxu0 %v20552_v35  ;;  %v21142_v6 = vld [vmem:[#allocation2 + $0x20] sm:$0xff]  ;;  %v20621_v35 = vld [vmem:[%s30466_s3 + $0x66c] ss:$16 sps:$4 sm:$0xff]  }
 0x530   :  { %10281 = vmatprep.subr.bf16.mxu1 %v20555_v49  ;;  %v21143_v49 = vld [vmem:[#allocation2 + $0x48] sm:$0xff] }
 0x532   :  { %10140 = vmatpush1.bf16.msra.mxu0 %v20550_v56  ;;  %v20616_v56 = vld [vmem:[%s30466_s3 + $0x660] ss:$16 sps:$4 sm:$0xff]  }
 0x533   :  { %10282 = vmatpush1.bf16.msra.mxu1 %v20553_v33  ;;  %10141 = vmatprep.subr.bf16.mxu0 %v20558_v51  ;;  %v20619_v33 = vld [vmem:[%s30466_s3 + $0x668] ss:$16 sps:$4 sm:$0xff]   ;;  %v20624_v51 = vld [vmem:[%s30466_s3 + $0x684] ss:$16 sps:$4 sm:$0xff]  }
 0x534   :  { %10283 = vmatprep.subr.bf16.mxu1 %v20561_v14  ;;  %v20627_v14 = vld [vmem:[%s30466_s3 + $0x68c] ss:$16 sps:$4 sm:$0xff]  }
 0x536   :  { %10142 = vmatpush1.bf16.msra.mxu0 %v20556_v50  ;;  %v20622_v50 = vld [vmem:[%s30466_s3 + $0x680] ss:$16 sps:$4 sm:$0xff]  }
 0x537   :  { %10284 = vmatpush1.bf16.msra.mxu1 %v20559_v52  ;;  %10143 = vmatprep.subr.bf16.mxu0 %v20564_v47  ;;  %v20625_v52 = vld [vmem:[%s30466_s3 + $0x688] ss:$16 sps:$4 sm:$0xff]   ;;  %v20630_v47 = vld [vmem:[%s30466_s3 + $0x6a4] ss:$16 sps:$4 sm:$0xff]  }
 0x538   :  { %10285 = vmatprep.subr.bf16.mxu1 %v20567_v46  ;;  %v21144_v46 = vld [vmem:[#allocation2 + $0x40] sm:$0xff] }
 0x53a   :  { %10144 = vmatpush1.bf16.msra.mxu0 %v20562_v57 }
 0x53b   :  { %10286 = vmatpush1.bf16.msra.mxu1 %v20565_v10  ;;  %10145 = vmatprep.subr.bf16.mxu0 %v20570_v16  ;;  %v20633_v10 = vld [vmem:[%s30466_s3 + $0x6ac] ss:$16 sps:$4 sm:$0xff]   ;;  %v21145_v16 = vld [vmem:[#allocation2 + $0x68] sm:$0xf] }
 0x53c   :  { %10287 = vmatprep.subr.bf16.mxu1 %v20573_v42 }
 0x53e   :  { %10146 = vmatpush1.bf16.msra.mxu0 %v20568_v32 }
 0x53f   :  { %10288 = vmatpush1.bf16.msra.mxu1 %v20571_v4  ;;  %10147 = vmatprep.subr.bf16.mxu0 %v20576_v37  ;;  %v20628_v37 = vld [vmem:[%s30466_s3 + $0x6a0] ss:$16 sps:$4 sm:$0xff]  }
 0x540   :  { %10289 = vmatprep.subr.bf16.mxu1 %v20579_v34 }
 0x542   :  { %10148 = vmatpush1.bf16.msra.mxu0 %v20574_v31  ;;  %v20631_v31 = vld [vmem:[%s30466_s3 + $0x6a8] ss:$16 sps:$4 sm:$0xff]  }
 0x543   :  { %10290 = vmatpush1.bf16.msra.mxu1 %v20577_v54  ;;  %10149 = vmatprep.subr.bf16.mxu0 %v20582_v28 }
 0x544   :  { %10291 = vmatprep.subr.bf16.mxu1 %v20585_v24  ;;  %v20636_v24 = vld [vmem:[%s30466_s3 + $0x6c4] ss:$16 sps:$4 sm:$0xff]  }
 0x546   :  { %10150 = vmatpush1.bf16.msra.mxu0 %v20580_v58 }
 0x547   :  { %10292 = vmatpush1.bf16.msra.mxu1 %v20583_v13  ;;  %10151 = vmatprep.subr.bf16.mxu0 %v20588_v59  ;;  %v20639_v13 = vld [vmem:[%s30466_s3 + $0x6cc] ss:$16 sps:$4 sm:$0xff]   ;;  %v20634_v59 = vld [vmem:[%s30466_s3 + $0x6c0] ss:$16 sps:$4 sm:$0xff]  }
 0x548   :  { %10293 = vmatprep.subr.bf16.mxu1 %v20591_v22  ;;  %v20637_v22 = vld [vmem:[%s30466_s3 + $0x6c8] ss:$16 sps:$4 sm:$0xff]  }
 0x54a   :  { %10152 = vmatpush1.bf16.msra.mxu0 %v20586_v15  ;;  %v20642_v15 = vld [vmem:[%s30466_s3 + $0x6e4] ss:$16 sps:$4 sm:$0xff]  }
 0x54b   :  { %10294 = vmatpush1.bf16.msra.mxu1 %v20589_v20  ;;  %10153 = vmatprep.subr.bf16.mxu0 %v20594_v63  ;;  %v21146_v20 = vld [vmem:[#allocation2 + $0x60] sm:$0xf] }
 0x54c   :  { %10295 = vmatprep.subr.bf16.mxu1 %v20597_v1  ;;  %v20645_v1 = vld [vmem:[%s30466_s3 + $0x6ec] ss:$16 sps:$4 sm:$0xff]  }
 0x54e   :  { %10154 = vmatpush1.bf16.msra.mxu0 %v20592_v25  ;;  %v21147_v25 = vld [vmem:[#allocation2 + $0x18] sm:$0xff] }
 0x54f   :  { %10296 = vmatpush1.bf16.msra.mxu1 %v20595_v5  ;;  %10194 = vmatprep.subr.bf16.mxu0 %v20600_v11 }
 0x550   :  { %10336 = vmatprep.subr.bf16.mxu1 %v20603_v3 }
 0x551   :  { %10156 = vmatmul.mubr.bf16.vlgmr.msra.gmra.mrb[144].mxu0 %v21140_v7 }
 0x552   :  { %10298 = vmatmul.mubr.bf16.vlgmr.msra.gmra.mrb[148].mxu1 %v21140_v7  ;;  %10165 = vmatprep.mubr.bf16.mxu0 %v21141_v12 }
 0x553   :  { %10195 = vmatpush1.bf16.msra.mxu0 %v20598_v62  ;;  %10307 = vmatprep.mubr.bf16.mxu1 %v21141_v12  ;;  %v20640_v62 = vld [vmem:[%s30466_s3 + $0x6e0] ss:$16 sps:$4 sm:$0xff]   ;;  %v20648_v12 = vld [vmem:[%s30466_s3 + $0x704] ss:$16 sps:$4 sm:$0xff]  }
 0x554   :  { %10337 = vmatpush1.bf16.msra.mxu1 %v20601_v8  ;;  %10196 = vmatprep.subr.bf16.mxu0 %v20606_v39  ;;  %v20643_v39 = vld [vmem:[%s30466_s3 + $0x6e8] ss:$16 sps:$4 sm:$0xff]  }
 0x555   :  { %10338 = vmatprep.subr.bf16.mxu1 %v20609_v18 }
 0x557   :  { %10197 = vmatpush1.bf16.msra.mxu0 %v20604_v21 }
 0x558   :  { %10339 = vmatpush1.bf16.msra.mxu1 %v20607_v27  ;;  %10198 = vmatprep.subr.bf16.mxu0 %v20612_v40  ;;  %v20651_v27 = vld [vmem:[%s30466_s3 + $0x70c] ss:$16 sps:$4 sm:$0xff]   ;;  %v20646_v40 = vld [vmem:[%s30466_s3 + $0x700] ss:$16 sps:$4 sm:$0xff]  }
 0x559   :  { %10166 = vmatmul.mubr.bf16.gmra.mrb[148].mxu0 %v21142_v6  ;;  %10340 = vmatprep.subr.bf16.mxu1 %v20615_v2  ;;  %v20649_v2 = vld [vmem:[%s30466_s3 + $0x708] ss:$16 sps:$4 sm:$0xff]  }
 0x55a   :  { %10308 = vmatmul.mubr.bf16.gmra.mrb[152].mxu1 %v21142_v6  ;;  %10175 = vmatprep.mubr.bf16.mxu0 %v21143_v49 }
 0x55b   :  { %10199 = vmatpush1.bf16.msra.mxu0 %v20610_v61  ;;  %10317 = vmatprep.mubr.bf16.mxu1 %v21143_v49  ;;  %v20654_v61 = vld [vmem:[%s30466_s3 + $0x724] ss:$16 sps:$4 sm:$0xff]  }
 0x55c   :  { %10341 = vmatpush1.bf16.msra.mxu1 %v20613_v9  ;;  %10200 = vmatprep.subr.bf16.mxu0 %v20618_v43  ;;  %v20657_v43 = vld [vmem:[%s30466_s3 + $0x72c] ss:$16 sps:$4 sm:$0xff]  }
 0x55d   :  { %10342 = vmatprep.subr.bf16.mxu1 %v20621_v35 }
 0x55f   :  { %10201 = vmatpush1.bf16.msra.mxu0 %v20616_v56  ;;  %v20652_v56 = vld [vmem:[%s30466_s3 + $0x720] ss:$16 sps:$4 sm:$0xff]  }
 0x560   :  { %10343 = vmatpush1.bf16.msra.mxu1 %v20619_v33  ;;  %10202 = vmatprep.subr.bf16.mxu0 %v20624_v51  ;;  %v20655_v51 = vld [vmem:[%s30466_s3 + $0x728] ss:$16 sps:$4 sm:$0xff]  }
 0x561   :  { %10176 = vmatmul.mubr.bf16.gmra.mrb[152].mxu0 %v21144_v46  ;;  %10344 = vmatprep.subr.bf16.mxu1 %v20627_v14  ;;  %v26243_v57 = vpop.f32.mrb[128].mxu0 }
 0x562   :  { %10318 = vmatmul.mubr.bf16.gmra.mrb[156].mxu1 %v21144_v46  ;;  %10185 = vmatprep.mubr.bf16.mxu0 %v21145_v16  ;;  %v26248_v42 = vpop.f32.mrb[132].mxu1  ;;  %v26250_v32 = vpop.f32.mrb[129].mxu0  ;;  %v20663_v46 = vld [vmem:[%s30466_s3 + $0x74c] ss:$16 sps:$4 sm:$0xff]  }
 0x563   :  { %10203 = vmatpush1.bf16.msra.mxu0 %v20622_v50  ;;  %10327 = vmatprep.mubr.bf16.mxu1 %v21145_v16  ;;  %v26252_v4 = vpop.f32.mrb[133].mxu1  ;;  %v26257_v34 = vpop.f32.mrb[130].mxu0  ;;  %v20661_v16 = vld [vmem:[%s30466_s3 + $0x748] ss:$16 sps:$4 sm:$0xff]  }
 0x564   :  { %10345 = vmatpush1.bf16.msra.mxu1 %v20625_v52  ;;  %10204 = vmatprep.subr.bf16.mxu0 %v20630_v47  ;;  %v26262_v54 = vpop.f32.mrb[134].mxu1  ;;  %v26264_v28 = vpop.f32.mrb[131].mxu0  ;;  %v20660_v52 = vld [vmem:[%s30466_s3 + $0x744] ss:$16 sps:$4 sm:$0xff]  }
 0x565   :  { %10346 = vmatprep.subr.bf16.mxu1 %v20633_v10  ;;  %v26269_v58 = vpop.f32.mrb[135].mxu1  ;;  %v20658_v10 = vld [vmem:[%s30466_s3 + $0x740] ss:$16 sps:$4 sm:$0xff]  }
 0x566   :  { %30737 = vst [vmem:[#allocation11_spill] sm:$0xff] %v26269_v58 }
 0x567   :  { %10205 = vmatpush1.bf16.msra.mxu0 %v20628_v37  ;;  %v20666_v37 = vld [vmem:[%s30466_s3 + $0x764] ss:$16 sps:$4 sm:$0xff]  }
 0x568   :  { %10347 = vmatpush1.bf16.msra.mxu1 %v20631_v31  ;;  %10206 = vmatprep.subr.bf16.mxu0 %v20636_v24  ;;  %v20669_v24 = vld [vmem:[%s30466_s3 + $0x76c] ss:$16 sps:$4 sm:$0xff]  }
 0x569   :  { %10186 = vmatmul.mubr.bf16.gmra.mrb[156].mxu0 %v21146_v20  ;;  %10348 = vmatprep.subr.bf16.mxu1 %v20639_v13  ;;  %v26283_v63 = vpop.f32.mrb[132].mxu0 }
 0x56a   :  { %10328 = vmatmul.mubr.bf16.gmra.mrb[160].mxu1 %v21146_v20  ;;  %10226 = vmatprep.mubr.bf16.mxu0 %v21147_v25  ;;  %v26288_v5 = vpop.f32.mrb[136].mxu1  ;;  %v26290_v11 = vpop.f32.mrb[133].mxu0 }
 0x56b   :  { %10207 = vmatpush1.bf16.msra.mxu0 %v20634_v59  ;;  %10368 = vmatprep.mubr.bf16.mxu1 %v21147_v25  ;;  %v26292_v3 = vpop.f32.mrb[137].mxu1  ;;  %v26297_v8 = vpop.f32.mrb[134].mxu0 }
 0x56c   :  { %10349 = vmatpush1.bf16.msra.mxu1 %v20637_v22  ;;  %10208 = vmatprep.subr.bf16.mxu0 %v20642_v15  ;;  %v26302_v7 = vpop.f32.mrb[138].mxu1  ;;  %v26304_v18 = vpop.f32.mrb[135].mxu0  ;;  %v20664_v15 = vld [vmem:[%s30466_s3 + $0x760] ss:$16 sps:$4 sm:$0xff]  }
 0x56d   :  { %30738 = vst [vmem:[#allocation10_spill] sm:$0xff] %v26304_v18  ;;  %10350 = vmatprep.subr.bf16.mxu1 %v20645_v1  ;;  %v26309_v21 = vpop.f32.mrb[139].mxu1  ;;  %v20667_v1 = vld [vmem:[%s30466_s3 + $0x768] ss:$16 sps:$4 sm:$0xff]  }
 0x56e   :  { %30739 = vst [vmem:[#allocation12_spill] sm:$0xff] %v26309_v21 }
 0x56f   :  { %10209 = vmatpush1.bf16.msra.mxu0 %v20640_v62 }
 0x570   :  { %10351 = vmatpush1.bf16.msra.mxu1 %v20643_v39  ;;  %10210 = vmatprep.subr.bf16.mxu0 %v20648_v12  ;;  %v20672_v39 = vld [vmem:[%s30466_s3 + $0x784] ss:$16 sps:$4 sm:$0xff]  }
 0x571   :  { %10352 = vmatprep.subr.bf16.mxu1 %v20651_v27  ;;  %v26323_v9 = vpop.f32.mrb[136].mxu0  ;;  %v20675_v27 = vld [vmem:[%s30466_s3 + $0x78c] ss:$16 sps:$4 sm:$0xff]  }
 0x572   :  { %v26328_v6 = vpop.f32.mrb[140].mxu1  ;;  %v26330_v35 = vpop.f32.mrb[137].mxu0 }
 0x573   :  { %30740 = vst [vmem:[#allocation14_spill] sm:$0xff] %v26330_v35  ;;  %10211 = vmatpush1.bf16.msra.mxu0 %v20646_v40  ;;  %v26332_v49 = vpop.f32.mrb[141].mxu1  ;;  %v26337_v33 = vpop.f32.mrb[138].mxu0  ;;  %v20670_v40 = vld [vmem:[%s30466_s3 + $0x780] ss:$16 sps:$4 sm:$0xff]  }
 0x574   :  { %10353 = vmatpush1.bf16.msra.mxu1 %v20649_v2  ;;  %10212 = vmatprep.subr.bf16.mxu0 %v20654_v61  ;;  %v26342_v14 = vpop.f32.mrb[142].mxu1  ;;  %v26344_v50 = vpop.f32.mrb[139].mxu0  ;;  %v20673_v2 = vld [vmem:[%s30466_s3 + $0x788] ss:$16 sps:$4 sm:$0xff]   ;;  %v20678_v61 = vld [vmem:[%s30466_s3 + $0x7a4] ss:$16 sps:$4 sm:$0xff]  }
 0x575   :  { %30741 = vst [vmem:[#allocation13_spill] sm:$0xff] %v26344_v50  ;;  %10354 = vmatprep.subr.bf16.mxu1 %v20657_v43  ;;  %v26349_v47 = vpop.f32.mrb[143].mxu1  ;;  %v20681_v43 = vld [vmem:[%s30466_s3 + $0x7ac] ss:$16 sps:$4 sm:$0xff]  }
 0x576   :  { %30742 = vst [vmem:[#allocation15_spill] sm:$0xff] %v26349_v47  ;;  %v21393_v35 = vld [vmem:[%s30466_s3 + $0x32c] ss:$16 sps:$4 sm:$0xff]  }
 0x577   :  { %10213 = vmatpush1.bf16.msra.mxu0 %v20652_v56  ;;  %v20676_v56 = vld [vmem:[%s30466_s3 + $0x7a0] ss:$16 sps:$4 sm:$0xff]  }
 0x578   :  { %10355 = vmatpush1.bf16.msra.mxu1 %v20655_v51  ;;  %10214 = vmatprep.subr.bf16.mxu0 %v20660_v52  ;;  %v20679_v51 = vld [vmem:[%s30466_s3 + $0x7a8] ss:$16 sps:$4 sm:$0xff]   ;;  %v20684_v52 = vld [vmem:[%s30466_s3 + $0x7c4] ss:$16 sps:$4 sm:$0xff]  }
 0x579   :  { %10356 = vmatprep.subr.bf16.mxu1 %v20663_v46  ;;  %v26363_v31 = vpop.f32.mrb[140].mxu0  ;;  %v20687_v46 = vld [vmem:[%s30466_s3 + $0x7cc] ss:$16 sps:$4 sm:$0xff]  }
 0x57a   :  { %v26368_v13 = vpop.f32.mrb[144].mxu1  ;;  %v26370_v59 = vpop.f32.mrb[141].mxu0 }
 0x57b   :  { %30743 = vst [vmem:[#allocation16_spill] sm:$0xff] %v26368_v13  ;;  %30744 = vst [vmem:[#allocation18_spill] sm:$0xff] %v26370_v59  ;;  %10215 = vmatpush1.bf16.msra.mxu0 %v20658_v10  ;;  %v26372_v22 = vpop.f32.mrb[145].mxu1  ;;  %v8128_v20 = vpop.f32.mrb[142].mxu0  ;;  %v20682_v10 = vld [vmem:[%s30466_s3 + $0x7c0] ss:$16 sps:$4 sm:$0xff]  }
 0x57c   :  { %30745 = vst [vmem:[#allocation17_spill] sm:$0xff] %v26372_v22  ;;  %10357 = vmatpush1.bf16.msra.mxu1 %v20661_v16  ;;  %10216 = vmatprep.subr.bf16.mxu0 %v20666_v37  ;;  %v8270_v25 = vpop.f32.mrb[146].mxu1  ;;  %v8129_v62 = vpop.f32.mrb[143].mxu0  ;;  %v20685_v16 = vld [vmem:[%s30466_s3 + $0x7c8] ss:$16 sps:$4 sm:$0xff]  }
 0x57d   :  { %10358 = vmatprep.subr.bf16.mxu1 %v20669_v24  ;;  %v8271_v12 = vpop.f32.mrb[147].mxu1  ;;  %v20690_v37 = vld [vmem:[%s30466_s3 + $0x7e4] ss:$16 sps:$4 sm:$0xff]   ;;  %v20693_v24 = vld [vmem:[%s30466_s3 + $0x7ec] ss:$16 sps:$4 sm:$0xff]  }
 0x57e   :  { %v20691_v20 = vld [vmem:[%s30466_s3 + $0x7e8] ss:$16 sps:$4 sm:$0xff]   ;;  %v20699_v25 = vld [vmem:[%s30466_s3 + $0x140c] ss:$16 sps:$4 sm:$0xff]   ;;  %v20694_v62 = vld [vmem:[%s30466_s3 + $0x1400] ss:$16 sps:$4 sm:$0xff]  }
 0x57f   :  { %10217 = vmatpush1.bf16.msra.mxu0 %v20664_v15  ;;  %v20688_v15 = vld [vmem:[%s30466_s3 + $0x7e0] ss:$16 sps:$4 sm:$0xff]   ;;  %v20702_v12 = vld [vmem:[%s30466_s3 + $0x1424] ss:$16 sps:$4 sm:$0xff]  }
 0x580   :  { %10359 = vmatpush1.bf16.msra.mxu1 %v20667_v1  ;;  %10218 = vmatprep.subr.bf16.mxu0 %v20672_v39  ;;  %v20696_v1 = vld [vmem:[%s30466_s3 + $0x1404] ss:$16 sps:$4 sm:$0xff]   ;;  %v20697_v39 = vld [vmem:[%s30466_s3 + $0x1408] ss:$16 sps:$4 sm:$0xff]   ;;  %v21451_v13 = vld [vmem:[#allocation3 + $0x70] sm:$0xf] }
 0x581   :  { %10360 = vmatprep.subr.bf16.mxu1 %v20675_v27  ;;  %v21148_v27 = vld [vmem:[#allocation2 + $0x10] sm:$0xff] }
 0x582   :  { %v21446_v22 = vld [vmem:[%s30466_s3 + $0x10a4] ss:$16 sps:$4 sm:$0xff]  }
 0x583   :  { %10219 = vmatpush1.bf16.msra.mxu0 %v20670_v40  ;;  %v20705_v40 = vld [vmem:[%s30466_s3 + $0x142c] ss:$16 sps:$4 sm:$0xff]  }
 0x584   :  { %10361 = vmatpush1.bf16.msra.mxu1 %v20673_v2  ;;  %10220 = vmatprep.subr.bf16.mxu0 %v20678_v61  ;;  %v21149_v2 = vld [vmem:[#allocation2 + $0x38] sm:$0xff]  ;;  %v20700_v61 = vld [vmem:[%s30466_s3 + $0x1420] ss:$16 sps:$4 sm:$0xff]  }
 0x585   :  { %10362 = vmatprep.subr.bf16.mxu1 %v20681_v43  ;;  %v20703_v43 = vld [vmem:[%s30466_s3 + $0x1428] ss:$16 sps:$4 sm:$0xff]  }
 0x587   :  { %10221 = vmatpush1.bf16.msra.mxu0 %v20676_v56  ;;  %v20708_v56 = vld [vmem:[%s30466_s3 + $0x1444] ss:$16 sps:$4 sm:$0xff]  }
 0x588   :  { %10363 = vmatpush1.bf16.msra.mxu1 %v20679_v51  ;;  %10222 = vmatprep.subr.bf16.mxu0 %v20684_v52  ;;  %v20711_v51 = vld [vmem:[%s30466_s3 + $0x144c] ss:$16 sps:$4 sm:$0xff]   ;;  %v20706_v52 = vld [vmem:[%s30466_s3 + $0x1440] ss:$16 sps:$4 sm:$0xff]  }
 0x589   :  { %10364 = vmatprep.subr.bf16.mxu1 %v20687_v46  ;;  %v20709_v46 = vld [vmem:[%s30466_s3 + $0x1448] ss:$16 sps:$4 sm:$0xff]  }
 0x58b   :  { %10223 = vmatpush1.bf16.msra.mxu0 %v20682_v10  ;;  %v20714_v10 = vld [vmem:[%s30466_s3 + $0x1464] ss:$16 sps:$4 sm:$0xff]  }
 0x58c   :  { %10365 = vmatpush1.bf16.msra.mxu1 %v20685_v16  ;;  %10224 = vmatprep.subr.bf16.mxu0 %v20690_v37  ;;  %v21150_v16 = vld [vmem:[#allocation2 + $0x30] sm:$0xff]  ;;  %v20717_v37 = vld [vmem:[%s30466_s3 + $0x146c] ss:$16 sps:$4 sm:$0xff]  }
 0x58d   :  { %10366 = vmatprep.subr.bf16.mxu1 %v20693_v24  ;;  %v21151_v24 = vld [vmem:[#allocation2 + $0x58] sm:$0xff] }
 0x58f   :  { %10225 = vmatpush1.bf16.msra.mxu0 %v20688_v15  ;;  %v20712_v15 = vld [vmem:[%s30466_s3 + $0x1460] ss:$16 sps:$4 sm:$0xff]  }
 0x590   :  { %10367 = vmatpush1.bf16.msra.mxu1 %v20691_v20  ;;  %11176 = vmatprep.subr.bf16.mxu0 %v20696_v1  ;;  %v20715_v20 = vld [vmem:[%s30466_s3 + $0x1468] ss:$16 sps:$4 sm:$0xff]   ;;  %v20720_v1 = vld [vmem:[%s30466_s3 + $0x1484] ss:$16 sps:$4 sm:$0xff]  }
 0x591   :  { %11318 = vmatprep.subr.bf16.mxu1 %v20699_v25  ;;  %v20723_v25 = vld [vmem:[%s30466_s3 + $0x148c] ss:$16 sps:$4 sm:$0xff]  }
 0x592   :  { %10227 = vmatmul.mubr.bf16.vlgmr.msra.gmra.mrb[144].mxu0 %v21148_v27 }
 0x593   :  { %10369 = vmatmul.mubr.bf16.vlgmr.msra.gmra.mrb[148].mxu1 %v21148_v27  ;;  %10236 = vmatprep.mubr.bf16.mxu0 %v21149_v2  ;;  %v21152_v27 = vld [vmem:[#allocation2 + $0x50] sm:$0xff] }
 0x594   :  { %10378 = vmatprep.mubr.bf16.mxu1 %v21149_v2  ;;  %11177 = vmatpush1.bf16.msra.mxu0 %v20694_v62  ;;  %v20718_v62 = vld [vmem:[%s30466_s3 + $0x1480] ss:$16 sps:$4 sm:$0xff]   ;;  %v21153_v2 = vld [vmem:[#allocation2 + $0x78] sm:$0xf] }
 0x595   :  { %11319 = vmatpush1.bf16.msra.mxu1 %v20697_v39  ;;  %11178 = vmatprep.subr.bf16.mxu0 %v20702_v12  ;;  %v20721_v39 = vld [vmem:[%s30466_s3 + $0x1488] ss:$16 sps:$4 sm:$0xff]   ;;  %v20726_v12 = vld [vmem:[%s30466_s3 + $0x14a4] ss:$16 sps:$4 sm:$0xff]  }
 0x596   :  { %11320 = vmatprep.subr.bf16.mxu1 %v20705_v40  ;;  %v20729_v40 = vld [vmem:[%s30466_s3 + $0x14ac] ss:$16 sps:$4 sm:$0xff]  }
 0x598   :  { %11179 = vmatpush1.bf16.msra.mxu0 %v20700_v61  ;;  %v20724_v61 = vld [vmem:[%s30466_s3 + $0x14a0] ss:$16 sps:$4 sm:$0xff]  }
 0x599   :  { %11321 = vmatpush1.bf16.msra.mxu1 %v20703_v43  ;;  %11180 = vmatprep.subr.bf16.mxu0 %v20708_v56  ;;  %v20727_v43 = vld [vmem:[%s30466_s3 + $0x14a8] ss:$16 sps:$4 sm:$0xff]   ;;  %v20732_v56 = vld [vmem:[%s30466_s3 + $0x14c4] ss:$16 sps:$4 sm:$0xff]  }
 0x59a   :  { %10237 = vmatmul.mubr.bf16.gmra.mrb[148].mxu0 %v21150_v16  ;;  %11322 = vmatprep.subr.bf16.mxu1 %v20711_v51  ;;  %v20735_v51 = vld [vmem:[%s30466_s3 + $0x14cc] ss:$16 sps:$4 sm:$0xff]  }
 0x59b   :  { %10379 = vmatmul.mubr.bf16.gmra.mrb[152].mxu1 %v21150_v16  ;;  %10246 = vmatprep.mubr.bf16.mxu0 %v21151_v24  ;;  %v21154_v16 = vld [vmem:[#allocation2 + $0x70] sm:$0xf] }
 0x59c   :  { %10388 = vmatprep.mubr.bf16.mxu1 %v21151_v24  ;;  %11181 = vmatpush1.bf16.msra.mxu0 %v20706_v52  ;;  %v20730_v52 = vld [vmem:[%s30466_s3 + $0x14c0] ss:$16 sps:$4 sm:$0xff]  }
 0x59d   :  { %11323 = vmatpush1.bf16.msra.mxu1 %v20709_v46  ;;  %11182 = vmatprep.subr.bf16.mxu0 %v20714_v10  ;;  %v20733_v46 = vld [vmem:[%s30466_s3 + $0x14c8] ss:$16 sps:$4 sm:$0xff]   ;;  %v20738_v10 = vld [vmem:[%s30466_s3 + $0x14e4] ss:$16 sps:$4 sm:$0xff]   ;;  %v20736_v24 = vld [vmem:[%s30466_s3 + $0x14e0] ss:$16 sps:$4 sm:$0xff]  }
 0x59e   :  { %11324 = vmatprep.subr.bf16.mxu1 %v20717_v37  ;;  %v20741_v37 = vld [vmem:[%s30466_s3 + $0x14ec] ss:$16 sps:$4 sm:$0xff]  }
 0x5a0   :  { %11183 = vmatpush1.bf16.msra.mxu0 %v20712_v15  ;;  %v20739_v15 = vld [vmem:[%s30466_s3 + $0x14e8] ss:$16 sps:$4 sm:$0xff]  }
 0x5a1   :  { %11325 = vmatpush1.bf16.msra.mxu1 %v20715_v20  ;;  %11184 = vmatprep.subr.bf16.mxu0 %v20720_v1  ;;  %v20744_v20 = vld [vmem:[%s30466_s3 + $0x1504] ss:$16 sps:$4 sm:$0xff]   ;;  %v20747_v1 = vld [vmem:[%s30466_s3 + $0x150c] ss:$16 sps:$4 sm:$0xff]  }
 0x5a2   :  { %10247 = vmatmul.mubr.bf16.gmra.mrb[152].mxu0 %v21152_v27  ;;  %11326 = vmatprep.subr.bf16.mxu1 %v20723_v25  ;;  %v20742_v25 = vld [vmem:[%s30466_s3 + $0x1500] ss:$16 sps:$4 sm:$0xff]  }
 0x5a3   :  { %10389 = vmatmul.mubr.bf16.gmra.mrb[156].mxu1 %v21152_v27  ;;  %10256 = vmatprep.mubr.bf16.mxu0 %v21153_v2  ;;  %v20748_v27 = vld [vmem:[%s30466_s3 + $0x1520] ss:$16 sps:$4 sm:$0xff]  }
 0x5a4   :  { %10398 = vmatprep.mubr.bf16.mxu1 %v21153_v2  ;;  %11185 = vmatpush1.bf16.msra.mxu0 %v20718_v62  ;;  %v20745_v62 = vld [vmem:[%s30466_s3 + $0x1508] ss:$16 sps:$4 sm:$0xff]   ;;  %v20756_v2 = vld [vmem:[%s30466_s3 + $0x1544] ss:$16 sps:$4 sm:$0xff]  }
 0x5a5   :  { %11327 = vmatpush1.bf16.msra.mxu1 %v20721_v39  ;;  %11186 = vmatprep.subr.bf16.mxu0 %v20726_v12  ;;  %v20750_v39 = vld [vmem:[%s30466_s3 + $0x1524] ss:$16 sps:$4 sm:$0xff]   ;;  %v20753_v12 = vld [vmem:[%s30466_s3 + $0x152c] ss:$16 sps:$4 sm:$0xff]  }
 0x5a6   :  { %11328 = vmatprep.subr.bf16.mxu1 %v20729_v40  ;;  %v20751_v40 = vld [vmem:[%s30466_s3 + $0x1528] ss:$16 sps:$4 sm:$0xff]  }
 0x5a8   :  { %11187 = vmatpush1.bf16.msra.mxu0 %v20724_v61  ;;  %v20759_v61 = vld [vmem:[%s30466_s3 + $0x154c] ss:$16 sps:$4 sm:$0xff]  }
 0x5a9   :  { %11329 = vmatpush1.bf16.msra.mxu1 %v20727_v43  ;;  %11188 = vmatprep.subr.bf16.mxu0 %v20732_v56  ;;  %v20754_v43 = vld [vmem:[%s30466_s3 + $0x1540] ss:$16 sps:$4 sm:$0xff]   ;;  %v20757_v56 = vld [vmem:[%s30466_s3 + $0x1548] ss:$16 sps:$4 sm:$0xff]  }
 0x5aa   :  { %10257 = vmatmul.mubr.bf16.gmra.mrb[156].mxu0 %v21154_v16  ;;  %11330 = vmatprep.subr.bf16.mxu1 %v20735_v51  ;;  %v20762_v51 = vld [vmem:[%s30466_s3 + $0x1564] ss:$16 sps:$4 sm:$0xff]  }
 0x5ab   :  { %10399 = vmatmul.mubr.bf16.gmra.mrb[160].mxu1 %v21154_v16  ;;  %11208 = vmatprep.mubr.bf16.mxu0 %v25214_v19  ;;  %v20768_v16 = vld [vmem:[%s30466_s3 + $0x1584] ss:$16 sps:$4 sm:$0xff]  }
 0x5ac   :  { %11189 = vmatpush1.bf16.msra.mxu0 %v20730_v52  ;;  %11350 = vmatprep.mubr.bf16.mxu1 %v25214_v19  ;;  %v20765_v52 = vld [vmem:[%s30466_s3 + $0x156c] ss:$16 sps:$4 sm:$0xff]  }
 0x5ad   :  { %11331 = vmatpush1.bf16.msra.mxu1 %v20733_v46  ;;  %11190 = vmatprep.subr.bf16.mxu0 %v20738_v10  ;;  %v20760_v46 = vld [vmem:[%s30466_s3 + $0x1560] ss:$16 sps:$4 sm:$0xff]   ;;  %v20763_v10 = vld [vmem:[%s30466_s3 + $0x1568] ss:$16 sps:$4 sm:$0xff]  }
 0x5ae   :  { %11332 = vmatprep.subr.bf16.mxu1 %v20741_v37  ;;  %v20771_v37 = vld [vmem:[%s30466_s3 + $0x158c] ss:$16 sps:$4 sm:$0xff]  }
 0x5b0   :  { %11191 = vmatpush1.bf16.msra.mxu0 %v20736_v24  ;;  %v20766_v24 = vld [vmem:[%s30466_s3 + $0x1580] ss:$16 sps:$4 sm:$0xff]  }
 0x5b1   :  { %11333 = vmatpush1.bf16.msra.mxu1 %v20739_v15  ;;  %11192 = vmatprep.subr.bf16.mxu0 %v20744_v20  ;;  %v20769_v15 = vld [vmem:[%s30466_s3 + $0x1588] ss:$16 sps:$4 sm:$0xff]   ;;  %v20774_v20 = vld [vmem:[%s30466_s3 + $0x15a4] ss:$16 sps:$4 sm:$0xff]  }
 0x5b2   :  { %11334 = vmatprep.subr.bf16.mxu1 %v20747_v1  ;;  %v20777_v1 = vld [vmem:[%s30466_s3 + $0x15ac] ss:$16 sps:$4 sm:$0xff]  }
 0x5b4   :  { %11193 = vmatpush1.bf16.msra.mxu0 %v20742_v25  ;;  %v20772_v25 = vld [vmem:[%s30466_s3 + $0x15a0] ss:$16 sps:$4 sm:$0xff]  }
 0x5b5   :  { %11335 = vmatpush1.bf16.msra.mxu1 %v20745_v62  ;;  %11194 = vmatprep.subr.bf16.mxu0 %v20750_v39  ;;  %v20775_v62 = vld [vmem:[%s30466_s3 + $0x15a8] ss:$16 sps:$4 sm:$0xff]   ;;  %v20780_v39 = vld [vmem:[%s30466_s3 + $0x15c4] ss:$16 sps:$4 sm:$0xff]  }
 0x5b6   :  { %11336 = vmatprep.subr.bf16.mxu1 %v20753_v12  ;;  %v20783_v12 = vld [vmem:[%s30466_s3 + $0x15cc] ss:$16 sps:$4 sm:$0xff]  }
 0x5b8   :  { %11195 = vmatpush1.bf16.msra.mxu0 %v20748_v27  ;;  %v20778_v27 = vld [vmem:[%s30466_s3 + $0x15c0] ss:$16 sps:$4 sm:$0xff]  }
 0x5b9   :  { %11337 = vmatpush1.bf16.msra.mxu1 %v20751_v40  ;;  %11196 = vmatprep.subr.bf16.mxu0 %v20756_v2  ;;  %v20781_v40 = vld [vmem:[%s30466_s3 + $0x15c8] ss:$16 sps:$4 sm:$0xff]   ;;  %v20786_v2 = vld [vmem:[%s30466_s3 + $0x15e4] ss:$16 sps:$4 sm:$0xff]  }
 0x5ba   :  { %11338 = vmatprep.subr.bf16.mxu1 %v20759_v61  ;;  %v20789_v61 = vld [vmem:[%s30466_s3 + $0x15ec] ss:$16 sps:$4 sm:$0xff]  }
 0x5bc   :  { %11197 = vmatpush1.bf16.msra.mxu0 %v20754_v43  ;;  %v20784_v43 = vld [vmem:[%s30466_s3 + $0x15e0] ss:$16 sps:$4 sm:$0xff]  }
 0x5bd   :  { %11339 = vmatpush1.bf16.msra.mxu1 %v20757_v56  ;;  %11198 = vmatprep.subr.bf16.mxu0 %v20762_v51  ;;  %v20787_v56 = vld [vmem:[%s30466_s3 + $0x15e8] ss:$16 sps:$4 sm:$0xff]   ;;  %v20792_v51 = vld [vmem:[%s30466_s3 + $0x1604] ss:$16 sps:$4 sm:$0xff]  }
 0x5be   :  { %11340 = vmatprep.subr.bf16.mxu1 %v20765_v52  ;;  %v20795_v52 = vld [vmem:[%s30466_s3 + $0x160c] ss:$16 sps:$4 sm:$0xff]  }
 0x5c0   :  { %11199 = vmatpush1.bf16.msra.mxu0 %v20760_v46  ;;  %v20790_v46 = vld [vmem:[%s30466_s3 + $0x1600] ss:$16 sps:$4 sm:$0xff]  }
 0x5c1   :  { %11341 = vmatpush1.bf16.msra.mxu1 %v20763_v10  ;;  %11200 = vmatprep.subr.bf16.mxu0 %v20768_v16  ;;  %v20793_v10 = vld [vmem:[%s30466_s3 + $0x1608] ss:$16 sps:$4 sm:$0xff]   ;;  %v20798_v16 = vld [vmem:[%s30466_s3 + $0x1624] ss:$16 sps:$4 sm:$0xff]  }
 0x5c2   :  { %11342 = vmatprep.subr.bf16.mxu1 %v20771_v37  ;;  %v20801_v37 = vld [vmem:[%s30466_s3 + $0x162c] ss:$16 sps:$4 sm:$0xff]  }
 0x5c4   :  { %11201 = vmatpush1.bf16.msra.mxu0 %v20766_v24  ;;  %v20796_v24 = vld [vmem:[%s30466_s3 + $0x1620] ss:$16 sps:$4 sm:$0xff]  }
 0x5c5   :  { %11343 = vmatpush1.bf16.msra.mxu1 %v20769_v15  ;;  %11202 = vmatprep.subr.bf16.mxu0 %v20774_v20  ;;  %v20799_v15 = vld [vmem:[%s30466_s3 + $0x1628] ss:$16 sps:$4 sm:$0xff]   ;;  %v20804_v20 = vld [vmem:[%s30466_s3 + $0x1644] ss:$16 sps:$4 sm:$0xff]  }
 0x5c6   :  { %11344 = vmatprep.subr.bf16.mxu1 %v20777_v1  ;;  %v20807_v1 = vld [vmem:[%s30466_s3 + $0x164c] ss:$16 sps:$4 sm:$0xff]  }
 0x5c8   :  { %11203 = vmatpush1.bf16.msra.mxu0 %v20772_v25  ;;  %v20802_v25 = vld [vmem:[%s30466_s3 + $0x1640] ss:$16 sps:$4 sm:$0xff]  }
 0x5c9   :  { %11345 = vmatpush1.bf16.msra.mxu1 %v20775_v62  ;;  %11204 = vmatprep.subr.bf16.mxu0 %v20780_v39  ;;  %v20805_v62 = vld [vmem:[%s30466_s3 + $0x1648] ss:$16 sps:$4 sm:$0xff]   ;;  %v20810_v39 = vld [vmem:[%s30466_s3 + $0x1664] ss:$16 sps:$4 sm:$0xff]  }
 0x5ca   :  { %11346 = vmatprep.subr.bf16.mxu1 %v20783_v12  ;;  %v20813_v12 = vld [vmem:[%s30466_s3 + $0x166c] ss:$16 sps:$4 sm:$0xff]  }
 0x5cc   :  { %11205 = vmatpush1.bf16.msra.mxu0 %v20778_v27  ;;  %v20808_v27 = vld [vmem:[%s30466_s3 + $0x1660] ss:$16 sps:$4 sm:$0xff]  }
 0x5cd   :  { %11347 = vmatpush1.bf16.msra.mxu1 %v20781_v40  ;;  %11206 = vmatprep.subr.bf16.mxu0 %v20786_v2  ;;  %v20811_v40 = vld [vmem:[%s30466_s3 + $0x1668] ss:$16 sps:$4 sm:$0xff]   ;;  %v20816_v2 = vld [vmem:[%s30466_s3 + $0x1684] ss:$16 sps:$4 sm:$0xff]  }
 0x5ce   :  { %11348 = vmatprep.subr.bf16.mxu1 %v20789_v61  ;;  %v20819_v61 = vld [vmem:[%s30466_s3 + $0x168c] ss:$16 sps:$4 sm:$0xff]  }
 0x5d0   :  { %11207 = vmatpush1.bf16.msra.mxu0 %v20784_v43  ;;  %v20814_v43 = vld [vmem:[%s30466_s3 + $0x1680] ss:$16 sps:$4 sm:$0xff]  }
 0x5d1   :  { %11349 = vmatpush1.bf16.msra.mxu1 %v20787_v56  ;;  %11247 = vmatprep.subr.bf16.mxu0 %v20792_v51  ;;  %v20817_v56 = vld [vmem:[%s30466_s3 + $0x1688] ss:$16 sps:$4 sm:$0xff]   ;;  %v20822_v51 = vld [vmem:[%s30466_s3 + $0x16a4] ss:$16 sps:$4 sm:$0xff]  }
 0x5d2   :  { %11389 = vmatprep.subr.bf16.mxu1 %v20795_v52  ;;  %v20825_v52 = vld [vmem:[%s30466_s3 + $0x16ac] ss:$16 sps:$4 sm:$0xff]  }
 0x5d3   :  { %11209 = vmatmul.mubr.bf16.vlgmr.msra.gmra.mrb[144].mxu0 %v25335_v53 }
 0x5d4   :  { %11351 = vmatmul.mubr.bf16.vlgmr.msra.gmra.mrb[148].mxu1 %v25335_v53  ;;  %11218 = vmatprep.mubr.bf16.mxu0 %v25348_v26 }
 0x5d5   :  { %11248 = vmatpush1.bf16.msra.mxu0 %v20790_v46  ;;  %11360 = vmatprep.mubr.bf16.mxu1 %v25348_v26  ;;  %v20820_v46 = vld [vmem:[%s30466_s3 + $0x16a0] ss:$16 sps:$4 sm:$0xff]  }
 0x5d6   :  { %11390 = vmatpush1.bf16.msra.mxu1 %v20793_v10  ;;  %11249 = vmatprep.subr.bf16.mxu0 %v20798_v16  ;;  %v20823_v10 = vld [vmem:[%s30466_s3 + $0x16a8] ss:$16 sps:$4 sm:$0xff]   ;;  %v20828_v16 = vld [vmem:[%s30466_s3 + $0x16c4] ss:$16 sps:$4 sm:$0xff]  }
 0x5d7   :  { %11391 = vmatprep.subr.bf16.mxu1 %v20801_v37  ;;  %v20831_v37 = vld [vmem:[%s30466_s3 + $0x16cc] ss:$16 sps:$4 sm:$0xff]  }
 0x5d9   :  { %11250 = vmatpush1.bf16.msra.mxu0 %v20796_v24  ;;  %v20826_v24 = vld [vmem:[%s30466_s3 + $0x16c0] ss:$16 sps:$4 sm:$0xff]  }
 0x5da   :  { %11392 = vmatpush1.bf16.msra.mxu1 %v20799_v15  ;;  %11251 = vmatprep.subr.bf16.mxu0 %v20804_v20  ;;  %v20829_v15 = vld [vmem:[%s30466_s3 + $0x16c8] ss:$16 sps:$4 sm:$0xff]   ;;  %v20834_v20 = vld [vmem:[%s30466_s3 + $0x16e4] ss:$16 sps:$4 sm:$0xff]  }
 0x5db   :  { %11219 = vmatmul.mubr.bf16.gmra.mrb[148].mxu0 %v25375_v55  ;;  %11393 = vmatprep.subr.bf16.mxu1 %v20807_v1  ;;  %v20837_v1 = vld [vmem:[%s30466_s3 + $0x16ec] ss:$16 sps:$4 sm:$0xff]  }
 0x5dc   :  { %11361 = vmatmul.mubr.bf16.gmra.mrb[152].mxu1 %v25375_v55  ;;  %11228 = vmatprep.mubr.bf16.mxu0 %v25387_v38 }
 0x5dd   :  { %11252 = vmatpush1.bf16.msra.mxu0 %v20802_v25  ;;  %11370 = vmatprep.mubr.bf16.mxu1 %v25387_v38  ;;  %v20832_v25 = vld [vmem:[%s30466_s3 + $0x16e0] ss:$16 sps:$4 sm:$0xff]  }
 0x5de   :  { %11394 = vmatpush1.bf16.msra.mxu1 %v20805_v62  ;;  %11253 = vmatprep.subr.bf16.mxu0 %v20810_v39  ;;  %v20835_v62 = vld [vmem:[%s30466_s3 + $0x16e8] ss:$16 sps:$4 sm:$0xff]   ;;  %v20840_v39 = vld [vmem:[%s30466_s3 + $0x1704] ss:$16 sps:$4 sm:$0xff]  }
 0x5df   :  { %11395 = vmatprep.subr.bf16.mxu1 %v20813_v12  ;;  %v20843_v12 = vld [vmem:[%s30466_s3 + $0x170c] ss:$16 sps:$4 sm:$0xff]  }
 0x5e1   :  { %11254 = vmatpush1.bf16.msra.mxu0 %v20808_v27  ;;  %v20838_v27 = vld [vmem:[%s30466_s3 + $0x1700] ss:$16 sps:$4 sm:$0xff]  }
 0x5e2   :  { %11396 = vmatpush1.bf16.msra.mxu1 %v20811_v40  ;;  %11255 = vmatprep.subr.bf16.mxu0 %v20816_v2  ;;  %v20841_v40 = vld [vmem:[%s30466_s3 + $0x1708] ss:$16 sps:$4 sm:$0xff]   ;;  %v20846_v2 = vld [vmem:[%s30466_s3 + $0x1724] ss:$16 sps:$4 sm:$0xff]  }
 0x5e3   :  { %11229 = vmatmul.mubr.bf16.gmra.mrb[152].mxu0 %v25414_v60  ;;  %11397 = vmatprep.subr.bf16.mxu1 %v20819_v61  ;;  %v20849_v61 = vld [vmem:[%s30466_s3 + $0x172c] ss:$16 sps:$4 sm:$0xff]  }
 0x5e4   :  { %11371 = vmatmul.mubr.bf16.gmra.mrb[156].mxu1 %v25414_v60  ;;  %11238 = vmatprep.mubr.bf16.mxu0 %v25366_v41 }
 0x5e5   :  { %11256 = vmatpush1.bf16.msra.mxu0 %v20814_v43  ;;  %11380 = vmatprep.mubr.bf16.mxu1 %v25366_v41  ;;  %v20844_v43 = vld [vmem:[%s30466_s3 + $0x1720] ss:$16 sps:$4 sm:$0xff]  }
 0x5e6   :  { %11398 = vmatpush1.bf16.msra.mxu1 %v20817_v56  ;;  %11257 = vmatprep.subr.bf16.mxu0 %v20822_v51  ;;  %v20847_v56 = vld [vmem:[%s30466_s3 + $0x1728] ss:$16 sps:$4 sm:$0xff]   ;;  %v20852_v51 = vld [vmem:[%s30466_s3 + $0x1744] ss:$16 sps:$4 sm:$0xff]  }
 0x5e7   :  { %11399 = vmatprep.subr.bf16.mxu1 %v20825_v52  ;;  %v20855_v52 = vld [vmem:[%s30466_s3 + $0x174c] ss:$16 sps:$4 sm:$0xff]  }
 0x5e9   :  { %11258 = vmatpush1.bf16.msra.mxu0 %v20820_v46  ;;  %v20850_v46 = vld [vmem:[%s30466_s3 + $0x1740] ss:$16 sps:$4 sm:$0xff]  }
 0x5ea   :  { %11400 = vmatpush1.bf16.msra.mxu1 %v20823_v10  ;;  %11259 = vmatprep.subr.bf16.mxu0 %v20828_v16  ;;  %v20853_v10 = vld [vmem:[%s30466_s3 + $0x1748] ss:$16 sps:$4 sm:$0xff]   ;;  %v20858_v16 = vld [vmem:[%s30466_s3 + $0x1764] ss:$16 sps:$4 sm:$0xff]  }
 0x5eb   :  { %11239 = vmatmul.mubr.bf16.gmra.mrb[156].mxu0 %v25401_v45  ;;  %11401 = vmatprep.subr.bf16.mxu1 %v20831_v37  ;;  %v20861_v37 = vld [vmem:[%s30466_s3 + $0x176c] ss:$16 sps:$4 sm:$0xff]  }
 0x5ec   :  { %11381 = vmatmul.mubr.bf16.gmra.mrb[160].mxu1 %v25401_v45  ;;  %11279 = vmatprep.mubr.bf16.mxu0 %v25456_v30 }
 0x5ed   :  { %11260 = vmatpush1.bf16.msra.mxu0 %v20826_v24  ;;  %11421 = vmatprep.mubr.bf16.mxu1 %v25456_v30  ;;  %v20856_v24 = vld [vmem:[%s30466_s3 + $0x1760] ss:$16 sps:$4 sm:$0xff]  }
 0x5ee   :  { %11402 = vmatpush1.bf16.msra.mxu1 %v20829_v15  ;;  %11261 = vmatprep.subr.bf16.mxu0 %v20834_v20  ;;  %v20859_v15 = vld [vmem:[%s30466_s3 + $0x1768] ss:$16 sps:$4 sm:$0xff]   ;;  %v20864_v20 = vld [vmem:[%s30466_s3 + $0x1784] ss:$16 sps:$4 sm:$0xff]  }
 0x5ef   :  { %11403 = vmatprep.subr.bf16.mxu1 %v20837_v1  ;;  %v20867_v1 = vld [vmem:[%s30466_s3 + $0x178c] ss:$16 sps:$4 sm:$0xff]  }
 0x5f1   :  { %11262 = vmatpush1.bf16.msra.mxu0 %v20832_v25  ;;  %v20862_v25 = vld [vmem:[%s30466_s3 + $0x1780] ss:$16 sps:$4 sm:$0xff]  }
 0x5f2   :  { %11404 = vmatpush1.bf16.msra.mxu1 %v20835_v62  ;;  %11263 = vmatprep.subr.bf16.mxu0 %v20840_v39  ;;  %v20865_v62 = vld [vmem:[%s30466_s3 + $0x1788] ss:$16 sps:$4 sm:$0xff]   ;;  %v20870_v39 = vld [vmem:[%s30466_s3 + $0x17a4] ss:$16 sps:$4 sm:$0xff]  }
 0x5f3   :  { %11405 = vmatprep.subr.bf16.mxu1 %v20843_v12  ;;  %v20873_v12 = vld [vmem:[%s30466_s3 + $0x17ac] ss:$16 sps:$4 sm:$0xff]  }
 0x5f5   :  { %11264 = vmatpush1.bf16.msra.mxu0 %v20838_v27  ;;  %v20868_v27 = vld [vmem:[%s30466_s3 + $0x17a0] ss:$16 sps:$4 sm:$0xff]  }
 0x5f6   :  { %11406 = vmatpush1.bf16.msra.mxu1 %v20841_v40  ;;  %11265 = vmatprep.subr.bf16.mxu0 %v20846_v2  ;;  %v20871_v40 = vld [vmem:[%s30466_s3 + $0x17a8] ss:$16 sps:$4 sm:$0xff]   ;;  %v20876_v2 = vld [vmem:[%s30466_s3 + $0x17c4] ss:$16 sps:$4 sm:$0xff]  }
 0x5f7   :  { %11407 = vmatprep.subr.bf16.mxu1 %v20849_v61  ;;  %v20879_v61 = vld [vmem:[%s30466_s3 + $0x17cc] ss:$16 sps:$4 sm:$0xff]  }
 0x5f9   :  { %11266 = vmatpush1.bf16.msra.mxu0 %v20844_v43  ;;  %v20874_v43 = vld [vmem:[%s30466_s3 + $0x17c0] ss:$16 sps:$4 sm:$0xff]  }
 0x5fa   :  { %11408 = vmatpush1.bf16.msra.mxu1 %v20847_v56  ;;  %11267 = vmatprep.subr.bf16.mxu0 %v20852_v51  ;;  %v20877_v56 = vld [vmem:[%s30466_s3 + $0x17c8] ss:$16 sps:$4 sm:$0xff]   ;;  %v20882_v51 = vld [vmem:[%s30466_s3 + $0x17e4] ss:$16 sps:$4 sm:$0xff]  }
 0x5fb   :  { %11409 = vmatprep.subr.bf16.mxu1 %v20855_v52  ;;  %v20885_v52 = vld [vmem:[%s30466_s3 + $0x17ec] ss:$16 sps:$4 sm:$0xff]  }
 0x5fd   :  { %11268 = vmatpush1.bf16.msra.mxu0 %v20850_v46  ;;  %v20880_v46 = vld [vmem:[%s30466_s3 + $0x17e0] ss:$16 sps:$4 sm:$0xff]  }
 0x5fe   :  { %11410 = vmatpush1.bf16.msra.mxu1 %v20853_v10  ;;  %11269 = vmatprep.subr.bf16.mxu0 %v20858_v16  ;;  %v20883_v10 = vld [vmem:[%s30466_s3 + $0x17e8] ss:$16 sps:$4 sm:$0xff]   ;;  %v21155_v16 = vld [vmem:[%s30466_s3 + $0x804] ss:$16 sps:$4 sm:$0xff]  }
 0x5ff   :  { %11411 = vmatprep.subr.bf16.mxu1 %v20861_v37  ;;  %v21156_v37 = vld [vmem:[%s30466_s3 + $0x80c] ss:$16 sps:$4 sm:$0xff]  }
 0x601   :  { %11270 = vmatpush1.bf16.msra.mxu0 %v20856_v24  ;;  %v21157_v24 = vld [vmem:[%s30466_s3 + $0x800] ss:$16 sps:$4 sm:$0xff]  }
 0x602   :  { %11412 = vmatpush1.bf16.msra.mxu1 %v20859_v15  ;;  %11271 = vmatprep.subr.bf16.mxu0 %v20864_v20  ;;  %v21158_v15 = vld [vmem:[%s30466_s3 + $0x808] ss:$16 sps:$4 sm:$0xff]   ;;  %v21159_v20 = vld [vmem:[%s30466_s3 + $0x824] ss:$16 sps:$4 sm:$0xff]  }
 0x603   :  { %11413 = vmatprep.subr.bf16.mxu1 %v20867_v1  ;;  %v21160_v1 = vld [vmem:[%s30466_s3 + $0x82c] ss:$16 sps:$4 sm:$0xff]  }
 0x605   :  { %11272 = vmatpush1.bf16.msra.mxu0 %v20862_v25  ;;  %v21161_v25 = vld [vmem:[%s30466_s3 + $0x820] ss:$16 sps:$4 sm:$0xff]  }
 0x606   :  { %11414 = vmatpush1.bf16.msra.mxu1 %v20865_v62  ;;  %11273 = vmatprep.subr.bf16.mxu0 %v20870_v39  ;;  %v21162_v62 = vld [vmem:[%s30466_s3 + $0x828] ss:$16 sps:$4 sm:$0xff]   ;;  %v21163_v39 = vld [vmem:[%s30466_s3 + $0x844] ss:$16 sps:$4 sm:$0xff]  }
 0x607   :  { %11415 = vmatprep.subr.bf16.mxu1 %v20873_v12  ;;  %v21164_v12 = vld [vmem:[%s30466_s3 + $0x84c] ss:$16 sps:$4 sm:$0xff]  }
 0x609   :  { %11274 = vmatpush1.bf16.msra.mxu0 %v20868_v27  ;;  %v21165_v27 = vld [vmem:[%s30466_s3 + $0x840] ss:$16 sps:$4 sm:$0xff]  }
 0x60a   :  { %11416 = vmatpush1.bf16.msra.mxu1 %v20871_v40  ;;  %11275 = vmatprep.subr.bf16.mxu0 %v20876_v2  ;;  %v21166_v40 = vld [vmem:[%s30466_s3 + $0x848] ss:$16 sps:$4 sm:$0xff]   ;;  %v21167_v2 = vld [vmem:[%s30466_s3 + $0x864] ss:$16 sps:$4 sm:$0xff]  }
 0x60b   :  { %11417 = vmatprep.subr.bf16.mxu1 %v20879_v61  ;;  %v21168_v61 = vld [vmem:[%s30466_s3 + $0x86c] ss:$16 sps:$4 sm:$0xff]  }
 0x60d   :  { %11276 = vmatpush1.bf16.msra.mxu0 %v20874_v43  ;;  %v21169_v43 = vld [vmem:[%s30466_s3 + $0x860] ss:$16 sps:$4 sm:$0xff]  }
 0x60e   :  { %11418 = vmatpush1.bf16.msra.mxu1 %v20877_v56  ;;  %11277 = vmatprep.subr.bf16.mxu0 %v20882_v51  ;;  %v21170_v56 = vld [vmem:[%s30466_s3 + $0x868] ss:$16 sps:$4 sm:$0xff]   ;;  %v21171_v51 = vld [vmem:[%s30466_s3 + $0x884] ss:$16 sps:$4 sm:$0xff]  }
 0x60f   :  { %11419 = vmatprep.subr.bf16.mxu1 %v20885_v52  ;;  %v21172_v52 = vld [vmem:[%s30466_s3 + $0x88c] ss:$16 sps:$4 sm:$0xff]  }
 0x611   :  { %11278 = vmatpush1.bf16.msra.mxu0 %v20880_v46  ;;  %v21173_v46 = vld [vmem:[%s30466_s3 + $0x880] ss:$16 sps:$4 sm:$0xff]  }
 0x612   :  { %11420 = vmatpush1.bf16.msra.mxu1 %v20883_v10  ;;  %11516 = vmatprep.subr.bf16.mxu0 %v21155_v16  ;;  %v21174_v10 = vld [vmem:[%s30466_s3 + $0x888] ss:$16 sps:$4 sm:$0xff]   ;;  %v21175_v16 = vld [vmem:[%s30466_s3 + $0x8a4] ss:$16 sps:$4 sm:$0xff]  }
 0x613   :  { %11658 = vmatprep.subr.bf16.mxu1 %v21156_v37  ;;  %v21176_v37 = vld [vmem:[%s30466_s3 + $0x8ac] ss:$16 sps:$4 sm:$0xff]  }
 0x614   :  { %11280 = vmatmul.mubr.bf16.vlgmr.msra.gmra.mrb[144].mxu0 %v25574_v48 }
 0x615   :  { %11422 = vmatmul.mubr.bf16.vlgmr.msra.gmra.mrb[148].mxu1 %v25574_v48  ;;  %11289 = vmatprep.mubr.bf16.mxu0 %v25586_v44 }
 0x616   :  { %11431 = vmatprep.mubr.bf16.mxu1 %v25586_v44  ;;  %11517 = vmatpush1.bf16.msra.mxu0 %v21157_v24  ;;  %v21177_v24 = vld [vmem:[%s30466_s3 + $0x8a0] ss:$16 sps:$4 sm:$0xff]  }
 0x617   :  { %11659 = vmatpush1.bf16.msra.mxu1 %v21158_v15  ;;  %11518 = vmatprep.subr.bf16.mxu0 %v21159_v20  ;;  %v21178_v15 = vld [vmem:[%s30466_s3 + $0x8a8] ss:$16 sps:$4 sm:$0xff]   ;;  %v21179_v20 = vld [vmem:[%s30466_s3 + $0x8c4] ss:$16 sps:$4 sm:$0xff]  }
 0x618   :  { %11660 = vmatprep.subr.bf16.mxu1 %v21160_v1  ;;  %v21180_v1 = vld [vmem:[%s30466_s3 + $0x8cc] ss:$16 sps:$4 sm:$0xff]  }
 0x61a   :  { %11519 = vmatpush1.bf16.msra.mxu0 %v21161_v25  ;;  %v21181_v25 = vld [vmem:[%s30466_s3 + $0x8c0] ss:$16 sps:$4 sm:$0xff]  }
 0x61b   :  { %11661 = vmatpush1.bf16.msra.mxu1 %v21162_v62  ;;  %11520 = vmatprep.subr.bf16.mxu0 %v21163_v39  ;;  %v21182_v62 = vld [vmem:[%s30466_s3 + $0x8c8] ss:$16 sps:$4 sm:$0xff]   ;;  %v21183_v39 = vld [vmem:[%s30466_s3 + $0x8e4] ss:$16 sps:$4 sm:$0xff]  }
 0x61c   :  { %11290 = vmatmul.mubr.bf16.gmra.mrb[148].mxu0 %v25614_v17  ;;  %11662 = vmatprep.subr.bf16.mxu1 %v21164_v12  ;;  %v21184_v12 = vld [vmem:[%s30466_s3 + $0x8ec] ss:$16 sps:$4 sm:$0xff]  }
 0x61d   :  { %11432 = vmatmul.mubr.bf16.gmra.mrb[152].mxu1 %v25614_v17  ;;  %11299 = vmatprep.mubr.bf16.mxu0 %v25625_v23 }
 0x61e   :  { %11441 = vmatprep.mubr.bf16.mxu1 %v25625_v23  ;;  %11521 = vmatpush1.bf16.msra.mxu0 %v21165_v27  ;;  %v21185_v27 = vld [vmem:[%s30466_s3 + $0x8e0] ss:$16 sps:$4 sm:$0xff]  }
 0x61f   :  { %11663 = vmatpush1.bf16.msra.mxu1 %v21166_v40  ;;  %11522 = vmatprep.subr.bf16.mxu0 %v21167_v2  ;;  %v21186_v40 = vld [vmem:[%s30466_s3 + $0x8e8] ss:$16 sps:$4 sm:$0xff]   ;;  %v21187_v2 = vld [vmem:[%s30466_s3 + $0x904] ss:$16 sps:$4 sm:$0xff]  }
 0x620   :  { %11664 = vmatprep.subr.bf16.mxu1 %v21168_v61  ;;  %v21188_v61 = vld [vmem:[%s30466_s3 + $0x90c] ss:$16 sps:$4 sm:$0xff]  }
 0x622   :  { %11523 = vmatpush1.bf16.msra.mxu0 %v21169_v43  ;;  %v21189_v43 = vld [vmem:[%s30466_s3 + $0x900] ss:$16 sps:$4 sm:$0xff]  }
 0x623   :  { %11665 = vmatpush1.bf16.msra.mxu1 %v21170_v56  ;;  %11524 = vmatprep.subr.bf16.mxu0 %v21171_v51  ;;  %v21190_v56 = vld [vmem:[%s30466_s3 + $0x908] ss:$16 sps:$4 sm:$0xff]   ;;  %v21191_v51 = vld [vmem:[%s30466_s3 + $0x924] ss:$16 sps:$4 sm:$0xff]  }
 0x624   :  { %11300 = vmatmul.mubr.bf16.gmra.mrb[152].mxu0 %v25653_v29  ;;  %11666 = vmatprep.subr.bf16.mxu1 %v21172_v52  ;;  %v21192_v52 = vld [vmem:[%s30466_s3 + $0x92c] ss:$16 sps:$4 sm:$0xff]  }
 0x625   :  { %11442 = vmatmul.mubr.bf16.gmra.mrb[156].mxu1 %v25653_v29  ;;  %11309 = vmatprep.mubr.bf16.mxu0 %v25605_v0 }
 0x626   :  { %11451 = vmatprep.mubr.bf16.mxu1 %v25605_v0  ;;  %11525 = vmatpush1.bf16.msra.mxu0 %v21173_v46  ;;  %v21193_v46 = vld [vmem:[%s30466_s3 + $0x920] ss:$16 sps:$4 sm:$0xff]  }
 0x627   :  { %11667 = vmatpush1.bf16.msra.mxu1 %v21174_v10  ;;  %11526 = vmatprep.subr.bf16.mxu0 %v21175_v16  ;;  %v21194_v10 = vld [vmem:[%s30466_s3 + $0x928] ss:$16 sps:$4 sm:$0xff]   ;;  %v21195_v16 = vld [vmem:[%s30466_s3 + $0x944] ss:$16 sps:$4 sm:$0xff]  }
 0x628   :  { %11668 = vmatprep.subr.bf16.mxu1 %v21176_v37  ;;  %v21196_v37 = vld [vmem:[%s30466_s3 + $0x94c] ss:$16 sps:$4 sm:$0xff]  }
 0x62a   :  { %11527 = vmatpush1.bf16.msra.mxu0 %v21177_v24  ;;  %v21197_v24 = vld [vmem:[%s30466_s3 + $0x940] ss:$16 sps:$4 sm:$0xff]  }
 0x62b   :  { %11669 = vmatpush1.bf16.msra.mxu1 %v21178_v15  ;;  %11528 = vmatprep.subr.bf16.mxu0 %v21179_v20  ;;  %v21198_v15 = vld [vmem:[%s30466_s3 + $0x948] ss:$16 sps:$4 sm:$0xff]   ;;  %v21199_v20 = vld [vmem:[%s30466_s3 + $0x964] ss:$16 sps:$4 sm:$0xff]  }
 0x62c   :  { %11310 = vmatmul.mubr.bf16.gmra.mrb[156].mxu0 %v25637_v36  ;;  %11670 = vmatprep.subr.bf16.mxu1 %v21180_v1  ;;  %v21200_v1 = vld [vmem:[%s30466_s3 + $0x96c] ss:$16 sps:$4 sm:$0xff]  }
 0x62d   :  { %11452 = vmatmul.mubr.bf16.gmra.mrb[160].mxu1 %v25637_v36  ;;  %11548 = vmatprep.mubr.bf16.mxu0 %v25214_v19 }
 0x62e   :  { %11529 = vmatpush1.bf16.msra.mxu0 %v21181_v25  ;;  %11690 = vmatprep.mubr.bf16.mxu1 %v25214_v19  ;;  %v21201_v25 = vld [vmem:[%s30466_s3 + $0x960] ss:$16 sps:$4 sm:$0xff]  }
 0x62f   :  { %11671 = vmatpush1.bf16.msra.mxu1 %v21182_v62  ;;  %11530 = vmatprep.subr.bf16.mxu0 %v21183_v39  ;;  %v21202_v62 = vld [vmem:[%s30466_s3 + $0x968] ss:$16 sps:$4 sm:$0xff]   ;;  %v21203_v39 = vld [vmem:[%s30466_s3 + $0x984] ss:$16 sps:$4 sm:$0xff]  }
 0x630   :  { %11672 = vmatprep.subr.bf16.mxu1 %v21184_v12  ;;  %v21204_v12 = vld [vmem:[%s30466_s3 + $0x98c] ss:$16 sps:$4 sm:$0xff]  }
 0x632   :  { %11531 = vmatpush1.bf16.msra.mxu0 %v21185_v27  ;;  %v21205_v27 = vld [vmem:[%s30466_s3 + $0x980] ss:$16 sps:$4 sm:$0xff]  }
 0x633   :  { %11673 = vmatpush1.bf16.msra.mxu1 %v21186_v40  ;;  %11532 = vmatprep.subr.bf16.mxu0 %v21187_v2  ;;  %v21206_v40 = vld [vmem:[%s30466_s3 + $0x988] ss:$16 sps:$4 sm:$0xff]   ;;  %v21207_v2 = vld [vmem:[%s30466_s3 + $0x9a4] ss:$16 sps:$4 sm:$0xff]  }
 0x634   :  { %11674 = vmatprep.subr.bf16.mxu1 %v21188_v61  ;;  %v21208_v61 = vld [vmem:[%s30466_s3 + $0x9ac] ss:$16 sps:$4 sm:$0xff]  }
 0x636   :  { %11533 = vmatpush1.bf16.msra.mxu0 %v21189_v43  ;;  %v21209_v43 = vld [vmem:[%s30466_s3 + $0x9a0] ss:$16 sps:$4 sm:$0xff]  }
 0x637   :  { %11675 = vmatpush1.bf16.msra.mxu1 %v21190_v56  ;;  %11534 = vmatprep.subr.bf16.mxu0 %v21191_v51  ;;  %v21210_v56 = vld [vmem:[%s30466_s3 + $0x9a8] ss:$16 sps:$4 sm:$0xff]   ;;  %v21211_v51 = vld [vmem:[%s30466_s3 + $0x9c4] ss:$16 sps:$4 sm:$0xff]  }
 0x638   :  { %11676 = vmatprep.subr.bf16.mxu1 %v21192_v52  ;;  %v21212_v52 = vld [vmem:[%s30466_s3 + $0x9cc] ss:$16 sps:$4 sm:$0xff]  }
 0x63a   :  { %11535 = vmatpush1.bf16.msra.mxu0 %v21193_v46  ;;  %v21213_v46 = vld [vmem:[%s30466_s3 + $0x9c0] ss:$16 sps:$4 sm:$0xff]  }
 0x63b   :  { %11677 = vmatpush1.bf16.msra.mxu1 %v21194_v10  ;;  %11536 = vmatprep.subr.bf16.mxu0 %v21195_v16  ;;  %v21214_v10 = vld [vmem:[%s30466_s3 + $0x9c8] ss:$16 sps:$4 sm:$0xff]   ;;  %v21215_v16 = vld [vmem:[%s30466_s3 + $0x9e4] ss:$16 sps:$4 sm:$0xff]  }
 0x63c   :  { %11678 = vmatprep.subr.bf16.mxu1 %v21196_v37  ;;  %v21216_v37 = vld [vmem:[%s30466_s3 + $0x9ec] ss:$16 sps:$4 sm:$0xff]  }
 0x63e   :  { %11537 = vmatpush1.bf16.msra.mxu0 %v21197_v24  ;;  %v21217_v24 = vld [vmem:[%s30466_s3 + $0x9e0] ss:$16 sps:$4 sm:$0xff]  }
 0x63f   :  { %11679 = vmatpush1.bf16.msra.mxu1 %v21198_v15  ;;  %11538 = vmatprep.subr.bf16.mxu0 %v21199_v20  ;;  %v21218_v15 = vld [vmem:[%s30466_s3 + $0x9e8] ss:$16 sps:$4 sm:$0xff]   ;;  %v21219_v20 = vld [vmem:[%s30466_s3 + $0xa04] ss:$16 sps:$4 sm:$0xff]  }
 0x640   :  { %11680 = vmatprep.subr.bf16.mxu1 %v21200_v1  ;;  %v21220_v1 = vld [vmem:[%s30466_s3 + $0xa0c] ss:$16 sps:$4 sm:$0xff]  }
 0x642   :  { %11539 = vmatpush1.bf16.msra.mxu0 %v21201_v25  ;;  %v21221_v25 = vld [vmem:[%s30466_s3 + $0xa00] ss:$16 sps:$4 sm:$0xff]  }
 0x643   :  { %11681 = vmatpush1.bf16.msra.mxu1 %v21202_v62  ;;  %11540 = vmatprep.subr.bf16.mxu0 %v21203_v39  ;;  %v21222_v62 = vld [vmem:[%s30466_s3 + $0xa08] ss:$16 sps:$4 sm:$0xff]   ;;  %v21223_v39 = vld [vmem:[%s30466_s3 + $0xa24] ss:$16 sps:$4 sm:$0xff]  }
 0x644   :  { %11682 = vmatprep.subr.bf16.mxu1 %v21204_v12  ;;  %v21224_v12 = vld [vmem:[%s30466_s3 + $0xa2c] ss:$16 sps:$4 sm:$0xff]  }
 0x646   :  { %11541 = vmatpush1.bf16.msra.mxu0 %v21205_v27  ;;  %v21225_v27 = vld [vmem:[%s30466_s3 + $0xa20] ss:$16 sps:$4 sm:$0xff]  }
 0x647   :  { %11683 = vmatpush1.bf16.msra.mxu1 %v21206_v40  ;;  %11542 = vmatprep.subr.bf16.mxu0 %v21207_v2  ;;  %v21226_v40 = vld [vmem:[%s30466_s3 + $0xa28] ss:$16 sps:$4 sm:$0xff]   ;;  %v21227_v2 = vld [vmem:[%s30466_s3 + $0xa44] ss:$16 sps:$4 sm:$0xff]  }
 0x648   :  { %11684 = vmatprep.subr.bf16.mxu1 %v21208_v61  ;;  %v21228_v61 = vld [vmem:[%s30466_s3 + $0xa4c] ss:$16 sps:$4 sm:$0xff]  }
 0x64a   :  { %11543 = vmatpush1.bf16.msra.mxu0 %v21209_v43  ;;  %v21229_v43 = vld [vmem:[%s30466_s3 + $0xa40] ss:$16 sps:$4 sm:$0xff]  }
 0x64b   :  { %11685 = vmatpush1.bf16.msra.mxu1 %v21210_v56  ;;  %11544 = vmatprep.subr.bf16.mxu0 %v21211_v51  ;;  %v21230_v56 = vld [vmem:[%s30466_s3 + $0xa48] ss:$16 sps:$4 sm:$0xff]   ;;  %v21231_v51 = vld [vmem:[%s30466_s3 + $0xa64] ss:$16 sps:$4 sm:$0xff]  }
 0x64c   :  { %11686 = vmatprep.subr.bf16.mxu1 %v21212_v52  ;;  %v21232_v52 = vld [vmem:[%s30466_s3 + $0xa6c] ss:$16 sps:$4 sm:$0xff]  }
 0x64e   :  { %11545 = vmatpush1.bf16.msra.mxu0 %v21213_v46  ;;  %v21233_v46 = vld [vmem:[%s30466_s3 + $0xa60] ss:$16 sps:$4 sm:$0xff]  }
 0x64f   :  { %11687 = vmatpush1.bf16.msra.mxu1 %v21214_v10  ;;  %11546 = vmatprep.subr.bf16.mxu0 %v21215_v16  ;;  %v21234_v10 = vld [vmem:[%s30466_s3 + $0xa68] ss:$16 sps:$4 sm:$0xff]   ;;  %v21235_v16 = vld [vmem:[%s30466_s3 + $0xa84] ss:$16 sps:$4 sm:$0xff]  }
 0x650   :  { %11688 = vmatprep.subr.bf16.mxu1 %v21216_v37  ;;  %v21236_v37 = vld [vmem:[%s30466_s3 + $0xa8c] ss:$16 sps:$4 sm:$0xff]  }
 0x652   :  { %11547 = vmatpush1.bf16.msra.mxu0 %v21217_v24  ;;  %v21237_v24 = vld [vmem:[%s30466_s3 + $0xa80] ss:$16 sps:$4 sm:$0xff]  }
 0x653   :  { %11689 = vmatpush1.bf16.msra.mxu1 %v21218_v15  ;;  %11587 = vmatprep.subr.bf16.mxu0 %v21219_v20  ;;  %v21238_v15 = vld [vmem:[%s30466_s3 + $0xa88] ss:$16 sps:$4 sm:$0xff]   ;;  %v21239_v20 = vld [vmem:[%s30466_s3 + $0xaa4] ss:$16 sps:$4 sm:$0xff]  }
 0x654   :  { %11729 = vmatprep.subr.bf16.mxu1 %v21220_v1  ;;  %v21240_v1 = vld [vmem:[%s30466_s3 + $0xaac] ss:$16 sps:$4 sm:$0xff]  }
 0x655   :  { %11549 = vmatmul.mubr.bf16.vlgmr.msra.gmra.mrb[160].mxu0 %v25335_v53 }
 0x656   :  { %11691 = vmatmul.mubr.bf16.vlgmr.msra.gmra.mrb[164].mxu1 %v25335_v53  ;;  %11558 = vmatprep.mubr.bf16.mxu0 %v25348_v26 }
 0x657   :  { %11588 = vmatpush1.bf16.msra.mxu0 %v21221_v25  ;;  %11700 = vmatprep.mubr.bf16.mxu1 %v25348_v26  ;;  %v21241_v25 = vld [vmem:[%s30466_s3 + $0xaa0] ss:$16 sps:$4 sm:$0xff]  }
 0x658   :  { %11730 = vmatpush1.bf16.msra.mxu1 %v21222_v62  ;;  %11589 = vmatprep.subr.bf16.mxu0 %v21223_v39  ;;  %v21242_v62 = vld [vmem:[%s30466_s3 + $0xaa8] ss:$16 sps:$4 sm:$0xff]   ;;  %v21243_v39 = vld [vmem:[%s30466_s3 + $0xac4] ss:$16 sps:$4 sm:$0xff]  }
 0x659   :  { %11731 = vmatprep.subr.bf16.mxu1 %v21224_v12  ;;  %v21244_v12 = vld [vmem:[%s30466_s3 + $0xacc] ss:$16 sps:$4 sm:$0xff]  }
 0x65b   :  { %11590 = vmatpush1.bf16.msra.mxu0 %v21225_v27  ;;  %v21245_v27 = vld [vmem:[%s30466_s3 + $0xac0] ss:$16 sps:$4 sm:$0xff]  }
 0x65c   :  { %11732 = vmatpush1.bf16.msra.mxu1 %v21226_v40  ;;  %11591 = vmatprep.subr.bf16.mxu0 %v21227_v2  ;;  %v21246_v40 = vld [vmem:[%s30466_s3 + $0xac8] ss:$16 sps:$4 sm:$0xff]   ;;  %v21247_v2 = vld [vmem:[%s30466_s3 + $0xae4] ss:$16 sps:$4 sm:$0xff]  }
 0x65d   :  { %11559 = vmatmul.mubr.bf16.gmra.mrb[164].mxu0 %v25375_v55  ;;  %11733 = vmatprep.subr.bf16.mxu1 %v21228_v61  ;;  %v21248_v61 = vld [vmem:[%s30466_s3 + $0xaec] ss:$16 sps:$4 sm:$0xff]  }
 0x65e   :  { %11701 = vmatmul.mubr.bf16.gmra.mrb[168].mxu1 %v25375_v55  ;;  %11568 = vmatprep.mubr.bf16.mxu0 %v25387_v38 }
 0x65f   :  { %11592 = vmatpush1.bf16.msra.mxu0 %v21229_v43  ;;  %11710 = vmatprep.mubr.bf16.mxu1 %v25387_v38  ;;  %v21249_v43 = vld [vmem:[%s30466_s3 + $0xae0] ss:$16 sps:$4 sm:$0xff]  }
 0x660   :  { %11734 = vmatpush1.bf16.msra.mxu1 %v21230_v56  ;;  %11593 = vmatprep.subr.bf16.mxu0 %v21231_v51  ;;  %v21250_v56 = vld [vmem:[%s30466_s3 + $0xae8] ss:$16 sps:$4 sm:$0xff]   ;;  %v21251_v51 = vld [vmem:[%s30466_s3 + $0xb04] ss:$16 sps:$4 sm:$0xff]  }
 0x661   :  { %11735 = vmatprep.subr.bf16.mxu1 %v21232_v52  ;;  %v21252_v52 = vld [vmem:[%s30466_s3 + $0xb0c] ss:$16 sps:$4 sm:$0xff]  }
 0x663   :  { %11594 = vmatpush1.bf16.msra.mxu0 %v21233_v46  ;;  %v21253_v46 = vld [vmem:[%s30466_s3 + $0xb00] ss:$16 sps:$4 sm:$0xff]  }
 0x664   :  { %11736 = vmatpush1.bf16.msra.mxu1 %v21234_v10  ;;  %11595 = vmatprep.subr.bf16.mxu0 %v21235_v16  ;;  %v21254_v10 = vld [vmem:[%s30466_s3 + $0xb08] ss:$16 sps:$4 sm:$0xff]   ;;  %v21255_v16 = vld [vmem:[%s30466_s3 + $0xb24] ss:$16 sps:$4 sm:$0xff]  }
 0x665   :  { %11569 = vmatmul.mubr.bf16.gmra.mrb[168].mxu0 %v25414_v60  ;;  %11737 = vmatprep.subr.bf16.mxu1 %v21236_v37  ;;  %v21256_v37 = vld [vmem:[%s30466_s3 + $0xb2c] ss:$16 sps:$4 sm:$0xff]  }
 0x666   :  { %11711 = vmatmul.mubr.bf16.gmra.mrb[172].mxu1 %v25414_v60  ;;  %11578 = vmatprep.mubr.bf16.mxu0 %v25366_v41 }
 0x667   :  { %11596 = vmatpush1.bf16.msra.mxu0 %v21237_v24  ;;  %11720 = vmatprep.mubr.bf16.mxu1 %v25366_v41  ;;  %v21257_v24 = vld [vmem:[%s30466_s3 + $0xb20] ss:$16 sps:$4 sm:$0xff]  }
 0x668   :  { %11738 = vmatpush1.bf16.msra.mxu1 %v21238_v15  ;;  %11597 = vmatprep.subr.bf16.mxu0 %v21239_v20  ;;  %v21258_v15 = vld [vmem:[%s30466_s3 + $0xb28] ss:$16 sps:$4 sm:$0xff]   ;;  %v21259_v20 = vld [vmem:[%s30466_s3 + $0xb44] ss:$16 sps:$4 sm:$0xff]  }
 0x669   :  { %11739 = vmatprep.subr.bf16.mxu1 %v21240_v1  ;;  %v21260_v1 = vld [vmem:[%s30466_s3 + $0xb4c] ss:$16 sps:$4 sm:$0xff]  }
 0x66b   :  { %11598 = vmatpush1.bf16.msra.mxu0 %v21241_v25  ;;  %v21261_v25 = vld [vmem:[%s30466_s3 + $0xb40] ss:$16 sps:$4 sm:$0xff]  }
 0x66c   :  { %11740 = vmatpush1.bf16.msra.mxu1 %v21242_v62  ;;  %11599 = vmatprep.subr.bf16.mxu0 %v21243_v39  ;;  %v21262_v62 = vld [vmem:[%s30466_s3 + $0xb48] ss:$16 sps:$4 sm:$0xff]   ;;  %v21263_v39 = vld [vmem:[%s30466_s3 + $0xb64] ss:$16 sps:$4 sm:$0xff]  }
 0x66d   :  { %11579 = vmatmul.mubr.bf16.gmra.mrb[172].mxu0 %v25401_v45  ;;  %11741 = vmatprep.subr.bf16.mxu1 %v21244_v12  ;;  %v21264_v12 = vld [vmem:[%s30466_s3 + $0xb6c] ss:$16 sps:$4 sm:$0xff]  }
 0x66e   :  { %11721 = vmatmul.mubr.bf16.gmra.mrb[176].mxu1 %v25401_v45  ;;  %11619 = vmatprep.mubr.bf16.mxu0 %v25456_v30 }
 0x66f   :  { %11600 = vmatpush1.bf16.msra.mxu0 %v21245_v27  ;;  %11761 = vmatprep.mubr.bf16.mxu1 %v25456_v30  ;;  %v21265_v27 = vld [vmem:[%s30466_s3 + $0xb60] ss:$16 sps:$4 sm:$0xff]  }
 0x670   :  { %11742 = vmatpush1.bf16.msra.mxu1 %v21246_v40  ;;  %11601 = vmatprep.subr.bf16.mxu0 %v21247_v2  ;;  %v21266_v40 = vld [vmem:[%s30466_s3 + $0xb68] ss:$16 sps:$4 sm:$0xff]   ;;  %v21267_v2 = vld [vmem:[%s30466_s3 + $0xb84] ss:$16 sps:$4 sm:$0xff]  }
 0x671   :  { %11743 = vmatprep.subr.bf16.mxu1 %v21248_v61  ;;  %v21268_v61 = vld [vmem:[%s30466_s3 + $0xb8c] ss:$16 sps:$4 sm:$0xff]  }
 0x673   :  { %11602 = vmatpush1.bf16.msra.mxu0 %v21249_v43  ;;  %v21269_v43 = vld [vmem:[%s30466_s3 + $0xb80] ss:$16 sps:$4 sm:$0xff]  }
 0x674   :  { %11744 = vmatpush1.bf16.msra.mxu1 %v21250_v56  ;;  %11603 = vmatprep.subr.bf16.mxu0 %v21251_v51  ;;  %v21270_v56 = vld [vmem:[%s30466_s3 + $0xb88] ss:$16 sps:$4 sm:$0xff]   ;;  %v21271_v51 = vld [vmem:[%s30466_s3 + $0xba4] ss:$16 sps:$4 sm:$0xff]  }
 0x675   :  { %11745 = vmatprep.subr.bf16.mxu1 %v21252_v52  ;;  %v21272_v52 = vld [vmem:[%s30466_s3 + $0xbac] ss:$16 sps:$4 sm:$0xff]  }
 0x677   :  { %11604 = vmatpush1.bf16.msra.mxu0 %v21253_v46  ;;  %v21273_v46 = vld [vmem:[%s30466_s3 + $0xba0] ss:$16 sps:$4 sm:$0xff]  }
 0x678   :  { %11746 = vmatpush1.bf16.msra.mxu1 %v21254_v10  ;;  %11605 = vmatprep.subr.bf16.mxu0 %v21255_v16  ;;  %v21274_v10 = vld [vmem:[%s30466_s3 + $0xba8] ss:$16 sps:$4 sm:$0xff]   ;;  %v21275_v16 = vld [vmem:[%s30466_s3 + $0xbc4] ss:$16 sps:$4 sm:$0xff]  }
 0x679   :  { %11747 = vmatprep.subr.bf16.mxu1 %v21256_v37  ;;  %v21276_v37 = vld [vmem:[%s30466_s3 + $0xbcc] ss:$16 sps:$4 sm:$0xff]  }
 0x67b   :  { %11606 = vmatpush1.bf16.msra.mxu0 %v21257_v24  ;;  %v21277_v24 = vld [vmem:[%s30466_s3 + $0xbc0] ss:$16 sps:$4 sm:$0xff]  }
 0x67c   :  { %11748 = vmatpush1.bf16.msra.mxu1 %v21258_v15  ;;  %11607 = vmatprep.subr.bf16.mxu0 %v21259_v20  ;;  %v21278_v15 = vld [vmem:[%s30466_s3 + $0xbc8] ss:$16 sps:$4 sm:$0xff]   ;;  %v21279_v20 = vld [vmem:[%s30466_s3 + $0xbe4] ss:$16 sps:$4 sm:$0xff]  }
 0x67d   :  { %11749 = vmatprep.subr.bf16.mxu1 %v21260_v1  ;;  %v21280_v1 = vld [vmem:[%s30466_s3 + $0xbec] ss:$16 sps:$4 sm:$0xff]  }
 0x67f   :  { %11608 = vmatpush1.bf16.msra.mxu0 %v21261_v25  ;;  %v21281_v25 = vld [vmem:[%s30466_s3 + $0xbe0] ss:$16 sps:$4 sm:$0xff]  }
 0x680   :  { %11750 = vmatpush1.bf16.msra.mxu1 %v21262_v62  ;;  %11609 = vmatprep.subr.bf16.mxu0 %v21263_v39  ;;  %v21282_v62 = vld [vmem:[%s30466_s3 + $0xbe8] ss:$16 sps:$4 sm:$0xff]   ;;  %v21283_v39 = vld [vmem:[%s30466_s3 + $0x4] ss:$16 sps:$4 sm:$0xff]  }
 0x681   :  { %11751 = vmatprep.subr.bf16.mxu1 %v21264_v12  ;;  %v21284_v12 = vld [vmem:[%s30466_s3 + $0xc] ss:$16 sps:$4 sm:$0xff]  }
 0x683   :  { %11610 = vmatpush1.bf16.msra.mxu0 %v21265_v27  ;;  %v21285_v27 = vld [vmem:[%s30466_s3] ss:$16 sps:$4 sm:$0xff]  }
 0x684   :  { %11752 = vmatpush1.bf16.msra.mxu1 %v21266_v40  ;;  %11611 = vmatprep.subr.bf16.mxu0 %v21267_v2  ;;  %v21286_v40 = vld [vmem:[%s30466_s3 + $0x8] ss:$16 sps:$4 sm:$0xff]   ;;  %v21287_v2 = vld [vmem:[%s30466_s3 + $0x24] ss:$16 sps:$4 sm:$0xff]  }
 0x685   :  { %11753 = vmatprep.subr.bf16.mxu1 %v21268_v61  ;;  %v21288_v61 = vld [vmem:[%s30466_s3 + $0x2c] ss:$16 sps:$4 sm:$0xff]  }
 0x687   :  { %11612 = vmatpush1.bf16.msra.mxu0 %v21269_v43  ;;  %v21289_v43 = vld [vmem:[%s30466_s3 + $0x20] ss:$16 sps:$4 sm:$0xff]  }
 0x688   :  { %11754 = vmatpush1.bf16.msra.mxu1 %v21270_v56  ;;  %11613 = vmatprep.subr.bf16.mxu0 %v21271_v51  ;;  %v21290_v56 = vld [vmem:[%s30466_s3 + $0x28] ss:$16 sps:$4 sm:$0xff]   ;;  %v21291_v51 = vld [vmem:[%s30466_s3 + $0x44] ss:$16 sps:$4 sm:$0xff]  }
 0x689   :  { %11755 = vmatprep.subr.bf16.mxu1 %v21272_v52  ;;  %v21292_v52 = vld [vmem:[%s30466_s3 + $0x4c] ss:$16 sps:$4 sm:$0xff]  }
 0x68b   :  { %11614 = vmatpush1.bf16.msra.mxu0 %v21273_v46  ;;  %v21293_v46 = vld [vmem:[%s30466_s3 + $0x40] ss:$16 sps:$4 sm:$0xff]  }
 0x68c   :  { %11756 = vmatpush1.bf16.msra.mxu1 %v21274_v10  ;;  %11615 = vmatprep.subr.bf16.mxu0 %v21275_v16  ;;  %v21294_v10 = vld [vmem:[%s30466_s3 + $0x48] ss:$16 sps:$4 sm:$0xff]   ;;  %v21295_v16 = vld [vmem:[%s30466_s3 + $0x64] ss:$16 sps:$4 sm:$0xff]  }
 0x68d   :  { %11757 = vmatprep.subr.bf16.mxu1 %v21276_v37  ;;  %v21296_v37 = vld [vmem:[%s30466_s3 + $0x6c] ss:$16 sps:$4 sm:$0xff]  }
 0x68f   :  { %11616 = vmatpush1.bf16.msra.mxu0 %v21277_v24  ;;  %v21297_v24 = vld [vmem:[%s30466_s3 + $0x60] ss:$16 sps:$4 sm:$0xff]  }
 0x690   :  { %11758 = vmatpush1.bf16.msra.mxu1 %v21278_v15  ;;  %11617 = vmatprep.subr.bf16.mxu0 %v21279_v20  ;;  %v21298_v15 = vld [vmem:[%s30466_s3 + $0x68] ss:$16 sps:$4 sm:$0xff]   ;;  %v21299_v20 = vld [vmem:[%s30466_s3 + $0x84] ss:$16 sps:$4 sm:$0xff]  }
 0x691   :  { %11759 = vmatprep.subr.bf16.mxu1 %v21280_v1  ;;  %v21300_v1 = vld [vmem:[%s30466_s3 + $0x8c] ss:$16 sps:$4 sm:$0xff]  }
 0x693   :  { %11618 = vmatpush1.bf16.msra.mxu0 %v21281_v25  ;;  %v21301_v25 = vld [vmem:[%s30466_s3 + $0x80] ss:$16 sps:$4 sm:$0xff]  }
 0x694   :  { %11760 = vmatpush1.bf16.msra.mxu1 %v21282_v62  ;;  %11800 = vmatprep.subr.bf16.mxu0 %v21283_v39  ;;  %v21302_v62 = vld [vmem:[%s30466_s3 + $0x88] ss:$16 sps:$4 sm:$0xff]   ;;  %v21303_v39 = vld [vmem:[%s30466_s3 + $0xa4] ss:$16 sps:$4 sm:$0xff]  }
 0x695   :  { %11942 = vmatprep.subr.bf16.mxu1 %v21284_v12  ;;  %v21304_v12 = vld [vmem:[%s30466_s3 + $0xac] ss:$16 sps:$4 sm:$0xff]  }
 0x696   :  { %11620 = vmatmul.mubr.bf16.vlgmr.msra.gmra.mrb[160].mxu0 %v25574_v48 }
 0x697   :  { %11762 = vmatmul.mubr.bf16.vlgmr.msra.gmra.mrb[164].mxu1 %v25574_v48  ;;  %11629 = vmatprep.mubr.bf16.mxu0 %v25586_v44 }
 0x698   :  { %11771 = vmatprep.mubr.bf16.mxu1 %v25586_v44  ;;  %11801 = vmatpush1.bf16.msra.mxu0 %v21285_v27  ;;  %v21305_v27 = vld [vmem:[%s30466_s3 + $0xa0] ss:$16 sps:$4 sm:$0xff]  }
 0x699   :  { %11943 = vmatpush1.bf16.msra.mxu1 %v21286_v40  ;;  %11802 = vmatprep.subr.bf16.mxu0 %v21287_v2  ;;  %v21306_v40 = vld [vmem:[%s30466_s3 + $0xa8] ss:$16 sps:$4 sm:$0xff]   ;;  %v21307_v2 = vld [vmem:[%s30466_s3 + $0xc4] ss:$16 sps:$4 sm:$0xff]  }
 0x69a   :  { %11944 = vmatprep.subr.bf16.mxu1 %v21288_v61  ;;  %v21308_v61 = vld [vmem:[%s30466_s3 + $0xcc] ss:$16 sps:$4 sm:$0xff]  }
 0x69c   :  { %11803 = vmatpush1.bf16.msra.mxu0 %v21289_v43  ;;  %v21309_v43 = vld [vmem:[#allocation3 + $0x8] sm:$0xff] }
 0x69d   :  { %11945 = vmatpush1.bf16.msra.mxu1 %v21290_v56  ;;  %11804 = vmatprep.subr.bf16.mxu0 %v21291_v51  ;;  %v21310_v56 = vld [vmem:[%s30466_s3 + $0xc0] ss:$16 sps:$4 sm:$0xff]   ;;  %v21311_v51 = vld [vmem:[%s30466_s3 + $0xc8] ss:$16 sps:$4 sm:$0xff]  }
 0x69e   :  { %11630 = vmatmul.mubr.bf16.gmra.mrb[164].mxu0 %v25614_v17  ;;  %11946 = vmatprep.subr.bf16.mxu1 %v21292_v52  ;;  %v21312_v52 = vld [vmem:[%s30466_s3 + $0xe4] ss:$16 sps:$4 sm:$0xff]  }
 0x69f   :  { %11772 = vmatmul.mubr.bf16.gmra.mrb[168].mxu1 %v25614_v17  ;;  %11639 = vmatprep.mubr.bf16.mxu0 %v25625_v23 }
 0x6a0   :  { %11781 = vmatprep.mubr.bf16.mxu1 %v25625_v23  ;;  %11805 = vmatpush1.bf16.msra.mxu0 %v21293_v46  ;;  %v21313_v46 = vld [vmem:[%s30466_s3 + $0xec] ss:$16 sps:$4 sm:$0xff]  }
 0x6a1   :  { %11947 = vmatpush1.bf16.msra.mxu1 %v21294_v10  ;;  %11806 = vmatprep.subr.bf16.mxu0 %v21295_v16  ;;  %v21314_v10 = vld [vmem:[%s30466_s3 + $0xe0] ss:$16 sps:$4 sm:$0xff]   ;;  %v21315_v16 = vld [vmem:[%s30466_s3 + $0xe8] ss:$16 sps:$4 sm:$0xff]  }
 0x6a2   :  { %11948 = vmatprep.subr.bf16.mxu1 %v21296_v37  ;;  %v21316_v37 = vld [vmem:[%s30466_s3 + $0x104] ss:$16 sps:$4 sm:$0xff]  }
 0x6a4   :  { %11807 = vmatpush1.bf16.msra.mxu0 %v21297_v24  ;;  %v21317_v24 = vld [vmem:[%s30466_s3 + $0x10c] ss:$16 sps:$4 sm:$0xff]  }
 0x6a5   :  { %11949 = vmatpush1.bf16.msra.mxu1 %v21298_v15  ;;  %11808 = vmatprep.subr.bf16.mxu0 %v21299_v20  ;;  %v21318_v15 = vld [vmem:[%s30466_s3 + $0x100] ss:$16 sps:$4 sm:$0xff]   ;;  %v21319_v20 = vld [vmem:[%s30466_s3 + $0x108] ss:$16 sps:$4 sm:$0xff]  }
 0x6a6   :  { %11640 = vmatmul.mubr.bf16.gmra.mrb[168].mxu0 %v25653_v29  ;;  %11950 = vmatprep.subr.bf16.mxu1 %v21300_v1  ;;  %v21320_v1 = vld [vmem:[%s30466_s3 + $0x124] ss:$16 sps:$4 sm:$0xff]  }
 0x6a7   :  { %11782 = vmatmul.mubr.bf16.gmra.mrb[172].mxu1 %v25653_v29  ;;  %11649 = vmatprep.mubr.bf16.mxu0 %v25605_v0 }
 0x6a8   :  { %11791 = vmatprep.mubr.bf16.mxu1 %v25605_v0  ;;  %11809 = vmatpush1.bf16.msra.mxu0 %v21301_v25  ;;  %v21321_v25 = vld [vmem:[%s30466_s3 + $0x12c] ss:$16 sps:$4 sm:$0xff]  }
 0x6a9   :  { %11951 = vmatpush1.bf16.msra.mxu1 %v21302_v62  ;;  %11810 = vmatprep.subr.bf16.mxu0 %v21303_v39  ;;  %v21322_v62 = vld [vmem:[%s30466_s3 + $0x120] ss:$16 sps:$4 sm:$0xff]   ;;  %v21323_v39 = vld [vmem:[%s30466_s3 + $0x128] ss:$16 sps:$4 sm:$0xff]  }
 0x6aa   :  { %11952 = vmatprep.subr.bf16.mxu1 %v21304_v12  ;;  %v21324_v12 = vld [vmem:[%s30466_s3 + $0x144] ss:$16 sps:$4 sm:$0xff]  }
 0x6ac   :  { %11811 = vmatpush1.bf16.msra.mxu0 %v21305_v27  ;;  %v21325_v27 = vld [vmem:[%s30466_s3 + $0x14c] ss:$16 sps:$4 sm:$0xff]  }
 0x6ad   :  { %11953 = vmatpush1.bf16.msra.mxu1 %v21306_v40  ;;  %11812 = vmatprep.subr.bf16.mxu0 %v21307_v2  ;;  %v21326_v40 = vld [vmem:[%s30466_s3 + $0x140] ss:$16 sps:$4 sm:$0xff]   ;;  %v21327_v2 = vld [vmem:[%s30466_s3 + $0x148] ss:$16 sps:$4 sm:$0xff]  }
 0x6ae   :  { %11650 = vmatmul.mubr.bf16.gmra.mrb[172].mxu0 %v25637_v36  ;;  %11954 = vmatprep.subr.bf16.mxu1 %v21308_v61  ;;  %v21328_v61 = vld [vmem:[%s30466_s3 + $0x164] ss:$16 sps:$4 sm:$0xff]  }
 0x6af   :  { %11792 = vmatmul.mubr.bf16.gmra.mrb[176].mxu1 %v25637_v36  ;;  %11832 = vmatprep.mubr.bf16.mxu0 %v21309_v43 }
 0x6b0   :  { %11813 = vmatpush1.bf16.msra.mxu0 %v21310_v56  ;;  %11974 = vmatprep.mubr.bf16.mxu1 %v21309_v43  ;;  %v21329_v43 = vld [vmem:[%s30466_s3 + $0x16c] ss:$16 sps:$4 sm:$0xff]   ;;  %v21330_v56 = vld [vmem:[%s30466_s3 + $0x160] ss:$16 sps:$4 sm:$0xff]  }
 0x6b1   :  { %11955 = vmatpush1.bf16.msra.mxu1 %v21311_v51  ;;  %11814 = vmatprep.subr.bf16.mxu0 %v21312_v52  ;;  %v21331_v51 = vld [vmem:[%s30466_s3 + $0x168] ss:$16 sps:$4 sm:$0xff]   ;;  %v21332_v52 = vld [vmem:[%s30466_s3 + $0x184] ss:$16 sps:$4 sm:$0xff]  }
 0x6b2   :  { %11956 = vmatprep.subr.bf16.mxu1 %v21313_v46  ;;  %v21333_v46 = vld [vmem:[%s30466_s3 + $0x18c] ss:$16 sps:$4 sm:$0xff]  }
 0x6b4   :  { %11815 = vmatpush1.bf16.msra.mxu0 %v21314_v10  ;;  %v21334_v10 = vld [vmem:[%s30466_s3 + $0x180] ss:$16 sps:$4 sm:$0xff]  }
 0x6b5   :  { %11957 = vmatpush1.bf16.msra.mxu1 %v21315_v16  ;;  %11816 = vmatprep.subr.bf16.mxu0 %v21316_v37  ;;  %v21335_v16 = vld [vmem:[%s30466_s3 + $0x188] ss:$16 sps:$4 sm:$0xff]   ;;  %v21336_v37 = vld [vmem:[%s30466_s3 + $0x1a4] ss:$16 sps:$4 sm:$0xff]  }
 0x6b6   :  { %11958 = vmatprep.subr.bf16.mxu1 %v21317_v24  ;;  %v21337_v24 = vld [vmem:[%s30466_s3 + $0x1ac] ss:$16 sps:$4 sm:$0xff]  }
 0x6b8   :  { %11817 = vmatpush1.bf16.msra.mxu0 %v21318_v15  ;;  %v21338_v15 = vld [vmem:[%s30466_s3 + $0x1a0] ss:$16 sps:$4 sm:$0xff]  }
 0x6b9   :  { %11959 = vmatpush1.bf16.msra.mxu1 %v21319_v20  ;;  %11818 = vmatprep.subr.bf16.mxu0 %v21320_v1  ;;  %v21339_v20 = vld [vmem:[%s30466_s3 + $0x1a8] ss:$16 sps:$4 sm:$0xff]   ;;  %v21340_v1 = vld [vmem:[%s30466_s3 + $0x1c4] ss:$16 sps:$4 sm:$0xff]  }
 0x6ba   :  { %11960 = vmatprep.subr.bf16.mxu1 %v21321_v25  ;;  %v21341_v25 = vld [vmem:[%s30466_s3 + $0x1cc] ss:$16 sps:$4 sm:$0xff]  }
 0x6bc   :  { %11819 = vmatpush1.bf16.msra.mxu0 %v21322_v62  ;;  %v21342_v62 = vld [vmem:[%s30466_s3 + $0x1c0] ss:$16 sps:$4 sm:$0xff]  }
 0x6bd   :  { %11961 = vmatpush1.bf16.msra.mxu1 %v21323_v39  ;;  %11820 = vmatprep.subr.bf16.mxu0 %v21324_v12  ;;  %v21343_v39 = vld [vmem:[%s30466_s3 + $0x1c8] ss:$16 sps:$4 sm:$0xff]   ;;  %v21344_v12 = vld [vmem:[%s30466_s3 + $0x1e4] ss:$16 sps:$4 sm:$0xff]  }
 0x6be   :  { %11962 = vmatprep.subr.bf16.mxu1 %v21325_v27  ;;  %v21345_v27 = vld [vmem:[%s30466_s3 + $0x1ec] ss:$16 sps:$4 sm:$0xff]  }
 0x6c0   :  { %11821 = vmatpush1.bf16.msra.mxu0 %v21326_v40  ;;  %v21346_v40 = vld [vmem:[%s30466_s3 + $0x1e0] ss:$16 sps:$4 sm:$0xff]  }
 0x6c1   :  { %11963 = vmatpush1.bf16.msra.mxu1 %v21327_v2  ;;  %11822 = vmatprep.subr.bf16.mxu0 %v21328_v61  ;;  %v21347_v2 = vld [vmem:[%s30466_s3 + $0x1e8] ss:$16 sps:$4 sm:$0xff]   ;;  %v21348_v61 = vld [vmem:[%s30466_s3 + $0x204] ss:$16 sps:$4 sm:$0xff]  }
 0x6c2   :  { %11964 = vmatprep.subr.bf16.mxu1 %v21329_v43  ;;  %v21349_v43 = vld [vmem:[%s30466_s3 + $0x20c] ss:$16 sps:$4 sm:$0xff]  }
 0x6c4   :  { %11823 = vmatpush1.bf16.msra.mxu0 %v21330_v56  ;;  %v21350_v56 = vld [vmem:[#allocation3] sm:$0xff] }
 0x6c5   :  { %11965 = vmatpush1.bf16.msra.mxu1 %v21331_v51  ;;  %11824 = vmatprep.subr.bf16.mxu0 %v21332_v52  ;;  %v27458_v51 = vld [vmem:[#allocation3 + $0x28] sm:$0xff]  ;;  %v21352_v52 = vld [vmem:[%s30466_s3 + $0x200] ss:$16 sps:$4 sm:$0xff]  }
 0x6c6   :  { %11966 = vmatprep.subr.bf16.mxu1 %v21333_v46  ;;  %v21353_v46 = vld [vmem:[%s30466_s3 + $0x208] ss:$16 sps:$4 sm:$0xff]  }
 0x6c8   :  { %11825 = vmatpush1.bf16.msra.mxu0 %v21334_v10  ;;  %v21354_v10 = vld [vmem:[%s30466_s3 + $0x224] ss:$16 sps:$4 sm:$0xff]  }
 0x6c9   :  { %11967 = vmatpush1.bf16.msra.mxu1 %v21335_v16  ;;  %11826 = vmatprep.subr.bf16.mxu0 %v21336_v37  ;;  %v21355_v16 = vld [vmem:[%s30466_s3 + $0x22c] ss:$16 sps:$4 sm:$0xff]   ;;  %v21356_v37 = vld [vmem:[%s30466_s3 + $0x220] ss:$16 sps:$4 sm:$0xff]  }
 0x6ca   :  { %11968 = vmatprep.subr.bf16.mxu1 %v21337_v24  ;;  %v21357_v24 = vld [vmem:[%s30466_s3 + $0x228] ss:$16 sps:$4 sm:$0xff]  }
 0x6cc   :  { %11827 = vmatpush1.bf16.msra.mxu0 %v21338_v15  ;;  %v21358_v15 = vld [vmem:[%s30466_s3 + $0x244] ss:$16 sps:$4 sm:$0xff]  }
 0x6cd   :  { %11969 = vmatpush1.bf16.msra.mxu1 %v21339_v20  ;;  %11828 = vmatprep.subr.bf16.mxu0 %v21340_v1  ;;  %v27483_v20 = vld [vmem:[#allocation3 + $0x20] sm:$0xff]  ;;  %v21360_v1 = vld [vmem:[%s30466_s3 + $0x24c] ss:$16 sps:$4 sm:$0xff]  }
 0x6ce   :  { %11970 = vmatprep.subr.bf16.mxu1 %v21341_v25  ;;  %v27490_v25 = vld [vmem:[#allocation3 + $0x48] sm:$0xff] }
 0x6d0   :  { %11829 = vmatpush1.bf16.msra.mxu0 %v21342_v62  ;;  %v21362_v62 = vld [vmem:[%s30466_s3 + $0x240] ss:$16 sps:$4 sm:$0xff]  }
 0x6d1   :  { %11971 = vmatpush1.bf16.msra.mxu1 %v21343_v39  ;;  %11830 = vmatprep.subr.bf16.mxu0 %v21344_v12  ;;  %v21363_v39 = vld [vmem:[%s30466_s3 + $0x248] ss:$16 sps:$4 sm:$0xff]   ;;  %v21364_v12 = vld [vmem:[%s30466_s3 + $0x264] ss:$16 sps:$4 sm:$0xff]  }
 0x6d2   :  { %11972 = vmatprep.subr.bf16.mxu1 %v21345_v27  ;;  %v21365_v27 = vld [vmem:[%s30466_s3 + $0x26c] ss:$16 sps:$4 sm:$0xff]  }
 0x6d4   :  { %11831 = vmatpush1.bf16.msra.mxu0 %v21346_v40  ;;  %v21366_v40 = vld [vmem:[%s30466_s3 + $0x260] ss:$16 sps:$4 sm:$0xff]  }
 0x6d5   :  { %11973 = vmatpush1.bf16.msra.mxu1 %v21347_v2  ;;  %11871 = vmatprep.subr.bf16.mxu0 %v21348_v61  ;;  %v21367_v2 = vld [vmem:[%s30466_s3 + $0x268] ss:$16 sps:$4 sm:$0xff]   ;;  %v21368_v61 = vld [vmem:[%s30466_s3 + $0x284] ss:$16 sps:$4 sm:$0xff]  }
 0x6d6   :  { %12013 = vmatprep.subr.bf16.mxu1 %v21349_v43  ;;  %v27515_v43 = vld [vmem:[#allocation3 + $0x40] sm:$0xff] }
 0x6d7   :  { %11833 = vmatmul.mubr.bf16.vlgmr.msra.gmra.mrb[160].mxu0 %v21350_v56 }
 0x6d8   :  { %11975 = vmatmul.mubr.bf16.vlgmr.msra.gmra.mrb[164].mxu1 %v21350_v56  ;;  %11842 = vmatprep.mubr.bf16.mxu0 %v27458_v51  ;;  %v21370_v56 = vld [vmem:[%s30466_s3 + $0x28c] ss:$16 sps:$4 sm:$0xff]  }
 0x6d9   :  { %11872 = vmatpush1.bf16.msra.mxu0 %v21352_v52  ;;  %11984 = vmatprep.mubr.bf16.mxu1 %v27458_v51 }
 0x6da   :  { %12014 = vmatpush1.bf16.msra.mxu1 %v21353_v46  ;;  %11873 = vmatprep.subr.bf16.mxu0 %v21354_v10  ;;  %v21371_v46 = vld [vmem:[#allocation3 + $0x68] sm:$0xf] }
 0x6db   :  { %12015 = vmatprep.subr.bf16.mxu1 %v21355_v16 }
 0x6dd   :  { %11874 = vmatpush1.bf16.msra.mxu0 %v21356_v37 }
 0x6de   :  { %12016 = vmatpush1.bf16.msra.mxu1 %v21357_v24  ;;  %11875 = vmatprep.subr.bf16.mxu0 %v21358_v15  ;;  %v21372_v24 = vld [vmem:[%s30466_s3 + $0x280] ss:$16 sps:$4 sm:$0xff]  }
 0x6df   :  { %11843 = vmatmul.mubr.bf16.gmra.mrb[164].mxu0 %v27483_v20  ;;  %12017 = vmatprep.subr.bf16.mxu1 %v21360_v1 }
 0x6e0   :  { %11985 = vmatmul.mubr.bf16.gmra.mrb[168].mxu1 %v27483_v20  ;;  %11852 = vmatprep.mubr.bf16.mxu0 %v27490_v25 }
 0x6e1   :  { %11876 = vmatpush1.bf16.msra.mxu0 %v21362_v62  ;;  %11994 = vmatprep.mubr.bf16.mxu1 %v27490_v25 }
 0x6e2   :  { %12018 = vmatpush1.bf16.msra.mxu1 %v21363_v39  ;;  %11877 = vmatprep.subr.bf16.mxu0 %v21364_v12  ;;  %v21373_v12 = vld [vmem:[%s30466_s3 + $0x288] ss:$16 sps:$4 sm:$0xff]  }
 0x6e3   :  { %12019 = vmatprep.subr.bf16.mxu1 %v21365_v27 }
 0x6e5   :  { %11878 = vmatpush1.bf16.msra.mxu0 %v21366_v40  ;;  %v21374_v40 = vld [vmem:[%s30466_s3 + $0x2a4] ss:$16 sps:$4 sm:$0xff]  }
 0x6e6   :  { %12020 = vmatpush1.bf16.msra.mxu1 %v21367_v2  ;;  %11879 = vmatprep.subr.bf16.mxu0 %v21368_v61  ;;  %v21376_v2 = vld [vmem:[%s30466_s3 + $0x2a0] ss:$16 sps:$4 sm:$0xff]  }
 0x6e7   :  { %11853 = vmatmul.mubr.bf16.gmra.mrb[168].mxu0 %v27515_v43  ;;  %12021 = vmatprep.subr.bf16.mxu1 %v21370_v56  ;;  %v27521_v52 = vpop.f32.mrb[144].mxu0 }
 0x6e8   :  { %11995 = vmatmul.mubr.bf16.gmra.mrb[172].mxu1 %v27515_v43  ;;  %11862 = vmatprep.mubr.bf16.mxu0 %v21371_v46  ;;  %v27526_v16 = vpop.f32.mrb[148].mxu1  ;;  %v27528_v37 = vpop.f32.mrb[145].mxu0 }
 0x6e9   :  { %11880 = vmatpush1.bf16.msra.mxu0 %v21372_v24  ;;  %12004 = vmatprep.mubr.bf16.mxu1 %v21371_v46  ;;  %v27537_v62 = vpop.f32.mrb[149].mxu1  ;;  %v27539_v39 = vpop.f32.mrb[146].mxu0  ;;  %v21375_v46 = vld [vmem:[%s30466_s3 + $0x2ac] ss:$16 sps:$4 sm:$0xff]   ;;  %v21378_v24 = vld [vmem:[%s30466_s3 + $0x2c4] ss:$16 sps:$4 sm:$0xff]  }
 0x6ea   :  { %12022 = vmatpush1.bf16.msra.mxu1 %v21373_v12  ;;  %11881 = vmatprep.subr.bf16.mxu0 %v21374_v40  ;;  %v27551_v61 = vpop.f32.mrb[150].mxu1  ;;  %v27553_v56 = vpop.f32.mrb[147].mxu0  ;;  %v21379_v12 = vld [vmem:[#allocation3 + $0x60] sm:$0xf]  ;;  %v21380_v40 = vld [vmem:[%s30466_s3 + $0x2cc] ss:$16 sps:$4 sm:$0xff]  }
 0x6eb   :  { %12023 = vmatprep.subr.bf16.mxu1 %v21375_v46  ;;  %v27562_v27 = vpop.f32.mrb[151].mxu1  ;;  %v21377_v46 = vld [vmem:[%s30466_s3 + $0x2a8] ss:$16 sps:$4 sm:$0xff]  }
 0x6ec   :  { %30746 = vst [vmem:[#allocation19_spill] sm:$0xff] %v27562_v27 }
 0x6ed   :  { %11882 = vmatpush1.bf16.msra.mxu0 %v21376_v2  ;;  %v21381_v2 = vld [vmem:[#allocation3 + $0x18] sm:$0xff] }
 0x6ee   :  { %12024 = vmatpush1.bf16.msra.mxu1 %v21377_v46  ;;  %11883 = vmatprep.subr.bf16.mxu0 %v21378_v24  ;;  %v21382_v24 = vld [vmem:[%s30466_s3 + $0x2c0] ss:$16 sps:$4 sm:$0xff]   ;;  %v21383_v46 = vld [vmem:[%s30466_s3 + $0x2c8] ss:$16 sps:$4 sm:$0xff]  }
 0x6ef   :  { %11863 = vmatmul.mubr.bf16.gmra.mrb[172].mxu0 %v21379_v12  ;;  %12025 = vmatprep.subr.bf16.mxu1 %v21380_v40  ;;  %v27578_v1 = vpop.f32.mrb[148].mxu0 }
 0x6f0   :  { %30747 = vst [vmem:[#allocation20_spill] sm:$0xff] %v27578_v1  ;;  %12005 = vmatmul.mubr.bf16.gmra.mrb[176].mxu1 %v21379_v12  ;;  %11903 = vmatprep.mubr.bf16.mxu0 %v21381_v2  ;;  %v27582_v15 = vpop.f32.mrb[152].mxu1  ;;  %v27584_v10 = vpop.f32.mrb[149].mxu0  ;;  %v21389_v1 = vld [vmem:[%s30466_s3 + $0x30c] ss:$16 sps:$4 sm:$0xff]  }
 0x6f1   :  { %30748 = vst [vmem:[#allocation24_spill] sm:$0xff] %v27584_v10  ;;  %11884 = vmatpush1.bf16.msra.mxu0 %v21382_v24  ;;  %12045 = vmatprep.mubr.bf16.mxu1 %v21381_v2  ;;  %v27593_v27 = vpop.f32.mrb[153].mxu1  ;;  %v27595_v58 = vpop.f32.mrb[150].mxu0  ;;  %v21384_v2 = vld [vmem:[%s30466_s3 + $0x2e4] ss:$16 sps:$4 sm:$0xff]  }
 0x6f2   :  { %30749 = vst [vmem:[#allocation25_spill] sm:$0xff] %v27593_v27  ;;  %12026 = vmatpush1.bf16.msra.mxu1 %v21383_v46  ;;  %11885 = vmatprep.subr.bf16.mxu0 %v21384_v2  ;;  %v27607_v12 = vpop.f32.mrb[154].mxu1  ;;  %v27609_v40 = vpop.f32.mrb[151].mxu0  ;;  %v21385_v10 = vld [vmem:[%s30466_s3 + $0x2ec] ss:$16 sps:$4 sm:$0xff]  }
 0x6f3   :  { %30750 = vst [vmem:[#allocation26_spill] sm:$0xff] %v27609_v40  ;;  %12027 = vmatprep.subr.bf16.mxu1 %v21385_v10  ;;  %v27618_v27 = vpop.f32.mrb[155].mxu1  ;;  %v21386_v24 = vld [vmem:[%s30466_s3 + $0x2e0] ss:$16 sps:$4 sm:$0xff]   ;;  %v21387_v10 = vld [vmem:[%s30466_s3 + $0x2e8] ss:$16 sps:$4 sm:$0xff]  }
 0x6f4   :  { %30751 = vst [vmem:[#allocation27_spill] sm:$0xff] %v27618_v27  ;;  %v21388_v46 = vld [vmem:[%s30466_s3 + $0x304] ss:$16 sps:$4 sm:$0xff]  }
 0x6f5   :  { %11886 = vmatpush1.bf16.msra.mxu0 %v21386_v24  ;;  %v21391_v24 = vld [vmem:[%s30466_s3 + $0x308] ss:$16 sps:$4 sm:$0xff]  }
 0x6f6   :  { %12028 = vmatpush1.bf16.msra.mxu1 %v21387_v10  ;;  %11887 = vmatprep.subr.bf16.mxu0 %v21388_v46  ;;  %v21390_v10 = vld [vmem:[%s30466_s3 + $0x300] ss:$16 sps:$4 sm:$0xff]  }
 0x6f7   :  { %12029 = vmatprep.subr.bf16.mxu1 %v21389_v1  ;;  %v27634_v2 = vpop.f32.mrb[152].mxu0  ;;  %v21394_v1 = vld [vmem:[%s30466_s3 + $0x320] ss:$16 sps:$4 sm:$0xff]  }
 0x6f8   :  { %30752 = vst [vmem:[#allocation31_spill] sm:$0xff] %v27634_v2  ;;  %v27638_v27 = vpop.f32.mrb[156].mxu1  ;;  %v27640_v21 = vpop.f32.mrb[153].mxu0  ;;  %v21397_v2 = vld [vmem:[%s30466_s3 + $0x34c] ss:$16 sps:$4 sm:$0xff]  }
 0x6f9   :  { %30753 = vst [vmem:[#allocation32_spill] sm:$0xff] %v27640_v21  ;;  %11888 = vmatpush1.bf16.msra.mxu0 %v21390_v10  ;;  %v27649_v40 = vpop.f32.mrb[157].mxu1  ;;  %v27651_v18 = vpop.f32.mrb[154].mxu0  ;;  %v21392_v10 = vld [vmem:[%s30466_s3 + $0x324] ss:$16 sps:$4 sm:$0xff]  }
 0x6fa   :  { %30754 = vst [vmem:[#allocation33_spill] sm:$0xff] %v27649_v40  ;;  %12030 = vmatpush1.bf16.msra.mxu1 %v21391_v24  ;;  %11889 = vmatprep.subr.bf16.mxu0 %v21392_v10  ;;  %v27663_v46 = vpop.f32.mrb[158].mxu1  ;;  %v27665_v21 = vpop.f32.mrb[155].mxu0  ;;  %v21396_v24 = vld [vmem:[%s30466_s3 + $0x344] ss:$16 sps:$4 sm:$0xff]  }
 0x6fb   :  { %30755 = vst [vmem:[#allocation34_spill] sm:$0xff] %v27665_v21  ;;  %12031 = vmatprep.subr.bf16.mxu1 %v21393_v35  ;;  %v27674_v40 = vpop.f32.mrb[159].mxu1  ;;  %v21395_v35 = vld [vmem:[%s30466_s3 + $0x328] ss:$16 sps:$4 sm:$0xff]  }
 0x6fc   :  { %30756 = vst [vmem:[#allocation35_spill] sm:$0xff] %v27674_v40 }
 0x6fd   :  { %11890 = vmatpush1.bf16.msra.mxu0 %v21394_v1  ;;  %v21399_v1 = vld [vmem:[%s30466_s3 + $0x348] ss:$16 sps:$4 sm:$0xff]  }
 0x6fe   :  { %12032 = vmatpush1.bf16.msra.mxu1 %v21395_v35  ;;  %11891 = vmatprep.subr.bf16.mxu0 %v21396_v24  ;;  %v21398_v35 = vld [vmem:[%s30466_s3 + $0x340] ss:$16 sps:$4 sm:$0xff]  }
 0x6ff   :  { %12033 = vmatprep.subr.bf16.mxu1 %v21397_v2  ;;  %v27690_v10 = vpop.f32.mrb[156].mxu0  ;;  %v21401_v2 = vld [vmem:[%s30466_s3 + $0x36c] ss:$16 sps:$4 sm:$0xff]  }
 0x700   :  { %30757 = vst [vmem:[#allocation36_spill] sm:$0xff] %v27690_v10  ;;  %v27694_v40 = vpop.f32.mrb[160].mxu1  ;;  %v27696_v47 = vpop.f32.mrb[157].mxu0  ;;  %v21403_v10 = vld [vmem:[%s30466_s3 + $0x368] ss:$16 sps:$4 sm:$0xff]  }
 0x701   :  { %30758 = vst [vmem:[#allocation37_spill] sm:$0xff] %v27694_v40  ;;  %30759 = vst [vmem:[#allocation38_spill] sm:$0xff] %v27696_v47  ;;  %11892 = vmatpush1.bf16.msra.mxu0 %v21398_v35  ;;  %v27705_v21 = vpop.f32.mrb[161].mxu1  ;;  %v11315_v50 = vpop.f32.mrb[158].mxu0  ;;  %v21400_v35 = vld [vmem:[%s30466_s3 + $0x364] ss:$16 sps:$4 sm:$0xff]  }
 0x702   :  { %30760 = vst [vmem:[#allocation40_spill] sm:$0xff] %v27705_v21  ;;  %12034 = vmatpush1.bf16.msra.mxu1 %v21399_v1  ;;  %11893 = vmatprep.subr.bf16.mxu0 %v21400_v35  ;;  %v11457_v24 = vpop.f32.mrb[162].mxu1  ;;  %v11316_v40 = vpop.f32.mrb[159].mxu0  ;;  %v21402_v1 = vld [vmem:[%s30466_s3 + $0x360] ss:$16 sps:$4 sm:$0xff]   ;;  %v30563_v47 = vrot.slane %v27458_v51, 4 }
 0x703   :  { %12035 = vmatprep.subr.bf16.mxu1 %v21401_v2  ;;  %v11458_v50 = vpop.f32.mrb[163].mxu1  ;;  %v21404_v40 = vld [vmem:[%s30466_s3 + $0x384] ss:$16 sps:$4 sm:$0xff]   ;;  %v21405_v24 = vld [vmem:[%s30466_s3 + $0x38c] ss:$16 sps:$4 sm:$0xff]  }
 0x704   :  { %v21406_v2 = vld [vmem:[%s30466_s3 + $0x380] ss:$16 sps:$4 sm:$0xff]   ;;  %v21407_v35 = vld [vmem:[%s30466_s3 + $0x388] ss:$16 sps:$4 sm:$0xff]   ;;  %v21409_v50 = vld [vmem:[%s30466_s3 + $0x3ac] ss:$16 sps:$4 sm:$0xff]  }
 0x705   :  { %11894 = vmatpush1.bf16.msra.mxu0 %v21402_v1  ;;  %v21410_v1 = vld [vmem:[%s30466_s3 + $0x3a0] ss:$16 sps:$4 sm:$0xff]  }
 0x706   :  { %12036 = vmatpush1.bf16.msra.mxu1 %v21403_v10  ;;  %11895 = vmatprep.subr.bf16.mxu0 %v21404_v40  ;;  %v21408_v10 = vld [vmem:[%s30466_s3 + $0x3a4] ss:$16 sps:$4 sm:$0xff]   ;;  %v21411_v40 = vld [vmem:[%s30466_s3 + $0x3a8] ss:$16 sps:$4 sm:$0xff]   ;;  %v21438_v21 = vld [vmem:[%s30466_s3 + $0x1060] ss:$16 sps:$4 sm:$0xff]  }
 0x707   :  { %12037 = vmatprep.subr.bf16.mxu1 %v21405_v24  ;;  %v21412_v24 = vld [vmem:[%s30466_s3 + $0x3c4] ss:$16 sps:$4 sm:$0xff]  }
 0x709   :  { %11896 = vmatpush1.bf16.msra.mxu0 %v21406_v2  ;;  %v21413_v2 = vld [vmem:[%s30466_s3 + $0x3cc] ss:$16 sps:$4 sm:$0xff]  }
 0x70a   :  { %12038 = vmatpush1.bf16.msra.mxu1 %v21407_v35  ;;  %11897 = vmatprep.subr.bf16.mxu0 %v21408_v10  ;;  %v21414_v35 = vld [vmem:[%s30466_s3 + $0x3c0] ss:$16 sps:$4 sm:$0xff]   ;;  %v21415_v10 = vld [vmem:[%s30466_s3 + $0x3c8] ss:$16 sps:$4 sm:$0xff]  }
 0x70b   :  { %12039 = vmatprep.subr.bf16.mxu1 %v21409_v50  ;;  %v21416_v50 = vld [vmem:[%s30466_s3 + $0x3e4] ss:$16 sps:$4 sm:$0xff]  }
 0x70d   :  { %11898 = vmatpush1.bf16.msra.mxu0 %v21410_v1  ;;  %v21417_v1 = vld [vmem:[%s30466_s3 + $0x3ec] ss:$16 sps:$4 sm:$0xff]  }
 0x70e   :  { %12040 = vmatpush1.bf16.msra.mxu1 %v21411_v40  ;;  %11899 = vmatprep.subr.bf16.mxu0 %v21412_v24  ;;  %v21418_v40 = vld [vmem:[%s30466_s3 + $0x3e0] ss:$16 sps:$4 sm:$0xff]   ;;  %v21419_v24 = vld [vmem:[%s30466_s3 + $0x3e8] ss:$16 sps:$4 sm:$0xff]  }
 0x70f   :  { %12041 = vmatprep.subr.bf16.mxu1 %v21413_v2  ;;  %v21420_v2 = vld [vmem:[%s30466_s3 + $0x1004] ss:$16 sps:$4 sm:$0xff]  }
 0x711   :  { %11900 = vmatpush1.bf16.msra.mxu0 %v21414_v35  ;;  %v21421_v35 = vld [vmem:[%s30466_s3 + $0x100c] ss:$16 sps:$4 sm:$0xff]  }
 0x712   :  { %12042 = vmatpush1.bf16.msra.mxu1 %v21415_v10  ;;  %11901 = vmatprep.subr.bf16.mxu0 %v21416_v50  ;;  %v21422_v10 = vld [vmem:[#allocation3 + $0x10] sm:$0xff]  ;;  %v27778_v50 = vld [vmem:[#allocation3 + $0x38] sm:$0xff] }
 0x713   :  { %12043 = vmatprep.subr.bf16.mxu1 %v21417_v1  ;;  %v21424_v1 = vld [vmem:[%s30466_s3 + $0x1000] ss:$16 sps:$4 sm:$0xff]  }
 0x715   :  { %11902 = vmatpush1.bf16.msra.mxu0 %v21418_v40  ;;  %v21425_v40 = vld [vmem:[%s30466_s3 + $0x1008] ss:$16 sps:$4 sm:$0xff]  }
 0x716   :  { %12044 = vmatpush1.bf16.msra.mxu1 %v21419_v24  ;;  %12144 = vmatprep.subr.bf16.mxu0 %v21420_v2  ;;  %v21426_v24 = vld [vmem:[%s30466_s3 + $0x1024] ss:$16 sps:$4 sm:$0xff]   ;;  %v21427_v2 = vld [vmem:[%s30466_s3 + $0x102c] ss:$16 sps:$4 sm:$0xff]  }
 0x717   :  { %12286 = vmatprep.subr.bf16.mxu1 %v21421_v35  ;;  %v21428_v35 = vld [vmem:[%s30466_s3 + $0x1020] ss:$16 sps:$4 sm:$0xff]  }
 0x718   :  { %11904 = vmatmul.mubr.bf16.vlgmr.msra.gmra.mrb[160].mxu0 %v21422_v10 }
 0x719   :  { %12046 = vmatmul.mubr.bf16.vlgmr.msra.gmra.mrb[164].mxu1 %v21422_v10  ;;  %11913 = vmatprep.mubr.bf16.mxu0 %v27778_v50  ;;  %v21429_v10 = vld [vmem:[%s30466_s3 + $0x1028] ss:$16 sps:$4 sm:$0xff]  }
 0x71a   :  { %12055 = vmatprep.mubr.bf16.mxu1 %v27778_v50  ;;  %12145 = vmatpush1.bf16.msra.mxu0 %v21424_v1  ;;  %v21430_v1 = vld [vmem:[%s30466_s3 + $0x1044] ss:$16 sps:$4 sm:$0xff]  }
 0x71b   :  { %12287 = vmatpush1.bf16.msra.mxu1 %v21425_v40  ;;  %12146 = vmatprep.subr.bf16.mxu0 %v21426_v24  ;;  %v27803_v40 = vld [vmem:[#allocation3 + $0x30] sm:$0xff]  ;;  %v21432_v24 = vld [vmem:[%s30466_s3 + $0x104c] ss:$16 sps:$4 sm:$0xff]  }
 0x71c   :  { %12288 = vmatprep.subr.bf16.mxu1 %v21427_v2  ;;  %v27810_v2 = vld [vmem:[#allocation3 + $0x58] sm:$0xff] }
 0x71e   :  { %12147 = vmatpush1.bf16.msra.mxu0 %v21428_v35  ;;  %v21434_v35 = vld [vmem:[%s30466_s3 + $0x1040] ss:$16 sps:$4 sm:$0xff]  }
 0x71f   :  { %12289 = vmatpush1.bf16.msra.mxu1 %v21429_v10  ;;  %12148 = vmatprep.subr.bf16.mxu0 %v21430_v1  ;;  %v21435_v10 = vld [vmem:[%s30466_s3 + $0x1048] ss:$16 sps:$4 sm:$0xff]   ;;  %v21436_v1 = vld [vmem:[%s30466_s3 + $0x1064] ss:$16 sps:$4 sm:$0xff]  }
 0x720   :  { %11914 = vmatmul.mubr.bf16.gmra.mrb[164].mxu0 %v27803_v40  ;;  %12290 = vmatprep.subr.bf16.mxu1 %v21432_v24  ;;  %v21437_v24 = vld [vmem:[%s30466_s3 + $0x106c] ss:$16 sps:$4 sm:$0xff]  }
 0x721   :  { %12056 = vmatmul.mubr.bf16.gmra.mrb[168].mxu1 %v27803_v40  ;;  %11923 = vmatprep.mubr.bf16.mxu0 %v27810_v2 }
 0x722   :  { %12065 = vmatprep.mubr.bf16.mxu1 %v27810_v2  ;;  %12149 = vmatpush1.bf16.msra.mxu0 %v21434_v35  ;;  %v21439_v35 = vld [vmem:[%s30466_s3 + $0x1068] ss:$16 sps:$4 sm:$0xff]  }
 0x723   :  { %12291 = vmatpush1.bf16.msra.mxu1 %v21435_v10  ;;  %12150 = vmatprep.subr.bf16.mxu0 %v21436_v1  ;;  %v21440_v10 = vld [vmem:[%s30466_s3 + $0x1084] ss:$16 sps:$4 sm:$0xff]  }
 0x724   :  { %12292 = vmatprep.subr.bf16.mxu1 %v21437_v24  ;;  %v27835_v1 = vld [vmem:[#allocation3 + $0x50] sm:$0xff]  ;;  %v21442_v24 = vld [vmem:[%s30466_s3 + $0x108c] ss:$16 sps:$4 sm:$0xff]  }
 0x726   :  { %12151 = vmatpush1.bf16.msra.mxu0 %v21438_v21  ;;  %v21443_v21 = vld [vmem:[#allocation3 + $0x78] sm:$0xf] }
 0x727   :  { %12293 = vmatpush1.bf16.msra.mxu1 %v21439_v35  ;;  %12152 = vmatprep.subr.bf16.mxu0 %v21440_v10  ;;  %v21444_v35 = vld [vmem:[%s30466_s3 + $0x1080] ss:$16 sps:$4 sm:$0xff]   ;;  %v21445_v10 = vld [vmem:[%s30466_s3 + $0x1088] ss:$16 sps:$4 sm:$0xff]  }
 0x728   :  { %11924 = vmatmul.mubr.bf16.gmra.mrb[168].mxu0 %v27835_v1  ;;  %12294 = vmatprep.subr.bf16.mxu1 %v21442_v24  ;;  %v5048_v24 = vld [vmem:[#allocation3 + $0x8] sm:$0xf0] }
 0x729   :  { %12066 = vmatmul.mubr.bf16.gmra.mrb[172].mxu1 %v27835_v1  ;;  %11933 = vmatprep.mubr.bf16.mxu0 %v21443_v21  ;;  %v12103_v59 = vrot.slane %v5048_v24, 4 }
 0x72a   :  { %12075 = vmatprep.mubr.bf16.mxu1 %v21443_v21  ;;  %12153 = vmatpush1.bf16.msra.mxu0 %v21444_v35  ;;  %v21447_v21 = vld [vmem:[%s30466_s3 + $0x10ac] ss:$16 sps:$4 sm:$0xff]   ;;  %v21448_v35 = vld [vmem:[%s30466_s3 + $0x10a0] ss:$16 sps:$4 sm:$0xff]  }
 0x72b   :  { %12295 = vmatpush1.bf16.msra.mxu1 %v21445_v10  ;;  %12154 = vmatprep.subr.bf16.mxu0 %v21446_v22  ;;  %v21449_v10 = vld [vmem:[%s30466_s3 + $0x10a8] ss:$16 sps:$4 sm:$0xff]   ;;  %v21450_v22 = vld [vmem:[%s30466_s3 + $0x10c4] ss:$16 sps:$4 sm:$0xff]   ;;  %v27870_v24 = vsel %vm4942_vm2, %v12103_v59, %v30563_v47  ;;  %v21489_v47 = vld [vmem:[%s30466_s3 + $0x11e0] ss:$16 sps:$4 sm:$0xff]  }
 0x72c   :  { %12296 = vmatprep.subr.bf16.mxu1 %v21447_v21  ;;  %v21452_v21 = vld [vmem:[%s30466_s3 + $0x10cc] ss:$16 sps:$4 sm:$0xff]   ;;  %30761 = vst [vmem:[#allocation41_spill] sm:$0xff] %v27870_v24  ;;  %v21455_v59 = vld [vmem:[%s30466_s3 + $0x10e4] ss:$16 sps:$4 sm:$0xff]  }
 0x72e   :  { %12155 = vmatpush1.bf16.msra.mxu0 %v21448_v35  ;;  %v21453_v35 = vld [vmem:[%s30466_s3 + $0x10c0] ss:$16 sps:$4 sm:$0xff]  }
 0x72f   :  { %12297 = vmatpush1.bf16.msra.mxu1 %v21449_v10  ;;  %12156 = vmatprep.subr.bf16.mxu0 %v21450_v22  ;;  %v21454_v10 = vld [vmem:[%s30466_s3 + $0x10c8] ss:$16 sps:$4 sm:$0xff]   ;;  %v21457_v22 = vld [vmem:[%s30466_s3 + $0x10e0] ss:$16 sps:$4 sm:$0xff]  }
 0x730   :  { %11934 = vmatmul.mubr.bf16.gmra.mrb[172].mxu0 %v21451_v13  ;;  %12298 = vmatprep.subr.bf16.mxu1 %v21452_v21  ;;  %v21458_v21 = vld [vmem:[%s30466_s3 + $0x10e8] ss:$16 sps:$4 sm:$0xff]  }
 0x731   :  { %12076 = vmatmul.mubr.bf16.gmra.mrb[176].mxu1 %v21451_v13  ;;  %12176 = vmatprep.mubr.bf16.mxu0 %v27870_v24  ;;  %v21456_v13 = vld [vmem:[%s30466_s3 + $0x10ec] ss:$16 sps:$4 sm:$0xff]  }
 0x732   :  { %12157 = vmatpush1.bf16.msra.mxu0 %v21453_v35  ;;  %12318 = vmatprep.mubr.bf16.mxu1 %v27870_v24  ;;  %v21459_v35 = vld [vmem:[%s30466_s3 + $0x1104] ss:$16 sps:$4 sm:$0xff]  }
 0x733   :  { %12299 = vmatpush1.bf16.msra.mxu1 %v21454_v10  ;;  %12158 = vmatprep.subr.bf16.mxu0 %v21455_v59  ;;  %v21460_v10 = vld [vmem:[%s30466_s3 + $0x110c] ss:$16 sps:$4 sm:$0xff]   ;;  %v21461_v59 = vld [vmem:[%s30466_s3 + $0x1100] ss:$16 sps:$4 sm:$0xff]   ;;  %v21491_v24 = vld [vmem:[%s30466_s3 + $0x1204] ss:$16 sps:$4 sm:$0xff]  }
 0x734   :  { %12300 = vmatprep.subr.bf16.mxu1 %v21456_v13  ;;  %v21462_v13 = vld [vmem:[%s30466_s3 + $0x1108] ss:$16 sps:$4 sm:$0xff]  }
 0x736   :  { %12159 = vmatpush1.bf16.msra.mxu0 %v21457_v22  ;;  %v21463_v22 = vld [vmem:[%s30466_s3 + $0x1124] ss:$16 sps:$4 sm:$0xff]  }
 0x737   :  { %12301 = vmatpush1.bf16.msra.mxu1 %v21458_v21  ;;  %12160 = vmatprep.subr.bf16.mxu0 %v21459_v35  ;;  %v21464_v21 = vld [vmem:[%s30466_s3 + $0x112c] ss:$16 sps:$4 sm:$0xff]   ;;  %v21465_v35 = vld [vmem:[%s30466_s3 + $0x1120] ss:$16 sps:$4 sm:$0xff]  }
 0x738   :  { %12302 = vmatprep.subr.bf16.mxu1 %v21460_v10  ;;  %v21466_v10 = vld [vmem:[%s30466_s3 + $0x1128] ss:$16 sps:$4 sm:$0xff]  }
 0x73a   :  { %12161 = vmatpush1.bf16.msra.mxu0 %v21461_v59  ;;  %v21467_v59 = vld [vmem:[%s30466_s3 + $0x1144] ss:$16 sps:$4 sm:$0xff]  }
 0x73b   :  { %12303 = vmatpush1.bf16.msra.mxu1 %v21462_v13  ;;  %12162 = vmatprep.subr.bf16.mxu0 %v21463_v22  ;;  %v21468_v13 = vld [vmem:[%s30466_s3 + $0x114c] ss:$16 sps:$4 sm:$0xff]   ;;  %v21469_v22 = vld [vmem:[%s30466_s3 + $0x1140] ss:$16 sps:$4 sm:$0xff]  }
 0x73c   :  { %12304 = vmatprep.subr.bf16.mxu1 %v21464_v21  ;;  %v21470_v21 = vld [vmem:[%s30466_s3 + $0x1148] ss:$16 sps:$4 sm:$0xff]  }
 0x73e   :  { %12163 = vmatpush1.bf16.msra.mxu0 %v21465_v35  ;;  %v21471_v35 = vld [vmem:[%s30466_s3 + $0x1164] ss:$16 sps:$4 sm:$0xff]  }
 0x73f   :  { %12305 = vmatpush1.bf16.msra.mxu1 %v21466_v10  ;;  %12164 = vmatprep.subr.bf16.mxu0 %v21467_v59  ;;  %v21472_v10 = vld [vmem:[%s30466_s3 + $0x116c] ss:$16 sps:$4 sm:$0xff]   ;;  %v21473_v59 = vld [vmem:[%s30466_s3 + $0x1160] ss:$16 sps:$4 sm:$0xff]  }
 0x740   :  { %12306 = vmatprep.subr.bf16.mxu1 %v21468_v13  ;;  %v21474_v13 = vld [vmem:[%s30466_s3 + $0x1168] ss:$16 sps:$4 sm:$0xff]  }
 0x742   :  { %12165 = vmatpush1.bf16.msra.mxu0 %v21469_v22  ;;  %v21475_v22 = vld [vmem:[%s30466_s3 + $0x1184] ss:$16 sps:$4 sm:$0xff]  }
 0x743   :  { %12307 = vmatpush1.bf16.msra.mxu1 %v21470_v21  ;;  %12166 = vmatprep.subr.bf16.mxu0 %v21471_v35  ;;  %v21476_v21 = vld [vmem:[%s30466_s3 + $0x118c] ss:$16 sps:$4 sm:$0xff]   ;;  %v21477_v35 = vld [vmem:[%s30466_s3 + $0x1180] ss:$16 sps:$4 sm:$0xff]  }
 0x744   :  { %12308 = vmatprep.subr.bf16.mxu1 %v21472_v10  ;;  %v21478_v10 = vld [vmem:[%s30466_s3 + $0x1188] ss:$16 sps:$4 sm:$0xff]  }
 0x746   :  { %12167 = vmatpush1.bf16.msra.mxu0 %v21473_v59  ;;  %v21479_v59 = vld [vmem:[%s30466_s3 + $0x11a4] ss:$16 sps:$4 sm:$0xff]  }
 0x747   :  { %12309 = vmatpush1.bf16.msra.mxu1 %v21474_v13  ;;  %12168 = vmatprep.subr.bf16.mxu0 %v21475_v22  ;;  %v21480_v13 = vld [vmem:[%s30466_s3 + $0x11ac] ss:$16 sps:$4 sm:$0xff]   ;;  %v21481_v22 = vld [vmem:[%s30466_s3 + $0x11a0] ss:$16 sps:$4 sm:$0xff]  }
 0x748   :  { %12310 = vmatprep.subr.bf16.mxu1 %v21476_v21  ;;  %v21482_v21 = vld [vmem:[%s30466_s3 + $0x11a8] ss:$16 sps:$4 sm:$0xff]  }
 0x74a   :  { %12169 = vmatpush1.bf16.msra.mxu0 %v21477_v35  ;;  %v21483_v35 = vld [vmem:[%s30466_s3 + $0x11c4] ss:$16 sps:$4 sm:$0xff]  }
 0x74b   :  { %12311 = vmatpush1.bf16.msra.mxu1 %v21478_v10  ;;  %12170 = vmatprep.subr.bf16.mxu0 %v21479_v59  ;;  %v21484_v10 = vld [vmem:[%s30466_s3 + $0x11cc] ss:$16 sps:$4 sm:$0xff]   ;;  %v21485_v59 = vld [vmem:[%s30466_s3 + $0x11c0] ss:$16 sps:$4 sm:$0xff]  }
 0x74c   :  { %12312 = vmatprep.subr.bf16.mxu1 %v21480_v13  ;;  %v21486_v13 = vld [vmem:[%s30466_s3 + $0x11c8] ss:$16 sps:$4 sm:$0xff]  }
 0x74e   :  { %12171 = vmatpush1.bf16.msra.mxu0 %v21481_v22  ;;  %v21487_v22 = vld [vmem:[%s30466_s3 + $0x11e4] ss:$16 sps:$4 sm:$0xff]  }
 0x74f   :  { %12313 = vmatpush1.bf16.msra.mxu1 %v21482_v21  ;;  %12172 = vmatprep.subr.bf16.mxu0 %v21483_v35  ;;  %v5047_v21 = vld [vmem:[#allocation3] sm:$0xf0]  ;;  %v21488_v35 = vld [vmem:[%s30466_s3 + $0x11ec] ss:$16 sps:$4 sm:$0xff]  }
 0x750   :  { %12314 = vmatprep.subr.bf16.mxu1 %v21484_v10  ;;  %v12101_v10 = vrot.slane %v27483_v20, 4 }
 0x752   :  { %12173 = vmatpush1.bf16.msra.mxu0 %v21485_v59  ;;  %v12114_v59 = vrot.slane %v27490_v25, 4  ;;  %v21492_v25 = vld [vmem:[%s30466_s3 + $0x120c] ss:$16 sps:$4 sm:$0xff]  }
 0x753   :  { %12315 = vmatpush1.bf16.msra.mxu1 %v21486_v13  ;;  %12174 = vmatprep.subr.bf16.mxu0 %v21487_v22  ;;  %v12100_v13 = vrot.slane %v5047_v21, 4  ;;  %v21490_v22 = vld [vmem:[%s30466_s3 + $0x11e8] ss:$16 sps:$4 sm:$0xff]  }
 0x754   :  { %12316 = vmatprep.subr.bf16.mxu1 %v21488_v35  ;;  %v21493_v35 = vld [vmem:[%s30466_s3 + $0x1200] ss:$16 sps:$4 sm:$0xff]  }
 0x755   :  { %v27994_v20 = vsel %vm4942_vm2, %v12100_v13, %v12101_v10  ;;  %v21494_v13 = vld [vmem:[%s30466_s3 + $0x1208] ss:$16 sps:$4 sm:$0xff]  }
 0x756   :  { %12175 = vmatpush1.bf16.msra.mxu0 %v21489_v47  ;;  %v30762_v47 = vrot.slane %v27458_v51, 4  ;;  %v21495_v51 = vld [vmem:[%s30466_s3 + $0x1224] ss:$16 sps:$4 sm:$0xff]  }
 0x757   :  { %12317 = vmatpush1.bf16.msra.mxu1 %v21490_v22  ;;  %12215 = vmatprep.subr.bf16.mxu0 %v21491_v24  ;;  %v5052_v24 = vld [vmem:[#allocation3 + $0x68] sm:$0xff]  ;;  %v12112_v22 = vrot.slane %v27515_v43, 4  ;;  %v21499_v43 = vld [vmem:[%s30466_s3 + $0x1244] ss:$16 sps:$4 sm:$0xff]  }
 0x758   :  { %12357 = vmatprep.subr.bf16.mxu1 %v21492_v25  ;;  %v28003_v21 = vsel %vm4942_vm2, %v30762_v47, %v12114_v59  ;;  %v21496_v25 = vld [vmem:[%s30466_s3 + $0x122c] ss:$16 sps:$4 sm:$0xff]   ;;  %v28021_v47 = vrot.slane %v5052_v24, 4 }
 0x759   :  { %12177 = vmatmul.mubr.bf16.vlgmr.msra.gmra.mrb[160].mxu0 %v27994_v20  ;;  %v21500_v24 = vld [vmem:[%s30466_s3 + $0x124c] ss:$16 sps:$4 sm:$0xff]  }
 0x75a   :  { %12319 = vmatmul.mubr.bf16.vlgmr.msra.gmra.mrb[164].mxu1 %v27994_v20  ;;  %12186 = vmatprep.mubr.bf16.mxu0 %v28003_v21  ;;  %30763 = vst [vmem:[#allocation42_spill] sm:$0xff] %v28021_v47 }
 0x75b   :  { %12216 = vmatpush1.bf16.msra.mxu0 %v21493_v35  ;;  %12328 = vmatprep.mubr.bf16.mxu1 %v28003_v21  ;;  %v21497_v35 = vld [vmem:[%s30466_s3 + $0x1220] ss:$16 sps:$4 sm:$0xff]  }
 0x75c   :  { %12358 = vmatpush1.bf16.msra.mxu1 %v21494_v13  ;;  %12217 = vmatprep.subr.bf16.mxu0 %v21495_v51  ;;  %v21498_v13 = vld [vmem:[%s30466_s3 + $0x1228] ss:$16 sps:$4 sm:$0xff]   ;;  %v28030_v51 = vsel %vm4942_vm2, %v12101_v10, %v12112_v22  ;;  %v21501_v10 = vld [vmem:[%s30466_s3 + $0x1240] ss:$16 sps:$4 sm:$0xff]  }
 0x75d   :  { %12359 = vmatprep.subr.bf16.mxu1 %v21496_v25  ;;  %v28041_v25 = vsel %vm4942_vm2, %v12114_v59, %v28021_v47  ;;  %v21503_v59 = vld [vmem:[%s30466_s3 + $0x1264] ss:$16 sps:$4 sm:$0xff]  }
 0x75f   :  { %12218 = vmatpush1.bf16.msra.mxu0 %v21497_v35  ;;  %v5051_v35 = vld [vmem:[#allocation3 + $0x60] sm:$0xff] }
 0x760   :  { %12360 = vmatpush1.bf16.msra.mxu1 %v21498_v13  ;;  %12219 = vmatprep.subr.bf16.mxu0 %v21499_v43  ;;  %v21502_v13 = vld [vmem:[%s30466_s3 + $0x1248] ss:$16 sps:$4 sm:$0xff]   ;;  %v28055_v43 = vrot.slane %v5051_v35, 4  ;;  %v21507_v35 = vld [vmem:[%s30466_s3 + $0x1284] ss:$16 sps:$4 sm:$0xff]  }
 0x761   :  { %12187 = vmatmul.mubr.bf16.gmra.mrb[164].mxu0 %v28030_v51  ;;  %12361 = vmatprep.subr.bf16.mxu1 %v21500_v24  ;;  %v21504_v24 = vld [vmem:[%s30466_s3 + $0x126c] ss:$16 sps:$4 sm:$0xff]  }
 0x762   :  { %12329 = vmatmul.mubr.bf16.gmra.mrb[168].mxu1 %v28030_v51  ;;  %12196 = vmatprep.mubr.bf16.mxu0 %v28041_v25  ;;  %30764 = vst [vmem:[#allocation43_spill] sm:$0xff] %v28055_v43 }
 0x763   :  { %12220 = vmatpush1.bf16.msra.mxu0 %v21501_v10  ;;  %12338 = vmatprep.mubr.bf16.mxu1 %v28041_v25  ;;  %v21505_v10 = vld [vmem:[%s30466_s3 + $0x1260] ss:$16 sps:$4 sm:$0xff]  }
 0x764   :  { %12362 = vmatpush1.bf16.msra.mxu1 %v21502_v13  ;;  %12221 = vmatprep.subr.bf16.mxu0 %v21503_v59  ;;  %v21506_v13 = vld [vmem:[%s30466_s3 + $0x1268] ss:$16 sps:$4 sm:$0xff]   ;;  %v28068_v59 = vsel %vm4942_vm2, %v12112_v22, %v28055_v43  ;;  %v21509_v22 = vld [vmem:[%s30466_s3 + $0x1280] ss:$16 sps:$4 sm:$0xff]  }
 0x765   :  { %12363 = vmatprep.subr.bf16.mxu1 %v21504_v24  ;;  %30765 = vst [vmem:[#allocation6_spill] sm:$0xff] %v28068_v59  ;;  %v21508_v24 = vld [vmem:[%s30466_s3 + $0x128c] ss:$16 sps:$4 sm:$0xff]  }
 0x767   :  { %12222 = vmatpush1.bf16.msra.mxu0 %v21505_v10  ;;  %v21510_v10 = vld [vmem:[%s30466_s3 + $0x1288] ss:$16 sps:$4 sm:$0xff]  }
 0x768   :  { %12364 = vmatpush1.bf16.msra.mxu1 %v21506_v13  ;;  %12223 = vmatprep.subr.bf16.mxu0 %v21507_v35  ;;  %v21511_v13 = vld [vmem:[%s30466_s3 + $0x12a4] ss:$16 sps:$4 sm:$0xff]   ;;  %v5050_v35 = vld [vmem:[#allocation3 + $0x18] sm:$0xf0] }
 0x769   :  { %12197 = vmatmul.mubr.bf16.gmra.mrb[168].mxu0 %v28068_v59  ;;  %12365 = vmatprep.subr.bf16.mxu1 %v21508_v24  ;;  %v21512_v24 = vld [vmem:[%s30466_s3 + $0x12ac] ss:$16 sps:$4 sm:$0xff]  }
 0x76a   :  { %12339 = vmatmul.mubr.bf16.gmra.mrb[172].mxu1 %v28068_v59  ;;  %12206 = vmatprep.mubr.bf16.mxu0 %v28021_v47  ;;  %v12109_v59 = vrot.slane %v5050_v35, 4  ;;  %v21517_v35 = vld [vmem:[%s30466_s3 + $0x12c0] ss:$16 sps:$4 sm:$0xff]  }
 0x76b   :  { %12224 = vmatpush1.bf16.msra.mxu0 %v21509_v22  ;;  %12348 = vmatprep.mubr.bf16.mxu1 %v28021_v47  ;;  %v30570_v22 = vrot.slane %v27778_v50, 4  ;;  %v21513_v47 = vld [vmem:[%s30466_s3 + $0x12a0] ss:$16 sps:$4 sm:$0xff]  }
 0x76c   :  { %12366 = vmatpush1.bf16.msra.mxu1 %v21510_v10  ;;  %12225 = vmatprep.subr.bf16.mxu0 %v21511_v13  ;;  %v21514_v10 = vld [vmem:[%s30466_s3 + $0x12a8] ss:$16 sps:$4 sm:$0xff]   ;;  %v21515_v13 = vld [vmem:[%s30466_s3 + $0x12c4] ss:$16 sps:$4 sm:$0xff]  }
 0x76d   :  { %12367 = vmatprep.subr.bf16.mxu1 %v21512_v24  ;;  %v21516_v24 = vld [vmem:[%s30466_s3 + $0x12cc] ss:$16 sps:$4 sm:$0xff]  }
 0x76f   :  { %12226 = vmatpush1.bf16.msra.mxu0 %v21513_v47  ;;  %v28109_v47 = vsel %vm4942_vm2, %v12109_v59, %v30570_v22  ;;  %v21519_v59 = vld [vmem:[%s30466_s3 + $0x12e4] ss:$16 sps:$4 sm:$0xff]   ;;  %v12107_v22 = vrot.slane %v27803_v40, 4 }
 0x770   :  { %12368 = vmatpush1.bf16.msra.mxu1 %v21514_v10  ;;  %12227 = vmatprep.subr.bf16.mxu0 %v21515_v13  ;;  %30766 = vst [vmem:[#allocation8_spill] sm:$0xff] %v28109_v47  ;;  %v21518_v10 = vld [vmem:[%s30466_s3 + $0x12c8] ss:$16 sps:$4 sm:$0xff]   ;;  %v21520_v13 = vld [vmem:[%s30466_s3 + $0x12ec] ss:$16 sps:$4 sm:$0xff]  }
 0x771   :  { %12207 = vmatmul.mubr.bf16.gmra.mrb[172].mxu0 %v28055_v43  ;;  %12369 = vmatprep.subr.bf16.mxu1 %v21516_v24  ;;  %v21521_v24 = vld [vmem:[%s30466_s3 + $0x12e0] ss:$16 sps:$4 sm:$0xff]  }
 0x772   :  { %12349 = vmatmul.mubr.bf16.gmra.mrb[176].mxu1 %v28055_v43  ;;  %12247 = vmatprep.mubr.bf16.mxu0 %v28109_v47  ;;  %v21555_v43 = vld [vmem:[%s30466_s3 + $0xc04] ss:$16 sps:$4 sm:$0xff]  }
 0x773   :  { %12228 = vmatpush1.bf16.msra.mxu0 %v21517_v35  ;;  %12389 = vmatprep.mubr.bf16.mxu1 %v28109_v47  ;;  %v21522_v35 = vld [vmem:[%s30466_s3 + $0x12e8] ss:$16 sps:$4 sm:$0xff]   ;;  %v21553_v47 = vld [vmem:[%s30466_s3 + $0x13e0] ss:$16 sps:$4 sm:$0xff]  }
 0x774   :  { %12370 = vmatpush1.bf16.msra.mxu1 %v21518_v10  ;;  %12229 = vmatprep.subr.bf16.mxu0 %v21519_v59  ;;  %v21523_v10 = vld [vmem:[%s30466_s3 + $0x1304] ss:$16 sps:$4 sm:$0xff]   ;;  %v21524_v59 = vld [vmem:[%s30466_s3 + $0x130c] ss:$16 sps:$4 sm:$0xff]  }
 0x775   :  { %12371 = vmatprep.subr.bf16.mxu1 %v21520_v13  ;;  %v21525_v13 = vld [vmem:[%s30466_s3 + $0x1300] ss:$16 sps:$4 sm:$0xff]  }
 0x777   :  { %12230 = vmatpush1.bf16.msra.mxu0 %v21521_v24  ;;  %v21526_v24 = vld [vmem:[%s30466_s3 + $0x1308] ss:$16 sps:$4 sm:$0xff]  }
 0x778   :  { %12372 = vmatpush1.bf16.msra.mxu1 %v21522_v35  ;;  %12231 = vmatprep.subr.bf16.mxu0 %v21523_v10  ;;  %v21527_v35 = vld [vmem:[%s30466_s3 + $0x1324] ss:$16 sps:$4 sm:$0xff]   ;;  %v21528_v10 = vld [vmem:[%s30466_s3 + $0x132c] ss:$16 sps:$4 sm:$0xff]  }
 0x779   :  { %12373 = vmatprep.subr.bf16.mxu1 %v21524_v59  ;;  %v21529_v59 = vld [vmem:[%s30466_s3 + $0x1320] ss:$16 sps:$4 sm:$0xff]  }
 0x77b   :  { %12232 = vmatpush1.bf16.msra.mxu0 %v21525_v13  ;;  %v21530_v13 = vld [vmem:[%s30466_s3 + $0x1328] ss:$16 sps:$4 sm:$0xff]  }
 0x77c   :  { %12374 = vmatpush1.bf16.msra.mxu1 %v21526_v24  ;;  %12233 = vmatprep.subr.bf16.mxu0 %v21527_v35  ;;  %v21531_v24 = vld [vmem:[%s30466_s3 + $0x1344] ss:$16 sps:$4 sm:$0xff]   ;;  %v21532_v35 = vld [vmem:[%s30466_s3 + $0x134c] ss:$16 sps:$4 sm:$0xff]  }
 0x77d   :  { %12375 = vmatprep.subr.bf16.mxu1 %v21528_v10  ;;  %v21533_v10 = vld [vmem:[%s30466_s3 + $0x1340] ss:$16 sps:$4 sm:$0xff]  }
 0x77f   :  { %12234 = vmatpush1.bf16.msra.mxu0 %v21529_v59  ;;  %v21534_v59 = vld [vmem:[%s30466_s3 + $0x1348] ss:$16 sps:$4 sm:$0xff]  }
 0x780   :  { %12376 = vmatpush1.bf16.msra.mxu1 %v21530_v13  ;;  %12235 = vmatprep.subr.bf16.mxu0 %v21531_v24  ;;  %v21535_v13 = vld [vmem:[%s30466_s3 + $0x1364] ss:$16 sps:$4 sm:$0xff]   ;;  %v21536_v24 = vld [vmem:[%s30466_s3 + $0x136c] ss:$16 sps:$4 sm:$0xff]  }
 0x781   :  { %12377 = vmatprep.subr.bf16.mxu1 %v21532_v35  ;;  %v21537_v35 = vld [vmem:[%s30466_s3 + $0x1360] ss:$16 sps:$4 sm:$0xff]  }
 0x783   :  { %12236 = vmatpush1.bf16.msra.mxu0 %v21533_v10  ;;  %v21538_v10 = vld [vmem:[%s30466_s3 + $0x1368] ss:$16 sps:$4 sm:$0xff]  }
 0x784   :  { %12378 = vmatpush1.bf16.msra.mxu1 %v21534_v59  ;;  %12237 = vmatprep.subr.bf16.mxu0 %v21535_v13  ;;  %v21539_v59 = vld [vmem:[%s30466_s3 + $0x1384] ss:$16 sps:$4 sm:$0xff]   ;;  %v21540_v13 = vld [vmem:[%s30466_s3 + $0x138c] ss:$16 sps:$4 sm:$0xff]  }
 0x785   :  { %12379 = vmatprep.subr.bf16.mxu1 %v21536_v24  ;;  %v21541_v24 = vld [vmem:[%s30466_s3 + $0x1380] ss:$16 sps:$4 sm:$0xff]  }
 0x787   :  { %12238 = vmatpush1.bf16.msra.mxu0 %v21537_v35  ;;  %v21542_v35 = vld [vmem:[%s30466_s3 + $0x1388] ss:$16 sps:$4 sm:$0xff]  }
 0x788   :  { %12380 = vmatpush1.bf16.msra.mxu1 %v21538_v10  ;;  %12239 = vmatprep.subr.bf16.mxu0 %v21539_v59  ;;  %v21543_v10 = vld [vmem:[%s30466_s3 + $0x13a4] ss:$16 sps:$4 sm:$0xff]   ;;  %v21544_v59 = vld [vmem:[%s30466_s3 + $0x13ac] ss:$16 sps:$4 sm:$0xff]  }
 0x789   :  { %12381 = vmatprep.subr.bf16.mxu1 %v21540_v13  ;;  %v21545_v13 = vld [vmem:[%s30466_s3 + $0x13a0] ss:$16 sps:$4 sm:$0xff]  }
 0x78b   :  { %12240 = vmatpush1.bf16.msra.mxu0 %v21541_v24  ;;  %v21546_v24 = vld [vmem:[%s30466_s3 + $0x13a8] ss:$16 sps:$4 sm:$0xff]  }
 0x78c   :  { %12382 = vmatpush1.bf16.msra.mxu1 %v21542_v35  ;;  %12241 = vmatprep.subr.bf16.mxu0 %v21543_v10  ;;  %v21547_v35 = vld [vmem:[%s30466_s3 + $0x13c4] ss:$16 sps:$4 sm:$0xff]   ;;  %v21548_v10 = vld [vmem:[%s30466_s3 + $0x13cc] ss:$16 sps:$4 sm:$0xff]  }
 0x78d   :  { %12383 = vmatprep.subr.bf16.mxu1 %v21544_v59  ;;  %v21549_v59 = vld [vmem:[%s30466_s3 + $0x13c0] ss:$16 sps:$4 sm:$0xff]  }
 0x78f   :  { %12242 = vmatpush1.bf16.msra.mxu0 %v21545_v13  ;;  %v21550_v13 = vld [vmem:[%s30466_s3 + $0x13c8] ss:$16 sps:$4 sm:$0xff]  }
 0x790   :  { %12384 = vmatpush1.bf16.msra.mxu1 %v21546_v24  ;;  %12243 = vmatprep.subr.bf16.mxu0 %v21547_v35  ;;  %v21551_v24 = vld [vmem:[%s30466_s3 + $0x13e4] ss:$16 sps:$4 sm:$0xff]  }
 0x791   :  { %12385 = vmatprep.subr.bf16.mxu1 %v21548_v10  ;;  %v5049_v35 = vld [vmem:[#allocation3 + $0x10] sm:$0xf0]  ;;  %v21552_v10 = vld [vmem:[%s30466_s3 + $0x13ec] ss:$16 sps:$4 sm:$0xff]  }
 0x793   :  { %12244 = vmatpush1.bf16.msra.mxu0 %v21549_v59  ;;  %v12118_v59 = vrot.slane %v27810_v2, 4  ;;  %v21556_v2 = vld [vmem:[%s30466_s3 + $0xc0c] ss:$16 sps:$4 sm:$0xff]  }
 0x794   :  { %12386 = vmatpush1.bf16.msra.mxu1 %v21550_v13  ;;  %12245 = vmatprep.subr.bf16.mxu0 %v21551_v24  ;;  %v12106_v13 = vrot.slane %v5049_v35, 4  ;;  %v21554_v24 = vld [vmem:[%s30466_s3 + $0x13e8] ss:$16 sps:$4 sm:$0xff]  }
 0x795   :  { %12387 = vmatprep.subr.bf16.mxu1 %v21552_v10  ;;  %v21557_v10 = vld [vmem:[%s30466_s3 + $0xc00] ss:$16 sps:$4 sm:$0xff]  }
 0x796   :  { %v28234_v40 = vsel %vm4942_vm2, %v12106_v13, %v12107_v22  ;;  %v21558_v13 = vld [vmem:[%s30466_s3 + $0xc08] ss:$16 sps:$4 sm:$0xff]  }
 0x797   :  { %12246 = vmatpush1.bf16.msra.mxu0 %v21553_v47  ;;  %v30767_v47 = vrot.slane %v27778_v50, 4  ;;  %v21559_v50 = vld [vmem:[%s30466_s3 + $0xc24] ss:$16 sps:$4 sm:$0xff]  }
 0x798   :  { %12388 = vmatpush1.bf16.msra.mxu1 %v21554_v24  ;;  %12484 = vmatprep.subr.bf16.mxu0 %v21555_v43  ;;  %v5054_v43 = vld [vmem:[#allocation3 + $0x78] sm:$0xff]  ;;  %v12116_v24 = vrot.slane %v27835_v1, 4  ;;  %v21563_v1 = vld [vmem:[%s30466_s3 + $0xc44] ss:$16 sps:$4 sm:$0xff]  }
 0x799   :  { %12626 = vmatprep.subr.bf16.mxu1 %v21556_v2  ;;  %v28243_v35 = vsel %vm4942_vm2, %v30767_v47, %v12118_v59  ;;  %v21560_v2 = vld [vmem:[%s30466_s3 + $0xc2c] ss:$16 sps:$4 sm:$0xff]   ;;  %v28261_v47 = vrot.slane %v5054_v43, 4 }
 0x79a   :  { %12248 = vmatmul.mubr.bf16.vlgmr.msra.gmra.mrb[160].mxu0 %v28234_v40  ;;  %v21564_v43 = vld [vmem:[%s30466_s3 + $0xc4c] ss:$16 sps:$4 sm:$0xff]  }
 0x79b   :  { %12390 = vmatmul.mubr.bf16.vlgmr.msra.gmra.mrb[164].mxu1 %v28234_v40  ;;  %12257 = vmatprep.mubr.bf16.mxu0 %v28243_v35 }
 0x79c   :  { %12399 = vmatprep.mubr.bf16.mxu1 %v28243_v35  ;;  %12485 = vmatpush1.bf16.msra.mxu0 %v21557_v10  ;;  %v21561_v10 = vld [vmem:[%s30466_s3 + $0xc20] ss:$16 sps:$4 sm:$0xff]  }
 0x79d   :  { %12627 = vmatpush1.bf16.msra.mxu1 %v21558_v13  ;;  %12486 = vmatprep.subr.bf16.mxu0 %v21559_v50  ;;  %v21562_v13 = vld [vmem:[%s30466_s3 + $0xc28] ss:$16 sps:$4 sm:$0xff]   ;;  %v28270_v50 = vsel %vm4942_vm2, %v12107_v22, %v12116_v24  ;;  %v21565_v22 = vld [vmem:[%s30466_s3 + $0xc40] ss:$16 sps:$4 sm:$0xff]  }
 0x79e   :  { %12628 = vmatprep.subr.bf16.mxu1 %v21560_v2  ;;  %v28281_v2 = vsel %vm4942_vm2, %v12118_v59, %v28261_v47  ;;  %v21567_v59 = vld [vmem:[%s30466_s3 + $0xc64] ss:$16 sps:$4 sm:$0xff]  }
 0x7a0   :  { %12487 = vmatpush1.bf16.msra.mxu0 %v21561_v10  ;;  %v5053_v10 = vld [vmem:[#allocation3 + $0x70] sm:$0xff] }
 0x7a1   :  { %12629 = vmatpush1.bf16.msra.mxu1 %v21562_v13  ;;  %12488 = vmatprep.subr.bf16.mxu0 %v21563_v1  ;;  %v21566_v13 = vld [vmem:[%s30466_s3 + $0xc48] ss:$16 sps:$4 sm:$0xff]   ;;  %v28295_v1 = vrot.slane %v5053_v10, 4  ;;  %v21571_v10 = vld [vmem:[%s30466_s3 + $0xc84] ss:$16 sps:$4 sm:$0xff]  }
 0x7a2   :  { %12258 = vmatmul.mubr.bf16.gmra.mrb[164].mxu0 %v28270_v50  ;;  %12630 = vmatprep.subr.bf16.mxu1 %v21564_v43  ;;  %v21568_v43 = vld [vmem:[%s30466_s3 + $0xc6c] ss:$16 sps:$4 sm:$0xff]  }
 0x7a3   :  { %12400 = vmatmul.mubr.bf16.gmra.mrb[168].mxu1 %v28270_v50  ;;  %12267 = vmatprep.mubr.bf16.mxu0 %v28281_v2 }
 0x7a4   :  { %12409 = vmatprep.mubr.bf16.mxu1 %v28281_v2  ;;  %12489 = vmatpush1.bf16.msra.mxu0 %v21565_v22  ;;  %v21569_v22 = vld [vmem:[%s30466_s3 + $0xc60] ss:$16 sps:$4 sm:$0xff]  }
 0x7a5   :  { %12631 = vmatpush1.bf16.msra.mxu1 %v21566_v13  ;;  %12490 = vmatprep.subr.bf16.mxu0 %v21567_v59  ;;  %v21570_v13 = vld [vmem:[%s30466_s3 + $0xc68] ss:$16 sps:$4 sm:$0xff]   ;;  %v28308_v59 = vsel %vm4942_vm2, %v12116_v24, %v28295_v1  ;;  %v21573_v24 = vld [vmem:[%s30466_s3 + $0xc80] ss:$16 sps:$4 sm:$0xff]  }
 0x7a6   :  { %12632 = vmatprep.subr.bf16.mxu1 %v21568_v43  ;;  %v21572_v43 = vld [vmem:[%s30466_s3 + $0xc8c] ss:$16 sps:$4 sm:$0xff]  }
 0x7a8   :  { %12491 = vmatpush1.bf16.msra.mxu0 %v21569_v22  ;;  %v21574_v22 = vld [vmem:[%s30466_s3 + $0xc88] ss:$16 sps:$4 sm:$0xff]  }
 0x7a9   :  { %12633 = vmatpush1.bf16.msra.mxu1 %v21570_v13  ;;  %12492 = vmatprep.subr.bf16.mxu0 %v21571_v10  ;;  %v21575_v13 = vld [vmem:[%s30466_s3 + $0xca4] ss:$16 sps:$4 sm:$0xff]   ;;  %v21576_v10 = vld [vmem:[%s30466_s3 + $0xcac] ss:$16 sps:$4 sm:$0xff]  }
 0x7aa   :  { %12268 = vmatmul.mubr.bf16.gmra.mrb[168].mxu0 %v28308_v59  ;;  %12634 = vmatprep.subr.bf16.mxu1 %v21572_v43  ;;  %v21577_v43 = vld [vmem:[%s30466_s3 + $0xca0] ss:$16 sps:$4 sm:$0xff]  }
 0x7ab   :  { %12410 = vmatmul.mubr.bf16.gmra.mrb[172].mxu1 %v28308_v59  ;;  %12277 = vmatprep.mubr.bf16.mxu0 %v28261_v47 }
 0x7ac   :  { %12419 = vmatprep.mubr.bf16.mxu1 %v28261_v47  ;;  %12493 = vmatpush1.bf16.msra.mxu0 %v21573_v24  ;;  %v21578_v24 = vld [vmem:[%s30466_s3 + $0xca8] ss:$16 sps:$4 sm:$0xff]  }
 0x7ad   :  { %12635 = vmatpush1.bf16.msra.mxu1 %v21574_v22  ;;  %12494 = vmatprep.subr.bf16.mxu0 %v21575_v13  ;;  %v21579_v22 = vld [vmem:[%s30466_s3 + $0xcc4] ss:$16 sps:$4 sm:$0xff]   ;;  %v21580_v13 = vld [vmem:[%s30466_s3 + $0xccc] ss:$16 sps:$4 sm:$0xff]  }
 0x7ae   :  { %12636 = vmatprep.subr.bf16.mxu1 %v21576_v10  ;;  %v21581_v10 = vld [vmem:[%s30466_s3 + $0xcc0] ss:$16 sps:$4 sm:$0xff]  }
 0x7b0   :  { %12495 = vmatpush1.bf16.msra.mxu0 %v21577_v43  ;;  %v21582_v43 = vld [vmem:[%s30466_s3 + $0xcc8] ss:$16 sps:$4 sm:$0xff]  }
 0x7b1   :  { %12637 = vmatpush1.bf16.msra.mxu1 %v21578_v24  ;;  %12496 = vmatprep.subr.bf16.mxu0 %v21579_v22  ;;  %v21583_v24 = vld [vmem:[%s30466_s3 + $0xce4] ss:$16 sps:$4 sm:$0xff]   ;;  %v21584_v22 = vld [vmem:[%s30466_s3 + $0xcec] ss:$16 sps:$4 sm:$0xff]  }
 0x7b2   :  { %12278 = vmatmul.mubr.bf16.gmra.mrb[172].mxu0 %v28295_v1  ;;  %12638 = vmatprep.subr.bf16.mxu1 %v21580_v13  ;;  %v21585_v13 = vld [vmem:[%s30466_s3 + $0xce0] ss:$16 sps:$4 sm:$0xff]  }
 0x7b3   :  { %12420 = vmatmul.mubr.bf16.gmra.mrb[176].mxu1 %v28295_v1  ;;  %12516 = vmatprep.mubr.bf16.mxu0 %v25214_v19 }
 0x7b4   :  { %12497 = vmatpush1.bf16.msra.mxu0 %v21581_v10  ;;  %12658 = vmatprep.mubr.bf16.mxu1 %v25214_v19  ;;  %v21586_v19 = vld [vmem:[%s30466_s3 + $0xce8] ss:$16 sps:$4 sm:$0xff]   ;;  %v21587_v10 = vld [vmem:[%s30466_s3 + $0xd04] ss:$16 sps:$4 sm:$0xff]  }
 0x7b5   :  { %12639 = vmatpush1.bf16.msra.mxu1 %v21582_v43  ;;  %12498 = vmatprep.subr.bf16.mxu0 %v21583_v24  ;;  %v21588_v43 = vld [vmem:[%s30466_s3 + $0xd0c] ss:$16 sps:$4 sm:$0xff]   ;;  %v21589_v24 = vld [vmem:[%s30466_s3 + $0xd00] ss:$16 sps:$4 sm:$0xff]  }
 0x7b6   :  { %12640 = vmatprep.subr.bf16.mxu1 %v21584_v22  ;;  %v21590_v22 = vld [vmem:[%s30466_s3 + $0xd08] ss:$16 sps:$4 sm:$0xff]  }
 0x7b8   :  { %12499 = vmatpush1.bf16.msra.mxu0 %v21585_v13  ;;  %v21591_v13 = vld [vmem:[%s30466_s3 + $0xd24] ss:$16 sps:$4 sm:$0xff]  }
 0x7b9   :  { %12641 = vmatpush1.bf16.msra.mxu1 %v21586_v19  ;;  %12500 = vmatprep.subr.bf16.mxu0 %v21587_v10  ;;  %v21592_v19 = vld [vmem:[%s30466_s3 + $0xd2c] ss:$16 sps:$4 sm:$0xff]   ;;  %v21593_v10 = vld [vmem:[%s30466_s3 + $0xd20] ss:$16 sps:$4 sm:$0xff]  }
 0x7ba   :  { %12642 = vmatprep.subr.bf16.mxu1 %v21588_v43  ;;  %v21594_v43 = vld [vmem:[%s30466_s3 + $0xd28] ss:$16 sps:$4 sm:$0xff]  }
 0x7bc   :  { %12501 = vmatpush1.bf16.msra.mxu0 %v21589_v24  ;;  %v21595_v24 = vld [vmem:[%s30466_s3 + $0xd44] ss:$16 sps:$4 sm:$0xff]  }
 0x7bd   :  { %12643 = vmatpush1.bf16.msra.mxu1 %v21590_v22  ;;  %12502 = vmatprep.subr.bf16.mxu0 %v21591_v13  ;;  %v21596_v22 = vld [vmem:[%s30466_s3 + $0xd4c] ss:$16 sps:$4 sm:$0xff]   ;;  %v21597_v13 = vld [vmem:[%s30466_s3 + $0xd40] ss:$16 sps:$4 sm:$0xff]  }
 0x7be   :  { %12644 = vmatprep.subr.bf16.mxu1 %v21592_v19  ;;  %v21598_v19 = vld [vmem:[%s30466_s3 + $0xd48] ss:$16 sps:$4 sm:$0xff]  }
 0x7c0   :  { %12503 = vmatpush1.bf16.msra.mxu0 %v21593_v10  ;;  %v21599_v10 = vld [vmem:[%s30466_s3 + $0xd64] ss:$16 sps:$4 sm:$0xff]  }
 0x7c1   :  { %12645 = vmatpush1.bf16.msra.mxu1 %v21594_v43  ;;  %12504 = vmatprep.subr.bf16.mxu0 %v21595_v24  ;;  %v21600_v43 = vld [vmem:[%s30466_s3 + $0xd6c] ss:$16 sps:$4 sm:$0xff]   ;;  %v21601_v24 = vld [vmem:[%s30466_s3 + $0xd60] ss:$16 sps:$4 sm:$0xff]  }
 0x7c2   :  { %12646 = vmatprep.subr.bf16.mxu1 %v21596_v22  ;;  %v21602_v22 = vld [vmem:[%s30466_s3 + $0xd68] ss:$16 sps:$4 sm:$0xff]  }
 0x7c4   :  { %12505 = vmatpush1.bf16.msra.mxu0 %v21597_v13  ;;  %v21603_v13 = vld [vmem:[%s30466_s3 + $0xd84] ss:$16 sps:$4 sm:$0xff]  }
 0x7c5   :  { %12647 = vmatpush1.bf16.msra.mxu1 %v21598_v19  ;;  %12506 = vmatprep.subr.bf16.mxu0 %v21599_v10  ;;  %v21604_v19 = vld [vmem:[%s30466_s3 + $0xd8c] ss:$16 sps:$4 sm:$0xff]   ;;  %v21605_v10 = vld [vmem:[%s30466_s3 + $0xd80] ss:$16 sps:$4 sm:$0xff]  }
 0x7c6   :  { %12648 = vmatprep.subr.bf16.mxu1 %v21600_v43  ;;  %v21606_v43 = vld [vmem:[%s30466_s3 + $0xd88] ss:$16 sps:$4 sm:$0xff]  }
 0x7c8   :  { %12507 = vmatpush1.bf16.msra.mxu0 %v21601_v24  ;;  %v21607_v24 = vld [vmem:[%s30466_s3 + $0xda4] ss:$16 sps:$4 sm:$0xff]  }
 0x7c9   :  { %12649 = vmatpush1.bf16.msra.mxu1 %v21602_v22  ;;  %12508 = vmatprep.subr.bf16.mxu0 %v21603_v13  ;;  %v21608_v22 = vld [vmem:[%s30466_s3 + $0xdac] ss:$16 sps:$4 sm:$0xff]   ;;  %v21609_v13 = vld [vmem:[%s30466_s3 + $0xda0] ss:$16 sps:$4 sm:$0xff]  }
 0x7ca   :  { %12650 = vmatprep.subr.bf16.mxu1 %v21604_v19  ;;  %v21610_v19 = vld [vmem:[%s30466_s3 + $0xda8] ss:$16 sps:$4 sm:$0xff]  }
 0x7cc   :  { %12509 = vmatpush1.bf16.msra.mxu0 %v21605_v10  ;;  %v21611_v10 = vld [vmem:[%s30466_s3 + $0xdc4] ss:$16 sps:$4 sm:$0xff]  }
 0x7cd   :  { %12651 = vmatpush1.bf16.msra.mxu1 %v21606_v43  ;;  %12510 = vmatprep.subr.bf16.mxu0 %v21607_v24  ;;  %v21612_v43 = vld [vmem:[%s30466_s3 + $0xdcc] ss:$16 sps:$4 sm:$0xff]   ;;  %v21613_v24 = vld [vmem:[%s30466_s3 + $0xdc0] ss:$16 sps:$4 sm:$0xff]  }
 0x7ce   :  { %12652 = vmatprep.subr.bf16.mxu1 %v21608_v22  ;;  %v21614_v22 = vld [vmem:[%s30466_s3 + $0xdc8] ss:$16 sps:$4 sm:$0xff]  }
 0x7d0   :  { %12511 = vmatpush1.bf16.msra.mxu0 %v21609_v13  ;;  %v21615_v13 = vld [vmem:[%s30466_s3 + $0xde4] ss:$16 sps:$4 sm:$0xff]  }
 0x7d1   :  { %12653 = vmatpush1.bf16.msra.mxu1 %v21610_v19  ;;  %12512 = vmatprep.subr.bf16.mxu0 %v21611_v10  ;;  %v21616_v19 = vld [vmem:[%s30466_s3 + $0xdec] ss:$16 sps:$4 sm:$0xff]   ;;  %v21617_v10 = vld [vmem:[%s30466_s3 + $0xde0] ss:$16 sps:$4 sm:$0xff]  }
 0x7d2   :  { %12654 = vmatprep.subr.bf16.mxu1 %v21612_v43  ;;  %v21618_v43 = vld [vmem:[%s30466_s3 + $0xde8] ss:$16 sps:$4 sm:$0xff]  }
 0x7d4   :  { %12513 = vmatpush1.bf16.msra.mxu0 %v21613_v24  ;;  %v21619_v24 = vld [vmem:[%s30466_s3 + $0xe04] ss:$16 sps:$4 sm:$0xff]  }
 0x7d5   :  { %12655 = vmatpush1.bf16.msra.mxu1 %v21614_v22  ;;  %12514 = vmatprep.subr.bf16.mxu0 %v21615_v13  ;;  %v21620_v22 = vld [vmem:[%s30466_s3 + $0xe0c] ss:$16 sps:$4 sm:$0xff]   ;;  %v21621_v13 = vld [vmem:[%s30466_s3 + $0xe00] ss:$16 sps:$4 sm:$0xff]  }
 0x7d6   :  { %12656 = vmatprep.subr.bf16.mxu1 %v21616_v19  ;;  %v21622_v19 = vld [vmem:[%s30466_s3 + $0xe08] ss:$16 sps:$4 sm:$0xff]  }
 0x7d8   :  { %12515 = vmatpush1.bf16.msra.mxu0 %v21617_v10  ;;  %v21623_v10 = vld [vmem:[%s30466_s3 + $0xe24] ss:$16 sps:$4 sm:$0xff]  }
 0x7d9   :  { %12657 = vmatpush1.bf16.msra.mxu1 %v21618_v43  ;;  %12555 = vmatprep.subr.bf16.mxu0 %v21619_v24  ;;  %v21625_v43 = vld [vmem:[%s30466_s3 + $0xe20] ss:$16 sps:$4 sm:$0xff]   ;;  %v21627_v24 = vld [vmem:[%s30466_s3 + $0xe44] ss:$16 sps:$4 sm:$0xff]  }
 0x7da   :  { %12697 = vmatprep.subr.bf16.mxu1 %v21620_v22  ;;  %v21628_v22 = vld [vmem:[%s30466_s3 + $0xe4c] ss:$16 sps:$4 sm:$0xff]  }
 0x7db   :  { %12517 = vmatmul.mubr.bf16.vlgmr.msra.gmra.mrb[176].mxu0 %v25335_v53 }
 0x7dc   :  { %12659 = vmatmul.mubr.bf16.vlgmr.msra.gmra.mrb[180].mxu1 %v25335_v53  ;;  %12526 = vmatprep.mubr.bf16.mxu0 %v25348_v26  ;;  %v21624_v53 = vld [vmem:[%s30466_s3 + $0xe2c] ss:$16 sps:$4 sm:$0xff]  }
 0x7dd   :  { %12556 = vmatpush1.bf16.msra.mxu0 %v21621_v13  ;;  %12668 = vmatprep.mubr.bf16.mxu1 %v25348_v26  ;;  %v21626_v26 = vld [vmem:[%s30466_s3 + $0xe28] ss:$16 sps:$4 sm:$0xff]   ;;  %v21629_v13 = vld [vmem:[%s30466_s3 + $0xe40] ss:$16 sps:$4 sm:$0xff]  }
 0x7de   :  { %12698 = vmatpush1.bf16.msra.mxu1 %v21622_v19  ;;  %12557 = vmatprep.subr.bf16.mxu0 %v21623_v10  ;;  %v21630_v19 = vld [vmem:[%s30466_s3 + $0xe48] ss:$16 sps:$4 sm:$0xff]   ;;  %v21631_v10 = vld [vmem:[%s30466_s3 + $0xe64] ss:$16 sps:$4 sm:$0xff]  }
 0x7df   :  { %12699 = vmatprep.subr.bf16.mxu1 %v21624_v53  ;;  %v21633_v53 = vld [vmem:[%s30466_s3 + $0xe60] ss:$16 sps:$4 sm:$0xff]  }
 0x7e1   :  { %12558 = vmatpush1.bf16.msra.mxu0 %v21625_v43  ;;  %v21635_v43 = vld [vmem:[%s30466_s3 + $0xe84] ss:$16 sps:$4 sm:$0xff]  }
 0x7e2   :  { %12700 = vmatpush1.bf16.msra.mxu1 %v21626_v26  ;;  %12559 = vmatprep.subr.bf16.mxu0 %v21627_v24  ;;  %v21636_v26 = vld [vmem:[%s30466_s3 + $0xe8c] ss:$16 sps:$4 sm:$0xff]   ;;  %v21637_v24 = vld [vmem:[%s30466_s3 + $0xe80] ss:$16 sps:$4 sm:$0xff]  }
 0x7e3   :  { %12527 = vmatmul.mubr.bf16.gmra.mrb[180].mxu0 %v25375_v55  ;;  %12701 = vmatprep.subr.bf16.mxu1 %v21628_v22  ;;  %v21638_v22 = vld [vmem:[%s30466_s3 + $0xe88] ss:$16 sps:$4 sm:$0xff]  }
 0x7e4   :  { %12669 = vmatmul.mubr.bf16.gmra.mrb[184].mxu1 %v25375_v55  ;;  %12536 = vmatprep.mubr.bf16.mxu0 %v25387_v38  ;;  %v21632_v55 = vld [vmem:[%s30466_s3 + $0xe6c] ss:$16 sps:$4 sm:$0xff]  }
 0x7e5   :  { %12560 = vmatpush1.bf16.msra.mxu0 %v21629_v13  ;;  %12678 = vmatprep.mubr.bf16.mxu1 %v25387_v38  ;;  %v21634_v38 = vld [vmem:[%s30466_s3 + $0xe68] ss:$16 sps:$4 sm:$0xff]   ;;  %v21639_v13 = vld [vmem:[%s30466_s3 + $0xea4] ss:$16 sps:$4 sm:$0xff]  }
 0x7e6   :  { %12702 = vmatpush1.bf16.msra.mxu1 %v21630_v19  ;;  %12561 = vmatprep.subr.bf16.mxu0 %v21631_v10  ;;  %v21641_v19 = vld [vmem:[%s30466_s3 + $0xea0] ss:$16 sps:$4 sm:$0xff]   ;;  %v21643_v10 = vld [vmem:[%s30466_s3 + $0xec4] ss:$16 sps:$4 sm:$0xff]  }
 0x7e7   :  { %12703 = vmatprep.subr.bf16.mxu1 %v21632_v55  ;;  %v21644_v55 = vld [vmem:[%s30466_s3 + $0xecc] ss:$16 sps:$4 sm:$0xff]  }
 0x7e9   :  { %12562 = vmatpush1.bf16.msra.mxu0 %v21633_v53  ;;  %v21645_v53 = vld [vmem:[%s30466_s3 + $0xec0] ss:$16 sps:$4 sm:$0xff]  }
 0x7ea   :  { %12704 = vmatpush1.bf16.msra.mxu1 %v21634_v38  ;;  %12563 = vmatprep.subr.bf16.mxu0 %v21635_v43  ;;  %v21646_v38 = vld [vmem:[%s30466_s3 + $0xec8] ss:$16 sps:$4 sm:$0xff]   ;;  %v21647_v43 = vld [vmem:[%s30466_s3 + $0xee4] ss:$16 sps:$4 sm:$0xff]  }
 0x7eb   :  { %12537 = vmatmul.mubr.bf16.gmra.mrb[184].mxu0 %v25414_v60  ;;  %12705 = vmatprep.subr.bf16.mxu1 %v21636_v26  ;;  %v21649_v26 = vld [vmem:[%s30466_s3 + $0xee0] ss:$16 sps:$4 sm:$0xff]  }
 0x7ec   :  { %12679 = vmatmul.mubr.bf16.gmra.mrb[188].mxu1 %v25414_v60  ;;  %12546 = vmatprep.mubr.bf16.mxu0 %v25366_v41  ;;  %v21640_v60 = vld [vmem:[%s30466_s3 + $0xeac] ss:$16 sps:$4 sm:$0xff]  }
 0x7ed   :  { %12564 = vmatpush1.bf16.msra.mxu0 %v21637_v24  ;;  %12688 = vmatprep.mubr.bf16.mxu1 %v25366_v41  ;;  %v21642_v41 = vld [vmem:[%s30466_s3 + $0xea8] ss:$16 sps:$4 sm:$0xff]   ;;  %v21651_v24 = vld [vmem:[%s30466_s3 + $0xf04] ss:$16 sps:$4 sm:$0xff]  }
 0x7ee   :  { %12706 = vmatpush1.bf16.msra.mxu1 %v21638_v22  ;;  %12565 = vmatprep.subr.bf16.mxu0 %v21639_v13  ;;  %v21652_v22 = vld [vmem:[%s30466_s3 + $0xf0c] ss:$16 sps:$4 sm:$0xff]   ;;  %v21653_v13 = vld [vmem:[%s30466_s3 + $0xf00] ss:$16 sps:$4 sm:$0xff]  }
 0x7ef   :  { %12707 = vmatprep.subr.bf16.mxu1 %v21640_v60  ;;  %v21654_v60 = vld [vmem:[%s30466_s3 + $0xf08] ss:$16 sps:$4 sm:$0xff]  }
 0x7f1   :  { %12566 = vmatpush1.bf16.msra.mxu0 %v21641_v19  ;;  %v21655_v19 = vld [vmem:[%s30466_s3 + $0xf24] ss:$16 sps:$4 sm:$0xff]  }
 0x7f2   :  { %12708 = vmatpush1.bf16.msra.mxu1 %v21642_v41  ;;  %12567 = vmatprep.subr.bf16.mxu0 %v21643_v10  ;;  %v21656_v41 = vld [vmem:[%s30466_s3 + $0xf2c] ss:$16 sps:$4 sm:$0xff]   ;;  %v21657_v10 = vld [vmem:[%s30466_s3 + $0xf20] ss:$16 sps:$4 sm:$0xff]  }
 0x7f3   :  { %12547 = vmatmul.mubr.bf16.gmra.mrb[188].mxu0 %v25401_v45  ;;  %12709 = vmatprep.subr.bf16.mxu1 %v21644_v55  ;;  %v21658_v55 = vld [vmem:[%s30466_s3 + $0xf28] ss:$16 sps:$4 sm:$0xff]  }
 0x7f4   :  { %12689 = vmatmul.mubr.bf16.gmra.mrb[192].mxu1 %v25401_v45  ;;  %12587 = vmatprep.mubr.bf16.mxu0 %v25456_v30  ;;  %v21648_v45 = vld [vmem:[%s30466_s3 + $0xeec] ss:$16 sps:$4 sm:$0xff]  }
 0x7f5   :  { %12568 = vmatpush1.bf16.msra.mxu0 %v21645_v53  ;;  %12729 = vmatprep.mubr.bf16.mxu1 %v25456_v30  ;;  %v21650_v30 = vld [vmem:[%s30466_s3 + $0xee8] ss:$16 sps:$4 sm:$0xff]   ;;  %v21659_v53 = vld [vmem:[%s30466_s3 + $0xf44] ss:$16 sps:$4 sm:$0xff]  }
 0x7f6   :  { %12710 = vmatpush1.bf16.msra.mxu1 %v21646_v38  ;;  %12569 = vmatprep.subr.bf16.mxu0 %v21647_v43  ;;  %v21660_v38 = vld [vmem:[%s30466_s3 + $0xf4c] ss:$16 sps:$4 sm:$0xff]   ;;  %v21661_v43 = vld [vmem:[%s30466_s3 + $0xf40] ss:$16 sps:$4 sm:$0xff]  }
 0x7f7   :  { %12711 = vmatprep.subr.bf16.mxu1 %v21648_v45  ;;  %v21662_v45 = vld [vmem:[%s30466_s3 + $0xf48] ss:$16 sps:$4 sm:$0xff]  }
 0x7f9   :  { %12570 = vmatpush1.bf16.msra.mxu0 %v21649_v26  ;;  %v21663_v26 = vld [vmem:[%s30466_s3 + $0xf64] ss:$16 sps:$4 sm:$0xff]  }
 0x7fa   :  { %12712 = vmatpush1.bf16.msra.mxu1 %v21650_v30  ;;  %12571 = vmatprep.subr.bf16.mxu0 %v21651_v24  ;;  %v21664_v30 = vld [vmem:[%s30466_s3 + $0xf6c] ss:$16 sps:$4 sm:$0xff]   ;;  %v21665_v24 = vld [vmem:[%s30466_s3 + $0xf60] ss:$16 sps:$4 sm:$0xff]  }
 0x7fb   :  { %12713 = vmatprep.subr.bf16.mxu1 %v21652_v22  ;;  %v21666_v22 = vld [vmem:[%s30466_s3 + $0xf68] ss:$16 sps:$4 sm:$0xff]  }
 0x7fd   :  { %12572 = vmatpush1.bf16.msra.mxu0 %v21653_v13  ;;  %v21667_v13 = vld [vmem:[%s30466_s3 + $0xf84] ss:$16 sps:$4 sm:$0xff]  }
 0x7fe   :  { %12714 = vmatpush1.bf16.msra.mxu1 %v21654_v60  ;;  %12573 = vmatprep.subr.bf16.mxu0 %v21655_v19  ;;  %v21668_v60 = vld [vmem:[%s30466_s3 + $0xf8c] ss:$16 sps:$4 sm:$0xff]   ;;  %v21669_v19 = vld [vmem:[%s30466_s3 + $0xf80] ss:$16 sps:$4 sm:$0xff]  }
 0x7ff   :  { %12715 = vmatprep.subr.bf16.mxu1 %v21656_v41  ;;  %v21670_v41 = vld [vmem:[%s30466_s3 + $0xf88] ss:$16 sps:$4 sm:$0xff]  }
 0x801   :  { %12574 = vmatpush1.bf16.msra.mxu0 %v21657_v10  ;;  %v21671_v10 = vld [vmem:[%s30466_s3 + $0xfa4] ss:$16 sps:$4 sm:$0xff]  }
 0x802   :  { %12716 = vmatpush1.bf16.msra.mxu1 %v21658_v55  ;;  %12575 = vmatprep.subr.bf16.mxu0 %v21659_v53  ;;  %v21672_v55 = vld [vmem:[%s30466_s3 + $0xfac] ss:$16 sps:$4 sm:$0xff]   ;;  %v21673_v53 = vld [vmem:[%s30466_s3 + $0xfa0] ss:$16 sps:$4 sm:$0xff]  }
 0x803   :  { %12717 = vmatprep.subr.bf16.mxu1 %v21660_v38  ;;  %v21674_v38 = vld [vmem:[%s30466_s3 + $0xfa8] ss:$16 sps:$4 sm:$0xff]  }
 0x805   :  { %12576 = vmatpush1.bf16.msra.mxu0 %v21661_v43  ;;  %v21675_v43 = vld [vmem:[%s30466_s3 + $0xfc4] ss:$16 sps:$4 sm:$0xff]  }
 0x806   :  { %12718 = vmatpush1.bf16.msra.mxu1 %v21662_v45  ;;  %12577 = vmatprep.subr.bf16.mxu0 %v21663_v26  ;;  %v21676_v45 = vld [vmem:[%s30466_s3 + $0xfcc] ss:$16 sps:$4 sm:$0xff]   ;;  %v21677_v26 = vld [vmem:[%s30466_s3 + $0xfc0] ss:$16 sps:$4 sm:$0xff]  }
 0x807   :  { %12719 = vmatprep.subr.bf16.mxu1 %v21664_v30  ;;  %v21678_v30 = vld [vmem:[%s30466_s3 + $0xfc8] ss:$16 sps:$4 sm:$0xff]  }
 0x809   :  { %12578 = vmatpush1.bf16.msra.mxu0 %v21665_v24  ;;  %v21679_v24 = vld [vmem:[%s30466_s3 + $0xfe4] ss:$16 sps:$4 sm:$0xff]  }
 0x80a   :  { %12720 = vmatpush1.bf16.msra.mxu1 %v21666_v22  ;;  %12579 = vmatprep.subr.bf16.mxu0 %v21667_v13  ;;  %v21680_v22 = vld [vmem:[%s30466_s3 + $0xfec] ss:$16 sps:$4 sm:$0xff]   ;;  %v21681_v13 = vld [vmem:[%s30466_s3 + $0xfe0] ss:$16 sps:$4 sm:$0xff]  }
 0x80b   :  { %12721 = vmatprep.subr.bf16.mxu1 %v21668_v60  ;;  %v21682_v60 = vld [vmem:[%s30466_s3 + $0xfe8] ss:$16 sps:$4 sm:$0xff]  }
 0x80d   :  { %12580 = vmatpush1.bf16.msra.mxu0 %v21669_v19  ;;  %v21683_v19 = vld [vmem:[%s30466_s3 + $0x404] ss:$16 sps:$4 sm:$0xff]  }
 0x80e   :  { %12722 = vmatpush1.bf16.msra.mxu1 %v21670_v41  ;;  %12581 = vmatprep.subr.bf16.mxu0 %v21671_v10  ;;  %v21684_v41 = vld [vmem:[%s30466_s3 + $0x40c] ss:$16 sps:$4 sm:$0xff]   ;;  %v21685_v10 = vld [vmem:[%s30466_s3 + $0x400] ss:$16 sps:$4 sm:$0xff]  }
 0x80f   :  { %12723 = vmatprep.subr.bf16.mxu1 %v21672_v55  ;;  %v21686_v55 = vld [vmem:[%s30466_s3 + $0x408] ss:$16 sps:$4 sm:$0xff]  }
 0x811   :  { %12582 = vmatpush1.bf16.msra.mxu0 %v21673_v53  ;;  %v21687_v53 = vld [vmem:[%s30466_s3 + $0x424] ss:$16 sps:$4 sm:$0xff]  }
 0x812   :  { %12724 = vmatpush1.bf16.msra.mxu1 %v21674_v38  ;;  %12583 = vmatprep.subr.bf16.mxu0 %v21675_v43  ;;  %v21690_v38 = vld [vmem:[%s30466_s3 + $0x428] ss:$16 sps:$4 sm:$0xff]   ;;  %v21691_v43 = vld [vmem:[%s30466_s3 + $0x444] ss:$16 sps:$4 sm:$0xff]  }
 0x813   :  { %12725 = vmatprep.subr.bf16.mxu1 %v21676_v45  ;;  %v21692_v45 = vld [vmem:[%s30466_s3 + $0x44c] ss:$16 sps:$4 sm:$0xff]  }
 0x815   :  { %12584 = vmatpush1.bf16.msra.mxu0 %v21677_v26  ;;  %v21693_v26 = vld [vmem:[%s30466_s3 + $0x440] ss:$16 sps:$4 sm:$0xff]  }
 0x816   :  { %12726 = vmatpush1.bf16.msra.mxu1 %v21678_v30  ;;  %12585 = vmatprep.subr.bf16.mxu0 %v21679_v24  ;;  %v21694_v30 = vld [vmem:[%s30466_s3 + $0x448] ss:$16 sps:$4 sm:$0xff]   ;;  %v21695_v24 = vld [vmem:[%s30466_s3 + $0x464] ss:$16 sps:$4 sm:$0xff]  }
 0x817   :  { %12727 = vmatprep.subr.bf16.mxu1 %v21680_v22  ;;  %v21698_v22 = vld [vmem:[%s30466_s3 + $0x468] ss:$16 sps:$4 sm:$0xff]  }
 0x819   :  { %12586 = vmatpush1.bf16.msra.mxu0 %v21681_v13  ;;  %v21699_v13 = vld [vmem:[%s30466_s3 + $0x484] ss:$16 sps:$4 sm:$0xff]  }
 0x81a   :  { %12728 = vmatpush1.bf16.msra.mxu1 %v21682_v60  ;;  %12768 = vmatprep.subr.bf16.mxu0 %v21683_v19  ;;  %v21700_v60 = vld [vmem:[%s30466_s3 + $0x48c] ss:$16 sps:$4 sm:$0xff]   ;;  %v21701_v19 = vld [vmem:[%s30466_s3 + $0x480] ss:$16 sps:$4 sm:$0xff]  }
 0x81b   :  { %12910 = vmatprep.subr.bf16.mxu1 %v21684_v41  ;;  %v21702_v41 = vld [vmem:[%s30466_s3 + $0x488] ss:$16 sps:$4 sm:$0xff]  }
 0x81c   :  { %12588 = vmatmul.mubr.bf16.vlgmr.msra.gmra.mrb[176].mxu0 %v25574_v48 }
 0x81d   :  { %12730 = vmatmul.mubr.bf16.vlgmr.msra.gmra.mrb[180].mxu1 %v25574_v48  ;;  %12597 = vmatprep.mubr.bf16.mxu0 %v25586_v44  ;;  %v21688_v48 = vld [vmem:[%s30466_s3 + $0x42c] ss:$16 sps:$4 sm:$0xff]  }
 0x81e   :  { %12739 = vmatprep.mubr.bf16.mxu1 %v25586_v44  ;;  %12769 = vmatpush1.bf16.msra.mxu0 %v21685_v10  ;;  %v21689_v44 = vld [vmem:[%s30466_s3 + $0x420] ss:$16 sps:$4 sm:$0xff]   ;;  %v21703_v10 = vld [vmem:[%s30466_s3 + $0x4a4] ss:$16 sps:$4 sm:$0xff]  }
 0x81f   :  { %12911 = vmatpush1.bf16.msra.mxu1 %v21686_v55  ;;  %12770 = vmatprep.subr.bf16.mxu0 %v21687_v53  ;;  %v21706_v55 = vld [vmem:[%s30466_s3 + $0x4a8] ss:$16 sps:$4 sm:$0xff]   ;;  %v21707_v53 = vld [vmem:[%s30466_s3 + $0x4c4] ss:$16 sps:$4 sm:$0xff]  }
 0x820   :  { %12912 = vmatprep.subr.bf16.mxu1 %v21688_v48  ;;  %v21708_v48 = vld [vmem:[%s30466_s3 + $0x4cc] ss:$16 sps:$4 sm:$0xff]  }
 0x822   :  { %12771 = vmatpush1.bf16.msra.mxu0 %v21689_v44  ;;  %v21709_v44 = vld [vmem:[#allocation3 + $0x8] sm:$0xff] }
 0x823   :  { %12913 = vmatpush1.bf16.msra.mxu1 %v21690_v38  ;;  %12772 = vmatprep.subr.bf16.mxu0 %v21691_v43  ;;  %v21710_v38 = vld [vmem:[%s30466_s3 + $0x4c0] ss:$16 sps:$4 sm:$0xff]   ;;  %v21711_v43 = vld [vmem:[%s30466_s3 + $0x4c8] ss:$16 sps:$4 sm:$0xff]  }
 0x824   :  { %12598 = vmatmul.mubr.bf16.gmra.mrb[180].mxu0 %v25614_v17  ;;  %12914 = vmatprep.subr.bf16.mxu1 %v21692_v45  ;;  %v21712_v45 = vld [vmem:[%s30466_s3 + $0x4e4] ss:$16 sps:$4 sm:$0xff]  }
 0x825   :  { %12740 = vmatmul.mubr.bf16.gmra.mrb[184].mxu1 %v25614_v17  ;;  %12607 = vmatprep.mubr.bf16.mxu0 %v25625_v23  ;;  %v21696_v17 = vld [vmem:[%s30466_s3 + $0x46c] ss:$16 sps:$4 sm:$0xff]  }
 0x826   :  { %12749 = vmatprep.mubr.bf16.mxu1 %v25625_v23  ;;  %12773 = vmatpush1.bf16.msra.mxu0 %v21693_v26  ;;  %v21697_v23 = vld [vmem:[%s30466_s3 + $0x460] ss:$16 sps:$4 sm:$0xff]  }
 0x827   :  { %12915 = vmatpush1.bf16.msra.mxu1 %v21694_v30  ;;  %12774 = vmatprep.subr.bf16.mxu0 %v21695_v24  ;;  %v21714_v26 = vld [vmem:[%s30466_s3 + $0x4e0] ss:$16 sps:$4 sm:$0xff]   ;;  %v21715_v30 = vld [vmem:[%s30466_s3 + $0x4e8] ss:$16 sps:$4 sm:$0xff]   ;;  %v21716_v24 = vld [vmem:[%s30466_s3 + $0x504] ss:$16 sps:$4 sm:$0xff]  }
 0x828   :  { %12916 = vmatprep.subr.bf16.mxu1 %v21696_v17  ;;  %v21717_v17 = vld [vmem:[%s30466_s3 + $0x50c] ss:$16 sps:$4 sm:$0xff]  }
 0x82a   :  { %12775 = vmatpush1.bf16.msra.mxu0 %v21697_v23  ;;  %v21718_v23 = vld [vmem:[%s30466_s3 + $0x500] ss:$16 sps:$4 sm:$0xff]  }
 0x82b   :  { %12917 = vmatpush1.bf16.msra.mxu1 %v21698_v22  ;;  %12776 = vmatprep.subr.bf16.mxu0 %v21699_v13  ;;  %v21719_v22 = vld [vmem:[%s30466_s3 + $0x508] ss:$16 sps:$4 sm:$0xff]   ;;  %v21720_v13 = vld [vmem:[%s30466_s3 + $0x524] ss:$16 sps:$4 sm:$0xff]  }
 0x82c   :  { %12608 = vmatmul.mubr.bf16.gmra.mrb[184].mxu0 %v25653_v29  ;;  %12918 = vmatprep.subr.bf16.mxu1 %v21700_v60  ;;  %v21721_v60 = vld [vmem:[%s30466_s3 + $0x52c] ss:$16 sps:$4 sm:$0xff]  }
 0x82d   :  { %12750 = vmatmul.mubr.bf16.gmra.mrb[188].mxu1 %v25653_v29  ;;  %12617 = vmatprep.mubr.bf16.mxu0 %v25605_v0  ;;  %v21704_v29 = vld [vmem:[%s30466_s3 + $0x4ac] ss:$16 sps:$4 sm:$0xff]  }
 0x82e   :  { %12759 = vmatprep.mubr.bf16.mxu1 %v25605_v0  ;;  %12777 = vmatpush1.bf16.msra.mxu0 %v21701_v19  ;;  %v21705_v0 = vld [vmem:[%s30466_s3 + $0x4a0] ss:$16 sps:$4 sm:$0xff]  }
 0x82f   :  { %12919 = vmatpush1.bf16.msra.mxu1 %v21702_v41  ;;  %12778 = vmatprep.subr.bf16.mxu0 %v21703_v10  ;;  %v21722_v19 = vld [vmem:[%s30466_s3 + $0x520] ss:$16 sps:$4 sm:$0xff]   ;;  %v21723_v41 = vld [vmem:[%s30466_s3 + $0x528] ss:$16 sps:$4 sm:$0xff]   ;;  %v21724_v10 = vld [vmem:[%s30466_s3 + $0x544] ss:$16 sps:$4 sm:$0xff]  }
 0x830   :  { %12920 = vmatprep.subr.bf16.mxu1 %v21704_v29  ;;  %v21725_v29 = vld [vmem:[%s30466_s3 + $0x54c] ss:$16 sps:$4 sm:$0xff]  }
 0x832   :  { %12779 = vmatpush1.bf16.msra.mxu0 %v21705_v0  ;;  %v21726_v0 = vld [vmem:[%s30466_s3 + $0x540] ss:$16 sps:$4 sm:$0xff]  }
 0x833   :  { %12921 = vmatpush1.bf16.msra.mxu1 %v21706_v55  ;;  %12780 = vmatprep.subr.bf16.mxu0 %v21707_v53  ;;  %v21727_v55 = vld [vmem:[%s30466_s3 + $0x548] ss:$16 sps:$4 sm:$0xff]   ;;  %v21728_v53 = vld [vmem:[%s30466_s3 + $0x564] ss:$16 sps:$4 sm:$0xff]  }
 0x834   :  { %12618 = vmatmul.mubr.bf16.gmra.mrb[188].mxu0 %v25637_v36  ;;  %12922 = vmatprep.subr.bf16.mxu1 %v21708_v48  ;;  %v21729_v48 = vld [vmem:[%s30466_s3 + $0x56c] ss:$16 sps:$4 sm:$0xff]  }
 0x835   :  { %12760 = vmatmul.mubr.bf16.gmra.mrb[192].mxu1 %v25637_v36  ;;  %12800 = vmatprep.mubr.bf16.mxu0 %v21709_v44  ;;  %v21713_v36 = vld [vmem:[%s30466_s3 + $0x4ec] ss:$16 sps:$4 sm:$0xff]  }
 0x836   :  { %12781 = vmatpush1.bf16.msra.mxu0 %v21710_v38  ;;  %12942 = vmatprep.mubr.bf16.mxu1 %v21709_v44  ;;  %v21730_v44 = vld [vmem:[%s30466_s3 + $0x560] ss:$16 sps:$4 sm:$0xff]   ;;  %v21731_v38 = vld [vmem:[%s30466_s3 + $0x568] ss:$16 sps:$4 sm:$0xff]  }
 0x837   :  { %12923 = vmatpush1.bf16.msra.mxu1 %v21711_v43  ;;  %12782 = vmatprep.subr.bf16.mxu0 %v21712_v45  ;;  %v21732_v43 = vld [vmem:[%s30466_s3 + $0x584] ss:$16 sps:$4 sm:$0xff]   ;;  %v21733_v45 = vld [vmem:[%s30466_s3 + $0x58c] ss:$16 sps:$4 sm:$0xff]  }
 0x838   :  { %12924 = vmatprep.subr.bf16.mxu1 %v21713_v36  ;;  %v21734_v36 = vld [vmem:[%s30466_s3 + $0x580] ss:$16 sps:$4 sm:$0xff]  }
 0x83a   :  { %12783 = vmatpush1.bf16.msra.mxu0 %v21714_v26  ;;  %v21735_v26 = vld [vmem:[%s30466_s3 + $0x588] ss:$16 sps:$4 sm:$0xff]  }
 0x83b   :  { %12925 = vmatpush1.bf16.msra.mxu1 %v21715_v30  ;;  %12784 = vmatprep.subr.bf16.mxu0 %v21716_v24  ;;  %v21736_v30 = vld [vmem:[%s30466_s3 + $0x5a4] ss:$16 sps:$4 sm:$0xff]   ;;  %v21737_v24 = vld [vmem:[%s30466_s3 + $0x5ac] ss:$16 sps:$4 sm:$0xff]  }
 0x83c   :  { %12926 = vmatprep.subr.bf16.mxu1 %v21717_v17  ;;  %v21738_v17 = vld [vmem:[%s30466_s3 + $0x5a0] ss:$16 sps:$4 sm:$0xff]  }
 0x83e   :  { %12785 = vmatpush1.bf16.msra.mxu0 %v21718_v23  ;;  %v21739_v23 = vld [vmem:[%s30466_s3 + $0x5a8] ss:$16 sps:$4 sm:$0xff]  }
 0x83f   :  { %12927 = vmatpush1.bf16.msra.mxu1 %v21719_v22  ;;  %12786 = vmatprep.subr.bf16.mxu0 %v21720_v13  ;;  %v21740_v22 = vld [vmem:[%s30466_s3 + $0x5c4] ss:$16 sps:$4 sm:$0xff]   ;;  %v21741_v13 = vld [vmem:[%s30466_s3 + $0x5cc] ss:$16 sps:$4 sm:$0xff]  }
 0x840   :  { %12928 = vmatprep.subr.bf16.mxu1 %v21721_v60  ;;  %v21742_v60 = vld [vmem:[%s30466_s3 + $0x5c0] ss:$16 sps:$4 sm:$0xff]  }
 0x842   :  { %12787 = vmatpush1.bf16.msra.mxu0 %v21722_v19  ;;  %v21743_v19 = vld [vmem:[%s30466_s3 + $0x5c8] ss:$16 sps:$4 sm:$0xff]  }
 0x843   :  { %12929 = vmatpush1.bf16.msra.mxu1 %v21723_v41  ;;  %12788 = vmatprep.subr.bf16.mxu0 %v21724_v10  ;;  %v21744_v41 = vld [vmem:[%s30466_s3 + $0x5e4] ss:$16 sps:$4 sm:$0xff]   ;;  %v21745_v10 = vld [vmem:[%s30466_s3 + $0x5ec] ss:$16 sps:$4 sm:$0xff]  }
 0x844   :  { %12930 = vmatprep.subr.bf16.mxu1 %v21725_v29  ;;  %v21746_v29 = vld [vmem:[%s30466_s3 + $0x5e0] ss:$16 sps:$4 sm:$0xff]  }
 0x846   :  { %12789 = vmatpush1.bf16.msra.mxu0 %v21726_v0  ;;  %v21747_v0 = vld [vmem:[%s30466_s3 + $0x5e8] ss:$16 sps:$4 sm:$0xff]  }
 0x847   :  { %12931 = vmatpush1.bf16.msra.mxu1 %v21727_v55  ;;  %12790 = vmatprep.subr.bf16.mxu0 %v21728_v53  ;;  %v21748_v55 = vld [vmem:[%s30466_s3 + $0x604] ss:$16 sps:$4 sm:$0xff]   ;;  %v21749_v53 = vld [vmem:[%s30466_s3 + $0x60c] ss:$16 sps:$4 sm:$0xff]  }
 0x848   :  { %12932 = vmatprep.subr.bf16.mxu1 %v21729_v48  ;;  %v21750_v48 = vld [vmem:[#allocation3] sm:$0xff] }
 0x84a   :  { %12791 = vmatpush1.bf16.msra.mxu0 %v21730_v44  ;;  %v21751_v44 = vld [vmem:[#allocation3 + $0x28] sm:$0xff] }
 0x84b   :  { %12933 = vmatpush1.bf16.msra.mxu1 %v21731_v38  ;;  %12792 = vmatprep.subr.bf16.mxu0 %v21732_v43  ;;  %v21752_v38 = vld [vmem:[%s30466_s3 + $0x600] ss:$16 sps:$4 sm:$0xff]   ;;  %v21753_v43 = vld [vmem:[%s30466_s3 + $0x608] ss:$16 sps:$4 sm:$0xff]  }
 0x84c   :  { %12934 = vmatprep.subr.bf16.mxu1 %v21733_v45  ;;  %v21754_v45 = vld [vmem:[%s30466_s3 + $0x624] ss:$16 sps:$4 sm:$0xff]  }
 0x84e   :  { %12793 = vmatpush1.bf16.msra.mxu0 %v21734_v36  ;;  %v21755_v36 = vld [vmem:[%s30466_s3 + $0x62c] ss:$16 sps:$4 sm:$0xff]  }
 0x84f   :  { %12935 = vmatpush1.bf16.msra.mxu1 %v21735_v26  ;;  %12794 = vmatprep.subr.bf16.mxu0 %v21736_v30  ;;  %v21756_v26 = vld [vmem:[%s30466_s3 + $0x620] ss:$16 sps:$4 sm:$0xff]   ;;  %v21757_v30 = vld [vmem:[%s30466_s3 + $0x628] ss:$16 sps:$4 sm:$0xff]  }
 0x850   :  { %12936 = vmatprep.subr.bf16.mxu1 %v21737_v24  ;;  %v21758_v24 = vld [vmem:[%s30466_s3 + $0x644] ss:$16 sps:$4 sm:$0xff]  }
 0x852   :  { %12795 = vmatpush1.bf16.msra.mxu0 %v21738_v17  ;;  %v21759_v17 = vld [vmem:[#allocation3 + $0x20] sm:$0xff] }
 0x853   :  { %12937 = vmatpush1.bf16.msra.mxu1 %v21739_v23  ;;  %12796 = vmatprep.subr.bf16.mxu0 %v21740_v22  ;;  %v21760_v23 = vld [vmem:[%s30466_s3 + $0x64c] ss:$16 sps:$4 sm:$0xff]  }
 0x854   :  { %12938 = vmatprep.subr.bf16.mxu1 %v21741_v13  ;;  %v21761_v22 = vld [vmem:[#allocation3 + $0x48] sm:$0xff]  ;;  %v21762_v13 = vld [vmem:[%s30466_s3 + $0x640] ss:$16 sps:$4 sm:$0xff]  }
 0x856   :  { %12797 = vmatpush1.bf16.msra.mxu0 %v21742_v60  ;;  %v21763_v60 = vld [vmem:[%s30466_s3 + $0x648] ss:$16 sps:$4 sm:$0xff]  }
 0x857   :  { %12939 = vmatpush1.bf16.msra.mxu1 %v21743_v19  ;;  %12798 = vmatprep.subr.bf16.mxu0 %v21744_v41  ;;  %v21764_v19 = vld [vmem:[%s30466_s3 + $0x664] ss:$16 sps:$4 sm:$0xff]   ;;  %v21765_v41 = vld [vmem:[%s30466_s3 + $0x66c] ss:$16 sps:$4 sm:$0xff]  }
 0x858   :  { %12940 = vmatprep.subr.bf16.mxu1 %v21745_v10  ;;  %v21766_v10 = vld [vmem:[%s30466_s3 + $0x660] ss:$16 sps:$4 sm:$0xff]  }
 0x85a   :  { %12799 = vmatpush1.bf16.msra.mxu0 %v21746_v29  ;;  %v21767_v29 = vld [vmem:[%s30466_s3 + $0x668] ss:$16 sps:$4 sm:$0xff]  }
 0x85b   :  { %12941 = vmatpush1.bf16.msra.mxu1 %v21747_v0  ;;  %12839 = vmatprep.subr.bf16.mxu0 %v21748_v55  ;;  %v21768_v0 = vld [vmem:[%s30466_s3 + $0x684] ss:$16 sps:$4 sm:$0xff]  }
 0x85c   :  { %12981 = vmatprep.subr.bf16.mxu1 %v21749_v53  ;;  %v21769_v55 = vld [vmem:[#allocation3 + $0x40] sm:$0xff]  ;;  %v21770_v53 = vld [vmem:[%s30466_s3 + $0x68c] ss:$16 sps:$4 sm:$0xff]  }
 0x85d   :  { %12801 = vmatmul.mubr.bf16.vlgmr.msra.gmra.mrb[176].mxu0 %v21750_v48 }
 0x85e   :  { %12943 = vmatmul.mubr.bf16.vlgmr.msra.gmra.mrb[180].mxu1 %v21750_v48  ;;  %12810 = vmatprep.mubr.bf16.mxu0 %v21751_v44 }
 0x85f   :  { %12840 = vmatpush1.bf16.msra.mxu0 %v21752_v38  ;;  %12952 = vmatprep.mubr.bf16.mxu1 %v21751_v44  ;;  %v21771_v44 = vld [vmem:[#allocation3 + $0x68] sm:$0xf]  ;;  %v30768_v38 = vmax.f32 %v26243_v57, %v27521_v52 }
 0x860   :  { %12982 = vmatpush1.bf16.msra.mxu1 %v21753_v43  ;;  %12841 = vmatprep.subr.bf16.mxu0 %v21754_v45 }
 0x861   :  { %12983 = vmatprep.subr.bf16.mxu1 %v21755_v36 }
 0x863   :  { %12842 = vmatpush1.bf16.msra.mxu0 %v21756_v26  ;;  %v21772_v26 = vld [vmem:[%s30466_s3 + $0x680] ss:$16 sps:$4 sm:$0xff]  }
 0x864   :  { %12984 = vmatpush1.bf16.msra.mxu1 %v21757_v30  ;;  %12843 = vmatprep.subr.bf16.mxu0 %v21758_v24  ;;  %v30769_v30 = vmax.f32 %v26248_v42, %v27526_v16  ;;  %v21774_v42 = vld [vmem:[%s30466_s3 + $0x6a4] ss:$16 sps:$4 sm:$0xff]  }
 0x865   :  { %12811 = vmatmul.mubr.bf16.gmra.mrb[180].mxu0 %v21759_v17  ;;  %12985 = vmatprep.subr.bf16.mxu1 %v21760_v23 }
 0x866   :  { %12953 = vmatmul.mubr.bf16.gmra.mrb[184].mxu1 %v21759_v17  ;;  %12820 = vmatprep.mubr.bf16.mxu0 %v21761_v22  ;;  %v30770_v17 = vmax.f32 %v26250_v32, %v27528_v37  ;;  %v30772_v32 = vmax.f32 %v26257_v34, %v27539_v39  ;;  %v30775_v39 = vld [vmem:[#allocation11_spill] sm:$0xff] }
 0x867   :  { %12844 = vmatpush1.bf16.msra.mxu0 %v21762_v13  ;;  %12962 = vmatprep.mubr.bf16.mxu1 %v21761_v22  ;;  %v21773_v22 = vld [vmem:[%s30466_s3 + $0x688] ss:$16 sps:$4 sm:$0xff]   ;;  %v30771_v13 = vmax.f32 %v26252_v4, %v27537_v62  ;;  %v30773_v4 = vmax.f32 %v26262_v54, %v27551_v61  ;;  %v21779_v61 = vld [vmem:[#allocation3 + $0x60] sm:$0xf] }
 0x868   :  { %12986 = vmatpush1.bf16.msra.mxu1 %v21763_v60  ;;  %12845 = vmatprep.subr.bf16.mxu0 %v21764_v19  ;;  %v21777_v54 = vld [vmem:[%s30466_s3 + $0x6a8] ss:$16 sps:$4 sm:$0xff]  }
 0x869   :  { %12987 = vmatprep.subr.bf16.mxu1 %v21765_v41  ;;  %v21775_v41 = vld [vmem:[%s30466_s3 + $0x6ac] ss:$16 sps:$4 sm:$0xff]  }
 0x86b   :  { %12846 = vmatpush1.bf16.msra.mxu0 %v21766_v10  ;;  %v30774_v10 = vmax.f32 %v26264_v28, %v27553_v56  ;;  %v21778_v28 = vld [vmem:[%s30466_s3 + $0x6c4] ss:$16 sps:$4 sm:$0xff]   ;;  %v21780_v56 = vld [vmem:[%s30466_s3 + $0x6cc] ss:$16 sps:$4 sm:$0xff]  }
 0x86c   :  { %12988 = vmatpush1.bf16.msra.mxu1 %v21767_v29  ;;  %12847 = vmatprep.subr.bf16.mxu0 %v21768_v0  ;;  %v30776_v0 = vld [vmem:[#allocation19_spill] sm:$0xff] }
 0x86d   :  { %12821 = vmatmul.mubr.bf16.gmra.mrb[184].mxu0 %v21769_v55  ;;  %12989 = vmatprep.subr.bf16.mxu1 %v21770_v53  ;;  %v12249_v48 = vpop.f32.mrb[160].mxu0 }
 0x86e   :  { %12963 = vmatmul.mubr.bf16.gmra.mrb[188].mxu1 %v21769_v55  ;;  %12830 = vmatprep.mubr.bf16.mxu0 %v21771_v44  ;;  %v28933_v43 = vmax.f32 %v30768_v38, %v12249_v48  ;;  %v12391_v45 = vpop.f32.mrb[164].mxu1  ;;  %v12251_v36 = vpop.f32.mrb[161].mxu0  ;;  %v30777_v55 = vmax.f32 %v30775_v39, %v30776_v0  ;;  %v21776_v48 = vld [vmem:[%s30466_s3 + $0x6a0] ss:$16 sps:$4 sm:$0xff]   ;;  %v21781_v38 = vld [vmem:[#allocation3 + $0x18] sm:$0xff] }
 0x86f   :  { %12848 = vmatpush1.bf16.msra.mxu0 %v21772_v26  ;;  %12972 = vmatprep.mubr.bf16.mxu1 %v21771_v44  ;;  %v28941_v24 = vmax.f32 %v30769_v30, %v12391_v45  ;;  %v28946_v23 = vmax.f32 %v30770_v17, %v12251_v36  ;;  %v12393_v57 = vpop.f32.mrb[165].mxu1  ;;  %v12253_v52 = vpop.f32.mrb[162].mxu0  ;;  %v30778_v45 = vld [vmem:[#allocation20_spill] sm:$0xff]  ;;  %v21785_v0 = vld [vmem:[%s30466_s3 + $0x6ec] ss:$16 sps:$4 sm:$0xff]  }
 0x870   :  { %12990 = vmatpush1.bf16.msra.mxu1 %v21773_v22  ;;  %v28954_v60 = vmax.f32 %v30771_v13, %v12393_v57  ;;  %12849 = vmatprep.subr.bf16.mxu0 %v21774_v42  ;;  %v28962_v16 = vmax.f32 %v30772_v32, %v12253_v52  ;;  %v12395_v37 = vpop.f32.mrb[166].mxu1  ;;  %v12255_v19 = vpop.f32.mrb[163].mxu0  ;;  %v30779_v36 = vmax.f32 %v26283_v63, %v30778_v45  ;;  %v21782_v57 = vld [vmem:[%s30466_s3 + $0x6c0] ss:$16 sps:$4 sm:$0xff]  }
 0x871   :  { %12991 = vmatprep.subr.bf16.mxu1 %v21775_v41  ;;  %v28970_v62 = vmax.f32 %v30773_v4, %v12395_v37  ;;  %v28975_v29 = vmax.f32 %v30774_v10, %v12255_v19  ;;  %v12397_v34 = vpop.f32.mrb[167].mxu1  ;;  %v30780_v52 = vmax.f32 %v26288_v5, %v27582_v15  ;;  %v30781_v13 = vld [vmem:[#allocation24_spill] sm:$0xff]  ;;  %v21783_v19 = vld [vmem:[%s30466_s3 + $0x6c8] ss:$16 sps:$4 sm:$0xff]  }
 0x872   :  { %v28980_v53 = vmax.f32 %v30777_v55, %v12397_v34  ;;  %v30782_v42 = vmax.f32 %v26290_v11, %v30781_v13  ;;  %v30783_v41 = vld [vmem:[#allocation25_spill] sm:$0xff]  ;;  %v21784_v5 = vld [vmem:[%s30466_s3 + $0x6e4] ss:$16 sps:$4 sm:$0xff]   ;;  %v30785_v11 = vmax.f32 %v26297_v8, %v27595_v58  ;;  %v21786_v45 = vld [vmem:[%s30466_s3 + $0x6e0] ss:$16 sps:$4 sm:$0xff]  }
 0x873   :  { %12850 = vmatpush1.bf16.msra.mxu0 %v21776_v48  ;;  %v30784_v4 = vmax.f32 %v26292_v3, %v30783_v41  ;;  %v30786_v3 = vmax.f32 %v26302_v7, %v27607_v12  ;;  %v30787_v48 = vld [vmem:[#allocation10_spill] sm:$0xff]  ;;  %v30790_v8 = vld [vmem:[#allocation12_spill] sm:$0xff]  ;;  %v21787_v7 = vld [vmem:[%s30466_s3 + $0x6e8] ss:$16 sps:$4 sm:$0xff]  }
 0x874   :  { %12992 = vmatpush1.bf16.msra.mxu1 %v21777_v54  ;;  %12851 = vmatprep.subr.bf16.mxu0 %v21778_v28  ;;  %v30788_v54 = vld [vmem:[#allocation26_spill] sm:$0xff] }
 0x875   :  { %12831 = vmatmul.mubr.bf16.gmra.mrb[188].mxu0 %v21779_v61  ;;  %12993 = vmatprep.subr.bf16.mxu1 %v21780_v56  ;;  %v12259_v44 = vpop.f32.mrb[164].mxu0  ;;  %v30789_v28 = vmax.f32 %v30787_v48, %v30788_v54  ;;  %v30791_v56 = vld [vmem:[#allocation27_spill] sm:$0xff]  ;;  %v21788_v12 = vld [vmem:[%s30466_s3 + $0x704] ss:$16 sps:$4 sm:$0xff]  }
 0x876   :  { %12973 = vmatmul.mubr.bf16.gmra.mrb[192].mxu1 %v21779_v61  ;;  %12871 = vmatprep.mubr.bf16.mxu0 %v21781_v38  ;;  %v28997_v26 = vmax.f32 %v30779_v36, %v12259_v44  ;;  %v12401_v30 = vpop.f32.mrb[168].mxu1  ;;  %v12261_v17 = vpop.f32.mrb[165].mxu0  ;;  %v30792_v44 = vmax.f32 %v30790_v8, %v30791_v56  ;;  %v21789_v36 = vld [vmem:[%s30466_s3 + $0x70c] ss:$16 sps:$4 sm:$0xff]   ;;  %v30796_v41 = vld [vmem:[#allocation14_spill] sm:$0xff] }
 0x877   :  { %12852 = vmatpush1.bf16.msra.mxu0 %v21782_v57  ;;  %13013 = vmatprep.mubr.bf16.mxu1 %v21781_v38  ;;  %v29005_v22 = vmax.f32 %v30780_v52, %v12401_v30  ;;  %v29010_v32 = vmax.f32 %v30782_v42, %v12261_v17  ;;  %v12403_v63 = vpop.f32.mrb[169].mxu1  ;;  %v12263_v37 = vpop.f32.mrb[166].mxu0  ;;  %v30793_v17 = vld [vmem:[#allocation31_spill] sm:$0xff] }
 0x878   :  { %12994 = vmatpush1.bf16.msra.mxu1 %v21783_v19  ;;  %v29018_v10 = vmax.f32 %v30784_v4, %v12403_v63  ;;  %12853 = vmatprep.subr.bf16.mxu0 %v21784_v5  ;;  %v29026_v15 = vmax.f32 %v30785_v11, %v12263_v37  ;;  %v12405_v34 = vpop.f32.mrb[170].mxu1  ;;  %v12265_v39 = vpop.f32.mrb[167].mxu0  ;;  %v30794_v57 = vmax.f32 %v26323_v9, %v30793_v17  ;;  %v21790_v63 = vld [vmem:[%s30466_s3 + $0x700] ss:$16 sps:$4 sm:$0xff]   ;;  %v21793_v8 = vld [vmem:[%s30466_s3 + $0x72c] ss:$16 sps:$4 sm:$0xff]  }
 0x879   :  { %12995 = vmatprep.subr.bf16.mxu1 %v21785_v0  ;;  %v29034_v55 = vmax.f32 %v30786_v3, %v12405_v34  ;;  %v29039_v61 = vmax.f32 %v30789_v28, %v12265_v39  ;;  %v12407_v58 = vpop.f32.mrb[171].mxu1  ;;  %v30795_v37 = vmax.f32 %v26328_v6, %v27638_v27  ;;  %v30797_v4 = vld [vmem:[#allocation32_spill] sm:$0xff]  ;;  %v21791_v39 = vld [vmem:[%s30466_s3 + $0x708] ss:$16 sps:$4 sm:$0xff]   ;;  %v30801_v27 = vmax.f32 %v26337_v33, %v27651_v18 }
 0x87a   :  { %v29044_v38 = vmax.f32 %v30792_v44, %v12407_v58  ;;  %v30798_v5 = vmax.f32 %v30796_v41, %v30797_v4  ;;  %v30799_v0 = vld [vmem:[#allocation33_spill] sm:$0xff]  ;;  %v21792_v6 = vld [vmem:[%s30466_s3 + $0x724] ss:$16 sps:$4 sm:$0xff]   ;;  %v30806_v33 = vld [vmem:[#allocation15_spill] sm:$0xff] }
 0x87b   :  { %12854 = vmatpush1.bf16.msra.mxu0 %v21786_v45  ;;  %v30800_v3 = vmax.f32 %v26332_v49, %v30799_v0  ;;  %v30802_v49 = vmax.f32 %v26342_v14, %v27663_v46  ;;  %v30803_v44 = vld [vmem:[#allocation13_spill] sm:$0xff]  ;;  %v30804_v45 = vld [vmem:[#allocation34_spill] sm:$0xff] }
 0x87c   :  { %12996 = vmatpush1.bf16.msra.mxu1 %v21787_v7  ;;  %12855 = vmatprep.subr.bf16.mxu0 %v21788_v12  ;;  %v30805_v7 = vmax.f32 %v30803_v44, %v30804_v45  ;;  %v21795_v14 = vld [vmem:[%s30466_s3 + $0x728] ss:$16 sps:$4 sm:$0xff]   ;;  %v21796_v46 = vld [vmem:[%s30466_s3 + $0x744] ss:$16 sps:$4 sm:$0xff]  }
 0x87d   :  { %12997 = vmatprep.subr.bf16.mxu1 %v21789_v36  ;;  %v12269_v30 = vpop.f32.mrb[168].mxu0  ;;  %v30807_v36 = vld [vmem:[#allocation35_spill] sm:$0xff]  ;;  %v30817_v44 = vld [vmem:[#allocation17_spill] sm:$0xff]  ;;  %v30818_v45 = vld [vmem:[#allocation40_spill] sm:$0xff] }
 0x87e   :  { %v29061_v52 = vmax.f32 %v30794_v57, %v12269_v30  ;;  %v12411_v13 = vpop.f32.mrb[172].mxu1  ;;  %v12271_v42 = vpop.f32.mrb[169].mxu0  ;;  %v30808_v30 = vmax.f32 %v30806_v33, %v30807_v36  ;;  %v21794_v57 = vld [vmem:[%s30466_s3 + $0x720] ss:$16 sps:$4 sm:$0xff]   ;;  %v21800_v33 = vld [vmem:[%s30466_s3 + $0x764] ss:$16 sps:$4 sm:$0xff]  }
 0x87f   :  { %12856 = vmatpush1.bf16.msra.mxu0 %v21790_v63  ;;  %v29069_v19 = vmax.f32 %v30795_v37, %v12411_v13  ;;  %v29074_v11 = vmax.f32 %v30798_v5, %v12271_v42  ;;  %v12413_v9 = vpop.f32.mrb[173].mxu1  ;;  %v12273_v34 = vpop.f32.mrb[170].mxu0  ;;  %v21797_v13 = vld [vmem:[%s30466_s3 + $0x74c] ss:$16 sps:$4 sm:$0xff]   ;;  %v30809_v63 = vld [vmem:[#allocation36_spill] sm:$0xff] }
 0x880   :  { %12998 = vmatpush1.bf16.msra.mxu1 %v21791_v39  ;;  %v29082_v48 = vmax.f32 %v30800_v3, %v12413_v9  ;;  %12857 = vmatprep.subr.bf16.mxu0 %v21792_v6  ;;  %v29090_v54 = vmax.f32 %v30801_v27, %v12273_v34  ;;  %v12415_v28 = vpop.f32.mrb[174].mxu1  ;;  %v12275_v58 = vpop.f32.mrb[171].mxu0  ;;  %v30810_v37 = vmax.f32 %v26363_v31, %v30809_v63  ;;  %v21798_v9 = vld [vmem:[%s30466_s3 + $0x740] ss:$16 sps:$4 sm:$0xff]   ;;  %v30812_v39 = vld [vmem:[#allocation37_spill] sm:$0xff] }
 0x881   :  { %12999 = vmatprep.subr.bf16.mxu1 %v21793_v8  ;;  %v29098_v56 = vmax.f32 %v30802_v49, %v12415_v28  ;;  %v29103_v12 = vmax.f32 %v30805_v7, %v12275_v58  ;;  %v12417_v18 = vpop.f32.mrb[175].mxu1  ;;  %v30811_v34 = vld [vmem:[#allocation16_spill] sm:$0xff]  ;;  %v30814_v6 = vld [vmem:[#allocation18_spill] sm:$0xff]  ;;  %v21799_v49 = vld [vmem:[%s30466_s3 + $0x748] ss:$16 sps:$4 sm:$0xff]   ;;  %v30819_v7 = vmax.f32 %v30817_v44, %v30818_v45 }
 0x882   :  { %v29108_v17 = vmax.f32 %v30808_v30, %v12417_v18  ;;  %v30813_v0 = vmax.f32 %v30811_v34, %v30812_v39  ;;  %v30815_v27 = vld [vmem:[#allocation38_spill] sm:$0xff]  ;;  %v21805_v63 = vld [vmem:[%s30466_s3 + $0x78c] ss:$16 sps:$4 sm:$0xff]   ;;  %v21811_v39 = vld [vmem:[%s30466_s3 + $0x7a8] ss:$16 sps:$4 sm:$0xff]  }
 0x883   :  { %12858 = vmatpush1.bf16.msra.mxu0 %v21794_v57  ;;  %v30816_v28 = vmax.f32 %v30814_v6, %v30815_v27  ;;  %v21801_v57 = vld [vmem:[%s30466_s3 + $0x76c] ss:$16 sps:$4 sm:$0xff]   ;;  %v21810_v34 = vld [vmem:[%s30466_s3 + $0x7a0] ss:$16 sps:$4 sm:$0xff]   ;;  %v21819_v44 = vld [vmem:[%s30466_s3 + $0x7e8] ss:$16 sps:$4 sm:$0xff]  }
 0x884   :  { %13000 = vmatpush1.bf16.msra.mxu1 %v21795_v14  ;;  %12859 = vmatprep.subr.bf16.mxu0 %v21796_v46  ;;  %v21802_v46 = vld [vmem:[%s30466_s3 + $0x760] ss:$16 sps:$4 sm:$0xff]   ;;  %v21813_v6 = vld [vmem:[%s30466_s3 + $0x7cc] ss:$16 sps:$4 sm:$0xff]   ;;  %v21820_v45 = vld [vmem:[%s30466_s3 + $0x1404] ss:$16 sps:$4 sm:$0xff]  }
 0x885   :  { %13001 = vmatprep.subr.bf16.mxu1 %v21797_v13  ;;  %v12279_v42 = vpop.f32.mrb[172].mxu0  ;;  %v21803_v13 = vld [vmem:[%s30466_s3 + $0x768] ss:$16 sps:$4 sm:$0xff]   ;;  %v21814_v27 = vld [vmem:[%s30466_s3 + $0x7c0] ss:$16 sps:$4 sm:$0xff]  }
 0x886   :  { %v29125_v41 = vmax.f32 %v30810_v37, %v12279_v42  ;;  %v12421_v4 = vpop.f32.mrb[176].mxu1  ;;  %v12281_v5 = vpop.f32.mrb[173].mxu0  ;;  %v21804_v42 = vld [vmem:[%s30466_s3 + $0x784] ss:$16 sps:$4 sm:$0xff]   ;;  %v21806_v37 = vld [vmem:[%s30466_s3 + $0x780] ss:$16 sps:$4 sm:$0xff]  }
 0x887   :  { %12860 = vmatpush1.bf16.msra.mxu0 %v21798_v9  ;;  %v29133_v3 = vmax.f32 %v30813_v0, %v12421_v4  ;;  %v29138_v58 = vmax.f32 %v30816_v28, %v12281_v5  ;;  %v12423_v31 = vpop.f32.mrb[177].mxu1  ;;  %v12283_v8 = vpop.f32.mrb[174].mxu0  ;;  %v21807_v4 = vld [vmem:[%s30466_s3 + $0x788] ss:$16 sps:$4 sm:$0xff]   ;;  %v21808_v5 = vld [vmem:[%s30466_s3 + $0x7a4] ss:$16 sps:$4 sm:$0xff]  }
 0x888   :  { %13002 = vmatpush1.bf16.msra.mxu1 %v21799_v49  ;;  %v29146_v18 = vmax.f32 %v30819_v7, %v12423_v31  ;;  %12861 = vmatprep.subr.bf16.mxu0 %v21800_v33  ;;  %v12425_v36 = vpop.f32.mrb[178].mxu1  ;;  %v12284_v30 = vpop.f32.mrb[175].mxu0  ;;  %v21809_v9 = vld [vmem:[%s30466_s3 + $0x7ac] ss:$16 sps:$4 sm:$0xff]   ;;  %v21812_v0 = vld [vmem:[%s30466_s3 + $0x7c4] ss:$16 sps:$4 sm:$0xff]  }
 0x889   :  { %13003 = vmatprep.subr.bf16.mxu1 %v21801_v57  ;;  %v12426_v14 = vpop.f32.mrb[179].mxu1  ;;  %v21815_v28 = vld [vmem:[%s30466_s3 + $0x7c8] ss:$16 sps:$4 sm:$0xff]   ;;  %v21816_v31 = vld [vmem:[%s30466_s3 + $0x7e4] ss:$16 sps:$4 sm:$0xff]  }
 0x88a   :  { %v21817_v8 = vld [vmem:[%s30466_s3 + $0x7ec] ss:$16 sps:$4 sm:$0xff]   ;;  %v21818_v49 = vld [vmem:[%s30466_s3 + $0x7e0] ss:$16 sps:$4 sm:$0xff]   ;;  %v21825_v57 = vld [vmem:[%s30466_s3 + $0x1408] ss:$16 sps:$4 sm:$0xff]  }
 0x88b   :  { %12862 = vmatpush1.bf16.msra.mxu0 %v21802_v46  ;;  %v21821_v7 = vld [vmem:[%s30466_s3 + $0x140c] ss:$16 sps:$4 sm:$0xff]   ;;  %v21822_v33 = vld [vmem:[#allocation3 + $0x10] sm:$0xff] }
 0x88c   :  { %13004 = vmatpush1.bf16.msra.mxu1 %v21803_v13  ;;  %12863 = vmatprep.subr.bf16.mxu0 %v21804_v42  ;;  %v21823_v36 = vld [vmem:[#allocation3 + $0x38] sm:$0xff]  ;;  %v21824_v30 = vld [vmem:[%s30466_s3 + $0x1400] ss:$16 sps:$4 sm:$0xff]   ;;  %v21826_v14 = vld [vmem:[%s30466_s3 + $0x1424] ss:$16 sps:$4 sm:$0xff]  }
 0x88d   :  { %13005 = vmatprep.subr.bf16.mxu1 %v21805_v63  ;;  %v21827_v46 = vld [vmem:[%s30466_s3 + $0x142c] ss:$16 sps:$4 sm:$0xff]   ;;  %v21828_v13 = vld [vmem:[%s30466_s3 + $0x1420] ss:$16 sps:$4 sm:$0xff]   ;;  %v21829_v42 = vld [vmem:[%s30466_s3 + $0x1428] ss:$16 sps:$4 sm:$0xff]  }
 0x88e   :  { %v21830_v63 = vld [vmem:[%s30466_s3 + $0x1444] ss:$16 sps:$4 sm:$0xff]  }
 0x88f   :  { %12864 = vmatpush1.bf16.msra.mxu0 %v21806_v37  ;;  %v21831_v37 = vld [vmem:[#allocation3 + $0x30] sm:$0xff] }
 0x890   :  { %13006 = vmatpush1.bf16.msra.mxu1 %v21807_v4  ;;  %12865 = vmatprep.subr.bf16.mxu0 %v21808_v5  ;;  %v21832_v4 = vld [vmem:[%s30466_s3 + $0x144c] ss:$16 sps:$4 sm:$0xff]  }
 0x891   :  { %13007 = vmatprep.subr.bf16.mxu1 %v21809_v9  ;;  %v21833_v5 = vld [vmem:[#allocation3 + $0x58] sm:$0xff]  ;;  %v21834_v9 = vld [vmem:[%s30466_s3 + $0x1440] ss:$16 sps:$4 sm:$0xff]  }
 0x893   :  { %12866 = vmatpush1.bf16.msra.mxu0 %v21810_v34  ;;  %v21835_v34 = vld [vmem:[%s30466_s3 + $0x1448] ss:$16 sps:$4 sm:$0xff]  }
 0x894   :  { %13008 = vmatpush1.bf16.msra.mxu1 %v21811_v39  ;;  %12867 = vmatprep.subr.bf16.mxu0 %v21812_v0  ;;  %v21836_v39 = vld [vmem:[%s30466_s3 + $0x1464] ss:$16 sps:$4 sm:$0xff]   ;;  %v21837_v0 = vld [vmem:[%s30466_s3 + $0x146c] ss:$16 sps:$4 sm:$0xff]  }
 0x895   :  { %13009 = vmatprep.subr.bf16.mxu1 %v21813_v6  ;;  %v21838_v6 = vld [vmem:[%s30466_s3 + $0x1460] ss:$16 sps:$4 sm:$0xff]  }
 0x897   :  { %12868 = vmatpush1.bf16.msra.mxu0 %v21814_v27  ;;  %v21839_v27 = vld [vmem:[%s30466_s3 + $0x1468] ss:$16 sps:$4 sm:$0xff]  }
 0x898   :  { %13010 = vmatpush1.bf16.msra.mxu1 %v21815_v28  ;;  %12869 = vmatprep.subr.bf16.mxu0 %v21816_v31  ;;  %v21840_v28 = vld [vmem:[%s30466_s3 + $0x1484] ss:$16 sps:$4 sm:$0xff]  }
 0x899   :  { %13011 = vmatprep.subr.bf16.mxu1 %v21817_v8  ;;  %v21841_v31 = vld [vmem:[#allocation3 + $0x50] sm:$0xff]  ;;  %v21842_v8 = vld [vmem:[%s30466_s3 + $0x148c] ss:$16 sps:$4 sm:$0xff]  }
 0x89b   :  { %12870 = vmatpush1.bf16.msra.mxu0 %v21818_v49  ;;  %v21843_v49 = vld [vmem:[#allocation3 + $0x78] sm:$0xf] }
 0x89c   :  { %13012 = vmatpush1.bf16.msra.mxu1 %v21819_v44  ;;  %13052 = vmatprep.subr.bf16.mxu0 %v21820_v45  ;;  %v21844_v44 = vld [vmem:[%s30466_s3 + $0x1480] ss:$16 sps:$4 sm:$0xff]   ;;  %v21845_v45 = vld [vmem:[%s30466_s3 + $0x1488] ss:$16 sps:$4 sm:$0xff]  }
 0x89d   :  { %13194 = vmatprep.subr.bf16.mxu1 %v21821_v7  ;;  %v21846_v7 = vld [vmem:[%s30466_s3 + $0x14a4] ss:$16 sps:$4 sm:$0xff]  }
 0x89e   :  { %12872 = vmatmul.mubr.bf16.vlgmr.msra.gmra.mrb[176].mxu0 %v21822_v33 }
 0x89f   :  { %13014 = vmatmul.mubr.bf16.vlgmr.msra.gmra.mrb[180].mxu1 %v21822_v33  ;;  %12881 = vmatprep.mubr.bf16.mxu0 %v21823_v36  ;;  %v21847_v33 = vld [vmem:[%s30466_s3 + $0x14ac] ss:$16 sps:$4 sm:$0xff]  }
 0x8a0   :  { %13023 = vmatprep.mubr.bf16.mxu1 %v21823_v36  ;;  %13053 = vmatpush1.bf16.msra.mxu0 %v21824_v30  ;;  %v21848_v36 = vld [vmem:[%s30466_s3 + $0x14a0] ss:$16 sps:$4 sm:$0xff]   ;;  %v21849_v30 = vld [vmem:[%s30466_s3 + $0x14a8] ss:$16 sps:$4 sm:$0xff]  }
 0x8a1   :  { %13195 = vmatpush1.bf16.msra.mxu1 %v21825_v57  ;;  %13054 = vmatprep.subr.bf16.mxu0 %v21826_v14  ;;  %v21850_v57 = vld [vmem:[%s30466_s3 + $0x14c4] ss:$16 sps:$4 sm:$0xff]   ;;  %v21851_v14 = vld [vmem:[#allocation3 + $0x70] sm:$0xf] }
 0x8a2   :  { %13196 = vmatprep.subr.bf16.mxu1 %v21827_v46  ;;  %v21852_v46 = vld [vmem:[%s30466_s3 + $0x14cc] ss:$16 sps:$4 sm:$0xff]  }
 0x8a4   :  { %13055 = vmatpush1.bf16.msra.mxu0 %v21828_v13  ;;  %v30820_v13 = vld [vmem:[#allocation41_spill] sm:$0xff] }
 0x8a5   :  { %13197 = vmatpush1.bf16.msra.mxu1 %v21829_v42  ;;  %13056 = vmatprep.subr.bf16.mxu0 %v21830_v63  ;;  %v21853_v42 = vld [vmem:[%s30466_s3 + $0x14c0] ss:$16 sps:$4 sm:$0xff]   ;;  %v21854_v63 = vld [vmem:[%s30466_s3 + $0x14c8] ss:$16 sps:$4 sm:$0xff]  }
 0x8a6   :  { %12882 = vmatmul.mubr.bf16.gmra.mrb[180].mxu0 %v21831_v37  ;;  %13198 = vmatprep.subr.bf16.mxu1 %v21832_v4  ;;  %v21856_v4 = vld [vmem:[%s30466_s3 + $0x14ec] ss:$16 sps:$4 sm:$0xff]  }
 0x8a7   :  { %13024 = vmatmul.mubr.bf16.gmra.mrb[184].mxu1 %v21831_v37  ;;  %12891 = vmatprep.mubr.bf16.mxu0 %v21833_v5  ;;  %v21855_v37 = vld [vmem:[%s30466_s3 + $0x14e4] ss:$16 sps:$4 sm:$0xff]  }
 0x8a8   :  { %13033 = vmatprep.mubr.bf16.mxu1 %v21833_v5  ;;  %13057 = vmatpush1.bf16.msra.mxu0 %v21834_v9  ;;  %v21857_v5 = vld [vmem:[%s30466_s3 + $0x14e0] ss:$16 sps:$4 sm:$0xff]   ;;  %v21858_v9 = vld [vmem:[%s30466_s3 + $0x14e8] ss:$16 sps:$4 sm:$0xff]  }
 0x8a9   :  { %13199 = vmatpush1.bf16.msra.mxu1 %v21835_v34  ;;  %13058 = vmatprep.subr.bf16.mxu0 %v21836_v39  ;;  %v21859_v34 = vld [vmem:[%s30466_s3 + $0x1504] ss:$16 sps:$4 sm:$0xff]   ;;  %v21860_v39 = vld [vmem:[%s30466_s3 + $0x150c] ss:$16 sps:$4 sm:$0xff]  }
 0x8aa   :  { %13200 = vmatprep.subr.bf16.mxu1 %v21837_v0  ;;  %v21861_v0 = vld [vmem:[%s30466_s3 + $0x1500] ss:$16 sps:$4 sm:$0xff]  }
 0x8ac   :  { %13059 = vmatpush1.bf16.msra.mxu0 %v21838_v6  ;;  %v21862_v6 = vld [vmem:[%s30466_s3 + $0x1508] ss:$16 sps:$4 sm:$0xff]  }
 0x8ad   :  { %13201 = vmatpush1.bf16.msra.mxu1 %v21839_v27  ;;  %13060 = vmatprep.subr.bf16.mxu0 %v21840_v28  ;;  %v21863_v27 = vld [vmem:[%s30466_s3 + $0x1524] ss:$16 sps:$4 sm:$0xff]   ;;  %v21864_v28 = vld [vmem:[%s30466_s3 + $0x152c] ss:$16 sps:$4 sm:$0xff]  }
 0x8ae   :  { %12892 = vmatmul.mubr.bf16.gmra.mrb[184].mxu0 %v21841_v31  ;;  %13202 = vmatprep.subr.bf16.mxu1 %v21842_v8  ;;  %v21866_v8 = vld [vmem:[%s30466_s3 + $0x1528] ss:$16 sps:$4 sm:$0xff]  }
 0x8af   :  { %13034 = vmatmul.mubr.bf16.gmra.mrb[188].mxu1 %v21841_v31  ;;  %12901 = vmatprep.mubr.bf16.mxu0 %v21843_v49  ;;  %v21865_v31 = vld [vmem:[%s30466_s3 + $0x1520] ss:$16 sps:$4 sm:$0xff]  }
 0x8b0   :  { %13043 = vmatprep.mubr.bf16.mxu1 %v21843_v49  ;;  %13061 = vmatpush1.bf16.msra.mxu0 %v21844_v44  ;;  %v21867_v49 = vld [vmem:[%s30466_s3 + $0x1544] ss:$16 sps:$4 sm:$0xff]   ;;  %v21868_v44 = vld [vmem:[%s30466_s3 + $0x154c] ss:$16 sps:$4 sm:$0xff]  }
 0x8b1   :  { %13203 = vmatpush1.bf16.msra.mxu1 %v21845_v45  ;;  %13062 = vmatprep.subr.bf16.mxu0 %v21846_v7  ;;  %v21869_v45 = vld [vmem:[%s30466_s3 + $0x1540] ss:$16 sps:$4 sm:$0xff]   ;;  %v21870_v7 = vld [vmem:[%s30466_s3 + $0x1548] ss:$16 sps:$4 sm:$0xff]  }
 0x8b2   :  { %13204 = vmatprep.subr.bf16.mxu1 %v21847_v33  ;;  %v21871_v33 = vld [vmem:[%s30466_s3 + $0x1564] ss:$16 sps:$4 sm:$0xff]  }
 0x8b4   :  { %13063 = vmatpush1.bf16.msra.mxu0 %v21848_v36  ;;  %v21872_v36 = vld [vmem:[%s30466_s3 + $0x156c] ss:$16 sps:$4 sm:$0xff]  }
 0x8b5   :  { %13205 = vmatpush1.bf16.msra.mxu1 %v21849_v30  ;;  %13064 = vmatprep.subr.bf16.mxu0 %v21850_v57  ;;  %v21873_v30 = vld [vmem:[%s30466_s3 + $0x1560] ss:$16 sps:$4 sm:$0xff]   ;;  %v21874_v57 = vld [vmem:[%s30466_s3 + $0x1568] ss:$16 sps:$4 sm:$0xff]  }
 0x8b6   :  { %12902 = vmatmul.mubr.bf16.gmra.mrb[188].mxu0 %v21851_v14  ;;  %13206 = vmatprep.subr.bf16.mxu1 %v21852_v46  ;;  %v21876_v46 = vld [vmem:[%s30466_s3 + $0x158c] ss:$16 sps:$4 sm:$0xff]  }
 0x8b7   :  { %13044 = vmatmul.mubr.bf16.gmra.mrb[192].mxu1 %v21851_v14  ;;  %13084 = vmatprep.mubr.bf16.mxu0 %v30820_v13  ;;  %v21875_v14 = vld [vmem:[%s30466_s3 + $0x1584] ss:$16 sps:$4 sm:$0xff]  }
 0x8b8   :  { %13065 = vmatpush1.bf16.msra.mxu0 %v21853_v42  ;;  %13226 = vmatprep.mubr.bf16.mxu1 %v30820_v13  ;;  %v21877_v13 = vld [vmem:[%s30466_s3 + $0x1580] ss:$16 sps:$4 sm:$0xff]   ;;  %v21878_v42 = vld [vmem:[%s30466_s3 + $0x1588] ss:$16 sps:$4 sm:$0xff]  }
 0x8b9   :  { %13207 = vmatpush1.bf16.msra.mxu1 %v21854_v63  ;;  %13066 = vmatprep.subr.bf16.mxu0 %v21855_v37  ;;  %v21879_v63 = vld [vmem:[%s30466_s3 + $0x15a4] ss:$16 sps:$4 sm:$0xff]   ;;  %v21880_v37 = vld [vmem:[%s30466_s3 + $0x15ac] ss:$16 sps:$4 sm:$0xff]  }
 0x8ba   :  { %13208 = vmatprep.subr.bf16.mxu1 %v21856_v4  ;;  %v21881_v4 = vld [vmem:[%s30466_s3 + $0x15a0] ss:$16 sps:$4 sm:$0xff]  }
 0x8bc   :  { %13067 = vmatpush1.bf16.msra.mxu0 %v21857_v5  ;;  %v21882_v5 = vld [vmem:[%s30466_s3 + $0x15a8] ss:$16 sps:$4 sm:$0xff]  }
 0x8bd   :  { %13209 = vmatpush1.bf16.msra.mxu1 %v21858_v9  ;;  %13068 = vmatprep.subr.bf16.mxu0 %v21859_v34  ;;  %v21883_v9 = vld [vmem:[%s30466_s3 + $0x15c4] ss:$16 sps:$4 sm:$0xff]   ;;  %v21884_v34 = vld [vmem:[%s30466_s3 + $0x15cc] ss:$16 sps:$4 sm:$0xff]  }
 0x8be   :  { %13210 = vmatprep.subr.bf16.mxu1 %v21860_v39  ;;  %v21885_v39 = vld [vmem:[%s30466_s3 + $0x15c0] ss:$16 sps:$4 sm:$0xff]  }
 0x8c0   :  { %13069 = vmatpush1.bf16.msra.mxu0 %v21861_v0  ;;  %v21886_v0 = vld [vmem:[%s30466_s3 + $0x15c8] ss:$16 sps:$4 sm:$0xff]  }
 0x8c1   :  { %13211 = vmatpush1.bf16.msra.mxu1 %v21862_v6  ;;  %13070 = vmatprep.subr.bf16.mxu0 %v21863_v27  ;;  %v21887_v6 = vld [vmem:[%s30466_s3 + $0x15e4] ss:$16 sps:$4 sm:$0xff]   ;;  %v21888_v27 = vld [vmem:[%s30466_s3 + $0x15ec] ss:$16 sps:$4 sm:$0xff]  }
 0x8c2   :  { %13212 = vmatprep.subr.bf16.mxu1 %v21864_v28  ;;  %v21889_v28 = vld [vmem:[%s30466_s3 + $0x15e0] ss:$16 sps:$4 sm:$0xff]  }
 0x8c4   :  { %13071 = vmatpush1.bf16.msra.mxu0 %v21865_v31  ;;  %v21890_v31 = vld [vmem:[%s30466_s3 + $0x15e8] ss:$16 sps:$4 sm:$0xff]  }
 0x8c5   :  { %13213 = vmatpush1.bf16.msra.mxu1 %v21866_v8  ;;  %13072 = vmatprep.subr.bf16.mxu0 %v21867_v49  ;;  %v21891_v8 = vld [vmem:[%s30466_s3 + $0x1604] ss:$16 sps:$4 sm:$0xff]   ;;  %v21892_v49 = vld [vmem:[%s30466_s3 + $0x160c] ss:$16 sps:$4 sm:$0xff]  }
 0x8c6   :  { %13214 = vmatprep.subr.bf16.mxu1 %v21868_v44  ;;  %v21893_v44 = vld [vmem:[%s30466_s3 + $0x1600] ss:$16 sps:$4 sm:$0xff]  }
 0x8c8   :  { %13073 = vmatpush1.bf16.msra.mxu0 %v21869_v45  ;;  %v21894_v45 = vld [vmem:[%s30466_s3 + $0x1608] ss:$16 sps:$4 sm:$0xff]  }
 0x8c9   :  { %13215 = vmatpush1.bf16.msra.mxu1 %v21870_v7  ;;  %13074 = vmatprep.subr.bf16.mxu0 %v21871_v33  ;;  %v21895_v7 = vld [vmem:[%s30466_s3 + $0x1624] ss:$16 sps:$4 sm:$0xff]   ;;  %v21897_v33 = vld [vmem:[%s30466_s3 + $0x1620] ss:$16 sps:$4 sm:$0xff]  }
 0x8ca   :  { %13216 = vmatprep.subr.bf16.mxu1 %v21872_v36  ;;  %v21899_v36 = vld [vmem:[%s30466_s3 + $0x1644] ss:$16 sps:$4 sm:$0xff]  }
 0x8cc   :  { %13075 = vmatpush1.bf16.msra.mxu0 %v21873_v30  ;;  %v21900_v30 = vld [vmem:[%s30466_s3 + $0x164c] ss:$16 sps:$4 sm:$0xff]  }
 0x8cd   :  { %13217 = vmatpush1.bf16.msra.mxu1 %v21874_v57  ;;  %13076 = vmatprep.subr.bf16.mxu0 %v21875_v14  ;;  %v21901_v57 = vld [vmem:[%s30466_s3 + $0x1640] ss:$16 sps:$4 sm:$0xff]   ;;  %v21902_v14 = vld [vmem:[%s30466_s3 + $0x1648] ss:$16 sps:$4 sm:$0xff]  }
 0x8ce   :  { %13218 = vmatprep.subr.bf16.mxu1 %v21876_v46  ;;  %v21903_v46 = vld [vmem:[%s30466_s3 + $0x1664] ss:$16 sps:$4 sm:$0xff]  }
 0x8d0   :  { %13077 = vmatpush1.bf16.msra.mxu0 %v21877_v13  ;;  %v21905_v13 = vld [vmem:[%s30466_s3 + $0x1660] ss:$16 sps:$4 sm:$0xff]  }
 0x8d1   :  { %13219 = vmatpush1.bf16.msra.mxu1 %v21878_v42  ;;  %13078 = vmatprep.subr.bf16.mxu0 %v21879_v63  ;;  %v21907_v42 = vld [vmem:[%s30466_s3 + $0x1684] ss:$16 sps:$4 sm:$0xff]  }
 0x8d2   :  { %13220 = vmatprep.subr.bf16.mxu1 %v21880_v37  ;;  %v30821_v63 = vld [vmem:[#allocation6_spill] sm:$0xff]  ;;  %v21908_v37 = vld [vmem:[%s30466_s3 + $0x168c] ss:$16 sps:$4 sm:$0xff]  }
 0x8d4   :  { %13079 = vmatpush1.bf16.msra.mxu0 %v21881_v4  ;;  %v30822_v4 = vld [vmem:[#allocation42_spill] sm:$0xff] }
 0x8d5   :  { %13221 = vmatpush1.bf16.msra.mxu1 %v21882_v5  ;;  %13080 = vmatprep.subr.bf16.mxu0 %v21883_v9  ;;  %v21909_v5 = vld [vmem:[%s30466_s3 + $0x1680] ss:$16 sps:$4 sm:$0xff]   ;;  %v21910_v9 = vld [vmem:[%s30466_s3 + $0x1688] ss:$16 sps:$4 sm:$0xff]  }
 0x8d6   :  { %13222 = vmatprep.subr.bf16.mxu1 %v21884_v34  ;;  %v21911_v34 = vld [vmem:[%s30466_s3 + $0x16a4] ss:$16 sps:$4 sm:$0xff]  }
 0x8d8   :  { %13081 = vmatpush1.bf16.msra.mxu0 %v21885_v39  ;;  %v21912_v39 = vld [vmem:[%s30466_s3 + $0x16ac] ss:$16 sps:$4 sm:$0xff]  }
 0x8d9   :  { %13223 = vmatpush1.bf16.msra.mxu1 %v21886_v0  ;;  %13082 = vmatprep.subr.bf16.mxu0 %v21887_v6  ;;  %v21913_v0 = vld [vmem:[%s30466_s3 + $0x16a0] ss:$16 sps:$4 sm:$0xff]   ;;  %v21914_v6 = vld [vmem:[%s30466_s3 + $0x16a8] ss:$16 sps:$4 sm:$0xff]  }
 0x8da   :  { %13224 = vmatprep.subr.bf16.mxu1 %v21888_v27  ;;  %v21915_v27 = vld [vmem:[%s30466_s3 + $0x16c4] ss:$16 sps:$4 sm:$0xff]  }
 0x8dc   :  { %13083 = vmatpush1.bf16.msra.mxu0 %v21889_v28  ;;  %v30823_v28 = vld [vmem:[#allocation43_spill] sm:$0xff] }
 0x8dd   :  { %13225 = vmatpush1.bf16.msra.mxu1 %v21890_v31  ;;  %13123 = vmatprep.subr.bf16.mxu0 %v21891_v8  ;;  %v21916_v31 = vld [vmem:[%s30466_s3 + $0x16cc] ss:$16 sps:$4 sm:$0xff]   ;;  %v30824_v8 = vld [vmem:[#allocation8_spill] sm:$0xff] }
 0x8de   :  { %13265 = vmatprep.subr.bf16.mxu1 %v21892_v49  ;;  %v21917_v49 = vld [vmem:[%s30466_s3 + $0x16c0] ss:$16 sps:$4 sm:$0xff]  }
 0x8df   :  { %13085 = vmatmul.mubr.bf16.vlgmr.msra.gmra.mrb[176].mxu0 %v27994_v20 }
 0x8e0   :  { %13227 = vmatmul.mubr.bf16.vlgmr.msra.gmra.mrb[180].mxu1 %v27994_v20  ;;  %13094 = vmatprep.mubr.bf16.mxu0 %v28003_v21  ;;  %v21896_v20 = vld [vmem:[%s30466_s3 + $0x162c] ss:$16 sps:$4 sm:$0xff]  }
 0x8e1   :  { %13124 = vmatpush1.bf16.msra.mxu0 %v21893_v44  ;;  %13236 = vmatprep.mubr.bf16.mxu1 %v28003_v21  ;;  %v21898_v21 = vld [vmem:[%s30466_s3 + $0x1628] ss:$16 sps:$4 sm:$0xff]  }
 0x8e2   :  { %13266 = vmatpush1.bf16.msra.mxu1 %v21894_v45  ;;  %13125 = vmatprep.subr.bf16.mxu0 %v21895_v7  ;;  %v21918_v44 = vld [vmem:[%s30466_s3 + $0x16c8] ss:$16 sps:$4 sm:$0xff]   ;;  %v21919_v45 = vld [vmem:[%s30466_s3 + $0x16e4] ss:$16 sps:$4 sm:$0xff]   ;;  %v21920_v7 = vld [vmem:[%s30466_s3 + $0x16ec] ss:$16 sps:$4 sm:$0xff]  }
 0x8e3   :  { %13267 = vmatprep.subr.bf16.mxu1 %v21896_v20  ;;  %v21921_v20 = vld [vmem:[%s30466_s3 + $0x16e0] ss:$16 sps:$4 sm:$0xff]  }
 0x8e5   :  { %13126 = vmatpush1.bf16.msra.mxu0 %v21897_v33  ;;  %v21922_v33 = vld [vmem:[%s30466_s3 + $0x16e8] ss:$16 sps:$4 sm:$0xff]  }
 0x8e6   :  { %13268 = vmatpush1.bf16.msra.mxu1 %v21898_v21  ;;  %13127 = vmatprep.subr.bf16.mxu0 %v21899_v36  ;;  %v21923_v21 = vld [vmem:[%s30466_s3 + $0x1704] ss:$16 sps:$4 sm:$0xff]   ;;  %v21924_v36 = vld [vmem:[%s30466_s3 + $0x170c] ss:$16 sps:$4 sm:$0xff]  }
 0x8e7   :  { %13095 = vmatmul.mubr.bf16.gmra.mrb[180].mxu0 %v28030_v51  ;;  %13269 = vmatprep.subr.bf16.mxu1 %v21900_v30  ;;  %v21925_v30 = vld [vmem:[%s30466_s3 + $0x1700] ss:$16 sps:$4 sm:$0xff]  }
 0x8e8   :  { %13237 = vmatmul.mubr.bf16.gmra.mrb[184].mxu1 %v28030_v51  ;;  %13104 = vmatprep.mubr.bf16.mxu0 %v28041_v25  ;;  %v21904_v51 = vld [vmem:[%s30466_s3 + $0x166c] ss:$16 sps:$4 sm:$0xff]  }
 0x8e9   :  { %13128 = vmatpush1.bf16.msra.mxu0 %v21901_v57  ;;  %13246 = vmatprep.mubr.bf16.mxu1 %v28041_v25  ;;  %v21906_v25 = vld [vmem:[%s30466_s3 + $0x1668] ss:$16 sps:$4 sm:$0xff]  }
 0x8ea   :  { %13270 = vmatpush1.bf16.msra.mxu1 %v21902_v14  ;;  %13129 = vmatprep.subr.bf16.mxu0 %v21903_v46  ;;  %v21926_v57 = vld [vmem:[%s30466_s3 + $0x1708] ss:$16 sps:$4 sm:$0xff]   ;;  %v21927_v14 = vld [vmem:[%s30466_s3 + $0x1724] ss:$16 sps:$4 sm:$0xff]   ;;  %v21928_v46 = vld [vmem:[%s30466_s3 + $0x172c] ss:$16 sps:$4 sm:$0xff]  }
 0x8eb   :  { %13271 = vmatprep.subr.bf16.mxu1 %v21904_v51  ;;  %v21929_v51 = vld [vmem:[%s30466_s3 + $0x1720] ss:$16 sps:$4 sm:$0xff]  }
 0x8ed   :  { %13130 = vmatpush1.bf16.msra.mxu0 %v21905_v13  ;;  %v21930_v13 = vld [vmem:[%s30466_s3 + $0x1728] ss:$16 sps:$4 sm:$0xff]  }
 0x8ee   :  { %13272 = vmatpush1.bf16.msra.mxu1 %v21906_v25  ;;  %13131 = vmatprep.subr.bf16.mxu0 %v21907_v42  ;;  %v21931_v25 = vld [vmem:[%s30466_s3 + $0x1744] ss:$16 sps:$4 sm:$0xff]   ;;  %v21932_v42 = vld [vmem:[%s30466_s3 + $0x174c] ss:$16 sps:$4 sm:$0xff]  }
 0x8ef   :  { %13105 = vmatmul.mubr.bf16.gmra.mrb[184].mxu0 %v30821_v63  ;;  %13273 = vmatprep.subr.bf16.mxu1 %v21908_v37  ;;  %v21934_v37 = vld [vmem:[%s30466_s3 + $0x1748] ss:$16 sps:$4 sm:$0xff]  }
 0x8f0   :  { %13247 = vmatmul.mubr.bf16.gmra.mrb[188].mxu1 %v30821_v63  ;;  %13114 = vmatprep.mubr.bf16.mxu0 %v30822_v4  ;;  %v21933_v63 = vld [vmem:[%s30466_s3 + $0x1740] ss:$16 sps:$4 sm:$0xff]  }
 0x8f1   :  { %13132 = vmatpush1.bf16.msra.mxu0 %v21909_v5  ;;  %13256 = vmatprep.mubr.bf16.mxu1 %v30822_v4  ;;  %v21935_v4 = vld [vmem:[%s30466_s3 + $0x1764] ss:$16 sps:$4 sm:$0xff]   ;;  %v21936_v5 = vld [vmem:[%s30466_s3 + $0x176c] ss:$16 sps:$4 sm:$0xff]  }
 0x8f2   :  { %13274 = vmatpush1.bf16.msra.mxu1 %v21910_v9  ;;  %13133 = vmatprep.subr.bf16.mxu0 %v21911_v34  ;;  %v21937_v9 = vld [vmem:[%s30466_s3 + $0x1760] ss:$16 sps:$4 sm:$0xff]   ;;  %v21938_v34 = vld [vmem:[%s30466_s3 + $0x1768] ss:$16 sps:$4 sm:$0xff]  }
 0x8f3   :  { %13275 = vmatprep.subr.bf16.mxu1 %v21912_v39  ;;  %v21939_v39 = vld [vmem:[%s30466_s3 + $0x1784] ss:$16 sps:$4 sm:$0xff]  }
 0x8f5   :  { %13134 = vmatpush1.bf16.msra.mxu0 %v21913_v0  ;;  %v21940_v0 = vld [vmem:[%s30466_s3 + $0x178c] ss:$16 sps:$4 sm:$0xff]  }
 0x8f6   :  { %13276 = vmatpush1.bf16.msra.mxu1 %v21914_v6  ;;  %13135 = vmatprep.subr.bf16.mxu0 %v21915_v27  ;;  %v21941_v6 = vld [vmem:[%s30466_s3 + $0x1780] ss:$16 sps:$4 sm:$0xff]   ;;  %v21942_v27 = vld [vmem:[%s30466_s3 + $0x1788] ss:$16 sps:$4 sm:$0xff]  }
 0x8f7   :  { %13115 = vmatmul.mubr.bf16.gmra.mrb[188].mxu0 %v30823_v28  ;;  %13277 = vmatprep.subr.bf16.mxu1 %v21916_v31  ;;  %v21944_v31 = vld [vmem:[%s30466_s3 + $0x17ac] ss:$16 sps:$4 sm:$0xff]  }
 0x8f8   :  { %13257 = vmatmul.mubr.bf16.gmra.mrb[192].mxu1 %v30823_v28  ;;  %13155 = vmatprep.mubr.bf16.mxu0 %v30824_v8  ;;  %v21943_v28 = vld [vmem:[%s30466_s3 + $0x17a4] ss:$16 sps:$4 sm:$0xff]  }
 0x8f9   :  { %13136 = vmatpush1.bf16.msra.mxu0 %v21917_v49  ;;  %13297 = vmatprep.mubr.bf16.mxu1 %v30824_v8  ;;  %v21945_v8 = vld [vmem:[%s30466_s3 + $0x17a0] ss:$16 sps:$4 sm:$0xff]   ;;  %v21946_v49 = vld [vmem:[%s30466_s3 + $0x17a8] ss:$16 sps:$4 sm:$0xff]  }
 0x8fa   :  { %13278 = vmatpush1.bf16.msra.mxu1 %v21918_v44  ;;  %13137 = vmatprep.subr.bf16.mxu0 %v21919_v45  ;;  %v21947_v44 = vld [vmem:[%s30466_s3 + $0x17c4] ss:$16 sps:$4 sm:$0xff]   ;;  %v21948_v45 = vld [vmem:[%s30466_s3 + $0x17cc] ss:$16 sps:$4 sm:$0xff]  }
 0x8fb   :  { %13279 = vmatprep.subr.bf16.mxu1 %v21920_v7  ;;  %v20890_v7 = vld [vmem:[%s30467_s5 + $0x120] sm:$0xff]  }
 0x8fd   :  { %13138 = vmatpush1.bf16.msra.mxu0 %v21921_v20  ;;  %v21949_v20 = vld [vmem:[%s30466_s3 + $0x17c0] ss:$16 sps:$4 sm:$0xff]  }
 0x8fe   :  { %13280 = vmatpush1.bf16.msra.mxu1 %v21922_v33  ;;  %13139 = vmatprep.subr.bf16.mxu0 %v21923_v21  ;;  %v21950_v33 = vld [vmem:[%s30466_s3 + $0x17c8] ss:$16 sps:$4 sm:$0xff]   ;;  %v21951_v21 = vld [vmem:[%s30466_s3 + $0x17e4] ss:$16 sps:$4 sm:$0xff]  }
 0x8ff   :  { %13281 = vmatprep.subr.bf16.mxu1 %v21924_v36  ;;  %v21952_v36 = vld [vmem:[%s30466_s3 + $0x17ec] ss:$16 sps:$4 sm:$0xff]  }
 0x901   :  { %13140 = vmatpush1.bf16.msra.mxu0 %v21925_v30  ;;  %v20886_v30 = vld [vmem:[%s30467_s5 + $0x160] sm:$0xff]  }
 0x902   :  { %13282 = vmatpush1.bf16.msra.mxu1 %v21926_v57  ;;  %13141 = vmatprep.subr.bf16.mxu0 %v21927_v14  ;;  %v21953_v57 = vld [vmem:[%s30466_s3 + $0x17e0] ss:$16 sps:$4 sm:$0xff]  }
 0x903   :  { %13283 = vmatprep.subr.bf16.mxu1 %v21928_v46  ;;  %v20891_v14 = vld [vmem:[%s30467_s5 + $0xe0] sm:$0xff]   ;;  %v21954_v46 = vld [vmem:[%s30466_s3 + $0x17e8] ss:$16 sps:$4 sm:$0xff]  }
 0x905   :  { %13142 = vmatpush1.bf16.msra.mxu0 %v21929_v51  ;;  %v20893_v51 = vld [vmem:[%s30467_s5 + $0x128] sm:$0xff]  }
 0x906   :  { %13284 = vmatpush1.bf16.msra.mxu1 %v21930_v13  ;;  %13143 = vmatprep.subr.bf16.mxu0 %v21931_v25  ;;  %v30825_v13 = vmov 0   ;;  %v20887_v25 = vld [vmem:[%s30467_s5 + $0x168] sm:$0xff]  }
 0x907   :  { %13285 = vmatprep.subr.bf16.mxu1 %v21932_v42  ;;  %v20894_v42 = vld [vmem:[%s30467_s5 + $0xe8] sm:$0xff]  }
 0x909   :  { %13144 = vmatpush1.bf16.msra.mxu0 %v21933_v63  ;;  %v20896_v63 = vld [vmem:[%s30467_s5 + $0x130] sm:$0xff]  }
 0x90a   :  { %13286 = vmatpush1.bf16.msra.mxu1 %v21934_v37  ;;  %13145 = vmatprep.subr.bf16.mxu0 %v21935_v4  ;;  %v20897_v37 = vld [vmem:[%s30467_s5 + $0xf0] sm:$0xff]   ;;  %v20889_v4 = vld [vmem:[%s30467_s5 + $0x178] sm:$0xff]  }
 0x90b   :  { %13287 = vmatprep.subr.bf16.mxu1 %v21936_v5  ;;  %v20900_v5 = vld [vmem:[%s30467_s5 + $0xf8] sm:$0xff]  }
 0x90d   :  { %13146 = vmatpush1.bf16.msra.mxu0 %v21937_v9  ;;  %v20902_v9 = vld [vmem:[%s30467_s5 + $0x140] sm:$0xff]  }
 0x90e   :  { %13288 = vmatpush1.bf16.msra.mxu1 %v21938_v34  ;;  %13147 = vmatprep.subr.bf16.mxu0 %v21939_v39  ;;  %v20903_v34 = vld [vmem:[%s30467_s5 + $0x100] sm:$0xff]   ;;  %v20898_v39 = vld [vmem:[%s30467_s5 + $0x190] sm:$0xff]  }
 0x90f   :  { %13289 = vmatprep.subr.bf16.mxu1 %v21940_v0  ;;  %v20905_v0 = vld [vmem:[%s30467_s5 + $0x148] sm:$0xff]  }
 0x911   :  { %13148 = vmatpush1.bf16.msra.mxu0 %v21941_v6  ;;  %v20907_v6 = vld [vmem:[%s30467_s5 + $0x1a8] sm:$0xff]  }
 0x912   :  { %13290 = vmatpush1.bf16.msra.mxu1 %v21942_v27  ;;  %13149 = vmatprep.subr.bf16.mxu0 %v21943_v28  ;;  %v20908_v27 = vld [vmem:[%s30467_s5 + $0x150] sm:$0xff]  }
 0x913   :  { %13291 = vmatprep.subr.bf16.mxu1 %v21944_v31  ;;  %v20909_v28 = vld [vmem:[%s30467_s5 + $0x110] sm:$0xff]  }
 0x914   :  { %v20910_v31 = vld [vmem:[%s30467_s5 + $0x1b0] sm:$0xff]  }
 0x915   :  { %13150 = vmatpush1.bf16.msra.mxu0 %v21945_v8  ;;  %v20911_v8 = vld [vmem:[%s30467_s5 + $0x158] sm:$0xff]  }
 0x916   :  { %13292 = vmatpush1.bf16.msra.mxu1 %v21946_v49  ;;  %13151 = vmatprep.subr.bf16.mxu0 %v21947_v44  ;;  %v20912_v49 = vld [vmem:[%s30467_s5 + $0x118] sm:$0xff]  }
 0x917   :  { %13293 = vmatprep.subr.bf16.mxu1 %v21948_v45  ;;  %v20913_v44 = vld [vmem:[%s30467_s5 + $0x1b8] sm:$0xff]   ;;  %v20914_v45 = vld [vmem:[%s30467_s5 + $0x40] sm:$0xff]  }
 0x919   :  { %13152 = vmatpush1.bf16.msra.mxu0 %v21949_v20  ;;  %v30826_v20 = vld [vmem:[#allocation21_spill] sm:$0xff] }
 0x91a   :  { %13294 = vmatpush1.bf16.msra.mxu1 %v21950_v33  ;;  %13153 = vmatprep.subr.bf16.mxu0 %v21951_v21  ;;  %v30827_v33 = vsub.s32 0, %v30826_v20 }
 0x91b   :  { %13295 = vmatprep.subr.bf16.mxu1 %v21952_v36 }
 0x91d   :  { %13154 = vmatpush1.bf16.msra.mxu0 %v21953_v57 }
 0x91e   :  { %13296 = vmatpush1.bf16.msra.mxu1 %v21954_v46  ;;  %18237 = vmatprep.subr.bf16.mxu0 %v20890_v7  ;;  %v81_v7 = vld [vmem:[%s30468_s4] sm:$0xf] }
 0x91f   :  { %13821 = vmatprep.subr.bf16.mxu1 %v30825_v13  ;;  %v29729_v21 = vrot.slane %v81_v7, %v30827_v33 }
 0x920   :  { %13156 = vmatmul.mubr.bf16.vlgmr.msra.gmra.mrb[176].mxu0 %v28234_v40 }
 0x921   :  { %13298 = vmatmul.mubr.bf16.vlgmr.msra.gmra.mrb[180].mxu1 %v28234_v40  ;;  %13165 = vmatprep.mubr.bf16.mxu0 %v28243_v35  ;;  %v20888_v40 = vld [vmem:[%s30467_s5 + $0x170] sm:$0xff]  }
 0x922   :  { %13307 = vmatprep.mubr.bf16.mxu1 %v28243_v35  ;;  %13822 = vmatpush1.bf16.msra.mxu1 %v20886_v30  ;;  %v20899_v35 = vld [vmem:[%s30467_s5 + $0x138] sm:$0xff]   ;;  %v30828_v30 = vsub.s32 2, %v30826_v20 }
 0x923   :  { %13823 = vmatprep.subr.bf16.mxu1 %v30825_v13  ;;  %18238 = vmatpush3.bf16.msra.mxu0 %v20891_v14  ;;  %v30829_v14 = vsub.s32 1, %v30826_v20 }
 0x924   :  { %18239 = vmatprep.subr.bf16.mxu0 %v20893_v51  ;;  %v29733_v57 = vrot.slane %v81_v7, %v30828_v30 }
 0x925   :  { %v29737_v46 = vrot.slane %v81_v7, %v30829_v14 }
 0x926   :  { %13824 = vmatpush1.bf16.msra.mxu1 %v20887_v25 }
 0x927   :  { %13825 = vmatprep.subr.bf16.mxu1 %v30825_v13  ;;  %18240 = vmatpush3.bf16.msra.mxu0 %v20894_v42 }
 0x928   :  { %13166 = vmatmul.mubr.bf16.gmra.mrb[180].mxu0 %v28270_v50  ;;  %18241 = vmatprep.subr.bf16.mxu0 %v20896_v63  ;;  %v30830_v63 = vsub.s32 3, %v30826_v20 }
 0x929   :  { %13308 = vmatmul.mubr.bf16.gmra.mrb[184].mxu1 %v28270_v50  ;;  %13175 = vmatprep.mubr.bf16.mxu0 %v28281_v2  ;;  %v20892_v50 = vld [vmem:[%s30467_s5 + $0x180] sm:$0xff]  }
 0x92a   :  { %13317 = vmatprep.mubr.bf16.mxu1 %v28281_v2  ;;  %13826 = vmatpush1.bf16.msra.mxu1 %v20888_v40  ;;  %v20895_v2 = vld [vmem:[%s30467_s5 + $0x188] sm:$0xff]   ;;  %v29742_v40 = vrot.slane %v81_v7, %v30830_v63 }
 0x92b   :  { %13827 = vmatprep.subr.bf16.mxu1 %v30825_v13  ;;  %18242 = vmatpush3.bf16.msra.mxu0 %v20897_v37 }
 0x92c   :  { %18243 = vmatprep.subr.bf16.mxu0 %v20899_v35 }
 0x92e   :  { %13828 = vmatpush1.bf16.msra.mxu1 %v20889_v4 }
 0x92f   :  { %13829 = vmatprep.subr.bf16.mxu1 %v30825_v13  ;;  %18244 = vmatpush3.bf16.msra.mxu0 %v20900_v5 }
 0x930   :  { %13176 = vmatmul.mubr.bf16.gmra.mrb[184].mxu0 %v28308_v59  ;;  %18245 = vmatprep.subr.bf16.mxu0 %v20902_v9 }
 0x931   :  { %13318 = vmatmul.mubr.bf16.gmra.mrb[188].mxu1 %v28308_v59  ;;  %13185 = vmatprep.mubr.bf16.mxu0 %v28261_v47  ;;  %v20901_v59 = vld [vmem:[%s30467_s5 + $0x198] sm:$0xff]  }
 0x932   :  { %13327 = vmatprep.mubr.bf16.mxu1 %v28261_v47  ;;  %13830 = vmatpush1.bf16.msra.mxu1 %v20892_v50  ;;  %v20904_v47 = vld [vmem:[%s30467_s5 + $0x1a0] sm:$0xff]  }
 0x933   :  { %13831 = vmatprep.subr.bf16.mxu1 %v30825_v13  ;;  %18246 = vmatpush3.bf16.msra.mxu0 %v20903_v34 }
 0x934   :  { %18247 = vmatprep.subr.bf16.mxu0 %v20905_v0 }
 0x936   :  { %13832 = vmatpush1.bf16.msra.mxu1 %v20895_v2 }
 0x937   :  { %13833 = vmatprep.subr.bf16.mxu1 %v30825_v13 }
 0x938   :  { %13186 = vmatmul.mubr.bf16.gmra.mrb[188].mxu0 %v28295_v1 }
 0x939   :  { %13328 = vmatmul.mubr.bf16.gmra.mrb[192].mxu1 %v28295_v1  ;;  %v20906_v1 = vld [vmem:[%s30467_s5 + $0x108] sm:$0xff]  }
 0x93a   :  { %13834 = vmatpush1.bf16.msra.mxu1 %v20898_v39  ;;  %18248 = vmatpush3.bf16.msra.mxu0 %v20906_v1 }
 0x93b   :  { %13835 = vmatprep.subr.bf16.mxu1 %v30825_v13  ;;  %18249 = vmatprep.subr.bf16.mxu0 %v20908_v27 }
 0x93e   :  { %13836 = vmatpush1.bf16.msra.mxu1 %v20901_v59  ;;  %18250 = vmatpush3.bf16.msra.mxu0 %v20909_v28 }
 0x93f   :  { %13837 = vmatprep.subr.bf16.mxu1 %v30825_v13  ;;  %18251 = vmatprep.subr.bf16.mxu0 %v20911_v8 }
 0x942   :  { %13838 = vmatpush1.bf16.msra.mxu1 %v20904_v47  ;;  %18252 = vmatpush3.bf16.msra.mxu0 %v20912_v49 }
 0x943   :  { %13839 = vmatprep.subr.bf16.mxu1 %v30825_v13  ;;  %18259 = vmatprep.subr.bf16.mxu0 %v20914_v45 }
 0x946   :  { %13840 = vmatpush1.bf16.msra.mxu1 %v20907_v6 }
 0x947   :  { %13841 = vmatprep.subr.bf16.mxu1 %v30825_v13 }
 0x94a   :  { %13842 = vmatpush1.bf16.msra.mxu1 %v20910_v31 }
 0x94b   :  { %13843 = vmatprep.subr.bf16.mxu1 %v30825_v13 }
 0x94e   :  { %13844 = vmatpush1.bf16.msra.mxu1 %v20913_v44 }
 0x94f   :  { %14072 = vmatprep.subr.bf16.mxu1 %v30825_v13 }
 0x9f3   :  { %v13157_v36 = vpop.f32.mrb[176].mxu0 }
 0x9f4   :  { %v13364_v51 = vmax.f32 %v28933_v43, %v13157_v36  ;;  %v13299_v25 = vpop.f32.mrb[180].mxu1  ;;  %v13159_v42 = vpop.f32.mrb[177].mxu0 }
 0x9f5   :  { %v13366_v37 = vmax.f32 %v28941_v24, %v13299_v25  ;;  %v13365_v35 = vmax.f32 %v28946_v23, %v13159_v42  ;;  %v13301_v4 = vpop.f32.mrb[181].mxu1  ;;  %v13161_v5 = vpop.f32.mrb[178].mxu0 }
 0x9f6   :  { %v13413_v9 = vadd.f32 %v29729_v21, %v13364_v51  ;;  %v13367_v50 = vmax.f32 %v28954_v60, %v13301_v4  ;;  %v13368_v34 = vmax.f32 %v28962_v16, %v13161_v5  ;;  %v13303_v2 = vpop.f32.mrb[182].mxu1  ;;  %v13163_v43 = vpop.f32.mrb[179].mxu0 }
 0x9f7   :  { %v13415_v39 = vadd.f32 %v29733_v57, %v13366_v37  ;;  %v13414_v59 = vadd.f32 %v29737_v46, %v13365_v35  ;;  %v13370_v47 = vmax.f32 %v28970_v62, %v13303_v2  ;;  %v13369_v24 = vmax.f32 %v28975_v29, %v13163_v43  ;;  %v13305_v0 = vpop.f32.mrb[183].mxu1  ;;  %v20916_v43 = vld [vmem:[%s30467_s5 + $0x80] sm:$0xff]  }
 0x9f8   :  { %v13416_v23 = vadd.f32 %v29742_v40, %v13367_v50  ;;  %v13417_v1 = vadd.f32 %v29729_v21, %v13368_v34  ;;  %v13371_v6 = vmax.f32 %v28980_v53, %v13305_v0  ;;  %v13441_v27 = vmax.f32 %v13413_v9, 0.0 }
 0x9f9   :  { %v13419_v60 = vadd.f32 %v29733_v57, %v13370_v47  ;;  %v13418_v16 = vadd.f32 %v29737_v46, %v13369_v24  ;;  %v13443_v8 = vmax.f32 %v13415_v39, 0.0  ;;  %v13442_v49 = vmax.f32 %v13414_v59, 0.0 }
 0x9fa   :  { %v13445_v28 = vmax.f32 %v13417_v1, 0.0  ;;  %v13420_v31 = vadd.f32 %v29742_v40, %v13371_v6  ;;  %v13444_v45 = vmax.f32 %v13416_v23, 0.0 }
 0x9fb   :  { %v13447_v62 = vmax.f32 %v13419_v60, 0.0  ;;  %v13446_v44 = vmax.f32 %v13418_v16, 0.0  ;;  %v13167_v29 = vpop.f32.mrb[180].mxu0  ;;  %v20917_v16 = vld [vmem:[%s30467_s5 + $0x48] sm:$0xff]  }
 0x9fc   :  { %v29759_v7 = vpack.c.bf16 %v13445_v28, %v13441_v27  ;;  %v13448_v20 = vmax.f32 %v13420_v31, 0.0  ;;  %v13372_v33 = vmax.f32 %v28997_v26, %v13167_v29  ;;  %v13309_v53 = vpop.f32.mrb[184].mxu1  ;;  %v13169_v36 = vpop.f32.mrb[181].mxu0 }
 0x9fd   :  { %v29762_v30 = vpack.c.bf16 %v13447_v62, %v13443_v8  ;;  %v13470_v14 = vpack.c.bf16 %v13446_v44, %v13442_v49  ;;  %v13374_v51 = vmax.f32 %v29005_v22, %v13309_v53  ;;  %v13373_v25 = vmax.f32 %v29010_v32, %v13169_v36  ;;  %v13311_v42 = vpop.f32.mrb[185].mxu1  ;;  %v13171_v63 = vpop.f32.mrb[182].mxu0  ;;  %v20919_v62 = vld [vmem:[%s30467_s5 + $0x88] sm:$0xff]  }
 0x9fe   :  { %v13472_v37 = vpack.c.bf16 %v13448_v20, %v13444_v45  ;;  %v13421_v35 = vadd.f32 %v29729_v21, %v13372_v33  ;;  %v13375_v4 = vmax.f32 %v29018_v10, %v13311_v42  ;;  %v13313_v5 = vpop.f32.mrb[186].mxu1  ;;  %v13173_v9 = vpop.f32.mrb[183].mxu0  ;;  %v13376_v50 = vmax.f32 %v29026_v15, %v13171_v63 }
 0x9ff   :  { %v13423_v26 = vadd.f32 %v29733_v57, %v13374_v51  ;;  %v13315_v34 = vpop.f32.mrb[187].mxu1  ;;  %v13378_v32 = vmax.f32 %v29034_v55, %v13313_v5  ;;  %v13604_v39 = vrot.slane %v29762_v30, 4  ;;  %v13377_v59 = vmax.f32 %v29039_v61, %v13173_v9  ;;  %v20915_v55 = vld [vmem:[%s30467_s5] sm:$0xff]  }
 0xa00   :  { %v13605_v2 = vrot.slane %v13472_v37, 4  ;;  %v13424_v22 = vadd.f32 %v29742_v40, %v13375_v4  ;;  %v13425_v10 = vadd.f32 %v29729_v21, %v13376_v50  ;;  %v13602_v47 = vrot.slane %v29759_v7, 4 }
 0xa01   :  { %v13427_v15 = vadd.f32 %v29733_v57, %v13378_v32  ;;  %v13379_v24 = vmax.f32 %v29044_v38, %v13315_v34  ;;  %v13603_v0 = vrot.slane %v13470_v14, 4  ;;  %v13449_v23 = vmax.f32 %v13421_v35, 0.0 }
 0xa02   :  { %17772 = vmatprep.mubr.msk.bf16.mxu1 %vm13777_vm3, %v13605_v2  ;;  %v13422_v1 = vadd.f32 %v29737_v46, %v13373_v25  ;;  %v13453_v6 = vmax.f32 %v13425_v10, 0.0  ;;  %v13426_v60 = vadd.f32 %v29737_v46, %v13377_v59  ;;  %v13451_v38 = vmax.f32 %v13423_v26, 0.0  ;;  %v20922_v26 = vld [vmem:[%s30467_s5 + $0x90] sm:$0xff]  }
 0xa03   :  { %13854 = vmatmul.mubr.bf16.vlgmr.msra.gmra.mrb[196].mxu1 %v13604_v39  ;;  %v13177_v61 = vpop.f32.mrb[184].mxu0  ;;  %v13455_v27 = vmax.f32 %v13427_v15, 0.0  ;;  %v13428_v28 = vadd.f32 %v29742_v40, %v13379_v24  ;;  %13813 = vmatprep.mubr.bf16.mxu0 %v13603_v0  ;;  %v13452_v44 = vmax.f32 %v13424_v22, 0.0 }
 0xa04   :  { %14073 = vmatpush1.bf16.msra.mxu1 %v20916_v43  ;;  %v13380_v31 = vmax.f32 %v29061_v52, %v13177_v61  ;;  %v13319_v8 = vpop.f32.mrb[188].mxu1  ;;  %v13179_v49 = vpop.f32.mrb[185].mxu0  ;;  %v29795_v29 = vpack.c.bf16 %v13453_v6, %v13449_v23  ;;  %13814 = vmatmul.mubr.bf16.vlgmr.msra.gmra.mrb[192].mxu0 %v13602_v47  ;;  %v13450_v50 = vmax.f32 %v13422_v1, 0.0  ;;  %v20921_v43 = vld [vmem:[%s30467_s5 + $0x10] sm:$0xff]   ;;  %v20925_v1 = vld [vmem:[%s30467_s5 + $0x98] sm:$0xff]  }
 0xa05   :  { %v13382_v45 = vmax.f32 %v29069_v19, %v13319_v8  ;;  %17801 = vmatprep.mubr.msk.bf16.mxu1 %vm13777_vm3, %v13472_v37  ;;  %v13381_v20 = vmax.f32 %v29074_v11, %v13179_v49  ;;  %v13321_v33 = vpop.f32.mrb[189].mxu1  ;;  %v13181_v53 = vpop.f32.mrb[186].mxu0  ;;  %v29800_v36 = vpack.c.bf16 %v13455_v27, %v13451_v38  ;;  %v13456_v52 = vmax.f32 %v13428_v28, 0.0  ;;  %18260 = vmatpush3.bf16.msra.mxu0 %v20915_v55  ;;  %v20918_v19 = vld [vmem:[%s30467_s5 + $0x8] sm:$0xff]  }
 0xa06   :  { %v13429_v51 = vadd.f32 %v29729_v21, %v13380_v31  ;;  %14064 = vmatprep.mubr.bf16.mxu0 %v13470_v14  ;;  %v13383_v25 = vmax.f32 %v29082_v48, %v13321_v33  ;;  %v13323_v42 = vpop.f32.mrb[190].mxu1  ;;  %v13183_v63 = vpop.f32.mrb[187].mxu0  ;;  %v13454_v37 = vmax.f32 %v13426_v60, 0.0  ;;  %v13384_v4 = vmax.f32 %v29090_v54, %v13181_v53  ;;  %18261 = vmatprep.subr.bf16.mxu0 %v20917_v16  ;;  %v20920_v48 = vld [vmem:[%s30467_s5 + $0x50] sm:$0xff]  }
 0xa07   :  { %v13431_v11 = vadd.f32 %v29733_v57, %v13382_v45  ;;  %v13430_v35 = vadd.f32 %v29737_v46, %v13381_v20  ;;  %14074 = vmatprep.subr.bf16.mxu1 %v30825_v13  ;;  %v13325_v5 = vpop.f32.mrb[191].mxu1  ;;  %v29814_v14 = vpack.c.bf16 %v13456_v52, %v13452_v44  ;;  %v13386_v34 = vmax.f32 %v29098_v56, %v13323_v42  ;;  %v20923_v56 = vld [vmem:[%s30467_s5 + $0x58] sm:$0xff]   ;;  %v20927_v52 = vld [vmem:[%s30467_s5 + $0x20] sm:$0xff]   ;;  %v20932_v42 = vld [vmem:[%s30467_s5 + $0x70] sm:$0xff]  }
 0xa08   :  { %v13432_v9 = vadd.f32 %v29742_v40, %v13383_v25  ;;  %14075 = vmatpush1.bf16.msra.mxu1 %v20919_v62  ;;  %v13433_v54 = vadd.f32 %v29729_v21, %v13384_v4  ;;  %v13457_v2 = vmax.f32 %v13429_v51, 0.0  ;;  %v13385_v22 = vmax.f32 %v29103_v12, %v13183_v63  ;;  %v20931_v51 = vld [vmem:[%s30467_s5 + $0xa8] sm:$0xff]   ;;  %v20934_v63 = vld [vmem:[%s30467_s5 + $0xb0] sm:$0xff]   ;;  %v20938_v4 = vld [vmem:[%s30467_s5 + $0x200] sm:$0xff]  }
 0xa09   :  { %14076 = vmatprep.subr.bf16.mxu1 %v30825_v13  ;;  %v13387_v32 = vmax.f32 %v29108_v17, %v13325_v5  ;;  %18262 = vmatpush3.bf16.msra.mxu0 %v20918_v19  ;;  %v13459_v39 = vmax.f32 %v13431_v11, 0.0  ;;  %v13435_v59 = vadd.f32 %v29733_v57, %v13386_v34  ;;  %v29832_v15 = vpack.c.bf16 %v13454_v37, %v13450_v50  ;;  %v20930_v25 = vld [vmem:[%s30467_s5 + $0x28] sm:$0xff]   ;;  %v20933_v19 = vld [vmem:[%s30467_s5 + $0x30] sm:$0xff]   ;;  %v20935_v37 = vld [vmem:[%s30467_s5 + $0x78] sm:$0xff]  }
 0xa0a   :  { %v13461_v10 = vmax.f32 %v13433_v54, 0.0  ;;  %18263 = vmatprep.subr.bf16.mxu0 %v20920_v48  ;;  %v13460_v12 = vmax.f32 %v13432_v9, 0.0  ;;  %v13434_v17 = vadd.f32 %v29737_v46, %v13385_v22  ;;  %v13458_v44 = vmax.f32 %v13430_v35, 0.0  ;;  %v20937_v11 = vld [vmem:[%s30467_s5 + $0xb8] sm:$0xff]   ;;  %v20939_v5 = vld [vmem:[%s30467_s5 + $0xc0] sm:$0xff]   ;;  %v20941_v9 = vld [vmem:[%s30467_s5 + $0x208] sm:$0xff]  }
 0xa0b   :  { %v13187_v47 = vpop.f32.mrb[188].mxu0  ;;  %v13436_v24 = vadd.f32 %v29742_v40, %v13387_v32  ;;  %v13463_v60 = vmax.f32 %v13435_v59, 0.0  ;;  %v20936_v35 = vld [vmem:[%s30467_s5 + $0x38] sm:$0xff]   ;;  %v20940_v48 = vld [vmem:[%s30467_s5 + $0x1c0] sm:$0xff]   ;;  %v20943_v50 = vld [vmem:[%s30467_s5 + $0x1c8] sm:$0xff]  }
 0xa0c   :  { %14077 = vmatpush1.bf16.msra.mxu1 %v20922_v26  ;;  %v13388_v0 = vmax.f32 %v29125_v41, %v13187_v47  ;;  %v13329_v55 = vpop.f32.mrb[192].mxu1  ;;  %v13189_v23 = vpop.f32.mrb[189].mxu0  ;;  %v29840_v6 = vpack.c.bf16 %v13461_v10, %v13457_v2  ;;  %v13462_v28 = vmax.f32 %v13434_v17, 0.0  ;;  %v20942_v26 = vld [vmem:[%s30467_s5 + $0xc8] sm:$0xff]   ;;  %v20944_v54 = vld [vmem:[%s30467_s5 + $0x210] sm:$0xff]   ;;  %v20947_v2 = vld [vmem:[%s30467_s5 + $0x218] sm:$0xff]  }
 0xa0d   :  { %v13390_v61 = vmax.f32 %v29133_v3, %v13329_v55  ;;  %v13389_v16 = vmax.f32 %v29138_v58, %v13189_v23  ;;  %v13331_v38 = vpop.f32.mrb[193].mxu1  ;;  %v13191_v27 = vpop.f32.mrb[190].mxu0  ;;  %14078 = vmatprep.subr.bf16.mxu1 %v30825_v13  ;;  %v13464_v31 = vmax.f32 %v13436_v24, 0.0  ;;  %18264 = vmatpush3.bf16.msra.mxu0 %v20921_v43  ;;  %v20924_v3 = vld [vmem:[%s30467_s5 + $0x18] sm:$0xff]   ;;  %v29852_v58 = vpack.c.bf16 %v13463_v60, %v13459_v39  ;;  %v20945_v34 = vld [vmem:[%s30467_s5 + $0xd0] sm:$0xff]   ;;  %v20951_v32 = vld [vmem:[%s30467_s5 + $0x2e0] sm:$0xff]  }
 0xa0e   :  { %v29846_v41 = vadd.f32 %v29729_v21, %v13388_v0  ;;  %v13391_v8 = vmax.f32 %v29146_v18, %v13331_v38  ;;  %v13333_v49 = vpop.f32.mrb[194].mxu1  ;;  %v13192_v62 = vpop.f32.mrb[191].mxu0  ;;  %18265 = vmatprep.subr.bf16.mxu0 %v20923_v56  ;;  %v20926_v18 = vld [vmem:[%s30467_s5 + $0x60] sm:$0xff]   ;;  %v20948_v22 = vld [vmem:[%s30467_s5 + $0xd8] sm:$0xff]   ;;  %v20955_v59 = vld [vmem:[%s30467_s5 + $0x2e8] sm:$0xff]   ;;  %v14483_v56 = vrot.slane %v29832_v15, 4 }
 0xa0f   :  { %v29855_v45 = vadd.f32 %v29733_v57, %v13390_v61  ;;  %v29858_v20 = vadd.f32 %v29737_v46, %v13389_v16  ;;  %v13334_v21 = vpop.f32.mrb[195].mxu1  ;;  %v29863_v33 = vpack.c.bf16 %v13464_v31, %v13460_v12  ;;  %v20928_v57 = vld [vmem:[%s30467_s5 + $0xa0] sm:$0xff]   ;;  %v29872_v46 = vpack.c.bf16 %v13462_v28, %v13458_v44  ;;  %v20949_v43 = vld [vmem:[%s30467_s5 + $0x1d8] sm:$0xff]   ;;  %v20954_v12 = vld [vmem:[%s30467_s5 + $0x228] sm:$0xff]  }
 0xa10   :  { %v29866_v53 = vadd.f32 %v29742_v40, %v13391_v8  ;;  %14079 = vmatpush1.bf16.msra.mxu1 %v20925_v1  ;;  %v20929_v40 = vld [vmem:[%s30467_s5 + $0x68] sm:$0xff]   ;;  %v20950_v39 = vld [vmem:[%s30467_s5 + $0x220] sm:$0xff]   ;;  %v20959_v24 = vld [vmem:[%s30467_s5 + $0x2f0] sm:$0xff]  }
 0xa11   :  { %14080 = vmatprep.subr.bf16.mxu1 %v30825_v13  ;;  %18266 = vmatpush3.bf16.msra.mxu0 %v20924_v3  ;;  %v20953_v10 = vld [vmem:[%s30467_s5 + $0x2a0] sm:$0xff]   ;;  %v20957_v17 = vld [vmem:[%s30467_s5 + $0x2a8] sm:$0xff]   ;;  %v20961_v0 = vld [vmem:[%s30467_s5 + $0x2b0] sm:$0xff]  }
 0xa12   :  { %18267 = vmatprep.subr.bf16.mxu0 %v20926_v18  ;;  %v20952_v47 = vld [vmem:[%s30467_s5 + $0x1e0] sm:$0xff]   ;;  %v20963_v55 = vld [vmem:[%s30467_s5 + $0x2f8] sm:$0xff]   ;;  %v20960_v23 = vld [vmem:[%s30467_s5 + $0x1f0] sm:$0xff]  }
 0xa13   :  { %v20962_v1 = vld [vmem:[%s30467_s5 + $0x238] sm:$0xff]   ;;  %v20966_v61 = vld [vmem:[%s30467_s5 + $0x300] sm:$0xff]   ;;  %v20969_v27 = vld [vmem:[%s30467_s5 + $0x308] sm:$0xff]  }
 0xa14   :  { %14081 = vmatpush1.bf16.msra.mxu1 %v20928_v57  ;;  %v20965_v60 = vld [vmem:[%s30467_s5 + $0x2b8] sm:$0xff]   ;;  %v20968_v38 = vld [vmem:[%s30467_s5 + $0x2c0] sm:$0xff]   ;;  %v20971_v31 = vld [vmem:[%s30467_s5 + $0x2c8] sm:$0xff]  }
 0xa15   :  { %14082 = vmatprep.subr.bf16.mxu1 %v30825_v13  ;;  %18268 = vmatpush3.bf16.msra.mxu0 %v20927_v52  ;;  %v20964_v16 = vld [vmem:[%s30467_s5 + $0x1f8] sm:$0xff]   ;;  %v20967_v28 = vld [vmem:[%s30467_s5 + $0x240] sm:$0xff]   ;;  %v20972_v8 = vld [vmem:[%s30467_s5 + $0x310] sm:$0xff]   ;;  %v14482_v52 = vrot.slane %v29795_v29, 4 }
 0xa16   :  { %18269 = vmatprep.subr.bf16.mxu0 %v20929_v40  ;;  %v20970_v49 = vld [vmem:[%s30467_s5 + $0x248] sm:$0xff]   ;;  %v20974_v62 = vld [vmem:[%s30467_s5 + $0x2d0] sm:$0xff]   ;;  %v20975_v3 = vld [vmem:[%s30467_s5 + $0x318] sm:$0xff]   ;;  %v14485_v40 = vrot.slane %v29814_v14, 4 }
 0xa17   :  { %v20973_v44 = vld [vmem:[%s30467_s5 + $0x250] sm:$0xff]   ;;  %v20977_v21 = vld [vmem:[%s30467_s5 + $0x2d8] sm:$0xff]   ;;  %v20979_v57 = vld [vmem:[%s30467_s5 + $0x320] sm:$0xff]  }
 0xa18   :  { %14083 = vmatpush1.bf16.msra.mxu1 %v20931_v51  ;;  %v20976_v18 = vld [vmem:[%s30467_s5 + $0x258] sm:$0xff]   ;;  %v20978_v51 = vld [vmem:[%s30467_s5 + $0x260] sm:$0xff]  }
 0xa19   :  { %14084 = vmatprep.subr.bf16.mxu1 %v30825_v13  ;;  %18270 = vmatpush3.bf16.msra.mxu0 %v20930_v25  ;;  %v20981_v25 = vld [vmem:[%s30467_s5 + $0x328] sm:$0xff]  }
 0xa1a   :  { %18271 = vmatprep.subr.bf16.mxu0 %v20932_v42  ;;  %v20982_v42 = vld [vmem:[%s30467_s5 + $0x270] sm:$0xff]  }
 0xa1c   :  { %14085 = vmatpush1.bf16.msra.mxu1 %v20934_v63  ;;  %v20985_v63 = vld [vmem:[%s30467_s5 + $0x338] sm:$0xff]  }
 0xa1d   :  { %14086 = vmatprep.subr.bf16.mxu1 %v30825_v13  ;;  %18272 = vmatpush3.bf16.msra.mxu0 %v20933_v19  ;;  %v20984_v19 = vld [vmem:[%s30467_s5 + $0x278] sm:$0xff]  }
 0xa1e   :  { %18273 = vmatprep.subr.bf16.mxu0 %v20935_v37  ;;  %v20987_v37 = vld [vmem:[%s30467_s5 + $0x340] sm:$0xff]  }
 0xa20   :  { %14087 = vmatpush1.bf16.msra.mxu1 %v20937_v11  ;;  %v20986_v11 = vld [vmem:[%s30467_s5 + $0x280] sm:$0xff]  }
 0xa21   :  { %14088 = vmatprep.subr.bf16.mxu1 %v30825_v13  ;;  %18274 = vmatpush3.bf16.msra.mxu0 %v20936_v35  ;;  %v20989_v35 = vld [vmem:[%s30467_s5 + $0x348] sm:$0xff]  }
 0xa22   :  { %18281 = vmatprep.subr.bf16.mxu0 %v20938_v4  ;;  %v20988_v4 = vld [vmem:[%s30467_s5 + $0x288] sm:$0xff]  }
 0xa24   :  { %14089 = vmatpush1.bf16.msra.mxu1 %v20939_v5  ;;  %14065 = vmatmul.mubr.bf16.vlgmr.msra.gmra.mrb[196].mxu0 %v29759_v7  ;;  %v20946_v7 = vld [vmem:[%s30467_s5 + $0x1d0] sm:$0xff]  }
 0xa25   :  { %14090 = vmatprep.subr.bf16.mxu1 %v30825_v13  ;;  %18282 = vmatpush3.bf16.msra.mxu0 %v20940_v48  ;;  %v20991_v5 = vld [vmem:[%s30467_s5 + $0x350] sm:$0xff]  }
 0xa26   :  { %14372 = vmatprep.mubr.bf16.mxu0 %v29832_v15  ;;  %18283 = vmatprep.subr.bf16.mxu0 %v20941_v9  ;;  %v20958_v15 = vld [vmem:[%s30467_s5 + $0x230] sm:$0xff]   ;;  %v20993_v9 = vld [vmem:[%s30467_s5 + $0x358] sm:$0xff]  }
 0xa27   :  { %v20990_v48 = vld [vmem:[%s30467_s5 + $0x290] sm:$0xff]  }
 0xa28   :  { %14091 = vmatpush1.bf16.msra.mxu1 %v20942_v26  ;;  %v20992_v26 = vld [vmem:[%s30467_s5 + $0x298] sm:$0xff]  }
 0xa29   :  { %14092 = vmatprep.subr.bf16.mxu1 %v30825_v13  ;;  %18284 = vmatpush3.bf16.msra.mxu0 %v20943_v50  ;;  %v20994_v50 = vld [vmem:[%s30467_s5 + $0x3c0] sm:$0xff]  }
 0xa2a   :  { %18285 = vmatprep.subr.bf16.mxu0 %v20944_v54  ;;  %v20995_v54 = vld [vmem:[%s30467_s5 + $0x360] sm:$0xff]  }
 0xa2c   :  { %14093 = vmatpush1.bf16.msra.mxu1 %v20945_v34  ;;  %v20996_v34 = vld [vmem:[%s30467_s5 + $0x380] sm:$0xff]  }
 0xa2d   :  { %14094 = vmatprep.subr.bf16.mxu1 %v30825_v13  ;;  %18286 = vmatpush3.bf16.msra.mxu0 %v20946_v7  ;;  %v20997_v7 = vld [vmem:[%s30467_s5 + $0x3c8] sm:$0xff]  }
 0xa2e   :  { %18287 = vmatprep.subr.bf16.mxu0 %v20947_v2  ;;  %v20998_v2 = vld [vmem:[%s30467_s5 + $0x368] sm:$0xff]  }
 0xa30   :  { %14095 = vmatpush1.bf16.msra.mxu1 %v20948_v22  ;;  %v20999_v22 = vld [vmem:[%s30467_s5 + $0x388] sm:$0xff]  }
 0xa31   :  { %18303 = vmatprep.subr.bf16.mxu1 %v20951_v32  ;;  %18288 = vmatpush3.bf16.msra.mxu0 %v20949_v43  ;;  %v21000_v32 = vld [vmem:[%s30467_s5 + $0x3d0] sm:$0xff]  }
 0xa32   :  { %18289 = vmatprep.subr.bf16.mxu0 %v20950_v39  ;;  %v21001_v43 = vld [vmem:[%s30467_s5 + $0x370] sm:$0xff]  }
 0xa33   :  { %14105 = vmatmul.mubr.bf16.vlgmr.msra.gmra.mrb[200].mxu1 %v29762_v30  ;;  %v20956_v30 = vld [vmem:[%s30467_s5 + $0x1e8] sm:$0xff]   ;;  %v21002_v39 = vld [vmem:[%s30467_s5 + $0x390] sm:$0xff]  }
 0xa34   :  { %18304 = vmatpush3.bf16.msra.mxu1 %v20953_v10  ;;  %14692 = vmatprep.mubr.bf16.mxu1 %v14483_v56  ;;  %v21003_v10 = vld [vmem:[%s30467_s5 + $0x3d8] sm:$0xff]  }
 0xa35   :  { %18305 = vmatprep.subr.bf16.mxu1 %v20955_v59  ;;  %18290 = vmatpush3.bf16.msra.mxu0 %v20952_v47  ;;  %v21004_v59 = vld [vmem:[%s30467_s5 + $0x378] sm:$0xff]   ;;  %v21007_v47 = vld [vmem:[%s30467_s5 + $0x4a0] sm:$0xff]  }
 0xa36   :  { %18291 = vmatprep.subr.bf16.mxu0 %v20954_v12  ;;  %v21005_v56 = vld [vmem:[%s30467_s5 + $0x398] sm:$0xff]   ;;  %v21006_v12 = vld [vmem:[%s30467_s5 + $0x3e0] sm:$0xff]  }
 0xa38   :  { %18306 = vmatpush3.bf16.msra.mxu1 %v20957_v17  ;;  %v21009_v17 = vld [vmem:[%s30467_s5 + $0x460] sm:$0xff]  }
 0xa39   :  { %18307 = vmatprep.subr.bf16.mxu1 %v20959_v24  ;;  %18292 = vmatpush3.bf16.msra.mxu0 %v20956_v30  ;;  %v14484_v24 = vrot.slane %v29800_v36, 4  ;;  %v21011_v30 = vld [vmem:[%s30467_s5 + $0x4a8] sm:$0xff]  }
 0xa3a   :  { %18293 = vmatprep.subr.bf16.mxu0 %v20958_v15  ;;  %v21008_v15 = vld [vmem:[%s30467_s5 + $0x3a0] sm:$0xff]  }
 0xa3c   :  { %18308 = vmatpush3.bf16.msra.mxu1 %v20961_v0  ;;  %v15112_v0 = vrot.slane %v29872_v46, 4 }
 0xa3d   :  { %18309 = vmatprep.subr.bf16.mxu1 %v20963_v55  ;;  %18294 = vmatpush3.bf16.msra.mxu0 %v20960_v23  ;;  %v21010_v55 = vld [vmem:[%s30467_s5 + $0x3e8] sm:$0xff]   ;;  %v21015_v23 = vld [vmem:[%s30467_s5 + $0x4b0] sm:$0xff]  }
 0xa3e   :  { %18295 = vmatprep.subr.bf16.mxu0 %v20962_v1  ;;  %v21014_v1 = vld [vmem:[%s30467_s5 + $0x3f0] sm:$0xff]  }
 0xa40   :  { %18310 = vmatpush3.bf16.msra.mxu1 %v20965_v60  ;;  %v21017_v60 = vld [vmem:[%s30467_s5 + $0x470] sm:$0xff]  }
 0xa41   :  { %18311 = vmatprep.subr.bf16.mxu1 %v20966_v61  ;;  %18296 = vmatpush3.bf16.msra.mxu0 %v20964_v16  ;;  %v21019_v61 = vld [vmem:[%s30467_s5 + $0x4b8] sm:$0xff]   ;;  %v21016_v16 = vld [vmem:[%s30467_s5 + $0x3b0] sm:$0xff]  }
 0xa42   :  { %14380 = vmatprep.subr.bf16.mxu0 %v30825_v13 }
 0xa44   :  { %18312 = vmatpush3.bf16.msra.mxu1 %v20968_v38  ;;  %14373 = vmatmul.mubr.bf16.vlgmr.msra.gmra.mrb[200].mxu0 %v29795_v29  ;;  %v20980_v29 = vld [vmem:[%s30467_s5 + $0x268] sm:$0xff]   ;;  %v21018_v38 = vld [vmem:[%s30467_s5 + $0x3f8] sm:$0xff]  }
 0xa45   :  { %18313 = vmatprep.subr.bf16.mxu1 %v20969_v27  ;;  %14381 = vmatpush1.bf16.msra.mxu0 %v20967_v28  ;;  %v21021_v27 = vld [vmem:[%s30467_s5 + $0x478] sm:$0xff]   ;;  %v21022_v28 = vld [vmem:[%s30467_s5 + $0x4c0] sm:$0xff]  }
 0xa46   :  { %17886 = vmatprep.mubr.msk.bf16.mxu0 %vm13777_vm3, %v29814_v14  ;;  %14382 = vmatprep.subr.bf16.mxu0 %v30825_v13  ;;  %v20983_v14 = vld [vmem:[%s30467_s5 + $0x330] sm:$0xff]  }
 0xa48   :  { %18314 = vmatpush3.bf16.msra.mxu1 %v20971_v31  ;;  %v21020_v31 = vld [vmem:[%s30467_s5 + $0x3b8] sm:$0xff]  }
 0xa49   :  { %18315 = vmatprep.subr.bf16.mxu1 %v20972_v8  ;;  %14383 = vmatpush1.bf16.msra.mxu0 %v20970_v49  ;;  %v21024_v8 = vld [vmem:[%s30467_s5 + $0x480] sm:$0xff]   ;;  %v21025_v49 = vld [vmem:[%s30467_s5 + $0x4c8] sm:$0xff]  }
 0xa4a   :  { %14384 = vmatprep.subr.bf16.mxu0 %v30825_v13 }
 0xa4c   :  { %18316 = vmatpush3.bf16.msra.mxu1 %v20974_v62  ;;  %v21023_v62 = vld [vmem:[%s30467_s5 + $0x400] sm:$0xff]  }
 0xa4d   :  { %18317 = vmatprep.subr.bf16.mxu1 %v20975_v3  ;;  %14385 = vmatpush1.bf16.msra.mxu0 %v20973_v44  ;;  %v21027_v3 = vld [vmem:[%s30467_s5 + $0x488] sm:$0xff]   ;;  %v21028_v44 = vld [vmem:[%s30467_s5 + $0x4d0] sm:$0xff]  }
 0xa4e   :  { %14386 = vmatprep.subr.bf16.mxu0 %v30825_v13 }
 0xa50   :  { %18318 = vmatpush3.bf16.msra.mxu1 %v20977_v21  ;;  %v21026_v21 = vld [vmem:[%s30467_s5 + $0x408] sm:$0xff]  }
 0xa51   :  { %14700 = vmatprep.subr.bf16.mxu1 %v30825_v13  ;;  %14387 = vmatpush1.bf16.msra.mxu0 %v20976_v18  ;;  %v21030_v18 = vld [vmem:[%s30467_s5 + $0x490] sm:$0xff]  }
 0xa52   :  { %14388 = vmatprep.subr.bf16.mxu0 %v30825_v13 }
 0xa53   :  { %14693 = vmatmul.mubr.bf16.vlgmr.msra.gmra.mrb[204].mxu1 %v14482_v52  ;;  %v21029_v52 = vld [vmem:[%s30467_s5 + $0x410] sm:$0xff]  }
 0xa54   :  { %14701 = vmatpush1.bf16.msra.mxu1 %v20979_v57  ;;  %17971 = vmatprep.mubr.msk.bf16.mxu1 %vm13777_vm3, %v14485_v40  ;;  %v21031_v57 = vld [vmem:[%s30467_s5 + $0x4d8] sm:$0xff]  }
 0xa55   :  { %14702 = vmatprep.subr.bf16.mxu1 %v30825_v13  ;;  %14389 = vmatpush1.bf16.msra.mxu0 %v20978_v51  ;;  %v21033_v40 = vld [vmem:[%s30467_s5 + $0x498] sm:$0xff]  }
 0xa56   :  { %14390 = vmatprep.subr.bf16.mxu0 %v30825_v13  ;;  %v21032_v51 = vld [vmem:[%s30467_s5 + $0x418] sm:$0xff]  }
 0xa58   :  { %14703 = vmatpush1.bf16.msra.mxu1 %v20981_v25  ;;  %v21035_v25 = vld [vmem:[%s30467_s5 + $0x4e0] sm:$0xff]  }
 0xa59   :  { %14704 = vmatprep.subr.bf16.mxu1 %v30825_v13  ;;  %14391 = vmatpush1.bf16.msra.mxu0 %v20980_v29  ;;  %v15111_v29 = vrot.slane %v29840_v6, 4 }
 0xa5a   :  { %14392 = vmatprep.subr.bf16.mxu0 %v30825_v13 }
 0xa5c   :  { %14705 = vmatpush1.bf16.msra.mxu1 %v20983_v14  ;;  %v15114_v14 = vrot.slane %v29863_v33, 4 }
 0xa5d   :  { %14706 = vmatprep.subr.bf16.mxu1 %v30825_v13  ;;  %14393 = vmatpush1.bf16.msra.mxu0 %v20982_v42  ;;  %v21034_v42 = vld [vmem:[%s30467_s5 + $0x420] sm:$0xff]  }
 0xa5e   :  { %14394 = vmatprep.subr.bf16.mxu0 %v30825_v13 }
 0xa60   :  { %14707 = vmatpush1.bf16.msra.mxu1 %v20985_v63  ;;  %v21037_v63 = vld [vmem:[%s30467_s5 + $0x4e8] sm:$0xff]  }
 0xa61   :  { %14708 = vmatprep.subr.bf16.mxu1 %v30825_v13  ;;  %14395 = vmatpush1.bf16.msra.mxu0 %v20984_v19  ;;  %v21038_v19 = vld [vmem:[%s30467_s5 + $0x430] sm:$0xff]  }
 0xa62   :  { %14396 = vmatprep.subr.bf16.mxu0 %v30825_v13 }
 0xa64   :  { %14709 = vmatpush1.bf16.msra.mxu1 %v20987_v37  ;;  %v21041_v37 = vld [vmem:[%s30467_s5 + $0x4f8] sm:$0xff]  }
 0xa65   :  { %14710 = vmatprep.subr.bf16.mxu1 %v30825_v13  ;;  %14397 = vmatpush1.bf16.msra.mxu0 %v20986_v11  ;;  %v21040_v11 = vld [vmem:[%s30467_s5 + $0x438] sm:$0xff]  }
 0xa66   :  { %14398 = vmatprep.subr.bf16.mxu0 %v30825_v13 }
 0xa68   :  { %14711 = vmatpush1.bf16.msra.mxu1 %v20989_v35  ;;  %v21043_v35 = vld [vmem:[%s30467_s5 + $0x500] sm:$0xff]  }
 0xa69   :  { %14712 = vmatprep.subr.bf16.mxu1 %v30825_v13  ;;  %14399 = vmatpush1.bf16.msra.mxu0 %v20988_v4  ;;  %v21042_v4 = vld [vmem:[%s30467_s5 + $0x440] sm:$0xff]  }
 0xa6a   :  { %14400 = vmatprep.subr.bf16.mxu0 %v30825_v13 }
 0xa6c   :  { %14713 = vmatpush1.bf16.msra.mxu1 %v20991_v5  ;;  %v21045_v5 = vld [vmem:[%s30467_s5 + $0x508] sm:$0xff]  }
 0xa6d   :  { %14714 = vmatprep.subr.bf16.mxu1 %v30825_v13  ;;  %14401 = vmatpush1.bf16.msra.mxu0 %v20990_v48  ;;  %v21044_v48 = vld [vmem:[%s30467_s5 + $0x448] sm:$0xff]  }
 0xa6e   :  { %14402 = vmatprep.subr.bf16.mxu0 %v30825_v13 }
 0xa70   :  { %14715 = vmatpush1.bf16.msra.mxu1 %v20993_v9  ;;  %v21047_v9 = vld [vmem:[%s30467_s5 + $0x510] sm:$0xff]  }
 0xa71   :  { %14716 = vmatprep.subr.bf16.mxu1 %v30825_v13  ;;  %14403 = vmatpush1.bf16.msra.mxu0 %v20992_v26  ;;  %v21046_v26 = vld [vmem:[%s30467_s5 + $0x450] sm:$0xff]  }
 0xa72   :  { %18325 = vmatprep.subr.bf16.mxu0 %v20994_v50  ;;  %v21049_v50 = vld [vmem:[%s30467_s5 + $0x518] sm:$0xff]  }
 0xa74   :  { %14717 = vmatpush1.bf16.msra.mxu1 %v20995_v54  ;;  %14413 = vmatmul.mubr.bf16.vlgmr.msra.gmra.mrb[204].mxu0 %v29800_v36  ;;  %v21013_v36 = vld [vmem:[%s30467_s5 + $0x468] sm:$0xff]   ;;  %v21048_v54 = vld [vmem:[%s30467_s5 + $0x458] sm:$0xff]  }
 0xa75   :  { %14718 = vmatprep.subr.bf16.mxu1 %v30825_v13  ;;  %18326 = vmatpush3.bf16.msra.mxu0 %v20996_v34  ;;  %v21050_v34 = vld [vmem:[%s30467_s5 + $0x580] sm:$0xff]  }
 0xa76   :  { %15001 = vmatprep.mubr.bf16.mxu0 %v29872_v46  ;;  %18327 = vmatprep.subr.bf16.mxu0 %v20997_v7  ;;  %v21012_v46 = vld [vmem:[%s30467_s5 + $0x3a8] sm:$0xff]   ;;  %v13466_v7 = vmax.f32 %v29858_v20, 0.0 }
 0xa77   :  { %v21054_v20 = vld [vmem:[%s30467_s5 + $0x528] sm:$0xff]  }
 0xa78   :  { %14719 = vmatpush1.bf16.msra.mxu1 %v20998_v2  ;;  %v21051_v2 = vld [vmem:[%s30467_s5 + $0x520] sm:$0xff]  }
 0xa79   :  { %14720 = vmatprep.subr.bf16.mxu1 %v30825_v13  ;;  %18328 = vmatpush3.bf16.msra.mxu0 %v20999_v22  ;;  %v21052_v22 = vld [vmem:[%s30467_s5 + $0x540] sm:$0xff]  }
 0xa7a   :  { %18329 = vmatprep.subr.bf16.mxu0 %v21000_v32  ;;  %v21053_v32 = vld [vmem:[%s30467_s5 + $0x588] sm:$0xff]  }
 0xa7c   :  { %14721 = vmatpush1.bf16.msra.mxu1 %v21001_v43  ;;  %v13482_v43 = vpack.c.bf16 %v13466_v7, %v13466_v7 }
 0xa7d   :  { %14722 = vmatprep.subr.bf16.mxu1 %v30825_v13  ;;  %18330 = vmatpush3.bf16.msra.mxu0 %v21002_v39  ;;  %v21055_v39 = vld [vmem:[%s30467_s5 + $0x548] sm:$0xff]  }
 0xa7e   :  { %18331 = vmatprep.subr.bf16.mxu0 %v21003_v10  ;;  %v21056_v10 = vld [vmem:[%s30467_s5 + $0x590] sm:$0xff]  }
 0xa80   :  { %14723 = vmatpush1.bf16.msra.mxu1 %v21004_v59  ;;  %v21057_v59 = vld [vmem:[%s30467_s5 + $0x530] sm:$0xff]  }
 0xa81   :  { %18347 = vmatprep.subr.bf16.mxu1 %v21007_v47  ;;  %18332 = vmatpush3.bf16.msra.mxu0 %v21005_v56  ;;  %v21058_v47 = vld [vmem:[%s30467_s5 + $0x550] sm:$0xff]   ;;  %v21059_v56 = vld [vmem:[%s30467_s5 + $0x598] sm:$0xff]  }
 0xa82   :  { %18333 = vmatprep.subr.bf16.mxu0 %v21006_v12  ;;  %v21060_v12 = vld [vmem:[%s30467_s5 + $0x538] sm:$0xff]  }
 0xa83   :  { %14733 = vmatmul.mubr.bf16.vlgmr.msra.gmra.mrb[208].mxu1 %v14484_v24  ;;  %v21062_v24 = vld [vmem:[%s30467_s5 + $0x5a0] sm:$0xff]  }
 0xa84   :  { %18348 = vmatpush3.bf16.msra.mxu1 %v21009_v17  ;;  %15321 = vmatprep.mubr.bf16.mxu1 %v15112_v0  ;;  %v21061_v17 = vld [vmem:[%s30467_s5 + $0x558] sm:$0xff]   ;;  %v21064_v0 = vld [vmem:[%s30467_s5 + $0x5a8] sm:$0xff]  }
 0xa85   :  { %18349 = vmatprep.subr.bf16.mxu1 %v21011_v30  ;;  %18334 = vmatpush3.bf16.msra.mxu0 %v21008_v15  ;;  %v15113_v30 = vrot.slane %v29852_v58, 4  ;;  %v21063_v15 = vld [vmem:[%s30467_s5 + $0x560] sm:$0xff]  }
 0xa86   :  { %18335 = vmatprep.subr.bf16.mxu0 %v21010_v55 }
 0xa88   :  { %18350 = vmatpush3.bf16.msra.mxu1 %v21013_v36  ;;  %v21065_v36 = vld [vmem:[%s30467_s5 + $0x568] sm:$0xff]  }
 0xa89   :  { %18351 = vmatprep.subr.bf16.mxu1 %v21015_v23  ;;  %18336 = vmatpush3.bf16.msra.mxu0 %v21012_v46 }
 0xa8a   :  { %18337 = vmatprep.subr.bf16.mxu0 %v21014_v1 }
 0xa8c   :  { %18352 = vmatpush3.bf16.msra.mxu1 %v21017_v60 }
 0xa8d   :  { %18353 = vmatprep.subr.bf16.mxu1 %v21019_v61  ;;  %18338 = vmatpush3.bf16.msra.mxu0 %v21016_v16 }
 0xa8e   :  { %18339 = vmatprep.subr.bf16.mxu0 %v21018_v38 }
 0xa90   :  { %18354 = vmatpush3.bf16.msra.mxu1 %v21021_v27  ;;  %v21067_v27 = vld [vmem:[%s30467_s5 + $0x570] sm:$0xff]  }
 0xa91   :  { %18355 = vmatprep.subr.bf16.mxu1 %v21022_v28  ;;  %18340 = vmatpush3.bf16.msra.mxu0 %v21020_v31  ;;  %v21068_v31 = vld [vmem:[%s30467_s5 + $0x5b8] sm:$0xff]  }
 0xa92   :  { %15009 = vmatprep.subr.bf16.mxu0 %v30825_v13 }
 0xa94   :  { %18356 = vmatpush3.bf16.msra.mxu1 %v21024_v8  ;;  %15002 = vmatmul.mubr.bf16.vlgmr.msra.gmra.mrb[208].mxu0 %v29840_v6  ;;  %v21036_v6 = vld [vmem:[%s30467_s5 + $0x428] sm:$0xff]  }
 0xa95   :  { %18357 = vmatprep.subr.bf16.mxu1 %v21025_v49  ;;  %15010 = vmatpush1.bf16.msra.mxu0 %v21023_v62  ;;  %v21069_v49 = vld [vmem:[%s30467_s5 + $0x578] sm:$0xff]   ;;  %v13465_v62 = vmax.f32 %v29846_v41, 0.0  ;;  %v21071_v41 = vld [vmem:[%s30467_s5 + $0x5c8] sm:$0xff]  }
 0xa96   :  { %18056 = vmatprep.mubr.msk.bf16.mxu0 %vm13777_vm3, %v29863_v33  ;;  %15011 = vmatprep.subr.bf16.mxu0 %v30825_v13  ;;  %v21039_v33 = vld [vmem:[%s30467_s5 + $0x4f0] sm:$0xff]  }
 0xa98   :  { %18358 = vmatpush3.bf16.msra.mxu1 %v21027_v3  ;;  %v13468_v3 = vmax.f32 %v29866_v53, 0.0  ;;  %v21072_v53 = vld [vmem:[%s30467_s5 + $0x5d0] sm:$0xff]  }
 0xa99   :  { %18359 = vmatprep.subr.bf16.mxu1 %v21028_v44  ;;  %15012 = vmatpush1.bf16.msra.mxu0 %v21026_v21  ;;  %v21070_v44 = vld [vmem:[%s30467_s5 + $0x5c0] sm:$0xff]   ;;  %v13481_v21 = vpack.c.bf16 %v13465_v62, %v13465_v62 }
 0xa9a   :  { %15013 = vmatprep.subr.bf16.mxu0 %v30825_v13 }
 0xa9c   :  { %18360 = vmatpush3.bf16.msra.mxu1 %v21030_v18  ;;  %v13484_v18 = vpack.c.bf16 %v13468_v3, %v13468_v3 }
 0xa9d   :  { %18361 = vmatprep.subr.bf16.mxu1 %v21031_v57  ;;  %15014 = vmatpush1.bf16.msra.mxu0 %v21029_v52  ;;  %v21073_v57 = vld [vmem:[%s30467_s5 + $0x5d8] sm:$0xff]   ;;  %v21074_v52 = vld [vmem:[%s30467_s5 + $0x5e0] sm:$0xff]  }
 0xa9e   :  { %15015 = vmatprep.subr.bf16.mxu0 %v30825_v13 }
 0xaa0   :  { %18362 = vmatpush3.bf16.msra.mxu1 %v21033_v40  ;;  %v21075_v40 = vld [vmem:[%s30467_s5 + $0x5e8] sm:$0xff]  }
 0xaa1   :  { %15329 = vmatprep.subr.bf16.mxu1 %v30825_v13  ;;  %15016 = vmatpush1.bf16.msra.mxu0 %v21032_v51 }
 0xaa2   :  { %15017 = vmatprep.subr.bf16.mxu0 %v30825_v13 }
 0xaa3   :  { %15322 = vmatmul.mubr.bf16.vlgmr.msra.gmra.mrb[212].mxu1 %v15111_v29 }
 0xaa4   :  { %15330 = vmatpush1.bf16.msra.mxu1 %v21035_v25  ;;  %18141 = vmatprep.mubr.msk.bf16.mxu1 %vm13777_vm3, %v15114_v14 }
 0xaa5   :  { %15331 = vmatprep.subr.bf16.mxu1 %v30825_v13  ;;  %15018 = vmatpush1.bf16.msra.mxu0 %v21034_v42  ;;  %v21076_v42 = vld [vmem:[%s30467_s5 + $0x5f0] sm:$0xff]  }
 0xaa6   :  { %15019 = vmatprep.subr.bf16.mxu0 %v30825_v13 }
 0xaa8   :  { %15332 = vmatpush1.bf16.msra.mxu1 %v21037_v63 }
 0xaa9   :  { %15333 = vmatprep.subr.bf16.mxu1 %v30825_v13  ;;  %15020 = vmatpush1.bf16.msra.mxu0 %v21036_v6 }
 0xaaa   :  { %15021 = vmatprep.subr.bf16.mxu0 %v30825_v13 }
 0xaac   :  { %15334 = vmatpush1.bf16.msra.mxu1 %v21039_v33  ;;  %v21077_v33 = vld [vmem:[%s30467_s5 + $0x5f8] sm:$0xff]  }
 0xaad   :  { %15335 = vmatprep.subr.bf16.mxu1 %v30825_v13  ;;  %15022 = vmatpush1.bf16.msra.mxu0 %v21038_v19  ;;  %v21078_v19 = vld [vmem:[%s30467_s5 + $0x600] sm:$0xff]  }
 0xaae   :  { %15023 = vmatprep.subr.bf16.mxu0 %v30825_v13 }
 0xab0   :  { %15336 = vmatpush1.bf16.msra.mxu1 %v21041_v37 }
 0xab1   :  { %15337 = vmatprep.subr.bf16.mxu1 %v30825_v13  ;;  %15024 = vmatpush1.bf16.msra.mxu0 %v21040_v11  ;;  %v21079_v11 = vld [vmem:[%s30467_s5 + $0x608] sm:$0xff]  }
 0xab2   :  { %15025 = vmatprep.subr.bf16.mxu0 %v30825_v13 }
 0xab4   :  { %15338 = vmatpush1.bf16.msra.mxu1 %v21043_v35 }
 0xab5   :  { %15339 = vmatprep.subr.bf16.mxu1 %v30825_v13  ;;  %15026 = vmatpush1.bf16.msra.mxu0 %v21042_v4 }
 0xab6   :  { %15027 = vmatprep.subr.bf16.mxu0 %v30825_v13 }
 0xab8   :  { %15340 = vmatpush1.bf16.msra.mxu1 %v21045_v5 }
 0xab9   :  { %15341 = vmatprep.subr.bf16.mxu1 %v30825_v13  ;;  %15028 = vmatpush1.bf16.msra.mxu0 %v21044_v48 }
 0xaba   :  { %15029 = vmatprep.subr.bf16.mxu0 %v30825_v13 }
 0xabc   :  { %15342 = vmatpush1.bf16.msra.mxu1 %v21047_v9  ;;  %v21080_v9 = vld [vmem:[%s30467_s5 + $0x610] sm:$0xff]  }
 0xabd   :  { %15343 = vmatprep.subr.bf16.mxu1 %v30825_v13  ;;  %15030 = vmatpush1.bf16.msra.mxu0 %v21046_v26  ;;  %v21081_v26 = vld [vmem:[%s30467_s5 + $0x618] sm:$0xff]  }
 0xabe   :  { %15031 = vmatprep.subr.bf16.mxu0 %v30825_v13 }
 0xac0   :  { %15344 = vmatpush1.bf16.msra.mxu1 %v21049_v50  ;;  %v13467_v50 = vmax.f32 %v29855_v45, 0.0  ;;  %v21082_v45 = vld [vmem:[%s30469_s7] sm:$0xff]  }
 0xac1   :  { %15345 = vmatprep.subr.bf16.mxu1 %v30825_v13  ;;  %15032 = vmatpush1.bf16.msra.mxu0 %v21048_v54 }
 0xac2   :  { %18369 = vmatprep.subr.bf16.mxu0 %v21050_v34  ;;  %v13483_v54 = vpack.c.bf16 %v13467_v50, %v13467_v50 }
 0xac4   :  { %15346 = vmatpush1.bf16.msra.mxu1 %v21051_v2  ;;  %15042 = vmatmul.mubr.bf16.vlgmr.msra.gmra.mrb[212].mxu0 %v29852_v58  ;;  %v21066_v58 = vld [vmem:[%s30467_s5 + $0x5b0] sm:$0xff]  }
 0xac5   :  { %15347 = vmatprep.subr.bf16.mxu1 %v30825_v13  ;;  %18370 = vmatpush3.bf16.msra.mxu0 %v21052_v22 }
 0xac6   :  { %15630 = vmatprep.mubr.bf16.mxu0 %v13482_v43  ;;  %18371 = vmatprep.subr.bf16.mxu0 %v21053_v32 }
 0xac8   :  { %15348 = vmatpush1.bf16.msra.mxu1 %v21054_v20 }
 0xac9   :  { %15349 = vmatprep.subr.bf16.mxu1 %v30825_v13  ;;  %18372 = vmatpush3.bf16.msra.mxu0 %v21055_v39 }
 0xaca   :  { %18373 = vmatprep.subr.bf16.mxu0 %v21056_v10 }
 0xacc   :  { %15350 = vmatpush1.bf16.msra.mxu1 %v21057_v59 }
 0xacd   :  { %15351 = vmatprep.subr.bf16.mxu1 %v30825_v13  ;;  %18374 = vmatpush3.bf16.msra.mxu0 %v21058_v47  ;;  %v21956_v47 = vmov 0.0  }
 0xace   :  { %18375 = vmatprep.subr.bf16.mxu0 %v21059_v56  ;;  %v21084_v56 = vld [vmem:[%s30469_s7 + $0x10] sm:$0xff]  }
 0xad0   :  { %15352 = vmatpush1.bf16.msra.mxu1 %v21060_v12  ;;  %v21085_v12 = vld [vmem:[%s30469_s7 + $0x18] sm:$0xff]  }
 0xad1   :  { %18376 = vmatpush3.bf16.msra.mxu0 %v21061_v17  ;;  %18400 = vmatprep.subr.bf16.mxu1 %v21956_v47 }
 0xad2   :  { %18377 = vmatprep.subr.bf16.mxu0 %v21062_v24 }
 0xad3   :  { %15362 = vmatmul.mubr.bf16.vlgmr.msra.gmra.mrb[216].mxu1 %v15113_v30 }
 0xad4   :  { %18401 = vmatpush3.bf16.msra.mxu1 %v21082_v45  ;;  %18416 = vmatprep.mubr.msk.bf16.mxu1 %vm21957_vm4, %v21956_v47 }
 0xad5   :  { %18378 = vmatpush3.bf16.msra.mxu0 %v21063_v15  ;;  %18402 = vmatprep.subr.bf16.mxu1 %v21956_v47 }
 0xad6   :  { %v13855_v55 = vpop.f32.mrb[196].mxu1  ;;  %18379 = vmatprep.subr.bf16.mxu0 %v21064_v0  ;;  %v21086_v0 = vld [vmem:[%s30469_s7 + $0x20] sm:$0xff]  }
 0xad7   :  { %v13857_v23 = vpop.f32.mrb[197].mxu1  ;;  %v18253_v46 = vpop.f32.mrb[192].mxu0 }
 0xad8   :  { %v13858_v1 = vpop.f32.mrb[198].mxu1  ;;  %v18254_v60 = vpop.f32.mrb[193].mxu0 }
 0xad9   :  { %v13859_v61 = vpop.f32.mrb[199].mxu1  ;;  %v18255_v16 = vadd.f32 %v18254_v60, %v18253_v46  ;;  %18380 = vmatpush3.bf16.msra.mxu0 %v21065_v36  ;;  %v18256_v38 = vpop.f32.mrb[194].mxu0 }
 0xada   :  { %v18257_v28 = vpop.f32.mrb[195].mxu0  ;;  %18381 = vmatprep.subr.bf16.mxu0 %v21066_v58 }
 0xadb   :  { %v13856_v8 = vadd.f32 %v18255_v16, %v13855_v55 }
 0xadd   :  { %18382 = vmatpush3.bf16.msra.mxu0 %v21067_v27 }
 0xade   :  { %18383 = vmatprep.subr.bf16.mxu0 %v21068_v31 }
 0xae1   :  { %18384 = vmatpush3.bf16.msra.mxu0 %v21069_v49  ;;  %v21088_v49 = vld [vmem:[%s30469_s7 + $0x30] sm:$0xff]  }
 0xae2   :  { %15638 = vmatprep.subr.bf16.mxu0 %v30825_v13 }
 0xae4   :  { %15631 = vmatmul.mubr.bf16.vlgmr.msra.gmra.mrb[216].mxu0 %v13481_v21 }
 0xae5   :  { %15639 = vmatpush1.bf16.msra.mxu0 %v21070_v44  ;;  %18226 = vmatprep.mubr.msk.bf16.mxu0 %vm13777_vm3, %v13484_v18  ;;  %v21089_v44 = vld [vmem:[%s30469_s7 + $0x38] sm:$0xff]  }
 0xae6   :  { %15640 = vmatprep.subr.bf16.mxu0 %v30825_v13 }
 0xae9   :  { %15641 = vmatpush1.bf16.msra.mxu0 %v21071_v41 }
 0xaea   :  { %15642 = vmatprep.subr.bf16.mxu0 %v30825_v13 }
 0xaed   :  { %15643 = vmatpush1.bf16.msra.mxu0 %v21072_v53 }
 0xaee   :  { %15644 = vmatprep.subr.bf16.mxu0 %v30825_v13 }
 0xaf1   :  { %15645 = vmatpush1.bf16.msra.mxu0 %v21073_v57 }
 0xaf2   :  { %15646 = vmatprep.subr.bf16.mxu0 %v30825_v13 }
 0xaf5   :  { %15647 = vmatpush1.bf16.msra.mxu0 %v21074_v52 }
 0xaf6   :  { %15648 = vmatprep.subr.bf16.mxu0 %v30825_v13 }
 0xaf7   :  { %v18275_v51 = vpop.f32.mrb[196].mxu0 }
 0xaf8   :  { %v18276_v25 = vpop.f32.mrb[197].mxu0 }
 0xaf9   :  { %v18277_v29 = vadd.f32 %v18276_v25, %v18275_v51  ;;  %v18278_v14 = vpop.f32.mrb[198].mxu0  ;;  %15649 = vmatpush1.bf16.msra.mxu0 %v21075_v40 }
 0xafa   :  { %v18279_v63 = vpop.f32.mrb[199].mxu0  ;;  %15650 = vmatprep.subr.bf16.mxu0 %v30825_v13 }
 0xafb   :  { %v14067_v6 = vadd.f32 %v18277_v29, %v13856_v8  ;;  %v21087_v8 = vld [vmem:[%s30469_s7 + $0x28] sm:$0xff]  }
 0xafd   :  { %15651 = vmatpush1.bf16.msra.mxu0 %v21076_v42 }
 0xafe   :  { %15652 = vmatprep.subr.bf16.mxu0 %v30825_v13 }
 0xb01   :  { %15653 = vmatpush1.bf16.msra.mxu0 %v21077_v33 }
 0xb02   :  { %15654 = vmatprep.subr.bf16.mxu0 %v30825_v13 }
 0xb05   :  { %15655 = vmatpush1.bf16.msra.mxu0 %v21078_v19 }
 0xb06   :  { %v14106_v37 = vpop.f32.mrb[200].mxu1  ;;  %15656 = vmatprep.subr.bf16.mxu0 %v30825_v13 }
 0xb07   :  { %v14107_v35 = vadd.f32 %v14106_v37, %v14067_v6  ;;  %v14108_v4 = vpop.f32.mrb[201].mxu1 }
 0xb08   :  { %v14109_v5 = vpop.f32.mrb[202].mxu1 }
 0xb09   :  { %v14110_v48 = vpop.f32.mrb[203].mxu1  ;;  %15657 = vmatpush1.bf16.msra.mxu0 %v21079_v11 }
 0xb0a   :  { %15658 = vmatprep.subr.bf16.mxu0 %v30825_v13 }
 0xb0d   :  { %15659 = vmatpush1.bf16.msra.mxu0 %v21080_v9 }
 0xb0e   :  { %15660 = vmatprep.subr.bf16.mxu0 %v30825_v13  ;;  %v21083_v13 = vld [vmem:[%s30469_s7 + $0x8] sm:$0xff]  }
 0xb0f   :  { %18403 = vmatpush3.bf16.msra.mxu1 %v21083_v13 }
 0xb10   :  { %18404 = vmatprep.subr.bf16.mxu1 %v21956_v47 }
 0xb11   :  { %15661 = vmatpush1.bf16.msra.mxu0 %v21081_v26  ;;  %v18227_v26 = vld [vmem:[%s30470_s6] ss:$0 sm:$0xff] }
 0xb13   :  { %18405 = vmatpush3.bf16.msra.mxu1 %v21084_v56 }
 0xb14   :  { %15671 = vmatmul.mubr.bf16.vlgmr.msra.gmra.mrb[220].mxu0 %v13483_v54  ;;  %18406 = vmatprep.subr.bf16.mxu1 %v21956_v47 }
 0xb17   :  { %v18297_v34 = vpop.f32.mrb[200].mxu0  ;;  %18407 = vmatpush3.bf16.msra.mxu1 %v21085_v12 }
 0xb18   :  { %v18298_v7 = vpop.f32.mrb[201].mxu0  ;;  %18408 = vmatprep.subr.bf16.mxu1 %v21956_v47 }
 0xb19   :  { %v18299_v2 = vadd.f32 %v18298_v7, %v18297_v34  ;;  %v18300_v22 = vpop.f32.mrb[202].mxu0 }
 0xb1a   :  { %v18301_v32 = vpop.f32.mrb[203].mxu0 }
 0xb1b   :  { %18409 = vmatpush3.bf16.msra.mxu1 %v21086_v0  ;;  %v18228_v32 = vld [vmem:[%s30471_s8] ss:$0 sm:$0xff] }
 0xb1c   :  { %18410 = vmatprep.subr.bf16.mxu1 %v21956_v47 }
 0xb1f   :  { %18411 = vmatpush3.bf16.msra.mxu1 %v21087_v8 }
 0xb20   :  { %18412 = vmatprep.subr.bf16.mxu1 %v21956_v47 }
 0xb23   :  { %18413 = vmatpush3.bf16.msra.mxu1 %v21088_v49 }
 0xb24   :  { %18414 = vmatprep.subr.bf16.mxu1 %v21956_v47 }
 0xb26   :  { %v18319_v43 = vpop.f32.mrb[204].mxu1 }
 0xb27   :  { %v18320_v20 = vpop.f32.mrb[205].mxu1  ;;  %18415 = vmatpush3.bf16.msra.mxu1 %v21089_v44 }
 0xb28   :  { %v18321_v39 = vadd.f32 %v18320_v20, %v18319_v43  ;;  %v18322_v10 = vpop.f32.mrb[206].mxu1 }
 0xb29   :  { %v18323_v59 = vpop.f32.mrb[207].mxu1 }
 0xb47   :  { %v14414_v17 = vpop.f32.mrb[204].mxu0 }
 0xb48   :  { %v14415_v24 = vadd.f32 %v18299_v2, %v14414_v17  ;;  %v14416_v30 = vpop.f32.mrb[205].mxu0 }
 0xb49   :  { %v14417_v15 = vpop.f32.mrb[206].mxu0 }
 0xb4a   :  { %v14420_v55 = vadd.f32 %v14415_v24, %v14107_v35  ;;  %v14418_v36 = vpop.f32.mrb[207].mxu0 }
 0xb56   :  { %v14734_v23 = vpop.f32.mrb[208].mxu1 }
 0xb57   :  { %v14735_v58 = vadd.f32 %v18321_v39, %v14734_v23  ;;  %v14736_v46 = vpop.f32.mrb[209].mxu1 }
 0xb58   :  { %v14737_v1 = vpop.f32.mrb[210].mxu1 }
 0xb59   :  { %v14740_v60 = vadd.f32 %v14735_v58, %v14420_v55  ;;  %v14738_v61 = vpop.f32.mrb[211].mxu1 }
 0xb67   :  { %v18341_v16 = vpop.f32.mrb[208].mxu0 }
 0xb68   :  { %v18342_v38 = vpop.f32.mrb[209].mxu0 }
 0xb69   :  { %v18343_v27 = vadd.f32 %v18342_v38, %v18341_v16  ;;  %v18344_v28 = vpop.f32.mrb[210].mxu0 }
 0xb6a   :  { %v18345_v31 = vpop.f32.mrb[211].mxu0 }
 0xb76   :  { %v18363_v62 = vpop.f32.mrb[212].mxu1 }
 0xb77   :  { %v18364_v3 = vpop.f32.mrb[213].mxu1 }
 0xb78   :  { %v18365_v21 = vadd.f32 %v18364_v3, %v18363_v62  ;;  %v18366_v18 = vpop.f32.mrb[214].mxu1 }
 0xb79   :  { %v18367_v41 = vpop.f32.mrb[215].mxu1 }
 0xb97   :  { %v15043_v53 = vpop.f32.mrb[212].mxu0 }
 0xb98   :  { %v15044_v57 = vadd.f32 %v18343_v27, %v15043_v53  ;;  %v15045_v52 = vpop.f32.mrb[213].mxu0 }
 0xb99   :  { %v15046_v40 = vpop.f32.mrb[214].mxu0 }
 0xb9a   :  { %v15049_v51 = vadd.f32 %v15044_v57, %v14740_v60  ;;  %v15047_v25 = vpop.f32.mrb[215].mxu0 }
 0xba6   :  { %v15363_v29 = vpop.f32.mrb[216].mxu1 }
 0xba7   :  { %v15364_v14 = vadd.f32 %v18365_v21, %v15363_v29  ;;  %v15365_v42 = vpop.f32.mrb[217].mxu1 }
 0xba8   :  { %v15366_v63 = vpop.f32.mrb[218].mxu1 }
 0xba9   :  { %v15369_v6 = vadd.f32 %v15364_v14, %v15049_v51  ;;  %v15367_v33 = vpop.f32.mrb[219].mxu1 }
 0xbb7   :  { %v18385_v19 = vpop.f32.mrb[216].mxu0 }
 0xbb8   :  { %v18386_v37 = vpop.f32.mrb[217].mxu0 }
 0xbb9   :  { %v18387_v11 = vadd.f32 %v18386_v37, %v18385_v19  ;;  %v18388_v35 = vpop.f32.mrb[218].mxu0 }
 0xbba   :  { %v18389_v4 = vpop.f32.mrb[219].mxu0 }
 0xbe7   :  { %v15672_v5 = vpop.f32.mrb[220].mxu0 }
 0xbe8   :  { %v15673_v48 = vadd.f32 %v18387_v11, %v15672_v5  ;;  %v15674_v9 = vpop.f32.mrb[221].mxu0 }
 0xbe9   :  { %v15675_v50 = vpop.f32.mrb[222].mxu0 }
 0xbea   :  { %v15678_v54 = vadd.f32 %v15673_v48, %v15369_v6  ;;  %v15676_v34 = vpop.f32.mrb[223].mxu0 }
 0xbec   :  { %v15686_v7 = vadd.f32 %v18227_v26, %v15678_v54 }
 0xbee   :  { %v15687_v2 = vmax.f32 %v15686_v7, 0.0 }
 0xbf0   :  { %v15688_v22 = vpack.c.bf16 %v15687_v2, %v15687_v2 }
 0xbf2   :  { %18417 = vmatmul.mubr.bf16.vlgmr.msra.gmra.mrb[220].mxu1 %v15688_v22 }
 0xcc5   :  { %v15794_v43 = vpop.f32.mrb[220].mxu1 }
 0xcc6   :  { %v15795_v20 = vadd.f32 %v18228_v32, %v15794_v43  ;;  %v18418_v39 = vpop.f32.mrb[221].mxu1 }
 0xcc7   :  { %v15797_v10 = vpop.f32.mrb[222].mxu1 }
 0xcc8   :  { %15800 = vst [vmem:[%s30472_s9] sm:$0xff] %v15795_v20  ;;  %v18419_v59 = vpop.f32.mrb[223].mxu1 }

</bundles_post_ra>
